<compile_context>
chip_gen: v7x
topology: tpu7x:2x2x1
jax: 0.10.0
libtpu: 0.0.40
codegen_flags: <defaults>
</compile_context>

<pallas_src>
import jax
import jax.numpy as jnp
from jax.experimental import pallas as pl
from jax.experimental.pallas import tpu as pltpu

_VMEM_LIMIT = 32 * 1024 * 1024   # safe on v5e/v6e (128 MiB) and v7x (64 MiB)


# ----------------------------- Pallas kernels -----------------------------

def _matmul_kernel(a_ref, b_ref, o_ref, acc_ref):
    """(tm, tk) @ (tk, tn), accumulated over the K grid axis in f32 VMEM."""
    @pl.when(pl.program_id(2) == 0)
    def _init():
        acc_ref[...] = jnp.zeros_like(acc_ref)

    acc_ref[...] += jnp.dot(a_ref[...], b_ref[...],
                            preferred_element_type=jnp.float32)

    @pl.when(pl.program_id(2) == pl.num_programs(2) - 1)
    def _store():
        o_ref[...] = acc_ref[...]


def _bn_relu_kernel(x_ref, mean_ref, inv_ref, o_ref):
    # (x - mean) * rsqrt(var + eps) then ReLU; gamma=1, beta=0 (PyTorch init).
    o_ref[...] = jnp.maximum((x_ref[...] - mean_ref[...]) * inv_ref[...], 0.0)


def _tanh_kernel(x_ref, o_ref):
    o_ref[...] = jnp.tanh(x_ref[...])


# ----------------------------- kernel wrappers -----------------------------

def _row_tile(rows, cols, bytes_per_elem, target_bytes=2 * 1024 * 1024):
    """Largest row tile (multiple of 8, <= rows, <= 1024) near target_bytes."""
    if rows <= 8:
        return int(rows)
    by_bytes = max(8, (target_bytes // (cols * bytes_per_elem)) // 8 * 8)
    return int(max(8, min((rows // 8) * 8, by_bytes, 1024)))


def pallas_matmul(a, b):
    """a: (M, K) bf16, b: (K, N) bf16 -> (M, N) f32 (f32 MXU accumulation)."""
    m0, k = a.shape
    _, n = b.shape
    if m0 < 8:                                   # tiny first-layer case only
        a = jnp.pad(a, ((0, 8 - m0), (0, 0)))
    m = a.shape[0]

    tm = int(min(512, max(8, (m // 8) * 8)))
    tk = 512 if (k > 512 and k % 512 == 0) else k     # K tiles must divide K
    tn = 512 if n > 512 else n

    grid = (pl.cdiv(m, tm), pl.cdiv(n, tn), k // tk)
    flops = 2 * m * k * n
    bytes_accessed = a.size * 2 + b.size * 2 + m * n * 4

    out = pl.pallas_call(
        _matmul_kernel,
        out_shape=jax.ShapeDtypeStruct((m, n), jnp.float32),
        grid=grid,
        in_specs=[pl.BlockSpec((tm, tk), lambda i, j, kk: (i, kk)),
                  pl.BlockSpec((tk, tn), lambda i, j, kk: (kk, j))],
        out_specs=pl.BlockSpec((tm, tn), lambda i, j, kk: (i, j)),
        scratch_shapes=[pltpu.VMEM((tm, tn), jnp.float32)],
        compiler_params=pltpu.CompilerParams(
            dimension_semantics=("parallel", "parallel", "arbitrary"),
            vmem_limit_bytes=_VMEM_LIMIT),
        cost_estimate=pl.CostEstimate(flops=flops, transcendentals=0,
                                      bytes_accessed=bytes_accessed),
    )(a, b)
    return out[:m0] if m0 != m else out


def pallas_bn_relu(x2d, mean_row, inv_row):
    """x2d: (rows, cols) f32; mean_row/inv_row: (1, cols) f32."""
    rows, cols = x2d.shape
    tr = _row_tile(rows, cols, 4)
    return pl.pallas_call(
        _bn_relu_kernel,
        out_shape=jax.ShapeDtypeStruct((rows, cols), jnp.float32),
        grid=(pl.cdiv(rows, tr),),
        in_specs=[pl.BlockSpec((tr, cols), lambda i: (i, 0)),
                  pl.BlockSpec((1, cols), lambda i: (0, 0)),
                  pl.BlockSpec((1, cols), lambda i: (0, 0))],
        out_specs=pl.BlockSpec((tr, cols), lambda i: (i, 0)),
        compiler_params=pltpu.CompilerParams(
            dimension_semantics=("parallel",),
            vmem_limit_bytes=_VMEM_LIMIT),
    )(x2d, mean_row, inv_row)


def pallas_tanh(x2d):
    rows, cols = x2d.shape
    tr = _row_tile(rows, cols, 4)
    return pl.pallas_call(
        _tanh_kernel,
        out_shape=jax.ShapeDtypeStruct((rows, cols), jnp.float32),
        grid=(pl.cdiv(rows, tr),),
        in_specs=[pl.BlockSpec((tr, cols), lambda i: (i, 0))],
        out_specs=pl.BlockSpec((tr, cols), lambda i: (i, 0)),
        compiler_params=pltpu.CompilerParams(
            dimension_semantics=("parallel",),
            vmem_limit_bytes=_VMEM_LIMIT),
    )(x2d)


# --------------------------- layer implementations --------------------------

def conv_transpose_first(z_nhwc, w):
    """ConvTranspose2d(k=4, s=1, p=0) on a 1x1 input == a single matmul."""
    n = z_nhwc.shape[0]
    cin, cout, k, _ = w.shape
    zf = z_nhwc.reshape(n, cin).astype(jnp.bfloat16)
    wm = jnp.transpose(w, (0, 2, 3, 1)).reshape(cin, k * k * cout)
    y = pallas_matmul(zf, wm.astype(jnp.bfloat16))       # (N, k*k*Cout)
    return y.reshape(n, k, k, cout)                      # NHWC


def conv_transpose_s2(x_nhwc, w):
    """ConvTranspose2d(k=4, s=2, p=1, bias=False) via sub-pixel decomposition.

    out[n, 2m+r, 2q+c, co] = sum_{ty,tx,ci} xp[n, m+r+ty, q+c+tx, ci]
                                            * w[ci, co, 3-r-2*ty, 3-c-2*tx]
    with xp the 1-padded NHWC input.  This is one stride-1 2x2 conv with
    4*Cout phase channels, i.e. a single (M, 4Cin) @ (4Cin, 4Cout) bf16
    matmul on the MXU, followed by a pixel-shuffle interleave.
    """
    n, h, wd, cin = x_nhwc.shape
    cout = w.shape[1]

    xp = jnp.pad(x_nhwc, ((0, 0), (1, 1), (1, 1), (0, 0)))
    # TODO(synk): the 2x2 tap gather is still materialized by XLA (4x the input,
    # in bf16); moving it in-kernel (shifted-window tap-reduction grid axis)
    # would cut patch HBM traffic a further ~4x.
    taps = [xp[:, ty:ty + h + 1, tx:tx + wd + 1, :]
            for ty in range(2) for tx in range(2)]
    patches = jnp.concatenate(taps, axis=-1).reshape(
        n * (h + 1) * (wd + 1), 4 * cin).astype(jnp.bfloat16)

    # Weight matrix: rows ordered (ty, tx, ci), cols ordered (r, c, co);
    # w[ci, co, 3-r-2ty, 3-c-2tx] == w[:, :, ::-1, ::-1][ci, co, 2ty+r, 2tx+c].
    wk = w[:, :, ::-1, ::-1].reshape(cin, cout, 2, 2, 2, 2)   # (ci,co,ty,r,tx,c)
    wm = jnp.transpose(wk, (2, 4, 0, 3, 5, 1)).reshape(4 * cin, 4 * cout)

    y = pallas_matmul(patches, wm.astype(jnp.bfloat16))  # (N*(H+1)*(W+1), 4Cout)
    y = y.reshape(n, h + 1, wd + 1, 2, 2, cout)           # (n, p, q, r, c, co)

    # pixel-shuffle: out[n, 2m+r, 2q+c, co] = y[n, m+r, q+c, r, c, co]
    parts = [y[:, r:r + h, c:c + wd, r, c, :]
             for r in range(2) for c in range(2)]
    stk = jnp.stack(parts, axis=0).reshape(2, 2, n, h, wd, cout)
    return jnp.transpose(stk, (2, 3, 0, 4, 1, 5)).reshape(n, 2 * h, 2 * wd, cout)


def batchnorm_relu(x_nhwc, eps=1e-5):
    """Training-mode BatchNorm2d (batch stats, biased var, gamma=1, beta=0) + ReLU."""
    n, h, w, c = x_nhwc.shape
    # TODO(synk): per-channel moments could be emitted as a fused epilogue of
    # the conv matmul to save one activation read; kept as a single fused XLA
    # reduction pass here for exact border/padding handling.
    mean = jnp.mean(x_nhwc, axis=(0, 1, 2))
    meansq = jnp.mean(jnp.square(x_nhwc), axis=(0, 1, 2))
    var = jnp.maximum(meansq - jnp.square(mean), 0.0)
    inv = jax.lax.rsqrt(var + eps)

    # Lane-dense slab: (N*H, W*C) so stores use full 128-lane vregs.
    x2d = x_nhwc.reshape(n * h, w * c)
    mean_row = jnp.tile(mean, w).reshape(1, w * c)
    inv_row = jnp.tile(inv, w).reshape(1, w * c)
    return pallas_bn_relu(x2d, mean_row, inv_row).reshape(n, h, w, c)


def tanh_nhwc(x_nhwc):
    n, h, w, c = x_nhwc.shape
    return pallas_tanh(x_nhwc.reshape(n * h, w * c)).reshape(n, h, w, c)


# ------------------------------- full decoder -------------------------------

@jax.jit
def decoder_forward(zc_nchw, weights):
    """zc: (N, nzc, 1, 1) -> (N, nc, 128, 128), matching the PyTorch Decoder."""
    x = jnp.transpose(zc_nchw, (0, 2, 3, 1))             # NCHW -> NHWC
    x = batchnorm_relu(conv_transpose_first(x, weights[0]))
    for i in range(1, 5):
        x = batchnorm_relu(conv_transpose_s2(x, weights[i]))
    x = tanh_nhwc(conv_transpose_s2(x, weights[5]))
    return jnp.transpose(x, (0, 3, 1, 2))                # NHWC -> NCHW


# ------------------------- pure-JAX reference (check) ------------------------

def _ref_conv_transpose(x_nchw, w, stride, padding):
    k = w.shape[2]
    rhs = jnp.transpose(w[:, :, ::-1, ::-1], (1, 0, 2, 3))    # (Cout, Cin, k, k)
    pad = k - 1 - padding
    return jax.lax.conv_general_dilated(
        x_nchw.astype(jnp.bfloat16), rhs.astype(jnp.bfloat16),
        window_strides=(1, 1), padding=[(pad, pad), (pad, pad)],
        lhs_dilation=(stride, stride),
        dimension_numbers=("NCHW", "OIHW", "NCHW"),
        preferred_element_type=jnp.float32)


def _ref_decoder(zc, weights, eps=1e-5):
    strides = (1, 2, 2, 2, 2, 2)
    pads = (0, 1, 1, 1, 1, 1)
    x = zc
    for i in range(5):
        x = _ref_conv_transpose(x, weights[i], strides[i], pads[i])
        mean = jnp.mean(x, axis=(0, 2, 3), keepdims=True)
        var = jnp.mean(jnp.square(x - mean), axis=(0, 2, 3), keepdims=True)
        x = jnp.maximum((x - mean) * jax.lax.rsqrt(var + eps), 0.0)
    x = _ref_conv_transpose(x, weights[5], strides[5], pads[5])
    return jnp.tanh(x)


if __name__ == "__main__":
    # small synthetic configuration
    batch, nzc, nc, ngf = 2, 8, 3, 4

    key = jax.random.PRNGKey(0)
    keys = jax.random.split(key, 7)
    shapes = [
        (nzc,      ngf * 16, 4, 4),
        (ngf * 16, ngf * 8,  4, 4),
        (ngf * 8,  ngf * 4,  4, 4),
        (ngf * 4,  ngf * 2,  4, 4),
        (ngf * 2,  ngf,      4, 4),
        (ngf,      nc,       4, 4),
    ]
    # deterministic DCGAN-style init (N(0, 0.02)), bias=False everywhere.
    weights = [0.02 * jax.random.normal(k, s, jnp.float32)
               for k, s in zip(keys[:6], shapes)]
    zc = jax.random.normal(keys[6], (batch, nzc, 1, 1), jnp.float32)

    out = jax.block_until_ready(decoder_forward(zc, weights))
    ref = jax.block_until_ready(_ref_decoder(zc, weights))

    assert out.shape == (batch, nc, 128, 128), out.shape
    assert out.dtype == jnp.float32
    assert bool(jnp.all(jnp.abs(out) <= 1.0))            # tanh output range
    max_err = float(jnp.max(jnp.abs(out - ref)))
    assert max_err < 2e-2, f"mismatch vs reference: {max_err}"
    print("KERNEL_OK")
</pallas_src>

<mosaic_0001>
module attributes {stable_mosaic.version = 11 : i64} {
  func.func @_matmul_kernel(%arg0: i32, %arg1: i32, %arg2: i32, %arg3: memref<8x8xbf16, #tpu.memory_space<vmem>>, %arg4: memref<8x512xbf16, #tpu.memory_space<vmem>>, %arg5: memref<8x512xf32, #tpu.memory_space<vmem>>, %arg6: memref<8x512xf32, #tpu.memory_space<vmem>>) attributes {dimension_semantics = [#tpu.dimension_semantics<parallel>, #tpu.dimension_semantics<parallel>, #tpu.dimension_semantics<arbitrary>], iteration_bounds = array<i64: 1, 2, 1>, scalar_prefetch = 0 : i64, scratch_operands = 1 : i64, tpu.core_type = #tpu.core_type<tc>, window_params = [{transform_indices = @transform_0, window_bounds = array<i64: 8, 8>}, {transform_indices = @transform_1, window_bounds = array<i64: 8, 512>}, {transform_indices = @transform_2, window_bounds = array<i64: 8, 512>}]} {
    %c0_i32 = arith.constant 0 : i32
    %0 = arith.cmpi eq, %arg2, %c0_i32 : i32
    %1 = arith.extui %0 : i1 to i32
    %c0_i32_0 = arith.constant 0 : i32
    %2 = arith.cmpi ne, %1, %c0_i32_0 : i32
    scf.if %2 {
      %cst_10 = arith.constant 0.000000e+00 : f32
      %12 = vector.broadcast %cst_10 : f32 to vector<8x512xf32>
      %c0_11 = arith.constant 0 : index
      %c0_12 = arith.constant 0 : index
      %13 = vector.load %arg6[%c0_11, %c0_12] : memref<8x512xf32, #tpu.memory_space<vmem>>, vector<8x512xf32>
      tpu.vector_store %arg6[%c0_11, %c0_12], %12 {strides = array<i32>} : memref<8x512xf32, #tpu.memory_space<vmem>>, vector<8x512xf32>,
    } else {
    }
    %c0 = arith.constant 0 : index
    %c0_1 = arith.constant 0 : index
    %3 = vector.load %arg6[%c0, %c0_1] : memref<8x512xf32, #tpu.memory_space<vmem>>, vector<8x512xf32>
    %c0_2 = arith.constant 0 : index
    %c0_3 = arith.constant 0 : index
    %4 = vector.load %arg3[%c0_2, %c0_3] : memref<8x8xbf16, #tpu.memory_space<vmem>>, vector<8x8xbf16>
    %c0_4 = arith.constant 0 : index
    %c0_5 = arith.constant 0 : index
    %5 = vector.load %arg4[%c0_4, %c0_5] : memref<8x512xbf16, #tpu.memory_space<vmem>>, vector<8x512xbf16>
    %cst = arith.constant dense<0.000000e+00> : vector<8x512xf32>
    %6 = tpu.matmul %4, %5, %cst {dimension_numbers = #tpu.dot_dimension_numbers<[1], [0], [0], [1], [0, 0, 1, 1], [], []>} : vector<8x8xbf16>, vector<8x512xbf16>, vector<8x512xf32> -> vector<8x512xf32>
    %7 = arith.addf %3, %6 : vector<8x512xf32>
    %c0_6 = arith.constant 0 : index
    %c0_7 = arith.constant 0 : index
    %8 = vector.load %arg6[%c0_6, %c0_7] : memref<8x512xf32, #tpu.memory_space<vmem>>, vector<8x512xf32>
    tpu.vector_store %arg6[%c0_6, %c0_7], %7 {strides = array<i32>} : memref<8x512xf32, #tpu.memory_space<vmem>>, vector<8x512xf32>,
    %c0_i32_8 = arith.constant 0 : i32
    %9 = arith.cmpi eq, %arg2, %c0_i32_8 : i32
    %10 = arith.extui %9 : i1 to i32
    %c0_i32_9 = arith.constant 0 : i32
    %11 = arith.cmpi ne, %10, %c0_i32_9 : i32
    scf.if %11 {
      %c0_10 = arith.constant 0 : index
      %c0_11 = arith.constant 0 : index
      %12 = vector.load %arg6[%c0_10, %c0_11] : memref<8x512xf32, #tpu.memory_space<vmem>>, vector<8x512xf32>
      %c0_12 = arith.constant 0 : index
      %c0_13 = arith.constant 0 : index
      %13 = vector.load %arg5[%c0_12, %c0_13] : memref<8x512xf32, #tpu.memory_space<vmem>>, vector<8x512xf32>
      tpu.vector_store %arg5[%c0_12, %c0_13], %12 {strides = array<i32>} : memref<8x512xf32, #tpu.memory_space<vmem>>, vector<8x512xf32>,
    } else {
    }
    return
  }
  func.func @transform_0(%arg0: i32, %arg1: i32, %arg2: i32) -> (i32, i32) {
    %c0_i32 = arith.constant 0 : i32
    return %arg0, %arg2 : i32, i32
  }
  func.func @transform_1(%arg0: i32, %arg1: i32, %arg2: i32) -> (i32, i32) {
    %c0_i32 = arith.constant 0 : i32
    return %arg2, %arg1 : i32, i32
  }
  func.func @transform_2(%arg0: i32, %arg1: i32, %arg2: i32) -> (i32, i32) {
    %c0_i32 = arith.constant 0 : i32
    return %arg0, %arg1 : i32, i32
  }
}

module attributes {stable_mosaic.version = 11 : i64} {
  func.func @_bn_relu_kernel(%arg0: i32, %arg1: memref<8x256xf32, #tpu.memory_space<vmem>>, %arg2: memref<1x256xf32, #tpu.memory_space<vmem>>, %arg3: memref<1x256xf32, #tpu.memory_space<vmem>>, %arg4: memref<8x256xf32, #tpu.memory_space<vmem>>) attributes {dimension_semantics = [#tpu.dimension_semantics<parallel>], iteration_bounds = array<i64: 1>, scalar_prefetch = 0 : i64, scratch_operands = 0 : i64, tpu.core_type = #tpu.core_type<tc>, window_params = [{transform_indices = @transform_0, window_bounds = array<i64: 8, 256>}, {pipeline_mode = #tpu.pipeline_mode<synchronous>, transform_indices = @transform_1, window_bounds = array<i64: 1, 256>}, {pipeline_mode = #tpu.pipeline_mode<synchronous>, transform_indices = @transform_2, window_bounds = array<i64: 1, 256>}, {transform_indices = @transform_3, window_bounds = array<i64: 8, 256>}]} {
    %c0 = arith.constant 0 : index
    %c0_0 = arith.constant 0 : index
    %0 = vector.load %arg1[%c0, %c0_0] : memref<8x256xf32, #tpu.memory_space<vmem>>, vector<8x256xf32>
    %c0_1 = arith.constant 0 : index
    %c0_2 = arith.constant 0 : index
    %1 = vector.load %arg2[%c0_1, %c0_2] : memref<1x256xf32, #tpu.memory_space<vmem>>, vector<1x256xf32>
    %2 = vector.broadcast %1 : vector<1x256xf32> to vector<8x256xf32>
    %3 = arith.subf %0, %2 : vector<8x256xf32>
    %c0_3 = arith.constant 0 : index
    %c0_4 = arith.constant 0 : index
    %4 = vector.load %arg3[%c0_3, %c0_4] : memref<1x256xf32, #tpu.memory_space<vmem>>, vector<1x256xf32>
    %5 = vector.broadcast %4 : vector<1x256xf32> to vector<8x256xf32>
    %6 = arith.mulf %3, %5 : vector<8x256xf32>
    %cst = arith.constant 0.000000e+00 : f32
    %7 = vector.broadcast %cst : f32 to vector<8x256xf32>
    %8 = arith.maximumf %6, %7 : vector<8x256xf32>
    %c0_5 = arith.constant 0 : index
    %c0_6 = arith.constant 0 : index
    %9 = vector.load %arg4[%c0_5, %c0_6] : memref<8x256xf32, #tpu.memory_space<vmem>>, vector<8x256xf32>
    tpu.vector_store %arg4[%c0_5, %c0_6], %8 {strides = array<i32>} : memref<8x256xf32, #tpu.memory_space<vmem>>, vector<8x256xf32>,
    return
  }
  func.func @transform_0(%arg0: i32) -> (i32, i32) {
    %c0_i32 = arith.constant 0 : i32
    %c0_i32_0 = arith.constant 0 : i32
    return %arg0, %c0_i32 : i32, i32
  }
  func.func @transform_1(%arg0: i32) -> (i32, i32) {
    %c0_i32 = arith.constant 0 : i32
    %c0_i32_0 = arith.constant 0 : i32
    %c0_i32_1 = arith.constant 0 : i32
    return %c0_i32, %c0_i32_0 : i32, i32
  }
  func.func @transform_2(%arg0: i32) -> (i32, i32) {
    %c0_i32 = arith.constant 0 : i32
    %c0_i32_0 = arith.constant 0 : i32
    %c0_i32_1 = arith.constant 0 : i32
    return %c0_i32, %c0_i32_0 : i32, i32
  }
  func.func @transform_3(%arg0: i32) -> (i32, i32) {
    %c0_i32 = arith.constant 0 : i32
    %c0_i32_0 = arith.constant 0 : i32
    return %arg0, %c0_i32 : i32, i32
  }
}

module attributes {stable_mosaic.version = 11 : i64} {
  func.func @_matmul_kernel(%arg0: i32, %arg1: i32, %arg2: i32, %arg3: memref<48x256xbf16, #tpu.memory_space<vmem>>, %arg4: memref<256x128xbf16, #tpu.memory_space<vmem>>, %arg5: memref<48x128xf32, #tpu.memory_space<vmem>>, %arg6: memref<48x128xf32, #tpu.memory_space<vmem>>) attributes {dimension_semantics = [#tpu.dimension_semantics<parallel>, #tpu.dimension_semantics<parallel>, #tpu.dimension_semantics<arbitrary>], iteration_bounds = array<i64: 2, 1, 1>, scalar_prefetch = 0 : i64, scratch_operands = 1 : i64, tpu.core_type = #tpu.core_type<tc>, window_params = [{transform_indices = @transform_0, window_bounds = array<i64: 48, 256>}, {transform_indices = @transform_1, window_bounds = array<i64: 256, 128>}, {transform_indices = @transform_2, window_bounds = array<i64: 48, 128>}]} {
    %c0_i32 = arith.constant 0 : i32
    %0 = arith.cmpi eq, %arg2, %c0_i32 : i32
    %1 = arith.extui %0 : i1 to i32
    %c0_i32_0 = arith.constant 0 : i32
    %2 = arith.cmpi ne, %1, %c0_i32_0 : i32
    scf.if %2 {
      %cst_10 = arith.constant 0.000000e+00 : f32
      %12 = vector.broadcast %cst_10 : f32 to vector<48x128xf32>
      %c0_11 = arith.constant 0 : index
      %c0_12 = arith.constant 0 : index
      %13 = vector.load %arg6[%c0_11, %c0_12] : memref<48x128xf32, #tpu.memory_space<vmem>>, vector<48x128xf32>
      tpu.vector_store %arg6[%c0_11, %c0_12], %12 {strides = array<i32>} : memref<48x128xf32, #tpu.memory_space<vmem>>, vector<48x128xf32>,
    } else {
    }
    %c0 = arith.constant 0 : index
    %c0_1 = arith.constant 0 : index
    %3 = vector.load %arg6[%c0, %c0_1] : memref<48x128xf32, #tpu.memory_space<vmem>>, vector<48x128xf32>
    %c0_2 = arith.constant 0 : index
    %c0_3 = arith.constant 0 : index
    %4 = vector.load %arg3[%c0_2, %c0_3] : memref<48x256xbf16, #tpu.memory_space<vmem>>, vector<48x256xbf16>
    %c0_4 = arith.constant 0 : index
    %c0_5 = arith.constant 0 : index
    %5 = vector.load %arg4[%c0_4, %c0_5] : memref<256x128xbf16, #tpu.memory_space<vmem>>, vector<256x128xbf16>
    %cst = arith.constant dense<0.000000e+00> : vector<48x128xf32>
    %6 = tpu.matmul %4, %5, %cst {dimension_numbers = #tpu.dot_dimension_numbers<[1], [0], [0], [1], [0, 0, 1, 1], [], []>} : vector<48x256xbf16>, vector<256x128xbf16>, vector<48x128xf32> -> vector<48x128xf32>
    %7 = arith.addf %3, %6 : vector<48x128xf32>
    %c0_6 = arith.constant 0 : index
    %c0_7 = arith.constant 0 : index
    %8 = vector.load %arg6[%c0_6, %c0_7] : memref<48x128xf32, #tpu.memory_space<vmem>>, vector<48x128xf32>
    tpu.vector_store %arg6[%c0_6, %c0_7], %7 {strides = array<i32>} : memref<48x128xf32, #tpu.memory_space<vmem>>, vector<48x128xf32>,
    %c0_i32_8 = arith.constant 0 : i32
    %9 = arith.cmpi eq, %arg2, %c0_i32_8 : i32
    %10 = arith.extui %9 : i1 to i32
    %c0_i32_9 = arith.constant 0 : i32
    %11 = arith.cmpi ne, %10, %c0_i32_9 : i32
    scf.if %11 {
      %c0_10 = arith.constant 0 : index
      %c0_11 = arith.constant 0 : index
      %12 = vector.load %arg6[%c0_10, %c0_11] : memref<48x128xf32, #tpu.memory_space<vmem>>, vector<48x128xf32>
      %c0_12 = arith.constant 0 : index
      %c0_13 = arith.constant 0 : index
      %13 = vector.load %arg5[%c0_12, %c0_13] : memref<48x128xf32, #tpu.memory_space<vmem>>, vector<48x128xf32>
      tpu.vector_store %arg5[%c0_12, %c0_13], %12 {strides = array<i32>} : memref<48x128xf32, #tpu.memory_space<vmem>>, vector<48x128xf32>,
    } else {
    }
    return
  }
  func.func @transform_0(%arg0: i32, %arg1: i32, %arg2: i32) -> (i32, i32) {
    %c0_i32 = arith.constant 0 : i32
    return %arg0, %arg2 : i32, i32
  }
  func.func @transform_1(%arg0: i32, %arg1: i32, %arg2: i32) -> (i32, i32) {
    %c0_i32 = arith.constant 0 : i32
    return %arg2, %arg1 : i32, i32
  }
  func.func @transform_2(%arg0: i32, %arg1: i32, %arg2: i32) -> (i32, i32) {
    %c0_i32 = arith.constant 0 : i32
    return %arg0, %arg1 : i32, i32
  }
}

module attributes {stable_mosaic.version = 11 : i64} {
  func.func @_bn_relu_kernel(%arg0: i32, %arg1: memref<16x256xf32, #tpu.memory_space<vmem>>, %arg2: memref<1x256xf32, #tpu.memory_space<vmem>>, %arg3: memref<1x256xf32, #tpu.memory_space<vmem>>, %arg4: memref<16x256xf32, #tpu.memory_space<vmem>>) attributes {dimension_semantics = [#tpu.dimension_semantics<parallel>], iteration_bounds = array<i64: 1>, scalar_prefetch = 0 : i64, scratch_operands = 0 : i64, tpu.core_type = #tpu.core_type<tc>, window_params = [{transform_indices = @transform_0, window_bounds = array<i64: 16, 256>}, {pipeline_mode = #tpu.pipeline_mode<synchronous>, transform_indices = @transform_1, window_bounds = array<i64: 1, 256>}, {pipeline_mode = #tpu.pipeline_mode<synchronous>, transform_indices = @transform_2, window_bounds = array<i64: 1, 256>}, {transform_indices = @transform_3, window_bounds = array<i64: 16, 256>}]} {
    %c0 = arith.constant 0 : index
    %c0_0 = arith.constant 0 : index
    %0 = vector.load %arg1[%c0, %c0_0] : memref<16x256xf32, #tpu.memory_space<vmem>>, vector<16x256xf32>
    %c0_1 = arith.constant 0 : index
    %c0_2 = arith.constant 0 : index
    %1 = vector.load %arg2[%c0_1, %c0_2] : memref<1x256xf32, #tpu.memory_space<vmem>>, vector<1x256xf32>
    %2 = vector.broadcast %1 : vector<1x256xf32> to vector<16x256xf32>
    %3 = arith.subf %0, %2 : vector<16x256xf32>
    %c0_3 = arith.constant 0 : index
    %c0_4 = arith.constant 0 : index
    %4 = vector.load %arg3[%c0_3, %c0_4] : memref<1x256xf32, #tpu.memory_space<vmem>>, vector<1x256xf32>
    %5 = vector.broadcast %4 : vector<1x256xf32> to vector<16x256xf32>
    %6 = arith.mulf %3, %5 : vector<16x256xf32>
    %cst = arith.constant 0.000000e+00 : f32
    %7 = vector.broadcast %cst : f32 to vector<16x256xf32>
    %8 = arith.maximumf %6, %7 : vector<16x256xf32>
    %c0_5 = arith.constant 0 : index
    %c0_6 = arith.constant 0 : index
    %9 = vector.load %arg4[%c0_5, %c0_6] : memref<16x256xf32, #tpu.memory_space<vmem>>, vector<16x256xf32>
    tpu.vector_store %arg4[%c0_5, %c0_6], %8 {strides = array<i32>} : memref<16x256xf32, #tpu.memory_space<vmem>>, vector<16x256xf32>,
    return
  }
  func.func @transform_0(%arg0: i32) -> (i32, i32) {
    %c0_i32 = arith.constant 0 : i32
    %c0_i32_0 = arith.constant 0 : i32
    return %arg0, %c0_i32 : i32, i32
  }
  func.func @transform_1(%arg0: i32) -> (i32, i32) {
    %c0_i32 = arith.constant 0 : i32
    %c0_i32_0 = arith.constant 0 : i32
    %c0_i32_1 = arith.constant 0 : i32
    return %c0_i32, %c0_i32_0 : i32, i32
  }
  func.func @transform_2(%arg0: i32) -> (i32, i32) {
    %c0_i32 = arith.constant 0 : i32
    %c0_i32_0 = arith.constant 0 : i32
    %c0_i32_1 = arith.constant 0 : i32
    return %c0_i32, %c0_i32_0 : i32, i32
  }
  func.func @transform_3(%arg0: i32) -> (i32, i32) {
    %c0_i32 = arith.constant 0 : i32
    %c0_i32_0 = arith.constant 0 : i32
    return %arg0, %c0_i32 : i32, i32
  }
}

module attributes {stable_mosaic.version = 11 : i64} {
  func.func @_matmul_kernel(%arg0: i32, %arg1: i32, %arg2: i32, %arg3: memref<160x128xbf16, #tpu.memory_space<vmem>>, %arg4: memref<128x64xbf16, #tpu.memory_space<vmem>>, %arg5: memref<160x64xf32, #tpu.memory_space<vmem>>, %arg6: memref<160x64xf32, #tpu.memory_space<vmem>>) attributes {dimension_semantics = [#tpu.dimension_semantics<parallel>, #tpu.dimension_semantics<parallel>, #tpu.dimension_semantics<arbitrary>], iteration_bounds = array<i64: 2, 1, 1>, scalar_prefetch = 0 : i64, scratch_operands = 1 : i64, tpu.core_type = #tpu.core_type<tc>, window_params = [{transform_indices = @transform_0, window_bounds = array<i64: 160, 128>}, {transform_indices = @transform_1, window_bounds = array<i64: 128, 64>}, {transform_indices = @transform_2, window_bounds = array<i64: 160, 64>}]} {
    %c0_i32 = arith.constant 0 : i32
    %0 = arith.cmpi eq, %arg2, %c0_i32 : i32
    %1 = arith.extui %0 : i1 to i32
    %c0_i32_0 = arith.constant 0 : i32
    %2 = arith.cmpi ne, %1, %c0_i32_0 : i32
    scf.if %2 {
      %cst_10 = arith.constant 0.000000e+00 : f32
      %12 = vector.broadcast %cst_10 : f32 to vector<160x64xf32>
      %c0_11 = arith.constant 0 : index
      %c0_12 = arith.constant 0 : index
      %13 = vector.load %arg6[%c0_11, %c0_12] : memref<160x64xf32, #tpu.memory_space<vmem>>, vector<160x64xf32>
      tpu.vector_store %arg6[%c0_11, %c0_12], %12 {strides = array<i32>} : memref<160x64xf32, #tpu.memory_space<vmem>>, vector<160x64xf32>,
    } else {
    }
    %c0 = arith.constant 0 : index
    %c0_1 = arith.constant 0 : index
    %3 = vector.load %arg6[%c0, %c0_1] : memref<160x64xf32, #tpu.memory_space<vmem>>, vector<160x64xf32>
    %c0_2 = arith.constant 0 : index
    %c0_3 = arith.constant 0 : index
    %4 = vector.load %arg3[%c0_2, %c0_3] : memref<160x128xbf16, #tpu.memory_space<vmem>>, vector<160x128xbf16>
    %c0_4 = arith.constant 0 : index
    %c0_5 = arith.constant 0 : index
    %5 = vector.load %arg4[%c0_4, %c0_5] : memref<128x64xbf16, #tpu.memory_space<vmem>>, vector<128x64xbf16>
    %cst = arith.constant dense<0.000000e+00> : vector<160x64xf32>
    %6 = tpu.matmul %4, %5, %cst {dimension_numbers = #tpu.dot_dimension_numbers<[1], [0], [0], [1], [0, 0, 1, 1], [], []>} : vector<160x128xbf16>, vector<128x64xbf16>, vector<160x64xf32> -> vector<160x64xf32>
    %7 = arith.addf %3, %6 : vector<160x64xf32>
    %c0_6 = arith.constant 0 : index
    %c0_7 = arith.constant 0 : index
    %8 = vector.load %arg6[%c0_6, %c0_7] : memref<160x64xf32, #tpu.memory_space<vmem>>, vector<160x64xf32>
    tpu.vector_store %arg6[%c0_6, %c0_7], %7 {strides = array<i32>} : memref<160x64xf32, #tpu.memory_space<vmem>>, vector<160x64xf32>,
    %c0_i32_8 = arith.constant 0 : i32
    %9 = arith.cmpi eq, %arg2, %c0_i32_8 : i32
    %10 = arith.extui %9 : i1 to i32
    %c0_i32_9 = arith.constant 0 : i32
    %11 = arith.cmpi ne, %10, %c0_i32_9 : i32
    scf.if %11 {
      %c0_10 = arith.constant 0 : index
      %c0_11 = arith.constant 0 : index
      %12 = vector.load %arg6[%c0_10, %c0_11] : memref<160x64xf32, #tpu.memory_space<vmem>>, vector<160x64xf32>
      %c0_12 = arith.constant 0 : index
      %c0_13 = arith.constant 0 : index
      %13 = vector.load %arg5[%c0_12, %c0_13] : memref<160x64xf32, #tpu.memory_space<vmem>>, vector<160x64xf32>
      tpu.vector_store %arg5[%c0_12, %c0_13], %12 {strides = array<i32>} : memref<160x64xf32, #tpu.memory_space<vmem>>, vector<160x64xf32>,
    } else {
    }
    return
  }
  func.func @transform_0(%arg0: i32, %arg1: i32, %arg2: i32) -> (i32, i32) {
    %c0_i32 = arith.constant 0 : i32
    return %arg0, %arg2 : i32, i32
  }
  func.func @transform_1(%arg0: i32, %arg1: i32, %arg2: i32) -> (i32, i32) {
    %c0_i32 = arith.constant 0 : i32
    return %arg2, %arg1 : i32, i32
  }
  func.func @transform_2(%arg0: i32, %arg1: i32, %arg2: i32) -> (i32, i32) {
    %c0_i32 = arith.constant 0 : i32
    return %arg0, %arg1 : i32, i32
  }
}

module attributes {stable_mosaic.version = 11 : i64} {
  func.func @_bn_relu_kernel(%arg0: i32, %arg1: memref<32x256xf32, #tpu.memory_space<vmem>>, %arg2: memref<1x256xf32, #tpu.memory_space<vmem>>, %arg3: memref<1x256xf32, #tpu.memory_space<vmem>>, %arg4: memref<32x256xf32, #tpu.memory_space<vmem>>) attributes {dimension_semantics = [#tpu.dimension_semantics<parallel>], iteration_bounds = array<i64: 1>, scalar_prefetch = 0 : i64, scratch_operands = 0 : i64, tpu.core_type = #tpu.core_type<tc>, window_params = [{transform_indices = @transform_0, window_bounds = array<i64: 32, 256>}, {pipeline_mode = #tpu.pipeline_mode<synchronous>, transform_indices = @transform_1, window_bounds = array<i64: 1, 256>}, {pipeline_mode = #tpu.pipeline_mode<synchronous>, transform_indices = @transform_2, window_bounds = array<i64: 1, 256>}, {transform_indices = @transform_3, window_bounds = array<i64: 32, 256>}]} {
    %c0 = arith.constant 0 : index
    %c0_0 = arith.constant 0 : index
    %0 = vector.load %arg1[%c0, %c0_0] : memref<32x256xf32, #tpu.memory_space<vmem>>, vector<32x256xf32>
    %c0_1 = arith.constant 0 : index
    %c0_2 = arith.constant 0 : index
    %1 = vector.load %arg2[%c0_1, %c0_2] : memref<1x256xf32, #tpu.memory_space<vmem>>, vector<1x256xf32>
    %2 = vector.broadcast %1 : vector<1x256xf32> to vector<32x256xf32>
    %3 = arith.subf %0, %2 : vector<32x256xf32>
    %c0_3 = arith.constant 0 : index
    %c0_4 = arith.constant 0 : index
    %4 = vector.load %arg3[%c0_3, %c0_4] : memref<1x256xf32, #tpu.memory_space<vmem>>, vector<1x256xf32>
    %5 = vector.broadcast %4 : vector<1x256xf32> to vector<32x256xf32>
    %6 = arith.mulf %3, %5 : vector<32x256xf32>
    %cst = arith.constant 0.000000e+00 : f32
    %7 = vector.broadcast %cst : f32 to vector<32x256xf32>
    %8 = arith.maximumf %6, %7 : vector<32x256xf32>
    %c0_5 = arith.constant 0 : index
    %c0_6 = arith.constant 0 : index
    %9 = vector.load %arg4[%c0_5, %c0_6] : memref<32x256xf32, #tpu.memory_space<vmem>>, vector<32x256xf32>
    tpu.vector_store %arg4[%c0_5, %c0_6], %8 {strides = array<i32>} : memref<32x256xf32, #tpu.memory_space<vmem>>, vector<32x256xf32>,
    return
  }
  func.func @transform_0(%arg0: i32) -> (i32, i32) {
    %c0_i32 = arith.constant 0 : i32
    %c0_i32_0 = arith.constant 0 : i32
    return %arg0, %c0_i32 : i32, i32
  }
  func.func @transform_1(%arg0: i32) -> (i32, i32) {
    %c0_i32 = arith.constant 0 : i32
    %c0_i32_0 = arith.constant 0 : i32
    %c0_i32_1 = arith.constant 0 : i32
    return %c0_i32, %c0_i32_0 : i32, i32
  }
  func.func @transform_2(%arg0: i32) -> (i32, i32) {
    %c0_i32 = arith.constant 0 : i32
    %c0_i32_0 = arith.constant 0 : i32
    %c0_i32_1 = arith.constant 0 : i32
    return %c0_i32, %c0_i32_0 : i32, i32
  }
  func.func @transform_3(%arg0: i32) -> (i32, i32) {
    %c0_i32 = arith.constant 0 : i32
    %c0_i32_0 = arith.constant 0 : i32
    return %arg0, %c0_i32 : i32, i32
  }
}

module attributes {stable_mosaic.version = 11 : i64} {
  func.func @_matmul_kernel(%arg0: i32, %arg1: i32, %arg2: i32, %arg3: memref<512x64xbf16, #tpu.memory_space<vmem>>, %arg4: memref<64x32xbf16, #tpu.memory_space<vmem>>, %arg5: memref<512x32xf32, #tpu.memory_space<vmem>>, %arg6: memref<512x32xf32, #tpu.memory_space<vmem>>) attributes {dimension_semantics = [#tpu.dimension_semantics<parallel>, #tpu.dimension_semantics<parallel>, #tpu.dimension_semantics<arbitrary>], iteration_bounds = array<i64: 2, 1, 1>, scalar_prefetch = 0 : i64, scratch_operands = 1 : i64, tpu.core_type = #tpu.core_type<tc>, window_params = [{transform_indices = @transform_0, window_bounds = array<i64: 512, 64>}, {transform_indices = @transform_1, window_bounds = array<i64: 64, 32>}, {transform_indices = @transform_2, window_bounds = array<i64: 512, 32>}]} {
    %c0_i32 = arith.constant 0 : i32
    %0 = arith.cmpi eq, %arg2, %c0_i32 : i32
    %1 = arith.extui %0 : i1 to i32
    %c0_i32_0 = arith.constant 0 : i32
    %2 = arith.cmpi ne, %1, %c0_i32_0 : i32
    scf.if %2 {
      %cst_10 = arith.constant 0.000000e+00 : f32
      %12 = vector.broadcast %cst_10 : f32 to vector<512x32xf32>
      %c0_11 = arith.constant 0 : index
      %c0_12 = arith.constant 0 : index
      %13 = vector.load %arg6[%c0_11, %c0_12] : memref<512x32xf32, #tpu.memory_space<vmem>>, vector<512x32xf32>
      tpu.vector_store %arg6[%c0_11, %c0_12], %12 {strides = array<i32>} : memref<512x32xf32, #tpu.memory_space<vmem>>, vector<512x32xf32>,
    } else {
    }
    %c0 = arith.constant 0 : index
    %c0_1 = arith.constant 0 : index
    %3 = vector.load %arg6[%c0, %c0_1] : memref<512x32xf32, #tpu.memory_space<vmem>>, vector<512x32xf32>
    %c0_2 = arith.constant 0 : index
    %c0_3 = arith.constant 0 : index
    %4 = vector.load %arg3[%c0_2, %c0_3] : memref<512x64xbf16, #tpu.memory_space<vmem>>, vector<512x64xbf16>
    %c0_4 = arith.constant 0 : index
    %c0_5 = arith.constant 0 : index
    %5 = vector.load %arg4[%c0_4, %c0_5] : memref<64x32xbf16, #tpu.memory_space<vmem>>, vector<64x32xbf16>
    %cst = arith.constant dense<0.000000e+00> : vector<512x32xf32>
    %6 = tpu.matmul %4, %5, %cst {dimension_numbers = #tpu.dot_dimension_numbers<[1], [0], [0], [1], [0, 0, 1, 1], [], []>} : vector<512x64xbf16>, vector<64x32xbf16>, vector<512x32xf32> -> vector<512x32xf32>
    %7 = arith.addf %3, %6 : vector<512x32xf32>
    %c0_6 = arith.constant 0 : index
    %c0_7 = arith.constant 0 : index
    %8 = vector.load %arg6[%c0_6, %c0_7] : memref<512x32xf32, #tpu.memory_space<vmem>>, vector<512x32xf32>
    tpu.vector_store %arg6[%c0_6, %c0_7], %7 {strides = array<i32>} : memref<512x32xf32, #tpu.memory_space<vmem>>, vector<512x32xf32>,
    %c0_i32_8 = arith.constant 0 : i32
    %9 = arith.cmpi eq, %arg2, %c0_i32_8 : i32
    %10 = arith.extui %9 : i1 to i32
    %c0_i32_9 = arith.constant 0 : i32
    %11 = arith.cmpi ne, %10, %c0_i32_9 : i32
    scf.if %11 {
      %c0_10 = arith.constant 0 : index
      %c0_11 = arith.constant 0 : index
      %12 = vector.load %arg6[%c0_10, %c0_11] : memref<512x32xf32, #tpu.memory_space<vmem>>, vector<512x32xf32>
      %c0_12 = arith.constant 0 : index
      %c0_13 = arith.constant 0 : index
      %13 = vector.load %arg5[%c0_12, %c0_13] : memref<512x32xf32, #tpu.memory_space<vmem>>, vector<512x32xf32>
      tpu.vector_store %arg5[%c0_12, %c0_13], %12 {strides = array<i32>} : memref<512x32xf32, #tpu.memory_space<vmem>>, vector<512x32xf32>,
    } else {
    }
    return
  }
  func.func @transform_0(%arg0: i32, %arg1: i32, %arg2: i32) -> (i32, i32) {
    %c0_i32 = arith.constant 0 : i32
    return %arg0, %arg2 : i32, i32
  }
  func.func @transform_1(%arg0: i32, %arg1: i32, %arg2: i32) -> (i32, i32) {
    %c0_i32 = arith.constant 0 : i32
    return %arg2, %arg1 : i32, i32
  }
  func.func @transform_2(%arg0: i32, %arg1: i32, %arg2: i32) -> (i32, i32) {
    %c0_i32 = arith.constant 0 : i32
    return %arg0, %arg1 : i32, i32
  }
}

module attributes {stable_mosaic.version = 11 : i64} {
  func.func @_bn_relu_kernel(%arg0: i32, %arg1: memref<64x256xf32, #tpu.memory_space<vmem>>, %arg2: memref<1x256xf32, #tpu.memory_space<vmem>>, %arg3: memref<1x256xf32, #tpu.memory_space<vmem>>, %arg4: memref<64x256xf32, #tpu.memory_space<vmem>>) attributes {dimension_semantics = [#tpu.dimension_semantics<parallel>], iteration_bounds = array<i64: 1>, scalar_prefetch = 0 : i64, scratch_operands = 0 : i64, tpu.core_type = #tpu.core_type<tc>, window_params = [{transform_indices = @transform_0, window_bounds = array<i64: 64, 256>}, {pipeline_mode = #tpu.pipeline_mode<synchronous>, transform_indices = @transform_1, window_bounds = array<i64: 1, 256>}, {pipeline_mode = #tpu.pipeline_mode<synchronous>, transform_indices = @transform_2, window_bounds = array<i64: 1, 256>}, {transform_indices = @transform_3, window_bounds = array<i64: 64, 256>}]} {
    %c0 = arith.constant 0 : index
    %c0_0 = arith.constant 0 : index
    %0 = vector.load %arg1[%c0, %c0_0] : memref<64x256xf32, #tpu.memory_space<vmem>>, vector<64x256xf32>
    %c0_1 = arith.constant 0 : index
    %c0_2 = arith.constant 0 : index
    %1 = vector.load %arg2[%c0_1, %c0_2] : memref<1x256xf32, #tpu.memory_space<vmem>>, vector<1x256xf32>
    %2 = vector.broadcast %1 : vector<1x256xf32> to vector<64x256xf32>
    %3 = arith.subf %0, %2 : vector<64x256xf32>
    %c0_3 = arith.constant 0 : index
    %c0_4 = arith.constant 0 : index
    %4 = vector.load %arg3[%c0_3, %c0_4] : memref<1x256xf32, #tpu.memory_space<vmem>>, vector<1x256xf32>
    %5 = vector.broadcast %4 : vector<1x256xf32> to vector<64x256xf32>
    %6 = arith.mulf %3, %5 : vector<64x256xf32>
    %cst = arith.constant 0.000000e+00 : f32
    %7 = vector.broadcast %cst : f32 to vector<64x256xf32>
    %8 = arith.maximumf %6, %7 : vector<64x256xf32>
    %c0_5 = arith.constant 0 : index
    %c0_6 = arith.constant 0 : index
    %9 = vector.load %arg4[%c0_5, %c0_6] : memref<64x256xf32, #tpu.memory_space<vmem>>, vector<64x256xf32>
    tpu.vector_store %arg4[%c0_5, %c0_6], %8 {strides = array<i32>} : memref<64x256xf32, #tpu.memory_space<vmem>>, vector<64x256xf32>,
    return
  }
  func.func @transform_0(%arg0: i32) -> (i32, i32) {
    %c0_i32 = arith.constant 0 : i32
    %c0_i32_0 = arith.constant 0 : i32
    return %arg0, %c0_i32 : i32, i32
  }
  func.func @transform_1(%arg0: i32) -> (i32, i32) {
    %c0_i32 = arith.constant 0 : i32
    %c0_i32_0 = arith.constant 0 : i32
    %c0_i32_1 = arith.constant 0 : i32
    return %c0_i32, %c0_i32_0 : i32, i32
  }
  func.func @transform_2(%arg0: i32) -> (i32, i32) {
    %c0_i32 = arith.constant 0 : i32
    %c0_i32_0 = arith.constant 0 : i32
    %c0_i32_1 = arith.constant 0 : i32
    return %c0_i32, %c0_i32_0 : i32, i32
  }
  func.func @transform_3(%arg0: i32) -> (i32, i32) {
    %c0_i32 = arith.constant 0 : i32
    %c0_i32_0 = arith.constant 0 : i32
    return %arg0, %c0_i32 : i32, i32
  }
}

module attributes {stable_mosaic.version = 11 : i64} {
  func.func @_matmul_kernel(%arg0: i32, %arg1: i32, %arg2: i32, %arg3: memref<512x32xbf16, #tpu.memory_space<vmem>>, %arg4: memref<32x16xbf16, #tpu.memory_space<vmem>>, %arg5: memref<512x16xf32, #tpu.memory_space<vmem>>, %arg6: memref<512x16xf32, #tpu.memory_space<vmem>>) attributes {dimension_semantics = [#tpu.dimension_semantics<parallel>, #tpu.dimension_semantics<parallel>, #tpu.dimension_semantics<arbitrary>], iteration_bounds = array<i64: 5, 1, 1>, scalar_prefetch = 0 : i64, scratch_operands = 1 : i64, tpu.core_type = #tpu.core_type<tc>, window_params = [{transform_indices = @transform_0, window_bounds = array<i64: 512, 32>}, {transform_indices = @transform_1, window_bounds = array<i64: 32, 16>}, {transform_indices = @transform_2, window_bounds = array<i64: 512, 16>}]} {
    %c0_i32 = arith.constant 0 : i32
    %0 = arith.cmpi eq, %arg2, %c0_i32 : i32
    %1 = arith.extui %0 : i1 to i32
    %c0_i32_0 = arith.constant 0 : i32
    %2 = arith.cmpi ne, %1, %c0_i32_0 : i32
    scf.if %2 {
      %cst_10 = arith.constant 0.000000e+00 : f32
      %12 = vector.broadcast %cst_10 : f32 to vector<512x16xf32>
      %c0_11 = arith.constant 0 : index
      %c0_12 = arith.constant 0 : index
      %13 = vector.load %arg6[%c0_11, %c0_12] : memref<512x16xf32, #tpu.memory_space<vmem>>, vector<512x16xf32>
      tpu.vector_store %arg6[%c0_11, %c0_12], %12 {strides = array<i32>} : memref<512x16xf32, #tpu.memory_space<vmem>>, vector<512x16xf32>,
    } else {
    }
    %c0 = arith.constant 0 : index
    %c0_1 = arith.constant 0 : index
    %3 = vector.load %arg6[%c0, %c0_1] : memref<512x16xf32, #tpu.memory_space<vmem>>, vector<512x16xf32>
    %c0_2 = arith.constant 0 : index
    %c0_3 = arith.constant 0 : index
    %4 = vector.load %arg3[%c0_2, %c0_3] : memref<512x32xbf16, #tpu.memory_space<vmem>>, vector<512x32xbf16>
    %c0_4 = arith.constant 0 : index
    %c0_5 = arith.constant 0 : index
    %5 = vector.load %arg4[%c0_4, %c0_5] : memref<32x16xbf16, #tpu.memory_space<vmem>>, vector<32x16xbf16>
    %cst = arith.constant dense<0.000000e+00> : vector<512x16xf32>
    %6 = tpu.matmul %4, %5, %cst {dimension_numbers = #tpu.dot_dimension_numbers<[1], [0], [0], [1], [0, 0, 1, 1], [], []>} : vector<512x32xbf16>, vector<32x16xbf16>, vector<512x16xf32> -> vector<512x16xf32>
    %7 = arith.addf %3, %6 : vector<512x16xf32>
    %c0_6 = arith.constant 0 : index
    %c0_7 = arith.constant 0 : index
    %8 = vector.load %arg6[%c0_6, %c0_7] : memref<512x16xf32, #tpu.memory_space<vmem>>, vector<512x16xf32>
    tpu.vector_store %arg6[%c0_6, %c0_7], %7 {strides = array<i32>} : memref<512x16xf32, #tpu.memory_space<vmem>>, vector<512x16xf32>,
    %c0_i32_8 = arith.constant 0 : i32
    %9 = arith.cmpi eq, %arg2, %c0_i32_8 : i32
    %10 = arith.extui %9 : i1 to i32
    %c0_i32_9 = arith.constant 0 : i32
    %11 = arith.cmpi ne, %10, %c0_i32_9 : i32
    scf.if %11 {
      %c0_10 = arith.constant 0 : index
      %c0_11 = arith.constant 0 : index
      %12 = vector.load %arg6[%c0_10, %c0_11] : memref<512x16xf32, #tpu.memory_space<vmem>>, vector<512x16xf32>
      %c0_12 = arith.constant 0 : index
      %c0_13 = arith.constant 0 : index
      %13 = vector.load %arg5[%c0_12, %c0_13] : memref<512x16xf32, #tpu.memory_space<vmem>>, vector<512x16xf32>
      tpu.vector_store %arg5[%c0_12, %c0_13], %12 {strides = array<i32>} : memref<512x16xf32, #tpu.memory_space<vmem>>, vector<512x16xf32>,
    } else {
    }
    return
  }
  func.func @transform_0(%arg0: i32, %arg1: i32, %arg2: i32) -> (i32, i32) {
    %c0_i32 = arith.constant 0 : i32
    return %arg0, %arg2 : i32, i32
  }
  func.func @transform_1(%arg0: i32, %arg1: i32, %arg2: i32) -> (i32, i32) {
    %c0_i32 = arith.constant 0 : i32
    return %arg2, %arg1 : i32, i32
  }
  func.func @transform_2(%arg0: i32, %arg1: i32, %arg2: i32) -> (i32, i32) {
    %c0_i32 = arith.constant 0 : i32
    return %arg0, %arg1 : i32, i32
  }
}

module attributes {stable_mosaic.version = 11 : i64} {
  func.func @_bn_relu_kernel(%arg0: i32, %arg1: memref<128x256xf32, #tpu.memory_space<vmem>>, %arg2: memref<1x256xf32, #tpu.memory_space<vmem>>, %arg3: memref<1x256xf32, #tpu.memory_space<vmem>>, %arg4: memref<128x256xf32, #tpu.memory_space<vmem>>) attributes {dimension_semantics = [#tpu.dimension_semantics<parallel>], iteration_bounds = array<i64: 1>, scalar_prefetch = 0 : i64, scratch_operands = 0 : i64, tpu.core_type = #tpu.core_type<tc>, window_params = [{transform_indices = @transform_0, window_bounds = array<i64: 128, 256>}, {pipeline_mode = #tpu.pipeline_mode<synchronous>, transform_indices = @transform_1, window_bounds = array<i64: 1, 256>}, {pipeline_mode = #tpu.pipeline_mode<synchronous>, transform_indices = @transform_2, window_bounds = array<i64: 1, 256>}, {transform_indices = @transform_3, window_bounds = array<i64: 128, 256>}]} {
    %c0 = arith.constant 0 : index
    %c0_0 = arith.constant 0 : index
    %0 = vector.load %arg1[%c0, %c0_0] : memref<128x256xf32, #tpu.memory_space<vmem>>, vector<128x256xf32>
    %c0_1 = arith.constant 0 : index
    %c0_2 = arith.constant 0 : index
    %1 = vector.load %arg2[%c0_1, %c0_2] : memref<1x256xf32, #tpu.memory_space<vmem>>, vector<1x256xf32>
    %2 = vector.broadcast %1 : vector<1x256xf32> to vector<128x256xf32>
    %3 = arith.subf %0, %2 : vector<128x256xf32>
    %c0_3 = arith.constant 0 : index
    %c0_4 = arith.constant 0 : index
    %4 = vector.load %arg3[%c0_3, %c0_4] : memref<1x256xf32, #tpu.memory_space<vmem>>, vector<1x256xf32>
    %5 = vector.broadcast %4 : vector<1x256xf32> to vector<128x256xf32>
    %6 = arith.mulf %3, %5 : vector<128x256xf32>
    %cst = arith.constant 0.000000e+00 : f32
    %7 = vector.broadcast %cst : f32 to vector<128x256xf32>
    %8 = arith.maximumf %6, %7 : vector<128x256xf32>
    %c0_5 = arith.constant 0 : index
    %c0_6 = arith.constant 0 : index
    %9 = vector.load %arg4[%c0_5, %c0_6] : memref<128x256xf32, #tpu.memory_space<vmem>>, vector<128x256xf32>
    tpu.vector_store %arg4[%c0_5, %c0_6], %8 {strides = array<i32>} : memref<128x256xf32, #tpu.memory_space<vmem>>, vector<128x256xf32>,
    return
  }
  func.func @transform_0(%arg0: i32) -> (i32, i32) {
    %c0_i32 = arith.constant 0 : i32
    %c0_i32_0 = arith.constant 0 : i32
    return %arg0, %c0_i32 : i32, i32
  }
  func.func @transform_1(%arg0: i32) -> (i32, i32) {
    %c0_i32 = arith.constant 0 : i32
    %c0_i32_0 = arith.constant 0 : i32
    %c0_i32_1 = arith.constant 0 : i32
    return %c0_i32, %c0_i32_0 : i32, i32
  }
  func.func @transform_2(%arg0: i32) -> (i32, i32) {
    %c0_i32 = arith.constant 0 : i32
    %c0_i32_0 = arith.constant 0 : i32
    %c0_i32_1 = arith.constant 0 : i32
    return %c0_i32, %c0_i32_0 : i32, i32
  }
  func.func @transform_3(%arg0: i32) -> (i32, i32) {
    %c0_i32 = arith.constant 0 : i32
    %c0_i32_0 = arith.constant 0 : i32
    return %arg0, %c0_i32 : i32, i32
  }
}

module attributes {stable_mosaic.version = 11 : i64} {
  func.func @_matmul_kernel(%arg0: i32, %arg1: i32, %arg2: i32, %arg3: memref<512x16xbf16, #tpu.memory_space<vmem>>, %arg4: memref<16x12xbf16, #tpu.memory_space<vmem>>, %arg5: memref<512x12xf32, #tpu.memory_space<vmem>>, %arg6: memref<512x12xf32, #tpu.memory_space<vmem>>) attributes {dimension_semantics = [#tpu.dimension_semantics<parallel>, #tpu.dimension_semantics<parallel>, #tpu.dimension_semantics<arbitrary>], iteration_bounds = array<i64: 17, 1, 1>, scalar_prefetch = 0 : i64, scratch_operands = 1 : i64, tpu.core_type = #tpu.core_type<tc>, window_params = [{transform_indices = @transform_0, window_bounds = array<i64: 512, 16>}, {transform_indices = @transform_1, window_bounds = array<i64: 16, 12>}, {transform_indices = @transform_2, window_bounds = array<i64: 512, 12>}]} {
    %c0_i32 = arith.constant 0 : i32
    %0 = arith.cmpi eq, %arg2, %c0_i32 : i32
    %1 = arith.extui %0 : i1 to i32
    %c0_i32_0 = arith.constant 0 : i32
    %2 = arith.cmpi ne, %1, %c0_i32_0 : i32
    scf.if %2 {
      %cst_10 = arith.constant 0.000000e+00 : f32
      %12 = vector.broadcast %cst_10 : f32 to vector<512x12xf32>
      %c0_11 = arith.constant 0 : index
      %c0_12 = arith.constant 0 : index
      %13 = vector.load %arg6[%c0_11, %c0_12] : memref<512x12xf32, #tpu.memory_space<vmem>>, vector<512x12xf32>
      tpu.vector_store %arg6[%c0_11, %c0_12], %12 {strides = array<i32>} : memref<512x12xf32, #tpu.memory_space<vmem>>, vector<512x12xf32>,
    } else {
    }
    %c0 = arith.constant 0 : index
    %c0_1 = arith.constant 0 : index
    %3 = vector.load %arg6[%c0, %c0_1] : memref<512x12xf32, #tpu.memory_space<vmem>>, vector<512x12xf32>
    %c0_2 = arith.constant 0 : index
    %c0_3 = arith.constant 0 : index
    %4 = vector.load %arg3[%c0_2, %c0_3] : memref<512x16xbf16, #tpu.memory_space<vmem>>, vector<512x16xbf16>
    %c0_4 = arith.constant 0 : index
    %c0_5 = arith.constant 0 : index
    %5 = vector.load %arg4[%c0_4, %c0_5] : memref<16x12xbf16, #tpu.memory_space<vmem>>, vector<16x12xbf16>
    %cst = arith.constant dense<0.000000e+00> : vector<512x12xf32>
    %6 = tpu.matmul %4, %5, %cst {dimension_numbers = #tpu.dot_dimension_numbers<[1], [0], [0], [1], [0, 0, 1, 1], [], []>} : vector<512x16xbf16>, vector<16x12xbf16>, vector<512x12xf32> -> vector<512x12xf32>
    %7 = arith.addf %3, %6 : vector<512x12xf32>
    %c0_6 = arith.constant 0 : index
    %c0_7 = arith.constant 0 : index
    %8 = vector.load %arg6[%c0_6, %c0_7] : memref<512x12xf32, #tpu.memory_space<vmem>>, vector<512x12xf32>
    tpu.vector_store %arg6[%c0_6, %c0_7], %7 {strides = array<i32>} : memref<512x12xf32, #tpu.memory_space<vmem>>, vector<512x12xf32>,
    %c0_i32_8 = arith.constant 0 : i32
    %9 = arith.cmpi eq, %arg2, %c0_i32_8 : i32
    %10 = arith.extui %9 : i1 to i32
    %c0_i32_9 = arith.constant 0 : i32
    %11 = arith.cmpi ne, %10, %c0_i32_9 : i32
    scf.if %11 {
      %c0_10 = arith.constant 0 : index
      %c0_11 = arith.constant 0 : index
      %12 = vector.load %arg6[%c0_10, %c0_11] : memref<512x12xf32, #tpu.memory_space<vmem>>, vector<512x12xf32>
      %c0_12 = arith.constant 0 : index
      %c0_13 = arith.constant 0 : index
      %13 = vector.load %arg5[%c0_12, %c0_13] : memref<512x12xf32, #tpu.memory_space<vmem>>, vector<512x12xf32>
      tpu.vector_store %arg5[%c0_12, %c0_13], %12 {strides = array<i32>} : memref<512x12xf32, #tpu.memory_space<vmem>>, vector<512x12xf32>,
    } else {
    }
    return
  }
  func.func @transform_0(%arg0: i32, %arg1: i32, %arg2: i32) -> (i32, i32) {
    %c0_i32 = arith.constant 0 : i32
    return %arg0, %arg2 : i32, i32
  }
  func.func @transform_1(%arg0: i32, %arg1: i32, %arg2: i32) -> (i32, i32) {
    %c0_i32 = arith.constant 0 : i32
    return %arg2, %arg1 : i32, i32
  }
  func.func @transform_2(%arg0: i32, %arg1: i32, %arg2: i32) -> (i32, i32) {
    %c0_i32 = arith.constant 0 : i32
    return %arg0, %arg1 : i32, i32
  }
}

module attributes {stable_mosaic.version = 11 : i64} {
  func.func @_tanh_kernel(%arg0: i32, %arg1: memref<256x384xf32, #tpu.memory_space<vmem>>, %arg2: memref<256x384xf32, #tpu.memory_space<vmem>>) attributes {dimension_semantics = [#tpu.dimension_semantics<parallel>], iteration_bounds = array<i64: 1>, scalar_prefetch = 0 : i64, scratch_operands = 0 : i64, tpu.core_type = #tpu.core_type<tc>, window_params = [{transform_indices = @transform_0, window_bounds = array<i64: 256, 384>}, {transform_indices = @transform_1, window_bounds = array<i64: 256, 384>}]} {
    %c0 = arith.constant 0 : index
    %c0_0 = arith.constant 0 : index
    %0 = vector.load %arg1[%c0, %c0_0] : memref<256x384xf32, #tpu.memory_space<vmem>>, vector<256x384xf32>
    %1 = math.tanh %0 : vector<256x384xf32>
    %c0_1 = arith.constant 0 : index
    %c0_2 = arith.constant 0 : index
    %2 = vector.load %arg2[%c0_1, %c0_2] : memref<256x384xf32, #tpu.memory_space<vmem>>, vector<256x384xf32>
    tpu.vector_store %arg2[%c0_1, %c0_2], %1 {strides = array<i32>} : memref<256x384xf32, #tpu.memory_space<vmem>>, vector<256x384xf32>,
    return
  }
  func.func @transform_0(%arg0: i32) -> (i32, i32) {
    %c0_i32 = arith.constant 0 : i32
    %c0_i32_0 = arith.constant 0 : i32
    return %arg0, %c0_i32 : i32, i32
  }
  func.func @transform_1(%arg0: i32) -> (i32, i32) {
    %c0_i32 = arith.constant 0 : i32
    %c0_i32_0 = arith.constant 0 : i32
    return %arg0, %c0_i32 : i32, i32
  }
}

</mosaic_0001>

<bundles_post_ra>
// kernel: tile.58
= control target key start
LH: loop header
LB: loop body
LE: loop exit
PB: predicated region body
PF: predicated region fallthrough
CT: control target
= control target key end

     0   :  { %s22_s0 = inlined_call_operand.vmem [shape: f32[64], index: 0, kind: input, shape index: {}]   ;;  %s23_s1 = inlined_call_operand.vmem [shape: f32[4,64], index: 1, kind: output, shape index: {}]  }
   0x1   :  { %v4_v0 = vld [vmem:[%s22_s0] ss:$0 sm:$0xff] }
   0x2   :  { %5 = vst [vmem:[%s23_s1] sm:$0xf] %v4_v0 }

// kernel: tile.59
= control target key start
LH: loop header
LB: loop body
LE: loop exit
PB: predicated region body
PF: predicated region fallthrough
CT: control target
= control target key end

     0   :  { %s6_s8 = smov 3  ;;  %vm8_vm0 = vcmask 523264   ;;  %s30_s9 = smov 64   ;;  %vm15_vm1 = vcmask 1048064   ;;  %s50_s0 = inlined_call_operand.vmem [shape: f32[4,64], index: 0, kind: input, shape index: {}]   ;;  %s51_s1 = inlined_call_operand.vmem [shape: f32[1,256], index: 1, kind: output, shape index: {}]  }
   0x1   :  { %v4_v0 = vld [vmem:[%s50_s0] sm:$0xf]  ;;  %s11_s0 = smov 3 }
   0x2   :  { %5 = vst [vmem:[#allocation1] sm:$0xf] %v4_v0 }
   0x9   :  { %v12_v1 = vld [vmem:[#allocation1 + $0x1] ss:$2 sm:%s11_s0]   ;;  %v7_v2 = vld [vmem:[#allocation1] ss:$2 sm:%s6_s8]  }
   0xa   :  { %13 = vrot.lane.b32.xlu0 %v12_v1, %s30_s9  ;;  %9 = vst.msk [vmem:[#allocation0] ss:$8 sm:$0x3] %vm8_vm0, %v7_v2  }
  0x7c   :  { %v14_v3 = vpop.permute.xlu0 %13  }
  0x7d   :  { %16 = vst.msk [vmem:[#allocation0] ss:$8 sm:$0x3] %vm15_vm1, %v14_v3  }
  0x84   :  { %v20_v4 = vld [vmem:[#allocation0] sm:$0x1]  ;;  %v24_v5 = vld [vmem:[#allocation0 + $0x8] sm:$0x1] }
  0x85   :  { %22 = vst [vmem:[%s51_s1] sm:$0x1] %v20_v4  ;;  %28 = vst [vmem:[%s51_s1 + $0x1] sm:$0x1] %v24_v5 }

// kernel: decoder_forward.13
= control target key start
LH: loop header
LB: loop body
LE: loop exit
PB: predicated region body
PF: predicated region fallthrough
CT: control target
= control target key end

     0   :  { %v18_v0 = vlaneseq  ;;  %s90_s1 = inlined_call_operand.vmem [shape: f32[1,256], index: 1, kind: input, shape index: {}]   ;;  %s91_s2 = inlined_call_operand.vmem [shape: f32[1,256], index: 2, kind: input, shape index: {}]   ;;  %s92_s0 = inlined_call_operand.vmem [shape: f32[8,256], index: 0, kind: input, shape index: {}]   ;;  %s93_s3 = inlined_call_operand.vmem [shape: f32[8,256], index: 3, kind: output, shape index: {}]  }
   0x1   :  { %v16_v2 = vld [vmem:[%s90_s1] sm:$0x3]  ;;  %v15_v7 = vld [vmem:[%s92_s0 + $0x8] sm:$0xff] }
   0x2   :  { %v19_v1 = vshrl.u32 %v18_v0, 7  ;;  %v30_v3 = vld [vmem:[%s91_s2] sm:$0x3] }
   0x3   :  { %v14_v6 = vld [vmem:[%s92_s0] sm:$0xff] }
   0x4   :  { %v20_v4 = vsub.s32 0, %v19_v1  ;;  %v24_v5 = vsub.s32 1, %v19_v1 }
   0x6   :  { %v21_v8 = vrot.slane %v16_v2, %v20_v4  ;;  %v35_v9 = vrot.slane %v30_v3, %v20_v4  ;;  %v25_v10 = vrot.slane %v16_v2, %v24_v5  ;;  %v39_v11 = vrot.slane %v30_v3, %v24_v5 }
   0x8   :  { %v28_v12 = vsub.f32 %v14_v6, %v21_v8  ;;  %v29_v13 = vsub.f32 %v15_v7, %v25_v10 }
   0xa   :  { %v42_v14 = vmul.f32 %v35_v9, %v28_v12  ;;  %v43_v15 = vmul.f32 %v39_v11, %v29_v13 }
   0xc   :  { %v44_v16 = vmax.f32 %v42_v14, 0.0  ;;  %v45_v17 = vmax.f32 %v43_v15, 0.0 }
   0xe   :  { %46 = vst [vmem:[%s93_s3] sm:$0xff] %v44_v16  ;;  %47 = vst [vmem:[%s93_s3 + $0x8] sm:$0xff] %v45_v17 }

// kernel: decoder_forward.12
= control target key start
LH: loop header
LB: loop body
LE: loop exit
PB: predicated region body
PF: predicated region fallthrough
CT: control target
= control target key end

     0   :  { %s559_s9 = smov 0   ;;  %s561_s10 = smov 0   ;;  %s595_s0 = inlined_call_operand.vmem [shape: bf16[8,8], index: 0, kind: input, shape index: {}]   ;;  %s596_s1 = inlined_call_operand.vmem [shape: bf16[8,1024], index: 1, kind: input, shape index: {}]   ;;  %s597_s2 = inlined_call_operand.vmem [shape: f32[8,1024], index: 2, kind: output, shape index: {}]  }
   0x1   :  { %s563_s11 = smov 0  }
   0x2 LB: > { %s27_s12 = sadd.s32 1, %s537_s10  ;;  %p475_p0 = scmp.ge.s32.totalorder %s541_s11, 1  ;;  %s541_s11 = sphi %s563_s11, %s12_s11   ;;  %s537_s10 = sphi %s561_s10, %s599_s10   ;;  %s533_s9 = sphi %s559_s9, %s598_s9  }
   0x3   : > { %p29_p1 = scmp.ge.s32.totalorder %s27_s12, 2  ;;  %p154_p2 = scmp.lt.s32.totalorder %s541_s11, 3 }
   0x5   : > { %s601_s12 = smov (%p29_p1, %s27_s12), 0  ;;  %p155_p3 = pnand %p475_p0, %p154_p2 }
   0x6   : > { %s476_s13 = sshll.u32 (!%p155_p3), %s533_s9, 2  ;;  %v543_v0 = vmov (!%p155_p3), 0   ;;  %vm248_vm0 = vcmask (!%p155_p3), 1043456   ;;  %v231_v9 = vld [vmem:[%s595_s0] sm:$0xf] (!%p155_p3)  ;;  %vm244_vm1 = vcmask (!%p155_p3), 64512  }
   0x7   : > { %158 = sbr.rel (%p155_p3) target bundleno = 239 (0xef), region = 28  ;;  %p201_p4 = scmp.lt.s32.totalorder (!%p155_p3), %s476_s13, 7  ;;  %293 = vmatprep.mubr.bf16.mxu0 (!%p155_p3), %v543_v0  ;;  %334 = vmatprep.mubr.bf16.mxu1 (!%p155_p3), %v543_v0 }
   0xe   : > { %s603_s13 = smov (!%p201_p4, %s476_s13), 7 }
   0xf   : > { %s477_s14 = sshll.u32 %s603_s13, 2  ;;  %s479_s20 = sshll.u32 %s603_s13, 3 }
  0x10   : > { %s206_s17 = scalar_lea.vmem %s596_s1, %s477_s14  ;;  %s216_s23 = scalar_lea.vmem %s597_s2, %s479_s20 }
  0x11   : > { %v232_v1 = vld [vmem:[%s206_s17] sm:$0xff]  ;;  %v233_v2 = vld [vmem:[%s206_s17 + $0x8] sm:$0xff] }
  0x12   : > { %v481_v3 = vcombine.high %v232_v1, %v232_v1  ;;  %v483_v4 = vcombine.high %v233_v2, %v233_v2  ;;  %v480_v5 = vcombine.low %v232_v1, %v232_v1  ;;  %v482_v6 = vcombine.low %v233_v2, %v233_v2 }
  0x14   : > { %484 = vmatprep.subr.msk.bf16.mxu0 %vm248_vm0, %v481_v3  ;;  %486 = vmatprep.subr.msk.bf16.mxu1 %vm248_vm0, %v483_v4  ;;  %v250_v7 = vsel %vm248_vm0, %v480_v5, 0  ;;  %v256_v8 = vsel %vm248_vm0, %v482_v6, 0 }
  0x15   : > { %262 = vmatpush1.bf16.msra.mxu0 %v250_v7  ;;  %303 = vmatpush1.bf16.msra.mxu1 %v256_v8 }
  0x18   : > { %485 = vmatmul.mubr.msk.bf16.vlgmr.msra.gmra.mrb[0].mxu0 %vm244_vm1, %v231_v9  ;;  %487 = vmatmul.mubr.msk.bf16.vlgmr.msra.gmra.mrb[0].mxu1 %vm244_vm1, %v231_v9 }
  0xeb   : > { %v295_v10 = vpop.f32.mrb[0].mxu0  ;;  %v336_v11 = vpop.f32.mrb[0].mxu1 }
  0xec   : > { %358 = vst [vmem:[%s216_s23] sm:$0xff] %v295_v10  ;;  %v297_v12 = vpop.f32.mrb[1].mxu0  ;;  %v338_v13 = vpop.f32.mrb[1].mxu1  ;;  %360 = vst [vmem:[%s216_s23 + $0x10] sm:$0xff] %v336_v11 }
  0xed   : > { %359 = vst [vmem:[%s216_s23 + $0x8] sm:$0xff] %v297_v12  ;;  %v299_v14 = vpop.f32.mrb[2].mxu0  ;;  %v340_v15 = vpop.f32.mrb[2].mxu1  ;;  %361 = vst [vmem:[%s216_s23 + $0x18] sm:$0xff] %v338_v13 }
  0xee   : > { %v300_v16 = vpop.f32.mrb[3].mxu0  ;;  %v341_v17 = vpop.f32.mrb[3].mxu1 }
  0xef PF: > { %s12_s11 = sadd.s32 1, %s541_s11   ;;  %s598_s9 = smov %s537_s10 }
  0xf0   : > { %p9_p5 = scmp.ge.s32.totalorder %s12_s11, 4   ;;  %s599_s10 = smov %s601_s12 }
  0xf2   :  { %11 = sbr.rel (!%p9_p5) target bundleno = 2 (0x2), region = 69 }

// kernel: decoder_forward.14
= control target key start
LH: loop header
LB: loop body
LE: loop exit
PB: predicated region body
PF: predicated region fallthrough
CT: control target
= control target key end

     0   :  { %s1131_s9 = smov 0   ;;  %s1133_s10 = smov 0   ;;  %s1308_s0 = inlined_call_operand.vmem [shape: bf16[50,256], index: 0, kind: input, shape index: {}]   ;;  %s1309_s1 = inlined_call_operand.vmem [shape: bf16[256,128], index: 1, kind: input, shape index: {}]   ;;  %s1310_s2 = inlined_call_operand.vmem [shape: f32[50,128], index: 2, kind: output, shape index: {}]  }
   0x1   :  { %s1135_s11 = smov 0   ;;  %s1137_s12 = smov 0  }
   0x2   :  { %s1139_s13 = smov 0  }
   0x3 LB: > { %s783_s14 = sadd.s32 4294967295, %s1082_s13   ;;  %s31_s15 = sadd.s32 1, %s1078_s12  ;;  %s1082_s13 = sphi %s1139_s13, %s12_s13   ;;  %s1078_s12 = sphi %s1137_s12, %s1318_s12   ;;  %s1074_s11 = sphi %s1135_s11, %s1317_s11   ;;  %s1070_s10 = sphi %s1133_s10, %s1316_s10   ;;  %s1066_s9 = sphi %s1131_s9, %s1315_s9  }
   0x4   : > { %p33_p0 = scmp.ge.s32.totalorder %s31_s15, 2  ;;  %s96_s16 = sadd.s32 1, %s1070_s10 }
   0x5   : > { %p106_p1 = scmp.ne.s32.totalorder %s1070_s10, %s1066_s9  ;;  %p107_p2 = scmp.eq.s32.totalorder %s783_s14, 1 }
   0x6   : > { %s1320_s15 = smov (%p33_p0, %s31_s15), 0  ;;  %p788_p4 = scmp.ge.s32.totalorder %s1082_s13, 1 }
   0x7   : > { %p1163_p3 = por %p107_p2, %p106_p1  ;;  %s91_s18 = ssub.s32 %s1078_s12, %s1320_s15 }
   0x8   : > { %p168_p5 = scmp.lt.s32.totalorder %s1082_s13, 3  ;;  %p94_p6 = scmp.eq.s32.totalorder %s91_s18, 0 }
   0xa   : > { %p169_p7 = pnand %p788_p4, %p168_p5 }
   0xb   : > { %s1172_s19 = scalar_select %p94_p6, %s1070_s10, %s96_s16  }
   0xc   : > { %172 = sbr.rel (%p169_p7) target bundleno = 332 (0x14c), region = 28  ;;  %v983_v0 = vld [vmem:[%s1309_s1 + $0x40] sm:$0xff] (!%p169_p7)   ;;  %v985_v2 = vld [vmem:[%s1309_s1 + $0x48] sm:$0xff] (!%p169_p7)   ;;  %v987_v4 = vld [vmem:[%s1309_s1 + $0x50] sm:$0xff] (!%p169_p7)   ;;  %s204_s18 = sand.u32 (!%p169_p7), 1, %s1066_s9  }
   0xd   : > { %s1178_s22 = smul.u32 (!%p169_p7), 6, %s1074_s11  ;;  %v984_v1 = vld [vmem:[%s1309_s1] sm:$0xff] (!%p169_p7)   ;;  %861 = vmatprep.subr.bf16.mxu1 (!%p169_p7), %v983_v0  ;;  %827 = vmatprep.subr.bf16.mxu0 (!%p169_p7), %v983_v0  ;;  %v986_v3 = vld [vmem:[%s1309_s1 + $0x8] sm:$0xff] (!%p169_p7)   ;;  %v988_v5 = vld [vmem:[%s1309_s1 + $0x10] sm:$0xff] (!%p169_p7)  }
   0xe   : > { %869 = vmatpush3.bf16.msra.mxu1 (!%p169_p7), %v984_v1  ;;  %828 = vmatpush3.bf16.msra.mxu0 (!%p169_p7), %v984_v1  ;;  %v989_v6 = vld [vmem:[%s1309_s1 + $0x58] sm:$0xff] (!%p169_p7)   ;;  %v991_v8 = vld [vmem:[%s1309_s1 + $0x60] sm:$0xff] (!%p169_p7)   ;;  %v993_v10 = vld [vmem:[%s1309_s1 + $0x68] sm:$0xff] (!%p169_p7)   ;;  %s877_s20 = smul.u32 (!%p169_p7), 48, %s204_s18 }
   0xf   : > { %p214_p8 = scmp.lt.s32.totalorder (!%p169_p7), %s1178_s22, 6  ;;  %862 = vmatprep.subr.bf16.mxu1 (!%p169_p7), %v985_v2  ;;  %829 = vmatprep.subr.bf16.mxu0 (!%p169_p7), %v985_v2  ;;  %v990_v7 = vld [vmem:[%s1309_s1 + $0x18] sm:$0xff] (!%p169_p7)   ;;  %v992_v9 = vld [vmem:[%s1309_s1 + $0x20] sm:$0xff] (!%p169_p7)   ;;  %v994_v13 = vld [vmem:[%s1309_s1 + $0x28] sm:$0xff] (!%p169_p7)  }
  0x10   : > { %v995_v14 = vld [vmem:[%s1309_s1 + $0x70] sm:$0xff] (!%p169_p7)   ;;  %v997_v16 = vld [vmem:[%s1309_s1 + $0x78] sm:$0xff] (!%p169_p7)   ;;  %s1239_s21 = scalar_lea.vmem (!%p169_p7), [#allocation3], %s877_s20  }
  0x11   : > { %v996_v15 = vld [vmem:[%s1309_s1 + $0x30] sm:$0xff] (!%p169_p7)   ;;  %v998_v17 = vld [vmem:[%s1309_s1 + $0x38] sm:$0xff] (!%p169_p7)  }
  0x12   : > { %870 = vmatpush3.bf16.msra.mxu1 (!%p169_p7), %v986_v3  ;;  %830 = vmatpush3.bf16.msra.mxu0 (!%p169_p7), %v986_v3 }
  0x13   : > { %s215_s5 = scalar_select %p214_p8, %s1178_s22, 6  ;;  %863 = vmatprep.subr.bf16.mxu1 %v987_v4  ;;  %831 = vmatprep.subr.bf16.mxu0 %v987_v4 }
  0x14   : > { %s516_s9 = ssub.s32 (%p1163_p3), 7, %s1178_s22  ;;  %s826_s23 = smul.u32 (%p1163_p3), 48, %s1074_s11 }
  0x15   : > { %s825_s16 = sshll.u32 %s215_s5, 3  ;;  %p517_p9 = scmp.lt.s32.totalorder (%p1163_p3), %s516_s9, 6 }
  0x16   : > { %871 = vmatpush3.bf16.msra.mxu1 %v988_v5  ;;  %832 = vmatpush3.bf16.msra.mxu0 %v988_v5  ;;  %s1209_s24 = scalar_lea.vmem %s1308_s0, %s825_s16  ;;  %s1254_s26 = scalar_lea.vmem (%p1163_p3), %s1310_s2, %s826_s23  }
  0x17   : > { %864 = vmatprep.subr.bf16.mxu1 %v989_v6  ;;  %833 = vmatprep.subr.bf16.mxu0 %v989_v6  ;;  %v1001_v11 = vld [vmem:[%s1209_s24 + $0x14] ss:$8 sps:$4 sm:$0xff]   ;;  %v1004_v12 = vld [vmem:[%s1209_s24 + $0x4] ss:$8 sps:$4 sm:$0xff]   ;;  %v999_v18 = vld [vmem:[%s1209_s24 + $0x10] ss:$8 sps:$4 sm:$0xff]  }
  0x18   : > { %464 = vmatprep.mubr.bf16.mxu1 %v1001_v11  ;;  %456 = vmatprep.mubr.bf16.mxu0 %v1004_v12  ;;  %v1002_v19 = vld [vmem:[%s1209_s24] ss:$8 sps:$4 sm:$0xff]   ;;  %v1005_v20 = vld [vmem:[%s1209_s24 + $0x24] ss:$8 sps:$4 sm:$0xff]  }
  0x19   : > { %v1007_v21 = vld [vmem:[%s1209_s24 + $0x20] ss:$8 sps:$4 sm:$0xff]  }
  0x1a   : > { %872 = vmatpush3.bf16.msra.mxu1 %v990_v7  ;;  %834 = vmatpush3.bf16.msra.mxu0 %v990_v7 }
  0x1b   : > { %865 = vmatprep.subr.bf16.mxu1 %v991_v8  ;;  %835 = vmatprep.subr.bf16.mxu0 %v991_v8 }
  0x1e   : > { %873 = vmatpush3.bf16.msra.mxu1 %v992_v9  ;;  %836 = vmatpush3.bf16.msra.mxu0 %v992_v9 }
  0x1f   : > { %866 = vmatprep.subr.bf16.mxu1 %v993_v10  ;;  %837 = vmatprep.subr.bf16.mxu0 %v993_v10 }
  0x22   : > { %874 = vmatpush3.bf16.msra.mxu1 %v994_v13  ;;  %838 = vmatpush3.bf16.msra.mxu0 %v994_v13 }
  0x23   : > { %867 = vmatprep.subr.bf16.mxu1 %v995_v14  ;;  %839 = vmatprep.subr.bf16.mxu0 %v995_v14 }
  0x26   : > { %875 = vmatpush3.bf16.msra.mxu1 %v996_v15  ;;  %840 = vmatpush3.bf16.msra.mxu0 %v996_v15 }
  0x27   : > { %868 = vmatprep.subr.bf16.mxu1 %v997_v16  ;;  %841 = vmatprep.subr.bf16.mxu0 %v997_v16 }
  0x2a   : > { %876 = vmatpush3.bf16.msra.mxu1 %v998_v17  ;;  %842 = vmatpush3.bf16.msra.mxu0 %v998_v17 }
  0x2d   : > { %465 = vmatmul.mubr.bf16.vlgmr.msra.gmra.mrb[0].mxu1 %v999_v18  ;;  %457 = vmatmul.mubr.bf16.vlgmr.msra.gmra.mrb[0].mxu0 %v1002_v19 }
  0x2e   : > { %472 = vmatprep.mubr.bf16.mxu1 %v1005_v20 }
  0x35   : > { %473 = vmatmul.mubr.bf16.gmra.mrb[4].mxu1 %v1007_v21 }
 0x100   : > { %v849_v22 = vpop.f32.mrb[0].mxu1  ;;  %v843_v23 = vpop.f32.mrb[0].mxu0 }
 0x101   : > { %v850_v24 = vpop.f32.mrb[1].mxu1  ;;  %v844_v25 = vpop.f32.mrb[1].mxu0 }
 0x102   : > { %v851_v26 = vadd.f32 %v850_v24, %v849_v22  ;;  %v852_v27 = vpop.f32.mrb[2].mxu1  ;;  %v845_v28 = vadd.f32 %v844_v25, %v843_v23  ;;  %v846_v29 = vpop.f32.mrb[2].mxu0 }
 0x103   : > { %v853_v30 = vpop.f32.mrb[3].mxu1  ;;  %v847_v31 = vpop.f32.mrb[3].mxu0 }
 0x104   : > { %504 = vst [vmem:[%s1239_s21 + $0x10] sm:$0xff] %v851_v26  ;;  %v854_v32 = vadd.f32 %v853_v30, %v852_v27  ;;  %502 = vst [vmem:[%s1239_s21] sm:$0xff] %v845_v28  ;;  %v848_v33 = vadd.f32 %v847_v31, %v846_v29 }
 0x106   : > { %505 = vst [vmem:[%s1239_s21 + $0x18] sm:$0xff] %v854_v32  ;;  %503 = vst [vmem:[%s1239_s21 + $0x8] sm:$0xff] %v848_v33 }
 0x108   : > { %v855_v34 = vpop.f32.mrb[4].mxu1  ;;  %514 = sbr.rel (!%p1163_p3) target bundleno = 332 (0x14c), region = 40 }
 0x109   : > { %v856_v35 = vpop.f32.mrb[5].mxu1 }
 0x10a   : > { %v857_v36 = vadd.f32 %v856_v35, %v855_v34  ;;  %v858_v37 = vpop.f32.mrb[6].mxu1 }
 0x10b   : > { %v859_v38 = vpop.f32.mrb[7].mxu1 }
 0x10c   : > { %506 = vst [vmem:[%s1239_s21 + $0x20] sm:$0xff] %v857_v36  ;;  %v860_v39 = vadd.f32 %v859_v38, %v858_v37 }
 0x10e   : > { %507 = vst [vmem:[%s1239_s21 + $0x28] sm:$0xff] %v860_v39 }
 0x10f   : > { %s1322_s9 = smov (!%p517_p9, %s516_s9), 6 }
 0x110   : > { %s813_s27 = sshll.u32 %s1322_s9, 7 }
 0x111   : > { %p816_p10 = scmp.eq.s32.totalorder %s813_s27, 0 }
 0x112   : > { %1008 = sdivrem.u32 (!%p816_p10), %s1322_s9, 6 }
 0x113   : > { %526 = sbr.rel (%p816_p10) target bundleno = 332 (0x14c), region = 44 }
 0x11b   : > { %s1260_s17 = spop.drf %1008 }
 0x11c   : > { %p817_p11 = scmp.le.s32.totalorder %s1260_s17, 0 }
 0x11d   : > { %s1312_s11 = smov (!%p817_p11), %s1254_s26  ;;  %s1313_s22 = smov (!%p817_p11), %s1239_s21 }
 0x11e   : > { %719 = sbr.rel (%p817_p11) target bundleno = 303 (0x12f), region = 123  ;;  %s1269_s28 = smov (!%p817_p11), 0  }
 0x11f   : > { %s1271_s29 = smov (!%p817_p11), 0  }
 0x125 LB: >> { %v600_v40 = vld [vmem:[%s1090_s22] sm:$0xff]  ;;  %v602_v41 = vld [vmem:[%s1090_s22 + $0x8] sm:$0xff]  ;;  %v604_v42 = vld [vmem:[%s1090_s22 + $0x10] sm:$0xff]  ;;  %s612_s30 = sadd.s32 1, %s1094_s28  ;;  %s594_s29 = sadd.s32 1, %s1098_s29   ;;  %s1098_s29 = sphi %s1271_s29, %s594_s29   ;;  %s1094_s28 = sphi %s1269_s28, %s1314_s28   ;;  %s1090_s22 = sphi %s1313_s22, %s617_s22   ;;  %s1086_s11 = sphi %s1312_s11, %s618_s11  }
 0x126   : >> { %601 = vst [vmem:[%s1086_s11] sm:$0xff] %v600_v40  ;;  %603 = vst [vmem:[%s1086_s11 + $0x8] sm:$0xff] %v602_v41  ;;  %v606_v43 = vld [vmem:[%s1090_s22 + $0x18] sm:$0xff]  ;;  %v608_v44 = vld [vmem:[%s1090_s22 + $0x20] sm:$0xff]  ;;  %p613_p12 = scmp.ge.s32.totalorder %s612_s30, %s1260_s17  ;;  %p593_p13 = scmp.ge.s32.totalorder %s594_s29, %s1260_s17 }
 0x127   : >> { %605 = vst [vmem:[%s1086_s11 + $0x10] sm:$0xff] %v604_v42  ;;  %v610_v45 = vld [vmem:[%s1090_s22 + $0x28] sm:$0xff]  ;;  %607 = vst [vmem:[%s1086_s11 + $0x18] sm:$0xff] %v606_v43 }
 0x128   : >> { %609 = vst [vmem:[%s1086_s11 + $0x20] sm:$0xff] %v608_v44  ;;  %611 = vst [vmem:[%s1086_s11 + $0x28] sm:$0xff] %v610_v45  ;;  %s1324_s30 = smov (%p613_p12, %s612_s30), 0  ;;  %596 = sbr.rel (!%p593_p13) target bundleno = 293 (0x125), region = 129 }
 0x129   : >> { %s615_s3 = smul.u32 48, %s1324_s30  ;;  %s1314_s28 = smov %s1324_s30 }
 0x12b   : >> { %s617_s22 = scalar_lea.vmem %s1239_s21, %s615_s3 [#allocation3]   ;;  %s618_s11 = scalar_lea.vmem %s1254_s26, %s615_s3  }
 0x12f PF: > { %1010 = sdivrem.u32 %s1322_s9, 6 }
 0x130   : > { %s818_s4 = smul.u32 48, %s1260_s17 }
 0x132   : > { %s623_s5 = scalar_lea.vmem %s1239_s21, %s818_s4 [#allocation3]   ;;  %s625_s6 = scalar_lea.vmem %s1254_s26, %s818_s4  }
 0x138   : > { %s1011_s7 = spop.drf %1010 }
 0x139   : > { %p820_p0 = scmp.le.s32.totalorder %s1011_s7, 0 }
 0x13a   : > { %s1100_s8 = smov (!%p820_p0), %s625_s6   ;;  %s1104_s14 = smov (!%p820_p0), %s623_s5  }
 0x13b   : > { %733 = sbr.rel (%p820_p0) target bundleno = 332 (0x14c), region = 134  ;;  %s1108_s16 = smov (!%p820_p0), 0  }
 0x13c   : > { %s1112_s18 = smov (!%p820_p0), 0  }
 0x142 LB: >> { %v635_v46 = vld [vmem:[%s1106_s14] sm:$0xff]  ;;  %s637_s20 = sadd.s32 1, %s1110_s16  ;;  %s629_s18 = sadd.s32 1, %s1114_s18   ;;  %s1114_s18 = sphi %s1112_s18, %s629_s18   ;;  %s1110_s16 = sphi %s1108_s16, %s1109_s16   ;;  %s1106_s14 = sphi %s1104_s14, %s642_s14   ;;  %s1102_s8 = sphi %s1100_s8, %s643_s8  }
 0x143   : >> { %636 = vst [vmem:[%s1102_s8] sm:$0xff] %v635_v46  ;;  %p638_p1 = scmp.ge.s32.totalorder %s637_s20, %s1011_s7  ;;  %p628_p2 = scmp.ge.s32.totalorder %s629_s18, %s1011_s7 }
 0x145   : >> { %s1326_s20 = smov (%p638_p1, %s637_s20), 0  ;;  %631 = sbr.rel (!%p628_p2) target bundleno = 322 (0x142), region = 140 }
 0x146   : >> { %s821_s21 = sshll.u32 %s1326_s20, 3  ;;  %s1109_s16 = smov %s1326_s20  }
 0x147   : >> { %s642_s14 = scalar_lea.vmem %s623_s5, %s821_s21 [#allocation3]   ;;  %s643_s8 = scalar_lea.vmem %s625_s6, %s821_s21  }
 0x14c PF: > { %s12_s13 = sadd.s32 1, %s1082_s13   ;;  %s1315_s9 = smov %s1070_s10 }
 0x14d   : > { %p9_p3 = scmp.ge.s32.totalorder %s12_s13, 4   ;;  %s1316_s10 = smov %s1172_s19 }
 0x14e   : > { %s1317_s11 = smov %s1078_s12  ;;  %s1318_s12 = smov %s1320_s15 }
 0x14f   :  { %11 = sbr.rel (!%p9_p3) target bundleno = 3 (0x3), region = 151 }

// kernel: tile.68
= control target key start
LH: loop header
LB: loop body
LE: loop exit
PB: predicated region body
PF: predicated region fallthrough
CT: control target
= control target key end

     0   :  { %s22_s0 = inlined_call_operand.vmem [shape: f32[32], index: 0, kind: input, shape index: {}]   ;;  %s23_s1 = inlined_call_operand.vmem [shape: f32[8,32], index: 1, kind: output, shape index: {}]  }
   0x1   :  { %v4_v0 = vld [vmem:[%s22_s0] ss:$0 sm:$0xff] }
   0x2   :  { %5 = vst [vmem:[%s23_s1] sm:$0xff] %v4_v0 }

// kernel: tile.69
= control target key start
LH: loop header
LB: loop body
LE: loop exit
PB: predicated region body
PF: predicated region fallthrough
CT: control target
= control target key end

     0   :  { %s7_s6 = smov 3  ;;  %s14_s9 = smov 3  ;;  %vm4_vm0 = vcmask 261120   ;;  %vm11_vm1 = vcmask 1048320   ;;  %vm18_vm2 = vcmask 785920   ;;  %vm25_vm3 = vcmask 523520   ;;  %s76_s0 = inlined_call_operand.vmem [shape: f32[8,32], index: 0, kind: input, shape index: {}]   ;;  %s77_s1 = inlined_call_operand.vmem [shape: f32[1,256], index: 1, kind: output, shape index: {}]  }
   0x1   :  { %v38_v0 = vld [vmem:[%s76_s0 + $0x3] ss:$4 sm:%s7_s6]   ;;  %s45_s10 = smov 96   ;;  %s21_s11 = smov 3  ;;  %v39_v1 = vld [vmem:[%s76_s0 + $0x2] ss:$4 sm:%s14_s9]  }
   0x2   :  { %9 = vrot.lane.b32.xlu0 %v38_v0, %s45_s10  ;;  %v40_v2 = vld [vmem:[%s76_s0 + $0x1] ss:$4 sm:%s21_s11]   ;;  %s2_s16 = smov 3  ;;  %s46_s17 = smov 32  }
   0x3   :  { %23 = vrot.lane.b32.xlu1 %v40_v2, %s46_s17  ;;  %v3_v3 = vld [vmem:[%s76_s0] ss:$4 sm:%s2_s16]   ;;  %s47_s0 = smov 64  }
   0x4   :  { %5 = vst.msk [vmem:[#allocation0] ss:$8 sm:$0x3] %vm4_vm0, %v3_v3  }
   0x6   :  { %16 = vrot.lane.b32.xlu0 %v39_v1, %s47_s0 }
  0x74   :  { %v10_v4 = vpop.permute.xlu0 %9  }
  0x75   :  { %12 = vst.msk [vmem:[#allocation0] ss:$8 sm:$0x3] %vm11_vm1, %v10_v4   ;;  %v24_v5 = vpop.permute.xlu1 %23  }
  0x78   :  { %v17_v6 = vpop.permute.xlu0 %16  }
  0x79   :  { %19 = vst.msk [vmem:[#allocation0] ss:$8 sm:$0x3] %vm18_vm2, %v17_v6  }
  0x7a   :  { %26 = vst.msk [vmem:[#allocation0] ss:$8 sm:$0x3] %vm25_vm3, %v24_v5  }
  0x81   :  { %v30_v7 = vld [vmem:[#allocation0] sm:$0x1]  ;;  %v34_v8 = vld [vmem:[#allocation0 + $0x8] sm:$0x1] }
  0x82   :  { %32 = vst [vmem:[%s77_s1] sm:$0x1] %v30_v7  ;;  %41 = vst [vmem:[%s77_s1 + $0x1] sm:$0x1] %v34_v8 }

// kernel: decoder_forward.15
= control target key start
LH: loop header
LB: loop body
LE: loop exit
PB: predicated region body
PF: predicated region fallthrough
CT: control target
= control target key end

     0   :  { %v20_v0 = vlaneseq  ;;  %s112_s1 = inlined_call_operand.vmem [shape: f32[1,256], index: 1, kind: input, shape index: {}]   ;;  %s113_s2 = inlined_call_operand.vmem [shape: f32[1,256], index: 2, kind: input, shape index: {}]   ;;  %s114_s0 = inlined_call_operand.vmem [shape: f32[16,256], index: 0, kind: input, shape index: {}]   ;;  %s115_s3 = inlined_call_operand.vmem [shape: f32[16,256], index: 3, kind: output, shape index: {}]  }
   0x1   :  { %v18_v2 = vld [vmem:[%s112_s1] sm:$0x3]  ;;  %v15_v7 = vld [vmem:[%s114_s0 + $0x8] sm:$0xff]  ;;  %v16_v8 = vld [vmem:[%s114_s0 + $0x10] sm:$0xff] }
   0x2   :  { %v21_v1 = vshrl.u32 %v20_v0, 7  ;;  %v34_v3 = vld [vmem:[%s113_s2] sm:$0x3]  ;;  %v17_v9 = vld [vmem:[%s114_s0 + $0x18] sm:$0xff] }
   0x3   :  { %v14_v4 = vld [vmem:[%s114_s0] sm:$0xff] }
   0x4   :  { %v22_v5 = vsub.s32 0, %v21_v1  ;;  %v26_v6 = vsub.s32 1, %v21_v1 }
   0x6   :  { %v23_v10 = vrot.slane %v18_v2, %v22_v5  ;;  %v39_v11 = vrot.slane %v34_v3, %v22_v5  ;;  %v27_v12 = vrot.slane %v18_v2, %v26_v6  ;;  %v43_v13 = vrot.slane %v34_v3, %v26_v6 }
   0x8   :  { %v30_v14 = vsub.f32 %v14_v4, %v23_v10  ;;  %v31_v15 = vsub.f32 %v15_v7, %v27_v12  ;;  %v32_v16 = vsub.f32 %v16_v8, %v23_v10  ;;  %v33_v17 = vsub.f32 %v17_v9, %v27_v12 }
   0xa   :  { %v46_v18 = vmul.f32 %v39_v11, %v30_v14  ;;  %v47_v19 = vmul.f32 %v43_v13, %v31_v15  ;;  %v48_v20 = vmul.f32 %v39_v11, %v32_v16  ;;  %v49_v21 = vmul.f32 %v43_v13, %v33_v17 }
   0xc   :  { %v50_v22 = vmax.f32 %v46_v18, 0.0  ;;  %v51_v23 = vmax.f32 %v47_v19, 0.0  ;;  %v52_v24 = vmax.f32 %v48_v20, 0.0  ;;  %v53_v25 = vmax.f32 %v49_v21, 0.0 }
   0xe   :  { %54 = vst [vmem:[%s115_s3] sm:$0xff] %v50_v22  ;;  %55 = vst [vmem:[%s115_s3 + $0x8] sm:$0xff] %v51_v23 }
   0xf   :  { %56 = vst [vmem:[%s115_s3 + $0x10] sm:$0xff] %v52_v24  ;;  %57 = vst [vmem:[%s115_s3 + $0x18] sm:$0xff] %v53_v25 }

// kernel: decoder_forward.16
= control target key start
LH: loop header
LB: loop body
LE: loop exit
PB: predicated region body
PF: predicated region fallthrough
CT: control target
= control target key end

     0   :  { %s1302_s9 = smov 0   ;;  %s1304_s10 = smov 0   ;;  %s1580_s0 = inlined_call_operand.vmem [shape: bf16[162,128], index: 0, kind: input, shape index: {}]   ;;  %s1581_s1 = inlined_call_operand.vmem [shape: bf16[128,64], index: 1, kind: input, shape index: {}]   ;;  %s1582_s2 = inlined_call_operand.vmem [shape: f32[162,64], index: 2, kind: output, shape index: {}]  }
   0x1   :  { %s1306_s11 = smov 0   ;;  %s1308_s12 = smov 0  }
   0x2   :  { %s1310_s13 = smov 0  }
   0x3 LB: > { %s945_s14 = sadd.s32 4294967295, %s1252_s13   ;;  %s31_s15 = sadd.s32 1, %s1248_s12  ;;  %s1252_s13 = sphi %s1310_s13, %s12_s13   ;;  %s1248_s12 = sphi %s1308_s12, %s1590_s12   ;;  %s1244_s11 = sphi %s1306_s11, %s1589_s11   ;;  %s1240_s10 = sphi %s1304_s10, %s1588_s10   ;;  %s1236_s9 = sphi %s1302_s9, %s1587_s9  }
   0x4   : > { %p33_p0 = scmp.ge.s32.totalorder %s31_s15, 2  ;;  %s96_s16 = sadd.s32 1, %s1240_s10 }
   0x5   : > { %p106_p1 = scmp.ne.s32.totalorder %s1240_s10, %s1236_s9  ;;  %p107_p2 = scmp.eq.s32.totalorder %s945_s14, 1 }
   0x6   : > { %s1592_s15 = smov (%p33_p0, %s31_s15), 0  ;;  %p950_p4 = scmp.ge.s32.totalorder %s1252_s13, 1 }
   0x7   : > { %p1334_p3 = por %p107_p2, %p106_p1  ;;  %s91_s18 = ssub.s32 %s1248_s12, %s1592_s15 }
   0x8   : > { %p163_p5 = scmp.lt.s32.totalorder %s1252_s13, 3  ;;  %p94_p6 = scmp.eq.s32.totalorder %s91_s18, 0 }
   0xa   : > { %p164_p7 = pnand %p950_p4, %p163_p5 }
   0xb   : > { %s1343_s19 = scalar_select %p94_p6, %s1240_s10, %s96_s16  }
   0xc   : > { %167 = sbr.rel (%p164_p7) target bundleno = 350 (0x15e), region = 28  ;;  %v1160_v0 = vld [vmem:[%s1581_s1] sm:$0xff] (!%p164_p7)   ;;  %v1161_v1 = vld [vmem:[%s1581_s1 + $0x8] sm:$0xff] (!%p164_p7)   ;;  %v1162_v2 = vld [vmem:[%s1581_s1 + $0x10] sm:$0xff] (!%p164_p7)   ;;  %vm235_vm0 = vcmask (!%p164_p7), 523264   ;;  %v1286_v5 = vmov (!%p164_p7), 0.0  }
   0xd   : > { %s1349_s22 = smul.u32 (!%p164_p7), 20, %s1244_s11  ;;  %1001 = vmatprep.subr.bf16.mxu0 (!%p164_p7), %v1160_v0  ;;  %1037 = vmatprep.subr.bf16.mxu1 (!%p164_p7), %v1160_v0  ;;  %v1163_v3 = vld [vmem:[%s1581_s1 + $0x18] sm:$0xff] (!%p164_p7)   ;;  %238 = vst.msk [vmem:[#allocation2 + $0x10] sm:$0xff] (!%p164_p7), %vm235_vm0, %v1286_v5  ;;  %236 = vst.msk [vmem:[#allocation2] sm:$0xff] (!%p164_p7), %vm235_vm0, %v1286_v5  ;;  %v1164_v7 = vld [vmem:[%s1581_s1 + $0x20] sm:$0xff] (!%p164_p7)   ;;  %s196_s23 = sand.u32 (!%p164_p7), 1, %s1236_s9  }
   0xe   : > { %1002 = vmatpush3.bf16.msra.mxu0 (!%p164_p7), %v1160_v0  ;;  %1045 = vmatpush3.bf16.msra.mxu1 (!%p164_p7), %v1160_v0  ;;  %237 = vst.msk [vmem:[#allocation2 + $0x8] sm:$0xff] (!%p164_p7), %vm235_vm0, %v1286_v5  ;;  %239 = vst.msk [vmem:[#allocation2 + $0x18] sm:$0xff] (!%p164_p7), %vm235_vm0, %v1286_v5  ;;  %v1165_v8 = vld [vmem:[%s1581_s1 + $0x28] sm:$0xff] (!%p164_p7)   ;;  %v1166_v9 = vld [vmem:[%s1581_s1 + $0x30] sm:$0xff] (!%p164_p7)   ;;  %s1053_s24 = smul.u32 (!%p164_p7), 160, %s196_s23 }
   0xf   : > { %p204_p8 = scmp.lt.s32.totalorder (!%p164_p7), %s1349_s22, 20  ;;  %1003 = vmatprep.subr.bf16.mxu0 (!%p164_p7), %v1161_v1  ;;  %1038 = vmatprep.subr.bf16.mxu1 (!%p164_p7), %v1161_v1  ;;  %240 = vst.msk [vmem:[#allocation2 + $0x20] sm:$0xff] (!%p164_p7), %vm235_vm0, %v1286_v5  ;;  %241 = vst.msk [vmem:[#allocation2 + $0x28] sm:$0xff] (!%p164_p7), %vm235_vm0, %v1286_v5  ;;  %v1167_v10 = vld [vmem:[%s1581_s1 + $0x38] sm:$0xff] (!%p164_p7)  }
  0x10   : > { %242 = vst.msk [vmem:[#allocation2 + $0x30] sm:$0xff] (!%p164_p7), %vm235_vm0, %v1286_v5  ;;  %243 = vst.msk [vmem:[#allocation2 + $0x38] sm:$0xff] (!%p164_p7), %vm235_vm0, %v1286_v5  ;;  %s1418_s9 = scalar_lea.vmem (!%p164_p7), [#allocation3], %s1053_s24  }
  0x11   : > { %244 = vst.msk [vmem:[#allocation2 + $0x40] sm:$0xff] (!%p164_p7), %vm235_vm0, %v1286_v5  ;;  %245 = vst.msk [vmem:[#allocation2 + $0x48] sm:$0xff] (!%p164_p7), %vm235_vm0, %v1286_v5 }
  0x12   : > { %1004 = vmatpush3.bf16.msra.mxu0 (!%p164_p7), %v1161_v1  ;;  %1046 = vmatpush3.bf16.msra.mxu1 (!%p164_p7), %v1161_v1  ;;  %246 = vst.msk [vmem:[#allocation2 + $0x50] sm:$0xff] (!%p164_p7), %vm235_vm0, %v1286_v5  ;;  %247 = vst.msk [vmem:[#allocation2 + $0x58] sm:$0xff] (!%p164_p7), %vm235_vm0, %v1286_v5 }
  0x13   : > { %s205_s27 = scalar_select %p204_p8, %s1349_s22, 20  ;;  %1005 = vmatprep.subr.bf16.mxu0 %v1162_v2  ;;  %1039 = vmatprep.subr.bf16.mxu1 %v1162_v2  ;;  %248 = vst.msk [vmem:[#allocation2 + $0x60] sm:$0xff] %vm235_vm0, %v1286_v5  ;;  %249 = vst.msk [vmem:[#allocation2 + $0x68] sm:$0xff] %vm235_vm0, %v1286_v5 }
  0x14   : > { %250 = vst.msk [vmem:[#allocation2 + $0x70] sm:$0xff] %vm235_vm0, %v1286_v5  ;;  %251 = vst.msk [vmem:[#allocation2 + $0x78] sm:$0xff] %vm235_vm0, %v1286_v5  ;;  %v258_v19 = vld [vmem:[#allocation2 + $0x10] sm:$0xff]  ;;  %v256_v21 = vld [vmem:[#allocation2] sm:$0xff]  ;;  %s625_s25 = ssub.s32 (%p1334_p3), 21, %s1349_s22  ;;  %s982_s26 = smul.u32 (%p1334_p3), 160, %s1244_s11 }
  0x15   : > { %s951_s28 = sshll.u32 %s205_s27, 2  ;;  %252 = vst.msk [vmem:[#allocation2 + $0x80] sm:$0xff] %vm235_vm0, %v1286_v5  ;;  %253 = vst.msk [vmem:[#allocation2 + $0x88] sm:$0xff] %vm235_vm0, %v1286_v5  ;;  %v259_v24 = vld [vmem:[#allocation2 + $0x18] sm:$0xff]  ;;  %v257_v29 = vld [vmem:[#allocation2 + $0x8] sm:$0xff]  ;;  %p626_p9 = scmp.lt.s32.totalorder (%p1334_p3), %s625_s25, 20 }
  0x16   : > { %s1365_s5 = scalar_lea.vmem %s1580_s0, %s951_s28  ;;  %254 = vst.msk [vmem:[#allocation2 + $0x90] sm:$0xff] %vm235_vm0, %v1286_v5  ;;  %255 = vst.msk [vmem:[#allocation2 + $0x98] sm:$0xff] %vm235_vm0, %v1286_v5  ;;  %1006 = vmatpush3.bf16.msra.mxu0 %v1162_v2  ;;  %1047 = vmatpush3.bf16.msra.mxu1 %v1162_v2  ;;  %v260_v45 = vld [vmem:[#allocation2 + $0x20] sm:$0xff]  ;;  %v261_v53 = vld [vmem:[#allocation2 + $0x28] sm:$0xff]  ;;  %s1479_s29 = scalar_lea.vmem (%p1334_p3), %s1582_s2, %s982_s26  }
  0x17   : > { %v1168_v4 = vld [vmem:[%s1365_s5] sm:$0xff]   ;;  %v1170_v6 = vld [vmem:[%s1365_s5 + $0x30] sm:$0xff]   ;;  %1007 = vmatprep.subr.bf16.mxu0 %v1163_v3  ;;  %1040 = vmatprep.subr.bf16.mxu1 %v1163_v3  ;;  %v1169_v11 = vld [vmem:[%s1365_s5 + $0x8] sm:$0xff]  }
  0x18   : > { %1017 = vmatprep.mubr.bf16.mxu0 %v1168_v4  ;;  %1029 = vmatprep.mubr.bf16.mxu1 %v1170_v6  ;;  %v1171_v12 = vld [vmem:[%s1365_s5 + $0x38] sm:$0xff]   ;;  %v1172_v13 = vld [vmem:[%s1365_s5 + $0x10] sm:$0xff]   ;;  %v1174_v14 = vld [vmem:[%s1365_s5 + $0x40] sm:$0xff]  }
  0x19   : > { %v1173_v15 = vld [vmem:[%s1365_s5 + $0x18] sm:$0xff]   ;;  %v1175_v16 = vld [vmem:[%s1365_s5 + $0x48] sm:$0xff]   ;;  %v1176_v17 = vld [vmem:[%s1365_s5 + $0x20] sm:$0xff]  }
  0x1a   : > { %1008 = vmatpush3.bf16.msra.mxu0 %v1163_v3  ;;  %1048 = vmatpush3.bf16.msra.mxu1 %v1163_v3  ;;  %v1177_v18 = vld [vmem:[%s1365_s5 + $0x28] sm:$0xff]   ;;  %v269_v32 = vld [vmem:[#allocation2 + $0x68] sm:$0xff]  ;;  %v262_v43 = vld [vmem:[#allocation2 + $0x30] sm:$0xff] }
  0x1b   : > { %1009 = vmatprep.subr.bf16.mxu0 %v1164_v7  ;;  %1041 = vmatprep.subr.bf16.mxu1 %v1164_v7  ;;  %v270_v20 = vld [vmem:[#allocation2 + $0x70] sm:$0xff]  ;;  %v268_v22 = vld [vmem:[#allocation2 + $0x60] sm:$0xff]  ;;  %v271_v26 = vld [vmem:[#allocation2 + $0x78] sm:$0xff] }
  0x1c   : > { %v272_v46 = vld [vmem:[#allocation2 + $0x80] sm:$0xff]  ;;  %v263_v48 = vld [vmem:[#allocation2 + $0x38] sm:$0xff]  ;;  %v273_v56 = vld [vmem:[#allocation2 + $0x88] sm:$0xff] }
  0x1d   : > { %v274_v44 = vld [vmem:[#allocation2 + $0x90] sm:$0xff]  ;;  %v275_v50 = vld [vmem:[#allocation2 + $0x98] sm:$0xff] }
  0x1e   : > { %1010 = vmatpush3.bf16.msra.mxu0 %v1164_v7  ;;  %1049 = vmatpush3.bf16.msra.mxu1 %v1164_v7 }
  0x1f   : > { %1011 = vmatprep.subr.bf16.mxu0 %v1165_v8  ;;  %1042 = vmatprep.subr.bf16.mxu1 %v1165_v8 }
  0x22   : > { %1012 = vmatpush3.bf16.msra.mxu0 %v1165_v8  ;;  %1050 = vmatpush3.bf16.msra.mxu1 %v1165_v8 }
  0x23   : > { %1013 = vmatprep.subr.bf16.mxu0 %v1166_v9  ;;  %1043 = vmatprep.subr.bf16.mxu1 %v1166_v9 }
  0x26   : > { %1014 = vmatpush3.bf16.msra.mxu0 %v1166_v9  ;;  %1051 = vmatpush3.bf16.msra.mxu1 %v1166_v9 }
  0x27   : > { %1015 = vmatprep.subr.bf16.mxu0 %v1167_v10  ;;  %1044 = vmatprep.subr.bf16.mxu1 %v1167_v10 }
  0x2a   : > { %1016 = vmatpush3.bf16.msra.mxu0 %v1167_v10  ;;  %1052 = vmatpush3.bf16.msra.mxu1 %v1167_v10 }
  0x2d   : > { %1018 = vmatmul.mubr.bf16.vlgmr.msra.gmra.mrb[0].mxu0 %v1169_v11  ;;  %1030 = vmatmul.mubr.bf16.vlgmr.msra.gmra.mrb[0].mxu1 %v1171_v12  ;;  %v266_v11 = vld [vmem:[#allocation2 + $0x50] sm:$0xff]  ;;  %v264_v12 = vld [vmem:[#allocation2 + $0x40] sm:$0xff] }
  0x2e   : > { %1021 = vmatprep.mubr.bf16.mxu0 %v1172_v13  ;;  %1033 = vmatprep.mubr.bf16.mxu1 %v1174_v14  ;;  %v267_v14 = vld [vmem:[#allocation2 + $0x58] sm:$0xff] }
  0x35   : > { %1022 = vmatmul.mubr.bf16.gmra.mrb[4].mxu0 %v1173_v15  ;;  %1034 = vmatmul.mubr.bf16.gmra.mrb[4].mxu1 %v1175_v16 }
  0x36   : > { %1025 = vmatprep.mubr.bf16.mxu0 %v1176_v17  ;;  %v265_v17 = vld [vmem:[#allocation2 + $0x48] sm:$0xff] }
  0x3d   : > { %1026 = vmatmul.mubr.bf16.gmra.mrb[8].mxu0 %v1177_v18 }
 0x100   : > { %v1019_v23 = vpop.f32.mrb[0].mxu0  ;;  %v1031_v25 = vpop.f32.mrb[0].mxu1 }
 0x101   : > { %v535_v27 = vadd.f32 %v1019_v23, %v258_v19  ;;  %v454_v28 = vpop.f32.mrb[1].mxu0  ;;  %v547_v30 = vadd.f32 %v1031_v25, %v270_v20  ;;  %v502_v31 = vpop.f32.mrb[1].mxu1 }
 0x102   : > { %v533_v33 = vadd.f32 %v454_v28, %v256_v21  ;;  %v1020_v34 = vpop.f32.mrb[2].mxu0  ;;  %v545_v35 = vadd.f32 %v502_v31, %v268_v22  ;;  %v1032_v36 = vpop.f32.mrb[2].mxu1 }
 0x103   : > { %556 = vst.msk [vmem:[#allocation2 + $0x10] sm:$0xff] %vm235_vm0, %v535_v27  ;;  %v536_v37 = vadd.f32 %v1020_v34, %v259_v24  ;;  %v457_v38 = vpop.f32.mrb[3].mxu0  ;;  %568 = vst.msk [vmem:[#allocation2 + $0x70] sm:$0xff] %vm235_vm0, %v547_v30  ;;  %v548_v39 = vadd.f32 %v1032_v36, %v271_v26  ;;  %v505_v40 = vpop.f32.mrb[3].mxu1 }
 0x104   : > { %554 = vst.msk [vmem:[#allocation2] sm:$0xff] %vm235_vm0, %v533_v33  ;;  %v534_v41 = vadd.f32 %v457_v38, %v257_v29  ;;  %566 = vst.msk [vmem:[#allocation2 + $0x60] sm:$0xff] %vm235_vm0, %v545_v35  ;;  %v546_v42 = vadd.f32 %v505_v40, %v269_v32 }
 0x105   : > { %557 = vst.msk [vmem:[#allocation2 + $0x18] sm:$0xff] %vm235_vm0, %v536_v37  ;;  %569 = vst.msk [vmem:[#allocation2 + $0x78] sm:$0xff] %vm235_vm0, %v548_v39 }
 0x106   : > { %555 = vst.msk [vmem:[#allocation2 + $0x8] sm:$0xff] %vm235_vm0, %v534_v41  ;;  %567 = vst.msk [vmem:[#allocation2 + $0x68] sm:$0xff] %vm235_vm0, %v546_v42 }
 0x108   : > { %v1023_v47 = vpop.f32.mrb[4].mxu0  ;;  %v1035_v49 = vpop.f32.mrb[4].mxu1 }
 0x109   : > { %v539_v51 = vadd.f32 %v1023_v47, %v262_v43  ;;  %v470_v52 = vpop.f32.mrb[5].mxu0  ;;  %v551_v54 = vadd.f32 %v1035_v49, %v274_v44  ;;  %v518_v55 = vpop.f32.mrb[5].mxu1 }
 0x10a   : > { %v579_v57 = vld [vmem:[#allocation2 + $0x10] sm:$0xff]  ;;  %v537_v59 = vadd.f32 %v470_v52, %v260_v45  ;;  %v1024_v60 = vpop.f32.mrb[6].mxu0  ;;  %v549_v61 = vadd.f32 %v518_v55, %v272_v46  ;;  %v1036_v62 = vpop.f32.mrb[6].mxu1 }
 0x10b   : > { %v591_v58 = vld [vmem:[#allocation2 + $0x70] sm:$0xff]  ;;  %599 = vst.msk [vmem:[%s1418_s9 + $0x10] sm:$0xff] %vm235_vm0, %v579_v57  ;;  %v577_v63 = vld [vmem:[#allocation2] sm:$0xff]  ;;  %560 = vst.msk [vmem:[#allocation2 + $0x30] sm:$0xff] %vm235_vm0, %v539_v51  ;;  %v540_v1 = vadd.f32 %v1024_v60, %v263_v48  ;;  %v473_v2 = vpop.f32.mrb[7].mxu0  ;;  %v552_v3 = vadd.f32 %v1036_v62, %v275_v50  ;;  %v521_v4 = vpop.f32.mrb[7].mxu1 }
 0x10c   : > { %611 = vst.msk [vmem:[%s1418_s9 + $0x70] sm:$0xff] %vm235_vm0, %v591_v58  ;;  %v589_v0 = vld [vmem:[#allocation2 + $0x60] sm:$0xff]  ;;  %572 = vst.msk [vmem:[#allocation2 + $0x90] sm:$0xff] %vm235_vm0, %v551_v54  ;;  %v580_v5 = vld [vmem:[#allocation2 + $0x18] sm:$0xff]  ;;  %v538_v7 = vadd.f32 %v473_v2, %v261_v53  ;;  %v550_v8 = vadd.f32 %v521_v4, %v273_v56 }
 0x10d   : > { %597 = vst.msk [vmem:[%s1418_s9] sm:$0xff] %vm235_vm0, %v577_v63  ;;  %609 = vst.msk [vmem:[%s1418_s9 + $0x60] sm:$0xff] %vm235_vm0, %v589_v0  ;;  %v592_v6 = vld [vmem:[#allocation2 + $0x78] sm:$0xff]  ;;  %v578_v9 = vld [vmem:[#allocation2 + $0x8] sm:$0xff] }
 0x10e   : > { %558 = vst.msk [vmem:[#allocation2 + $0x20] sm:$0xff] %vm235_vm0, %v537_v59  ;;  %570 = vst.msk [vmem:[#allocation2 + $0x80] sm:$0xff] %vm235_vm0, %v549_v61  ;;  %v590_v10 = vld [vmem:[#allocation2 + $0x68] sm:$0xff] }
 0x10f   : > { %600 = vst.msk [vmem:[%s1418_s9 + $0x18] sm:$0xff] %vm235_vm0, %v580_v5  ;;  %612 = vst.msk [vmem:[%s1418_s9 + $0x78] sm:$0xff] %vm235_vm0, %v592_v6 }
 0x110   : > { %561 = vst.msk [vmem:[#allocation2 + $0x38] sm:$0xff] %vm235_vm0, %v540_v1  ;;  %573 = vst.msk [vmem:[#allocation2 + $0x98] sm:$0xff] %vm235_vm0, %v552_v3  ;;  %v1027_v13 = vpop.f32.mrb[8].mxu0 }
 0x111   : > { %598 = vst.msk [vmem:[%s1418_s9 + $0x8] sm:$0xff] %vm235_vm0, %v578_v9  ;;  %610 = vst.msk [vmem:[%s1418_s9 + $0x68] sm:$0xff] %vm235_vm0, %v590_v10  ;;  %v543_v15 = vadd.f32 %v1027_v13, %v266_v11  ;;  %v486_v16 = vpop.f32.mrb[9].mxu0 }
 0x112   : > { %559 = vst.msk [vmem:[#allocation2 + $0x28] sm:$0xff] %vm235_vm0, %v538_v7  ;;  %571 = vst.msk [vmem:[#allocation2 + $0x88] sm:$0xff] %vm235_vm0, %v550_v8  ;;  %v583_v18 = vld [vmem:[#allocation2 + $0x30] sm:$0xff]  ;;  %v541_v20 = vadd.f32 %v486_v16, %v264_v12  ;;  %v1028_v21 = vpop.f32.mrb[10].mxu0 }
 0x113   : > { %v595_v19 = vld [vmem:[#allocation2 + $0x90] sm:$0xff]  ;;  %603 = vst.msk [vmem:[%s1418_s9 + $0x30] sm:$0xff] %vm235_vm0, %v583_v18  ;;  %564 = vst.msk [vmem:[#allocation2 + $0x50] sm:$0xff] %vm235_vm0, %v543_v15  ;;  %v544_v24 = vadd.f32 %v1028_v21, %v267_v14  ;;  %v489_v25 = vpop.f32.mrb[11].mxu0 }
 0x114   : > { %615 = vst.msk [vmem:[%s1418_s9 + $0x90] sm:$0xff] %vm235_vm0, %v595_v19  ;;  %562 = vst.msk [vmem:[#allocation2 + $0x40] sm:$0xff] %vm235_vm0, %v541_v20  ;;  %v542_v28 = vadd.f32 %v489_v25, %v265_v17 }
 0x115   : > { %v581_v22 = vld [vmem:[#allocation2 + $0x20] sm:$0xff]  ;;  %565 = vst.msk [vmem:[#allocation2 + $0x58] sm:$0xff] %vm235_vm0, %v544_v24 }
 0x116   : > { %v593_v23 = vld [vmem:[#allocation2 + $0x80] sm:$0xff]  ;;  %601 = vst.msk [vmem:[%s1418_s9 + $0x20] sm:$0xff] %vm235_vm0, %v581_v22  ;;  %563 = vst.msk [vmem:[#allocation2 + $0x48] sm:$0xff] %vm235_vm0, %v542_v28 }
 0x117   : > { %v584_v26 = vld [vmem:[#allocation2 + $0x38] sm:$0xff]  ;;  %613 = vst.msk [vmem:[%s1418_s9 + $0x80] sm:$0xff] %vm235_vm0, %v593_v23 }
 0x118   : > { %v596_v27 = vld [vmem:[#allocation2 + $0x98] sm:$0xff]  ;;  %604 = vst.msk [vmem:[%s1418_s9 + $0x38] sm:$0xff] %vm235_vm0, %v584_v26  ;;  %623 = sbr.rel (!%p1334_p3) target bundleno = 350 (0x15e), region = 40 }
 0x119   : > { %v582_v29 = vld [vmem:[#allocation2 + $0x28] sm:$0xff]  ;;  %616 = vst.msk [vmem:[%s1418_s9 + $0x98] sm:$0xff] %vm235_vm0, %v596_v27 }
 0x11a   : > { %v594_v30 = vld [vmem:[#allocation2 + $0x88] sm:$0xff]  ;;  %602 = vst.msk [vmem:[%s1418_s9 + $0x28] sm:$0xff] %vm235_vm0, %v582_v29  ;;  %v587_v31 = vld [vmem:[#allocation2 + $0x50] sm:$0xff] }
 0x11b   : > { %614 = vst.msk [vmem:[%s1418_s9 + $0x88] sm:$0xff] %vm235_vm0, %v594_v30  ;;  %607 = vst.msk [vmem:[%s1418_s9 + $0x50] sm:$0xff] %vm235_vm0, %v587_v31  ;;  %v585_v32 = vld [vmem:[#allocation2 + $0x40] sm:$0xff] }
 0x11c   : > { %605 = vst.msk [vmem:[%s1418_s9 + $0x40] sm:$0xff] %vm235_vm0, %v585_v32  ;;  %v588_v33 = vld [vmem:[#allocation2 + $0x58] sm:$0xff] }
 0x11d   : > { %608 = vst.msk [vmem:[%s1418_s9 + $0x58] sm:$0xff] %vm235_vm0, %v588_v33  ;;  %v586_v34 = vld [vmem:[#allocation2 + $0x48] sm:$0xff] }
 0x11e   : > { %606 = vst.msk [vmem:[%s1418_s9 + $0x48] sm:$0xff] %vm235_vm0, %v586_v34 }
 0x11f   : > { %s1594_s25 = smov (!%p626_p9, %s625_s25), 20 }
 0x120   : > { %s970_s30 = sshll.u32 %s1594_s25, 7 }
 0x121   : > { %p973_p10 = scmp.eq.s32.totalorder %s970_s30, 0 }
 0x122   : > { %1178 = sdivrem.u32 (!%p973_p10), %s1594_s25, 20 }
 0x123   : > { %635 = sbr.rel (%p973_p10) target bundleno = 350 (0x15e), region = 44 }
 0x12b   : > { %s1485_s17 = spop.drf %1178 }
 0x12c   : > { %p974_p11 = scmp.le.s32.totalorder %s1485_s17, 0 }
 0x12d   : > { %s1584_s11 = smov (!%p974_p11), %s1479_s29  ;;  %s1585_s22 = smov (!%p974_p11), %s1418_s9 }
 0x12e   : > { %881 = sbr.rel (%p974_p11) target bundleno = 321 (0x141), region = 123  ;;  %s1494_s3 = smov (!%p974_p11), 0  }
 0x12f   : > { %s1496_s4 = smov (!%p974_p11), 0  }
 0x135 LB: >> { %v737_v35 = vld [vmem:[%s1260_s22] sm:$0xff]  ;;  %v739_v36 = vld [vmem:[%s1260_s22 + $0x8] sm:$0xff]  ;;  %v741_v37 = vld [vmem:[%s1260_s22 + $0x10] sm:$0xff]  ;;  %s777_s5 = sadd.s32 1, %s1264_s3  ;;  %s731_s4 = sadd.s32 1, %s1268_s4   ;;  %s1268_s4 = sphi %s1496_s4, %s731_s4   ;;  %s1264_s3 = sphi %s1494_s3, %s1586_s3   ;;  %s1260_s22 = sphi %s1585_s22, %s782_s22   ;;  %s1256_s11 = sphi %s1584_s11, %s783_s11  }
 0x136   : >> { %738 = vst [vmem:[%s1256_s11] sm:$0xff] %v737_v35  ;;  %740 = vst [vmem:[%s1256_s11 + $0x8] sm:$0xff] %v739_v36  ;;  %v743_v38 = vld [vmem:[%s1260_s22 + $0x18] sm:$0xff]  ;;  %v745_v39 = vld [vmem:[%s1260_s22 + $0x20] sm:$0xff]  ;;  %p778_p12 = scmp.ge.s32.totalorder %s777_s5, %s1485_s17  ;;  %p730_p13 = scmp.ge.s32.totalorder %s731_s4, %s1485_s17 }
 0x137   : >> { %742 = vst [vmem:[%s1256_s11 + $0x10] sm:$0xff] %v741_v37  ;;  %v747_v40 = vld [vmem:[%s1260_s22 + $0x28] sm:$0xff]  ;;  %744 = vst [vmem:[%s1256_s11 + $0x18] sm:$0xff] %v743_v38  ;;  %v749_v41 = vld [vmem:[%s1260_s22 + $0x30] sm:$0xff] }
 0x138   : >> { %746 = vst [vmem:[%s1256_s11 + $0x20] sm:$0xff] %v745_v39  ;;  %748 = vst [vmem:[%s1256_s11 + $0x28] sm:$0xff] %v747_v40  ;;  %v751_v42 = vld [vmem:[%s1260_s22 + $0x38] sm:$0xff]  ;;  %v753_v43 = vld [vmem:[%s1260_s22 + $0x40] sm:$0xff]  ;;  %s1596_s5 = smov (%p778_p12, %s777_s5), 0 }
 0x139   : >> { %750 = vst [vmem:[%s1256_s11 + $0x30] sm:$0xff] %v749_v41  ;;  %752 = vst [vmem:[%s1256_s11 + $0x38] sm:$0xff] %v751_v42  ;;  %v755_v44 = vld [vmem:[%s1260_s22 + $0x48] sm:$0xff]  ;;  %v757_v45 = vld [vmem:[%s1260_s22 + $0x50] sm:$0xff]  ;;  %s780_s6 = smul.u32 160, %s1596_s5  ;;  %s1586_s3 = smov %s1596_s5 }
 0x13a   : >> { %754 = vst [vmem:[%s1256_s11 + $0x40] sm:$0xff] %v753_v43  ;;  %v759_v46 = vld [vmem:[%s1260_s22 + $0x58] sm:$0xff]  ;;  %756 = vst [vmem:[%s1256_s11 + $0x48] sm:$0xff] %v755_v44  ;;  %v761_v47 = vld [vmem:[%s1260_s22 + $0x60] sm:$0xff]  ;;  %733 = sbr.rel (!%p730_p13) target bundleno = 309 (0x135), region = 129 }
 0x13b   : >> { %758 = vst [vmem:[%s1256_s11 + $0x50] sm:$0xff] %v757_v45  ;;  %760 = vst [vmem:[%s1256_s11 + $0x58] sm:$0xff] %v759_v46  ;;  %v763_v48 = vld [vmem:[%s1260_s22 + $0x68] sm:$0xff]  ;;  %v765_v49 = vld [vmem:[%s1260_s22 + $0x70] sm:$0xff] }
 0x13c   : >> { %762 = vst [vmem:[%s1256_s11 + $0x60] sm:$0xff] %v761_v47  ;;  %764 = vst [vmem:[%s1256_s11 + $0x68] sm:$0xff] %v763_v48  ;;  %v767_v50 = vld [vmem:[%s1260_s22 + $0x78] sm:$0xff]  ;;  %v769_v51 = vld [vmem:[%s1260_s22 + $0x80] sm:$0xff] }
 0x13d   : >> { %766 = vst [vmem:[%s1256_s11 + $0x70] sm:$0xff] %v765_v49  ;;  %v771_v52 = vld [vmem:[%s1260_s22 + $0x88] sm:$0xff]  ;;  %768 = vst [vmem:[%s1256_s11 + $0x78] sm:$0xff] %v767_v50  ;;  %v773_v53 = vld [vmem:[%s1260_s22 + $0x90] sm:$0xff] }
 0x13e   : >> { %770 = vst [vmem:[%s1256_s11 + $0x80] sm:$0xff] %v769_v51  ;;  %772 = vst [vmem:[%s1256_s11 + $0x88] sm:$0xff] %v771_v52  ;;  %v775_v54 = vld [vmem:[%s1260_s22 + $0x98] sm:$0xff]  ;;  %s782_s22 = scalar_lea.vmem %s1418_s9, %s780_s6 [#allocation3]  }
 0x13f   : >> { %774 = vst [vmem:[%s1256_s11 + $0x90] sm:$0xff] %v773_v53  ;;  %776 = vst [vmem:[%s1256_s11 + $0x98] sm:$0xff] %v775_v54  ;;  %s783_s11 = scalar_lea.vmem %s1479_s29, %s780_s6  }
 0x141 PF: > { %1180 = sdivrem.u32 %s1594_s25, 20 }
 0x142   : > { %s975_s7 = smul.u32 160, %s1485_s17 }
 0x144   : > { %s788_s8 = scalar_lea.vmem %s1418_s9, %s975_s7 [#allocation3]   ;;  %s790_s14 = scalar_lea.vmem %s1479_s29, %s975_s7  }
 0x14a   : > { %s1181_s16 = spop.drf %1180 }
 0x14b   : > { %p977_p0 = scmp.le.s32.totalorder %s1181_s16, 0 }
 0x14c   : > { %s1270_s18 = smov (!%p977_p0), %s790_s14   ;;  %s1274_s20 = smov (!%p977_p0), %s788_s8  }
 0x14d   : > { %895 = sbr.rel (%p977_p0) target bundleno = 350 (0x15e), region = 134  ;;  %s1278_s21 = smov (!%p977_p0), 0  }
 0x14e   : > { %s1282_s23 = smov (!%p977_p0), 0  }
 0x154 LB: >> { %v800_v55 = vld [vmem:[%s1276_s20] sm:$0xff]  ;;  %s802_s24 = sadd.s32 1, %s1280_s21  ;;  %s794_s23 = sadd.s32 1, %s1284_s23   ;;  %s1284_s23 = sphi %s1282_s23, %s794_s23   ;;  %s1280_s21 = sphi %s1278_s21, %s1279_s21   ;;  %s1276_s20 = sphi %s1274_s20, %s807_s20   ;;  %s1272_s18 = sphi %s1270_s18, %s808_s18  }
 0x155   : >> { %801 = vst [vmem:[%s1272_s18] sm:$0xff] %v800_v55  ;;  %p803_p1 = scmp.ge.s32.totalorder %s802_s24, %s1181_s16  ;;  %p793_p2 = scmp.ge.s32.totalorder %s794_s23, %s1181_s16 }
 0x157   : >> { %s1598_s24 = smov (%p803_p1, %s802_s24), 0  ;;  %796 = sbr.rel (!%p793_p2) target bundleno = 340 (0x154), region = 140 }
 0x158   : >> { %s978_s9 = sshll.u32 %s1598_s24, 3  ;;  %s1279_s21 = smov %s1598_s24  }
 0x159   : >> { %s807_s20 = scalar_lea.vmem %s788_s8, %s978_s9 [#allocation3]   ;;  %s808_s18 = scalar_lea.vmem %s790_s14, %s978_s9  }
 0x15e PF: > { %s12_s13 = sadd.s32 1, %s1252_s13   ;;  %s1587_s9 = smov %s1240_s10 }
 0x15f   : > { %p9_p3 = scmp.ge.s32.totalorder %s12_s13, 4   ;;  %s1588_s10 = smov %s1343_s19 }
 0x160   : > { %s1589_s11 = smov %s1248_s12  ;;  %s1590_s12 = smov %s1592_s15 }
 0x161   :  { %11 = sbr.rel (!%p9_p3) target bundleno = 3 (0x3), region = 151 }

// kernel: tile.78
= control target key start
LH: loop header
LB: loop body
LE: loop exit
PB: predicated region body
PF: predicated region fallthrough
CT: control target
= control target key end

     0   :  { %s28_s0 = inlined_call_operand.vmem [shape: f32[16], index: 0, kind: input, shape index: {}]   ;;  %s29_s1 = inlined_call_operand.vmem [shape: f32[16,16], index: 1, kind: output, shape index: {}]  }
   0x1   :  { %v4_v0 = vld [vmem:[%s28_s0] ss:$0 sm:$0xff] }
   0x2   :  { %5 = vst [vmem:[%s29_s1] sm:$0xff] %v4_v0  ;;  %8 = vst [vmem:[%s29_s1 + $0x8] sm:$0xff] %v4_v0 }

// kernel: tile.79
= control target key start
LH: loop header
LB: loop body
LE: loop exit
PB: predicated region body
PF: predicated region fallthrough
CT: control target
= control target key end

     0   :  { %s7_s6 = smov 3  ;;  %s21_s9 = smov 3  ;;  %vm4_vm0 = vcmask 130048   ;;  %vm11_vm1 = vcmask 1048448   ;;  %vm18_vm2 = vcmask 917248   ;;  %vm25_vm3 = vcmask 786048   ;;  %s128_s0 = inlined_call_operand.vmem [shape: f32[16,16], index: 0, kind: input, shape index: {}]   ;;  %s129_s1 = inlined_call_operand.vmem [shape: f32[1,256], index: 1, kind: output, shape index: {}]  }
   0x1   :  { %v66_v0 = vld [vmem:[%s128_s0 + $0x7] ss:$8 sm:%s7_s6]   ;;  %s81_s10 = smov 112   ;;  %v68_v1 = vld [vmem:[%s128_s0 + $0x5] ss:$8 sm:%s21_s9]   ;;  %s14_s13 = smov 3 }
   0x2   :  { %9 = vrot.lane.b32.xlu0 %v66_v0, %s81_s10  ;;  %s82_s14 = smov 80   ;;  %v67_v2 = vld [vmem:[%s128_s0 + $0x6] ss:$8 sm:%s14_s13]   ;;  %s28_s17 = smov 3  ;;  %vm32_vm4 = vcmask 654848   ;;  %vm39_vm5 = vcmask 523648  }
   0x3   :  { %23 = vrot.lane.b32.xlu1 %v68_v1, %s82_s14  ;;  %v69_v3 = vld [vmem:[%s128_s0 + $0x4] ss:$8 sm:%s28_s17]   ;;  %s35_s20 = smov 3  ;;  %s42_s21 = smov 3  ;;  %vm46_vm6 = vcmask 392448   ;;  %vm53_vm7 = vcmask 261248  }
   0x4   :  { %s83_s22 = smov 96   ;;  %s84_s23 = smov 64   ;;  %v70_v4 = vld [vmem:[%s128_s0 + $0x3] ss:$8 sm:%s35_s20]   ;;  %v71_v5 = vld [vmem:[%s128_s0 + $0x2] ss:$8 sm:%s42_s21]  }
   0x5   :  { %s2_s26 = smov 3  ;;  %s49_s29 = smov 3 }
   0x6   :  { %16 = vrot.lane.b32.xlu0 %v67_v2, %s83_s22  ;;  %v3_v6 = vld [vmem:[%s128_s0] ss:$8 sm:%s2_s26]   ;;  %s85_s3 = smov 48   ;;  %s86_s4 = smov 32  }
   0x7   :  { %30 = vrot.lane.b32.xlu1 %v69_v3, %s84_s23  ;;  %5 = vst.msk [vmem:[#allocation0] ss:$8 sm:$0x3] %vm4_vm0, %v3_v6   ;;  %v72_v7 = vld [vmem:[%s128_s0 + $0x1] ss:$8 sm:%s49_s29]   ;;  %s87_s0 = smov 16  }
   0xa   :  { %37 = vrot.lane.b32.xlu0 %v70_v4, %s85_s3 }
   0xb   :  { %44 = vrot.lane.b32.xlu1 %v71_v5, %s86_s4 }
   0xe   :  { %51 = vrot.lane.b32.xlu0 %v72_v7, %s87_s0 }
  0x74   :  { %v10_v8 = vpop.permute.xlu0 %9  }
  0x75   :  { %12 = vst.msk [vmem:[#allocation0] ss:$8 sm:$0x3] %vm11_vm1, %v10_v8   ;;  %v24_v9 = vpop.permute.xlu1 %23  }
  0x78   :  { %v17_v10 = vpop.permute.xlu0 %16  }
  0x79   :  { %19 = vst.msk [vmem:[#allocation0] ss:$8 sm:$0x3] %vm18_vm2, %v17_v10   ;;  %v31_v11 = vpop.permute.xlu1 %30  }
  0x7a   :  { %26 = vst.msk [vmem:[#allocation0] ss:$8 sm:$0x3] %vm25_vm3, %v24_v9  }
  0x7b   :  { %33 = vst.msk [vmem:[#allocation0] ss:$8 sm:$0x3] %vm32_vm4, %v31_v11  }
  0x7c   :  { %v38_v12 = vpop.permute.xlu0 %37  }
  0x7d   :  { %40 = vst.msk [vmem:[#allocation0] ss:$8 sm:$0x3] %vm39_vm5, %v38_v12   ;;  %v45_v13 = vpop.permute.xlu1 %44  }
  0x7e   :  { %47 = vst.msk [vmem:[#allocation0] ss:$8 sm:$0x3] %vm46_vm6, %v45_v13  }
  0x80   :  { %v52_v14 = vpop.permute.xlu0 %51  }
  0x81   :  { %54 = vst.msk [vmem:[#allocation0] ss:$8 sm:$0x3] %vm53_vm7, %v52_v14  }
  0x88   :  { %v58_v15 = vld [vmem:[#allocation0] sm:$0x1]  ;;  %v62_v16 = vld [vmem:[#allocation0 + $0x8] sm:$0x1] }
  0x89   :  { %60 = vst [vmem:[%s129_s1] sm:$0x1] %v58_v15  ;;  %73 = vst [vmem:[%s129_s1 + $0x1] sm:$0x1] %v62_v16 }

// kernel: decoder_forward.17
= control target key start
LH: loop header
LB: loop body
LE: loop exit
PB: predicated region body
PF: predicated region fallthrough
CT: control target
= control target key end

     0   :  { %v24_v0 = vlaneseq  ;;  %s156_s1 = inlined_call_operand.vmem [shape: f32[1,256], index: 1, kind: input, shape index: {}]   ;;  %s157_s2 = inlined_call_operand.vmem [shape: f32[1,256], index: 2, kind: input, shape index: {}]   ;;  %s158_s0 = inlined_call_operand.vmem [shape: f32[32,256], index: 0, kind: input, shape index: {}]   ;;  %s159_s3 = inlined_call_operand.vmem [shape: f32[32,256], index: 3, kind: output, shape index: {}]  }
   0x1   :  { %v22_v2 = vld [vmem:[%s156_s1] sm:$0x3]  ;;  %v15_v6 = vld [vmem:[%s158_s0 + $0x8] sm:$0xff]  ;;  %v16_v8 = vld [vmem:[%s158_s0 + $0x10] sm:$0xff] }
   0x2   :  { %v25_v1 = vshrl.u32 %v24_v0, 7  ;;  %v42_v3 = vld [vmem:[%s157_s2] sm:$0x3]  ;;  %v17_v9 = vld [vmem:[%s158_s0 + $0x18] sm:$0xff]  ;;  %v19_v15 = vld [vmem:[%s158_s0 + $0x28] sm:$0xff] }
   0x3   :  { %v14_v4 = vld [vmem:[%s158_s0] sm:$0xff]  ;;  %v20_v16 = vld [vmem:[%s158_s0 + $0x30] sm:$0xff]  ;;  %v21_v17 = vld [vmem:[%s158_s0 + $0x38] sm:$0xff] }
   0x4   :  { %v26_v5 = vsub.s32 0, %v25_v1  ;;  %v30_v7 = vsub.s32 1, %v25_v1  ;;  %v18_v10 = vld [vmem:[%s158_s0 + $0x20] sm:$0xff] }
   0x6   :  { %v27_v11 = vrot.slane %v22_v2, %v26_v5  ;;  %v47_v12 = vrot.slane %v42_v3, %v26_v5  ;;  %v31_v13 = vrot.slane %v22_v2, %v30_v7  ;;  %v51_v14 = vrot.slane %v42_v3, %v30_v7 }
   0x8   :  { %v34_v18 = vsub.f32 %v14_v4, %v27_v11  ;;  %v35_v19 = vsub.f32 %v15_v6, %v31_v13  ;;  %v36_v20 = vsub.f32 %v16_v8, %v27_v11  ;;  %v37_v21 = vsub.f32 %v17_v9, %v31_v13 }
   0x9   :  { %v38_v22 = vsub.f32 %v18_v10, %v27_v11  ;;  %v39_v23 = vsub.f32 %v19_v15, %v31_v13  ;;  %v40_v24 = vsub.f32 %v20_v16, %v27_v11  ;;  %v41_v25 = vsub.f32 %v21_v17, %v31_v13 }
   0xa   :  { %v54_v26 = vmul.f32 %v47_v12, %v34_v18  ;;  %v55_v27 = vmul.f32 %v51_v14, %v35_v19  ;;  %v56_v28 = vmul.f32 %v47_v12, %v36_v20  ;;  %v57_v29 = vmul.f32 %v51_v14, %v37_v21 }
   0xb   :  { %v58_v30 = vmul.f32 %v47_v12, %v38_v22  ;;  %v59_v31 = vmul.f32 %v51_v14, %v39_v23  ;;  %v60_v32 = vmul.f32 %v47_v12, %v40_v24  ;;  %v61_v33 = vmul.f32 %v51_v14, %v41_v25 }
   0xc   :  { %v62_v34 = vmax.f32 %v54_v26, 0.0  ;;  %v63_v35 = vmax.f32 %v55_v27, 0.0  ;;  %v64_v36 = vmax.f32 %v56_v28, 0.0  ;;  %v65_v37 = vmax.f32 %v57_v29, 0.0 }
   0xd   :  { %v66_v38 = vmax.f32 %v58_v30, 0.0  ;;  %v67_v39 = vmax.f32 %v59_v31, 0.0  ;;  %v68_v40 = vmax.f32 %v60_v32, 0.0  ;;  %v69_v41 = vmax.f32 %v61_v33, 0.0 }
   0xe   :  { %70 = vst [vmem:[%s159_s3] sm:$0xff] %v62_v34  ;;  %71 = vst [vmem:[%s159_s3 + $0x8] sm:$0xff] %v63_v35 }
   0xf   :  { %72 = vst [vmem:[%s159_s3 + $0x10] sm:$0xff] %v64_v36  ;;  %73 = vst [vmem:[%s159_s3 + $0x18] sm:$0xff] %v65_v37 }
  0x10   :  { %74 = vst [vmem:[%s159_s3 + $0x20] sm:$0xff] %v66_v38  ;;  %75 = vst [vmem:[%s159_s3 + $0x28] sm:$0xff] %v67_v39 }
  0x11   :  { %76 = vst [vmem:[%s159_s3 + $0x30] sm:$0xff] %v68_v40  ;;  %77 = vst [vmem:[%s159_s3 + $0x38] sm:$0xff] %v69_v41 }

// kernel: decoder_forward.18
= control target key start
LH: loop header
LB: loop body
LE: loop exit
PB: predicated region body
PF: predicated region fallthrough
CT: control target
= control target key end

     0   :  { %s2242_s9 = smov 0   ;;  %s2244_s10 = smov 0   ;;  %s2922_s0 = inlined_call_operand.vmem [shape: bf16[578,64], index: 0, kind: input, shape index: {}]   ;;  %s2923_s1 = inlined_call_operand.vmem [shape: bf16[64,32], index: 1, kind: input, shape index: {}]   ;;  %s2924_s2 = inlined_call_operand.vmem [shape: f32[578,32], index: 2, kind: output, shape index: {}]  }
   0x1   :  { %s2246_s11 = smov 0   ;;  %s2248_s12 = smov 0  }
   0x2   :  { %s2250_s13 = smov 0  }
   0x3 LB: > { %s1768_s14 = sadd.s32 4294967295, %s2192_s13   ;;  %s31_s15 = sadd.s32 1, %s2188_s12  ;;  %s2192_s13 = sphi %s2250_s13, %s12_s13   ;;  %s2188_s12 = sphi %s2248_s12, %s2934_s12   ;;  %s2184_s11 = sphi %s2246_s11, %s2933_s11   ;;  %s2180_s10 = sphi %s2244_s10, %s2932_s10   ;;  %s2176_s9 = sphi %s2242_s9, %s2931_s9  }
   0x4   : > { %p33_p0 = scmp.ge.s32.totalorder %s31_s15, 2  ;;  %s96_s16 = sadd.s32 1, %s2180_s10 }
   0x5   : > { %p106_p1 = scmp.ne.s32.totalorder %s2180_s10, %s2176_s9  ;;  %p107_p2 = scmp.eq.s32.totalorder %s1768_s14, 1 }
   0x6   : > { %s2936_s15 = smov (%p33_p0, %s31_s15), 0  ;;  %p1773_p4 = scmp.ge.s32.totalorder %s2192_s13, 1 }
   0x7   : > { %p2274_p3 = por %p107_p2, %p106_p1  ;;  %s91_s18 = ssub.s32 %s2188_s12, %s2936_s15 }
   0x8   : > { %p163_p5 = scmp.lt.s32.totalorder %s2192_s13, 3  ;;  %p94_p6 = scmp.eq.s32.totalorder %s91_s18, 0 }
   0xa   : > { %p164_p7 = pnand %p1773_p4, %p163_p5 }
   0xb   : > { %s2283_s19 = scalar_select %p94_p6, %s2180_s10, %s96_s16  }
   0xc   : > { %167 = sbr.rel (%p164_p7) target bundleno = 388 (0x184), region = 28  ;;  %v2086_v0 = vld [vmem:[%s2923_s1] sm:$0xff] (!%p164_p7)   ;;  %s2289_s22 = sshll.u32 (!%p164_p7), %s2184_s11, 6  ;;  %v2294_v1 = vld [vmem:[%s2923_s1 + $0x8] sm:$0xff] (!%p164_p7)   ;;  %v2305_v2 = vld [vmem:[%s2923_s1 + $0x10] sm:$0xff] (!%p164_p7)   ;;  %vm235_vm0 = vcmask (!%p164_p7), 261120  }
   0xd   : > { %p204_p8 = scmp.lt.s32.totalorder (!%p164_p7), %s2289_s22, 72  ;;  %1901 = vmatprep.subr.bf16.mxu0 (!%p164_p7), %v2086_v0  ;;  %1973 = vmatprep.subr.bf16.mxu1 (!%p164_p7), %v2086_v0  ;;  %v2226_v3 = vmov (!%p164_p7), 0.0   ;;  %v2089_v4 = vld [vmem:[%s2923_s1 + $0x18] sm:$0xff] (!%p164_p7)   ;;  %vm620_vm1 = vcmask (!%p164_p7), 523264   ;;  %s196_s6 = sand.u32 (!%p164_p7), 1, %s2176_s9  }
   0xe   : > { %1902 = vmatpush3.bf16.msra.mxu0 (!%p164_p7), %v2086_v0  ;;  %1977 = vmatpush3.bf16.msra.mxu1 (!%p164_p7), %v2086_v0  ;;  %238 = vst.msk [vmem:[#allocation2 + $0x10] sm:$0xff] (!%p164_p7), %vm235_vm0, %v2226_v3  ;;  %236 = vst.msk [vmem:[#allocation2] sm:$0xff] (!%p164_p7), %vm235_vm0, %v2226_v3  ;;  %s1774_s7 = sshll.u32 (!%p164_p7), %s196_s6, 9 }
   0xf   : > { %1903 = vmatprep.subr.bf16.mxu0 (!%p164_p7), %v2294_v1  ;;  %1974 = vmatprep.subr.bf16.mxu1 (!%p164_p7), %v2294_v1  ;;  %237 = vst.msk [vmem:[#allocation2 + $0x8] sm:$0xff] (!%p164_p7), %vm235_vm0, %v2226_v3  ;;  %239 = vst.msk [vmem:[#allocation2 + $0x18] sm:$0xff] (!%p164_p7), %vm235_vm0, %v2226_v3  ;;  %s2525_s8 = scalar_lea.vmem (!%p164_p7), [#allocation3], %s1774_s7  }
  0x10   : > { %240 = vst.msk [vmem:[#allocation2 + $0x20] sm:$0xff] (!%p164_p7), %vm235_vm0, %v2226_v3  ;;  %241 = vst.msk [vmem:[#allocation2 + $0x28] sm:$0xff] (!%p164_p7), %vm235_vm0, %v2226_v3 }
  0x11   : > { %242 = vst.msk [vmem:[#allocation2 + $0x30] sm:$0xff] (!%p164_p7), %vm235_vm0, %v2226_v3  ;;  %243 = vst.msk [vmem:[#allocation2 + $0x38] sm:$0xff] (!%p164_p7), %vm235_vm0, %v2226_v3 }
  0x12   : > { %244 = vst.msk [vmem:[#allocation2 + $0x40] sm:$0xff] (!%p164_p7), %vm235_vm0, %v2226_v3  ;;  %245 = vst.msk [vmem:[#allocation2 + $0x48] sm:$0xff] (!%p164_p7), %vm235_vm0, %v2226_v3  ;;  %1904 = vmatpush3.bf16.msra.mxu0 (!%p164_p7), %v2294_v1  ;;  %1978 = vmatpush3.bf16.msra.mxu1 (!%p164_p7), %v2294_v1 }
  0x13   : > { %s2298_s25 = scalar_select %p204_p8, %s2289_s22, 72  ;;  %246 = vst.msk [vmem:[#allocation2 + $0x50] sm:$0xff] %vm235_vm0, %v2226_v3  ;;  %247 = vst.msk [vmem:[#allocation2 + $0x58] sm:$0xff] %vm235_vm0, %v2226_v3  ;;  %1905 = vmatprep.subr.bf16.mxu0 %v2305_v2  ;;  %1975 = vmatprep.subr.bf16.mxu1 %v2305_v2 }
  0x14   : > { %248 = vst.msk [vmem:[#allocation2 + $0x60] sm:$0xff] %vm235_vm0, %v2226_v3  ;;  %249 = vst.msk [vmem:[#allocation2 + $0x68] sm:$0xff] %vm235_vm0, %v2226_v3  ;;  %s1274_s9 = ssub.s32 (%p2274_p3), 73, %s2289_s22  ;;  %s1862_s14 = sshll.u32 (%p2274_p3), %s2184_s11, 9 }
  0x15   : > { %s1776_s28 = sshll.u32 %s2298_s25, 2  ;;  %250 = vst.msk [vmem:[#allocation2 + $0x70] sm:$0xff] %vm235_vm0, %v2226_v3  ;;  %251 = vst.msk [vmem:[#allocation2 + $0x78] sm:$0xff] %vm235_vm0, %v2226_v3  ;;  %v302_v37 = vld [vmem:[#allocation2 + $0x10] sm:$0xff]  ;;  %v300_v39 = vld [vmem:[#allocation2] sm:$0xff]  ;;  %p1275_p9 = scmp.lt.s32.totalorder (%p2274_p3), %s1274_s9, 64 }
  0x16   : > { %252 = vst.msk [vmem:[#allocation2 + $0x80] sm:$0xff] %vm235_vm0, %v2226_v3  ;;  %253 = vst.msk [vmem:[#allocation2 + $0x88] sm:$0xff] %vm235_vm0, %v2226_v3  ;;  %s2444_s5 = scalar_lea.vmem %s2922_s0, %s1776_s28  ;;  %1906 = vmatpush3.bf16.msra.mxu0 %v2305_v2  ;;  %1979 = vmatpush3.bf16.msra.mxu1 %v2305_v2  ;;  %v303_v43 = vld [vmem:[#allocation2 + $0x18] sm:$0xff]  ;;  %v301_v49 = vld [vmem:[#allocation2 + $0x8] sm:$0xff]  ;;  %s2718_s20 = scalar_lea.vmem (%p2274_p3), %s2924_s2, %s1862_s14  }
  0x17   : > { %254 = vst.msk [vmem:[#allocation2 + $0x90] sm:$0xff] %vm235_vm0, %v2226_v3  ;;  %255 = vst.msk [vmem:[#allocation2 + $0x98] sm:$0xff] %vm235_vm0, %v2226_v3  ;;  %v2090_v5 = vld [vmem:[%s2444_s5] sm:$0xff]   ;;  %1907 = vmatprep.subr.bf16.mxu0 %v2089_v4  ;;  %1976 = vmatprep.subr.bf16.mxu1 %v2089_v4  ;;  %v2092_v7 = vld [vmem:[%s2444_s5 + $0x8] sm:$0xff]  }
  0x18   : > { %256 = vst.msk [vmem:[#allocation2 + $0xa0] sm:$0xff] %vm235_vm0, %v2226_v3  ;;  %257 = vst.msk [vmem:[#allocation2 + $0xa8] sm:$0xff] %vm235_vm0, %v2226_v3  ;;  %v2091_v6 = vld [vmem:[%s2444_s5 + $0x80] sm:$0xff]   ;;  %1909 = vmatprep.mubr.msk.bf16.mxu0 %vm620_vm1, %v2090_v5  ;;  %v2093_v8 = vld [vmem:[%s2444_s5 + $0x88] sm:$0xff]  }
  0x19   : > { %258 = vst.msk [vmem:[#allocation2 + $0xb0] sm:$0xff] %vm235_vm0, %v2226_v3  ;;  %259 = vst.msk [vmem:[#allocation2 + $0xb8] sm:$0xff] %vm235_vm0, %v2226_v3  ;;  %1941 = vmatprep.mubr.msk.bf16.mxu1 %vm620_vm1, %v2091_v6  ;;  %v2094_v9 = vld [vmem:[%s2444_s5 + $0x10] sm:$0xff]   ;;  %v2096_v11 = vld [vmem:[%s2444_s5 + $0x18] sm:$0xff]  }
  0x1a   : > { %260 = vst.msk [vmem:[#allocation2 + $0xc0] sm:$0xff] %vm235_vm0, %v2226_v3  ;;  %261 = vst.msk [vmem:[#allocation2 + $0xc8] sm:$0xff] %vm235_vm0, %v2226_v3  ;;  %1908 = vmatpush3.bf16.msra.mxu0 %v2089_v4  ;;  %1980 = vmatpush3.bf16.msra.mxu1 %v2089_v4  ;;  %v2095_v10 = vld [vmem:[%s2444_s5 + $0x90] sm:$0xff]   ;;  %v2097_v12 = vld [vmem:[%s2444_s5 + $0x98] sm:$0xff]  }
  0x1b   : > { %262 = vst.msk [vmem:[#allocation2 + $0xd0] sm:$0xff] %vm235_vm0, %v2226_v3  ;;  %263 = vst.msk [vmem:[#allocation2 + $0xd8] sm:$0xff] %vm235_vm0, %v2226_v3  ;;  %v2098_v13 = vld [vmem:[%s2444_s5 + $0x20] sm:$0xff]   ;;  %v2100_v15 = vld [vmem:[%s2444_s5 + $0x28] sm:$0xff]  }
  0x1c   : > { %264 = vst.msk [vmem:[#allocation2 + $0xe0] sm:$0xff] %vm235_vm0, %v2226_v3  ;;  %265 = vst.msk [vmem:[#allocation2 + $0xe8] sm:$0xff] %vm235_vm0, %v2226_v3  ;;  %v2099_v14 = vld [vmem:[%s2444_s5 + $0xa0] sm:$0xff]   ;;  %v2101_v16 = vld [vmem:[%s2444_s5 + $0xa8] sm:$0xff]  }
  0x1d   : > { %266 = vst.msk [vmem:[#allocation2 + $0xf0] sm:$0xff] %vm235_vm0, %v2226_v3  ;;  %267 = vst.msk [vmem:[#allocation2 + $0xf8] sm:$0xff] %vm235_vm0, %v2226_v3  ;;  %1910 = vmatmul.mubr.msk.bf16.vlgmr.msra.gmra.mrb[0].mxu0 %vm620_vm1, %v2092_v7  ;;  %1942 = vmatmul.mubr.msk.bf16.vlgmr.msra.gmra.mrb[0].mxu1 %vm620_vm1, %v2093_v8  ;;  %v2102_v17 = vld [vmem:[%s2444_s5 + $0x30] sm:$0xff]   ;;  %v2104_v19 = vld [vmem:[%s2444_s5 + $0x38] sm:$0xff]  }
  0x1e   : > { %268 = vst.msk [vmem:[#allocation2 + $0x100] sm:$0xff] %vm235_vm0, %v2226_v3  ;;  %269 = vst.msk [vmem:[#allocation2 + $0x108] sm:$0xff] %vm235_vm0, %v2226_v3  ;;  %1913 = vmatprep.mubr.msk.bf16.mxu0 %vm620_vm1, %v2094_v9  ;;  %1945 = vmatprep.mubr.msk.bf16.mxu1 %vm620_vm1, %v2095_v10  ;;  %v2103_v18 = vld [vmem:[%s2444_s5 + $0xb0] sm:$0xff]   ;;  %v2105_v20 = vld [vmem:[%s2444_s5 + $0xb8] sm:$0xff]  }
  0x1f   : > { %270 = vst.msk [vmem:[#allocation2 + $0x110] sm:$0xff] %vm235_vm0, %v2226_v3  ;;  %271 = vst.msk [vmem:[#allocation2 + $0x118] sm:$0xff] %vm235_vm0, %v2226_v3  ;;  %v2106_v21 = vld [vmem:[%s2444_s5 + $0x40] sm:$0xff]   ;;  %v2108_v23 = vld [vmem:[%s2444_s5 + $0x48] sm:$0xff]  }
  0x20   : > { %272 = vst.msk [vmem:[#allocation2 + $0x120] sm:$0xff] %vm235_vm0, %v2226_v3  ;;  %273 = vst.msk [vmem:[#allocation2 + $0x128] sm:$0xff] %vm235_vm0, %v2226_v3  ;;  %v2107_v22 = vld [vmem:[%s2444_s5 + $0xc0] sm:$0xff]   ;;  %v2109_v24 = vld [vmem:[%s2444_s5 + $0xc8] sm:$0xff]  }
  0x21   : > { %274 = vst.msk [vmem:[#allocation2 + $0x130] sm:$0xff] %vm235_vm0, %v2226_v3  ;;  %275 = vst.msk [vmem:[#allocation2 + $0x138] sm:$0xff] %vm235_vm0, %v2226_v3  ;;  %v2110_v25 = vld [vmem:[%s2444_s5 + $0x50] sm:$0xff]   ;;  %v2112_v27 = vld [vmem:[%s2444_s5 + $0x58] sm:$0xff]  }
  0x22   : > { %276 = vst.msk [vmem:[#allocation2 + $0x140] sm:$0xff] %vm235_vm0, %v2226_v3  ;;  %277 = vst.msk [vmem:[#allocation2 + $0x148] sm:$0xff] %vm235_vm0, %v2226_v3  ;;  %v2111_v26 = vld [vmem:[%s2444_s5 + $0xd0] sm:$0xff]   ;;  %v2113_v28 = vld [vmem:[%s2444_s5 + $0xd8] sm:$0xff]  }
  0x23   : > { %278 = vst.msk [vmem:[#allocation2 + $0x150] sm:$0xff] %vm235_vm0, %v2226_v3  ;;  %279 = vst.msk [vmem:[#allocation2 + $0x158] sm:$0xff] %vm235_vm0, %v2226_v3  ;;  %v2114_v29 = vld [vmem:[%s2444_s5 + $0x60] sm:$0xff]   ;;  %v2116_v31 = vld [vmem:[%s2444_s5 + $0x68] sm:$0xff]  }
  0x24   : > { %280 = vst.msk [vmem:[#allocation2 + $0x160] sm:$0xff] %vm235_vm0, %v2226_v3  ;;  %281 = vst.msk [vmem:[#allocation2 + $0x168] sm:$0xff] %vm235_vm0, %v2226_v3  ;;  %v2115_v30 = vld [vmem:[%s2444_s5 + $0xe0] sm:$0xff]   ;;  %v2117_v32 = vld [vmem:[%s2444_s5 + $0xe8] sm:$0xff]  }
  0x25   : > { %282 = vst.msk [vmem:[#allocation2 + $0x170] sm:$0xff] %vm235_vm0, %v2226_v3  ;;  %283 = vst.msk [vmem:[#allocation2 + $0x178] sm:$0xff] %vm235_vm0, %v2226_v3  ;;  %1914 = vmatmul.mubr.msk.bf16.gmra.mrb[4].mxu0 %vm620_vm1, %v2096_v11  ;;  %1946 = vmatmul.mubr.msk.bf16.gmra.mrb[4].mxu1 %vm620_vm1, %v2097_v12  ;;  %v2118_v33 = vld [vmem:[%s2444_s5 + $0x70] sm:$0xff]   ;;  %v2120_v35 = vld [vmem:[%s2444_s5 + $0x78] sm:$0xff]  }
  0x26   : > { %284 = vst.msk [vmem:[#allocation2 + $0x180] sm:$0xff] %vm235_vm0, %v2226_v3  ;;  %285 = vst.msk [vmem:[#allocation2 + $0x188] sm:$0xff] %vm235_vm0, %v2226_v3  ;;  %1917 = vmatprep.mubr.msk.bf16.mxu0 %vm620_vm1, %v2098_v13  ;;  %1949 = vmatprep.mubr.msk.bf16.mxu1 %vm620_vm1, %v2099_v14  ;;  %v2119_v34 = vld [vmem:[%s2444_s5 + $0xf0] sm:$0xff]   ;;  %v2121_v36 = vld [vmem:[%s2444_s5 + $0xf8] sm:$0xff]  }
  0x27   : > { %286 = vst.msk [vmem:[#allocation2 + $0x190] sm:$0xff] %vm235_vm0, %v2226_v3  ;;  %287 = vst.msk [vmem:[#allocation2 + $0x198] sm:$0xff] %vm235_vm0, %v2226_v3  ;;  %v334_v38 = vld [vmem:[#allocation2 + $0x110] sm:$0xff]  ;;  %v332_v40 = vld [vmem:[#allocation2 + $0x100] sm:$0xff] }
  0x28   : > { %288 = vst.msk [vmem:[#allocation2 + $0x1a0] sm:$0xff] %vm235_vm0, %v2226_v3  ;;  %289 = vst.msk [vmem:[#allocation2 + $0x1a8] sm:$0xff] %vm235_vm0, %v2226_v3  ;;  %v335_v44 = vld [vmem:[#allocation2 + $0x118] sm:$0xff]  ;;  %v333_v50 = vld [vmem:[#allocation2 + $0x108] sm:$0xff] }
  0x29   : > { %290 = vst.msk [vmem:[#allocation2 + $0x1b0] sm:$0xff] %vm235_vm0, %v2226_v3  ;;  %291 = vst.msk [vmem:[#allocation2 + $0x1b8] sm:$0xff] %vm235_vm0, %v2226_v3  ;;  %v306_v61 = vld [vmem:[#allocation2 + $0x30] sm:$0xff]  ;;  %v304_v63 = vld [vmem:[#allocation2 + $0x20] sm:$0xff] }
  0x2a   : > { %292 = vst.msk [vmem:[#allocation2 + $0x1c0] sm:$0xff] %vm235_vm0, %v2226_v3  ;;  %293 = vst.msk [vmem:[#allocation2 + $0x1c8] sm:$0xff] %vm235_vm0, %v2226_v3  ;;  %v338_v62 = vld [vmem:[#allocation2 + $0x130] sm:$0xff]  ;;  %v336_v0 = vld [vmem:[#allocation2 + $0x120] sm:$0xff] }
  0x2b   : > { %294 = vst.msk [vmem:[#allocation2 + $0x1d0] sm:$0xff] %vm235_vm0, %v2226_v3  ;;  %295 = vst.msk [vmem:[#allocation2 + $0x1d8] sm:$0xff] %vm235_vm0, %v2226_v3  ;;  %v339_v4 = vld [vmem:[#allocation2 + $0x138] sm:$0xff]  ;;  %v305_v9 = vld [vmem:[#allocation2 + $0x28] sm:$0xff] }
  0x2c   : > { %296 = vst.msk [vmem:[#allocation2 + $0x1e0] sm:$0xff] %vm235_vm0, %v2226_v3  ;;  %297 = vst.msk [vmem:[#allocation2 + $0x1e8] sm:$0xff] %vm235_vm0, %v2226_v3  ;;  %v337_v10 = vld [vmem:[#allocation2 + $0x128] sm:$0xff] }
  0x2d   : > { %298 = vst.msk [vmem:[#allocation2 + $0x1f0] sm:$0xff] %vm235_vm0, %v2226_v3  ;;  %299 = vst.msk [vmem:[#allocation2 + $0x1f8] sm:$0xff] %vm235_vm0, %v2226_v3  ;;  %1918 = vmatmul.mubr.msk.bf16.gmra.mrb[8].mxu0 %vm620_vm1, %v2100_v15  ;;  %1950 = vmatmul.mubr.msk.bf16.gmra.mrb[8].mxu1 %vm620_vm1, %v2101_v16  ;;  %v307_v3 = vld [vmem:[#allocation2 + $0x38] sm:$0xff] }
  0x2e   : > { %1921 = vmatprep.mubr.msk.bf16.mxu0 %vm620_vm1, %v2102_v17  ;;  %1953 = vmatprep.mubr.msk.bf16.mxu1 %vm620_vm1, %v2103_v18 }
  0x35   : > { %1922 = vmatmul.mubr.msk.bf16.gmra.mrb[12].mxu0 %vm620_vm1, %v2104_v19  ;;  %1954 = vmatmul.mubr.msk.bf16.gmra.mrb[12].mxu1 %vm620_vm1, %v2105_v20 }
  0x36   : > { %1925 = vmatprep.mubr.msk.bf16.mxu0 %vm620_vm1, %v2106_v21  ;;  %1957 = vmatprep.mubr.msk.bf16.mxu1 %vm620_vm1, %v2107_v22 }
  0x3d   : > { %1926 = vmatmul.mubr.msk.bf16.gmra.mrb[16].mxu0 %vm620_vm1, %v2108_v23  ;;  %1958 = vmatmul.mubr.msk.bf16.gmra.mrb[16].mxu1 %vm620_vm1, %v2109_v24 }
  0x3e   : > { %1929 = vmatprep.mubr.msk.bf16.mxu0 %vm620_vm1, %v2110_v25  ;;  %1961 = vmatprep.mubr.msk.bf16.mxu1 %vm620_vm1, %v2111_v26 }
  0x45   : > { %1930 = vmatmul.mubr.msk.bf16.gmra.mrb[20].mxu0 %vm620_vm1, %v2112_v27  ;;  %1962 = vmatmul.mubr.msk.bf16.gmra.mrb[20].mxu1 %vm620_vm1, %v2113_v28 }
  0x46   : > { %1933 = vmatprep.mubr.msk.bf16.mxu0 %vm620_vm1, %v2114_v29  ;;  %1965 = vmatprep.mubr.msk.bf16.mxu1 %vm620_vm1, %v2115_v30  ;;  %v310_v29 = vld [vmem:[#allocation2 + $0x50] sm:$0xff] }
  0x47   : > { %v342_v30 = vld [vmem:[#allocation2 + $0x150] sm:$0xff] }
  0x4d   : > { %1934 = vmatmul.mubr.msk.bf16.gmra.mrb[24].mxu0 %vm620_vm1, %v2116_v31  ;;  %1966 = vmatmul.mubr.msk.bf16.gmra.mrb[24].mxu1 %vm620_vm1, %v2117_v32  ;;  %v308_v31 = vld [vmem:[#allocation2 + $0x40] sm:$0xff] }
  0x4e   : > { %1937 = vmatprep.mubr.msk.bf16.mxu0 %vm620_vm1, %v2118_v33  ;;  %1969 = vmatprep.mubr.msk.bf16.mxu1 %vm620_vm1, %v2119_v34  ;;  %v340_v32 = vld [vmem:[#allocation2 + $0x140] sm:$0xff] }
  0x55   : > { %1938 = vmatmul.mubr.msk.bf16.gmra.mrb[28].mxu0 %vm620_vm1, %v2120_v35  ;;  %1970 = vmatmul.mubr.msk.bf16.gmra.mrb[28].mxu1 %vm620_vm1, %v2121_v36  ;;  %v311_v35 = vld [vmem:[#allocation2 + $0x58] sm:$0xff] }
  0x56   : > { %v343_v36 = vld [vmem:[#allocation2 + $0x158] sm:$0xff] }
  0xf0   : > { %v1911_v41 = vpop.f32.mrb[0].mxu0  ;;  %v1943_v42 = vpop.f32.mrb[0].mxu1 }
  0xf1   : > { %v1008_v45 = vadd.f32 %v1911_v41, %v302_v37  ;;  %v1040_v46 = vadd.f32 %v1943_v42, %v334_v38  ;;  %v751_v47 = vpop.f32.mrb[1].mxu0  ;;  %v879_v48 = vpop.f32.mrb[1].mxu1  ;;  %v309_v41 = vld [vmem:[#allocation2 + $0x48] sm:$0xff] }
  0xf2   : > { %v1006_v51 = vadd.f32 %v751_v47, %v300_v39  ;;  %v1038_v52 = vadd.f32 %v879_v48, %v332_v40  ;;  %v1912_v53 = vpop.f32.mrb[2].mxu0  ;;  %v1944_v54 = vpop.f32.mrb[2].mxu1  ;;  %v341_v42 = vld [vmem:[#allocation2 + $0x148] sm:$0xff] }
  0xf3   : > { %1073 = vst.msk [vmem:[#allocation2 + $0x10] sm:$0xff] %vm235_vm0, %v1008_v45  ;;  %1105 = vst.msk [vmem:[#allocation2 + $0x110] sm:$0xff] %vm235_vm0, %v1040_v46  ;;  %v1009_v55 = vadd.f32 %v1912_v53, %v303_v43  ;;  %v1041_v56 = vadd.f32 %v1944_v54, %v335_v44  ;;  %v754_v57 = vpop.f32.mrb[3].mxu0  ;;  %v882_v58 = vpop.f32.mrb[3].mxu1 }
  0xf4   : > { %1071 = vst.msk [vmem:[#allocation2] sm:$0xff] %vm235_vm0, %v1006_v51  ;;  %1103 = vst.msk [vmem:[#allocation2 + $0x100] sm:$0xff] %vm235_vm0, %v1038_v52  ;;  %v1007_v59 = vadd.f32 %v754_v57, %v301_v49  ;;  %v1039_v60 = vadd.f32 %v882_v58, %v333_v50 }
  0xf5   : > { %1074 = vst.msk [vmem:[#allocation2 + $0x18] sm:$0xff] %vm235_vm0, %v1009_v55  ;;  %1106 = vst.msk [vmem:[#allocation2 + $0x118] sm:$0xff] %vm235_vm0, %v1041_v56 }
  0xf6   : > { %1072 = vst.msk [vmem:[#allocation2 + $0x8] sm:$0xff] %vm235_vm0, %v1007_v59  ;;  %1104 = vst.msk [vmem:[#allocation2 + $0x108] sm:$0xff] %vm235_vm0, %v1039_v60 }
  0xf8   : > { %v1915_v1 = vpop.f32.mrb[4].mxu0  ;;  %v1947_v2 = vpop.f32.mrb[4].mxu1 }
  0xf9   : > { %v1012_v5 = vadd.f32 %v1915_v1, %v306_v61  ;;  %v1044_v6 = vadd.f32 %v1947_v2, %v338_v62  ;;  %v767_v7 = vpop.f32.mrb[5].mxu0  ;;  %v895_v8 = vpop.f32.mrb[5].mxu1  ;;  %v314_v61 = vld [vmem:[#allocation2 + $0x70] sm:$0xff] }
  0xfa   : > { %v1140_v11 = vld [vmem:[#allocation2 + $0x10] sm:$0xff]  ;;  %v1010_v13 = vadd.f32 %v767_v7, %v304_v63  ;;  %v1042_v14 = vadd.f32 %v895_v8, %v336_v0  ;;  %v1916_v15 = vpop.f32.mrb[6].mxu0  ;;  %v1948_v16 = vpop.f32.mrb[6].mxu1  ;;  %v312_v63 = vld [vmem:[#allocation2 + $0x60] sm:$0xff] }
  0xfb   : > { %v1172_v12 = vld [vmem:[#allocation2 + $0x110] sm:$0xff]  ;;  %1204 = vst.msk [vmem:[%s2525_s8 + $0x10] sm:$0xff] %vm235_vm0, %v1140_v11  ;;  %v1138_v17 = vld [vmem:[#allocation2] sm:$0xff]  ;;  %1077 = vst.msk [vmem:[#allocation2 + $0x30] sm:$0xff] %vm235_vm0, %v1012_v5  ;;  %v1013_v19 = vadd.f32 %v1916_v15, %v307_v3  ;;  %v1045_v20 = vadd.f32 %v1948_v16, %v339_v4  ;;  %v770_v21 = vpop.f32.mrb[7].mxu0  ;;  %v898_v22 = vpop.f32.mrb[7].mxu1 }
  0xfc   : > { %1236 = vst.msk [vmem:[%s2525_s8 + $0x110] sm:$0xff] %vm235_vm0, %v1172_v12  ;;  %v1170_v18 = vld [vmem:[#allocation2 + $0x100] sm:$0xff]  ;;  %1109 = vst.msk [vmem:[#allocation2 + $0x130] sm:$0xff] %vm235_vm0, %v1044_v6  ;;  %v1141_v23 = vld [vmem:[#allocation2 + $0x18] sm:$0xff]  ;;  %v1011_v25 = vadd.f32 %v770_v21, %v305_v9  ;;  %v1043_v26 = vadd.f32 %v898_v22, %v337_v10 }
  0xfd   : > { %1202 = vst.msk [vmem:[%s2525_s8] sm:$0xff] %vm235_vm0, %v1138_v17  ;;  %1234 = vst.msk [vmem:[%s2525_s8 + $0x100] sm:$0xff] %vm235_vm0, %v1170_v18  ;;  %v1173_v24 = vld [vmem:[#allocation2 + $0x118] sm:$0xff]  ;;  %v1139_v27 = vld [vmem:[#allocation2 + $0x8] sm:$0xff] }
  0xfe   : > { %1075 = vst.msk [vmem:[#allocation2 + $0x20] sm:$0xff] %vm235_vm0, %v1010_v13  ;;  %1107 = vst.msk [vmem:[#allocation2 + $0x120] sm:$0xff] %vm235_vm0, %v1042_v14  ;;  %v1171_v28 = vld [vmem:[#allocation2 + $0x108] sm:$0xff]  ;;  %v346_v62 = vld [vmem:[#allocation2 + $0x170] sm:$0xff] }
  0xff   : > { %1205 = vst.msk [vmem:[%s2525_s8 + $0x18] sm:$0xff] %vm235_vm0, %v1141_v23  ;;  %1237 = vst.msk [vmem:[%s2525_s8 + $0x118] sm:$0xff] %vm235_vm0, %v1173_v24  ;;  %v344_v0 = vld [vmem:[#allocation2 + $0x160] sm:$0xff]  ;;  %v315_v3 = vld [vmem:[#allocation2 + $0x78] sm:$0xff] }
 0x100   : > { %1078 = vst.msk [vmem:[#allocation2 + $0x38] sm:$0xff] %vm235_vm0, %v1013_v19  ;;  %1110 = vst.msk [vmem:[#allocation2 + $0x138] sm:$0xff] %vm235_vm0, %v1045_v20  ;;  %v1919_v33 = vpop.f32.mrb[8].mxu0  ;;  %v1951_v34 = vpop.f32.mrb[8].mxu1  ;;  %v347_v4 = vld [vmem:[#allocation2 + $0x178] sm:$0xff]  ;;  %v313_v9 = vld [vmem:[#allocation2 + $0x68] sm:$0xff] }
 0x101   : > { %1203 = vst.msk [vmem:[%s2525_s8 + $0x8] sm:$0xff] %vm235_vm0, %v1139_v27  ;;  %1235 = vst.msk [vmem:[%s2525_s8 + $0x108] sm:$0xff] %vm235_vm0, %v1171_v28  ;;  %v1016_v37 = vadd.f32 %v1919_v33, %v310_v29  ;;  %v1048_v38 = vadd.f32 %v1951_v34, %v342_v30  ;;  %v783_v39 = vpop.f32.mrb[9].mxu0  ;;  %v911_v40 = vpop.f32.mrb[9].mxu1  ;;  %v345_v10 = vld [vmem:[#allocation2 + $0x168] sm:$0xff]  ;;  %v318_v29 = vld [vmem:[#allocation2 + $0x90] sm:$0xff] }
 0x102   : > { %1076 = vst.msk [vmem:[#allocation2 + $0x28] sm:$0xff] %vm235_vm0, %v1011_v25  ;;  %1108 = vst.msk [vmem:[#allocation2 + $0x128] sm:$0xff] %vm235_vm0, %v1043_v26  ;;  %v1144_v43 = vld [vmem:[#allocation2 + $0x30] sm:$0xff]  ;;  %v1014_v45 = vadd.f32 %v783_v39, %v308_v31  ;;  %v1046_v46 = vadd.f32 %v911_v40, %v340_v32  ;;  %v1920_v47 = vpop.f32.mrb[10].mxu0  ;;  %v1952_v48 = vpop.f32.mrb[10].mxu1  ;;  %v316_v31 = vld [vmem:[#allocation2 + $0x80] sm:$0xff] }
 0x103   : > { %v1176_v44 = vld [vmem:[#allocation2 + $0x130] sm:$0xff]  ;;  %1208 = vst.msk [vmem:[%s2525_s8 + $0x30] sm:$0xff] %vm235_vm0, %v1144_v43  ;;  %1081 = vst.msk [vmem:[#allocation2 + $0x50] sm:$0xff] %vm235_vm0, %v1016_v37  ;;  %v1017_v51 = vadd.f32 %v1920_v47, %v311_v35  ;;  %v1049_v52 = vadd.f32 %v1952_v48, %v343_v36  ;;  %v786_v53 = vpop.f32.mrb[11].mxu0  ;;  %v914_v54 = vpop.f32.mrb[11].mxu1  ;;  %v348_v32 = vld [vmem:[#allocation2 + $0x180] sm:$0xff] }
 0x104   : > { %1240 = vst.msk [vmem:[%s2525_s8 + $0x130] sm:$0xff] %vm235_vm0, %v1176_v44  ;;  %1113 = vst.msk [vmem:[#allocation2 + $0x150] sm:$0xff] %vm235_vm0, %v1048_v38  ;;  %v1015_v57 = vadd.f32 %v786_v53, %v309_v41  ;;  %v1047_v58 = vadd.f32 %v914_v54, %v341_v42  ;;  %v350_v30 = vld [vmem:[#allocation2 + $0x190] sm:$0xff]  ;;  %v319_v35 = vld [vmem:[#allocation2 + $0x98] sm:$0xff] }
 0x105   : > { %v1142_v49 = vld [vmem:[#allocation2 + $0x20] sm:$0xff]  ;;  %1079 = vst.msk [vmem:[#allocation2 + $0x40] sm:$0xff] %vm235_vm0, %v1014_v45  ;;  %1111 = vst.msk [vmem:[#allocation2 + $0x140] sm:$0xff] %vm235_vm0, %v1046_v46  ;;  %v351_v36 = vld [vmem:[#allocation2 + $0x198] sm:$0xff] }
 0x106   : > { %v1174_v50 = vld [vmem:[#allocation2 + $0x120] sm:$0xff]  ;;  %1206 = vst.msk [vmem:[%s2525_s8 + $0x20] sm:$0xff] %vm235_vm0, %v1142_v49  ;;  %1082 = vst.msk [vmem:[#allocation2 + $0x58] sm:$0xff] %vm235_vm0, %v1017_v51  ;;  %v317_v41 = vld [vmem:[#allocation2 + $0x88] sm:$0xff] }
 0x107   : > { %1238 = vst.msk [vmem:[%s2525_s8 + $0x120] sm:$0xff] %vm235_vm0, %v1174_v50  ;;  %v1145_v55 = vld [vmem:[#allocation2 + $0x38] sm:$0xff]  ;;  %1114 = vst.msk [vmem:[#allocation2 + $0x158] sm:$0xff] %vm235_vm0, %v1049_v52  ;;  %v349_v42 = vld [vmem:[#allocation2 + $0x188] sm:$0xff] }
 0x108   : > { %v1177_v56 = vld [vmem:[#allocation2 + $0x138] sm:$0xff]  ;;  %1209 = vst.msk [vmem:[%s2525_s8 + $0x38] sm:$0xff] %vm235_vm0, %v1145_v55  ;;  %1080 = vst.msk [vmem:[#allocation2 + $0x48] sm:$0xff] %vm235_vm0, %v1015_v57  ;;  %v1923_v1 = vpop.f32.mrb[12].mxu0  ;;  %v1955_v2 = vpop.f32.mrb[12].mxu1 }
 0x109   : > { %1241 = vst.msk [vmem:[%s2525_s8 + $0x138] sm:$0xff] %vm235_vm0, %v1177_v56  ;;  %v1143_v59 = vld [vmem:[#allocation2 + $0x28] sm:$0xff]  ;;  %1112 = vst.msk [vmem:[#allocation2 + $0x148] sm:$0xff] %vm235_vm0, %v1047_v58  ;;  %v1020_v5 = vadd.f32 %v1923_v1, %v314_v61  ;;  %v1052_v6 = vadd.f32 %v1955_v2, %v346_v62  ;;  %v799_v7 = vpop.f32.mrb[13].mxu0  ;;  %v927_v8 = vpop.f32.mrb[13].mxu1  ;;  %v322_v61 = vld [vmem:[#allocation2 + $0xb0] sm:$0xff] }
 0x10a   : > { %v1175_v60 = vld [vmem:[#allocation2 + $0x128] sm:$0xff]  ;;  %1207 = vst.msk [vmem:[%s2525_s8 + $0x28] sm:$0xff] %vm235_vm0, %v1143_v59  ;;  %v1148_v11 = vld [vmem:[#allocation2 + $0x50] sm:$0xff]  ;;  %v1018_v13 = vadd.f32 %v799_v7, %v312_v63  ;;  %v1050_v14 = vadd.f32 %v927_v8, %v344_v0  ;;  %v1924_v15 = vpop.f32.mrb[14].mxu0  ;;  %v1956_v16 = vpop.f32.mrb[14].mxu1  ;;  %v320_v63 = vld [vmem:[#allocation2 + $0xa0] sm:$0xff] }
 0x10b   : > { %1239 = vst.msk [vmem:[%s2525_s8 + $0x128] sm:$0xff] %vm235_vm0, %v1175_v60  ;;  %v1180_v12 = vld [vmem:[#allocation2 + $0x150] sm:$0xff]  ;;  %1212 = vst.msk [vmem:[%s2525_s8 + $0x50] sm:$0xff] %vm235_vm0, %v1148_v11  ;;  %v1021_v19 = vadd.f32 %v1924_v15, %v315_v3  ;;  %v1053_v20 = vadd.f32 %v1956_v16, %v347_v4  ;;  %v802_v21 = vpop.f32.mrb[15].mxu0  ;;  %v930_v22 = vpop.f32.mrb[15].mxu1  ;;  %v352_v0 = vld [vmem:[#allocation2 + $0x1a0] sm:$0xff] }
 0x10c   : > { %1244 = vst.msk [vmem:[%s2525_s8 + $0x150] sm:$0xff] %vm235_vm0, %v1180_v12  ;;  %v1146_v17 = vld [vmem:[#allocation2 + $0x40] sm:$0xff]  ;;  %1085 = vst.msk [vmem:[#allocation2 + $0x70] sm:$0xff] %vm235_vm0, %v1020_v5  ;;  %v1019_v25 = vadd.f32 %v802_v21, %v313_v9  ;;  %v1051_v26 = vadd.f32 %v930_v22, %v345_v10  ;;  %v354_v62 = vld [vmem:[#allocation2 + $0x1b0] sm:$0xff] }
 0x10d   : > { %v1178_v18 = vld [vmem:[#allocation2 + $0x140] sm:$0xff]  ;;  %1117 = vst.msk [vmem:[#allocation2 + $0x170] sm:$0xff] %vm235_vm0, %v1052_v6  ;;  %1210 = vst.msk [vmem:[%s2525_s8 + $0x40] sm:$0xff] %vm235_vm0, %v1146_v17  ;;  %v1149_v23 = vld [vmem:[#allocation2 + $0x58] sm:$0xff] }
 0x10e   : > { %1242 = vst.msk [vmem:[%s2525_s8 + $0x140] sm:$0xff] %vm235_vm0, %v1178_v18  ;;  %v1181_v24 = vld [vmem:[#allocation2 + $0x158] sm:$0xff]  ;;  %1083 = vst.msk [vmem:[#allocation2 + $0x60] sm:$0xff] %vm235_vm0, %v1018_v13  ;;  %v321_v9 = vld [vmem:[#allocation2 + $0xa8] sm:$0xff] }
 0x10f   : > { %1115 = vst.msk [vmem:[#allocation2 + $0x160] sm:$0xff] %vm235_vm0, %v1050_v14  ;;  %1213 = vst.msk [vmem:[%s2525_s8 + $0x58] sm:$0xff] %vm235_vm0, %v1149_v23  ;;  %v1147_v27 = vld [vmem:[#allocation2 + $0x48] sm:$0xff]  ;;  %v323_v3 = vld [vmem:[#allocation2 + $0xb8] sm:$0xff] }
 0x110   : > { %1245 = vst.msk [vmem:[%s2525_s8 + $0x158] sm:$0xff] %vm235_vm0, %v1181_v24  ;;  %v1179_v28 = vld [vmem:[#allocation2 + $0x148] sm:$0xff]  ;;  %1086 = vst.msk [vmem:[#allocation2 + $0x78] sm:$0xff] %vm235_vm0, %v1021_v19  ;;  %v1927_v33 = vpop.f32.mrb[16].mxu0  ;;  %v1959_v34 = vpop.f32.mrb[16].mxu1  ;;  %v355_v4 = vld [vmem:[#allocation2 + $0x1b8] sm:$0xff] }
 0x111   : > { %1118 = vst.msk [vmem:[#allocation2 + $0x178] sm:$0xff] %vm235_vm0, %v1053_v20  ;;  %1211 = vst.msk [vmem:[%s2525_s8 + $0x48] sm:$0xff] %vm235_vm0, %v1147_v27  ;;  %v1024_v37 = vadd.f32 %v1927_v33, %v318_v29  ;;  %v1056_v38 = vadd.f32 %v1959_v34, %v350_v30  ;;  %v815_v39 = vpop.f32.mrb[17].mxu0  ;;  %v943_v40 = vpop.f32.mrb[17].mxu1  ;;  %v353_v10 = vld [vmem:[#allocation2 + $0x1a8] sm:$0xff]  ;;  %v326_v29 = vld [vmem:[#allocation2 + $0xd0] sm:$0xff] }
 0x112   : > { %1243 = vst.msk [vmem:[%s2525_s8 + $0x148] sm:$0xff] %vm235_vm0, %v1179_v28  ;;  %1084 = vst.msk [vmem:[#allocation2 + $0x68] sm:$0xff] %vm235_vm0, %v1019_v25  ;;  %v1022_v45 = vadd.f32 %v815_v39, %v316_v31  ;;  %v1054_v46 = vadd.f32 %v943_v40, %v348_v32  ;;  %v1928_v47 = vpop.f32.mrb[18].mxu0  ;;  %v1960_v48 = vpop.f32.mrb[18].mxu1  ;;  %v358_v30 = vld [vmem:[#allocation2 + $0x1d0] sm:$0xff]  ;;  %v324_v31 = vld [vmem:[#allocation2 + $0xc0] sm:$0xff] }
 0x113   : > { %1116 = vst.msk [vmem:[#allocation2 + $0x168] sm:$0xff] %vm235_vm0, %v1051_v26  ;;  %v1152_v43 = vld [vmem:[#allocation2 + $0x70] sm:$0xff]  ;;  %1089 = vst.msk [vmem:[#allocation2 + $0x90] sm:$0xff] %vm235_vm0, %v1024_v37  ;;  %v1025_v51 = vadd.f32 %v1928_v47, %v319_v35  ;;  %v1057_v52 = vadd.f32 %v1960_v48, %v351_v36  ;;  %v818_v53 = vpop.f32.mrb[19].mxu0  ;;  %v946_v54 = vpop.f32.mrb[19].mxu1  ;;  %v356_v32 = vld [vmem:[#allocation2 + $0x1c0] sm:$0xff] }
 0x114   : > { %v1184_v44 = vld [vmem:[#allocation2 + $0x170] sm:$0xff]  ;;  %1216 = vst.msk [vmem:[%s2525_s8 + $0x70] sm:$0xff] %vm235_vm0, %v1152_v43  ;;  %1121 = vst.msk [vmem:[#allocation2 + $0x190] sm:$0xff] %vm235_vm0, %v1056_v38  ;;  %v1023_v57 = vadd.f32 %v818_v53, %v317_v41  ;;  %v1055_v58 = vadd.f32 %v946_v54, %v349_v42  ;;  %v327_v35 = vld [vmem:[#allocation2 + $0xd8] sm:$0xff] }
 0x115   : > { %1248 = vst.msk [vmem:[%s2525_s8 + $0x170] sm:$0xff] %vm235_vm0, %v1184_v44  ;;  %v1150_v49 = vld [vmem:[#allocation2 + $0x60] sm:$0xff]  ;;  %1087 = vst.msk [vmem:[#allocation2 + $0x80] sm:$0xff] %vm235_vm0, %v1022_v45  ;;  %v359_v36 = vld [vmem:[#allocation2 + $0x1d8] sm:$0xff] }
 0x116   : > { %v1182_v50 = vld [vmem:[#allocation2 + $0x160] sm:$0xff]  ;;  %1214 = vst.msk [vmem:[%s2525_s8 + $0x60] sm:$0xff] %vm235_vm0, %v1150_v49  ;;  %1119 = vst.msk [vmem:[#allocation2 + $0x180] sm:$0xff] %vm235_vm0, %v1054_v46  ;;  %v325_v41 = vld [vmem:[#allocation2 + $0xc8] sm:$0xff] }
 0x117   : > { %1246 = vst.msk [vmem:[%s2525_s8 + $0x160] sm:$0xff] %vm235_vm0, %v1182_v50  ;;  %v1153_v55 = vld [vmem:[#allocation2 + $0x78] sm:$0xff]  ;;  %1090 = vst.msk [vmem:[#allocation2 + $0x98] sm:$0xff] %vm235_vm0, %v1025_v51  ;;  %v357_v42 = vld [vmem:[#allocation2 + $0x1c8] sm:$0xff] }
 0x118   : > { %v1185_v56 = vld [vmem:[#allocation2 + $0x178] sm:$0xff]  ;;  %1217 = vst.msk [vmem:[%s2525_s8 + $0x78] sm:$0xff] %vm235_vm0, %v1153_v55  ;;  %1122 = vst.msk [vmem:[#allocation2 + $0x198] sm:$0xff] %vm235_vm0, %v1057_v52  ;;  %v1931_v1 = vpop.f32.mrb[20].mxu0  ;;  %v1963_v2 = vpop.f32.mrb[20].mxu1 }
 0x119   : > { %1249 = vst.msk [vmem:[%s2525_s8 + $0x178] sm:$0xff] %vm235_vm0, %v1185_v56  ;;  %v1151_v59 = vld [vmem:[#allocation2 + $0x68] sm:$0xff]  ;;  %1088 = vst.msk [vmem:[#allocation2 + $0x88] sm:$0xff] %vm235_vm0, %v1023_v57  ;;  %v1028_v5 = vadd.f32 %v1931_v1, %v322_v61  ;;  %v1060_v6 = vadd.f32 %v1963_v2, %v354_v62  ;;  %v831_v7 = vpop.f32.mrb[21].mxu0  ;;  %v959_v8 = vpop.f32.mrb[21].mxu1  ;;  %v330_v61 = vld [vmem:[#allocation2 + $0xf0] sm:$0xff] }
 0x11a   : > { %v1183_v60 = vld [vmem:[#allocation2 + $0x168] sm:$0xff]  ;;  %1215 = vst.msk [vmem:[%s2525_s8 + $0x68] sm:$0xff] %vm235_vm0, %v1151_v59  ;;  %1120 = vst.msk [vmem:[#allocation2 + $0x188] sm:$0xff] %vm235_vm0, %v1055_v58  ;;  %v1156_v11 = vld [vmem:[#allocation2 + $0x90] sm:$0xff]  ;;  %v1026_v13 = vadd.f32 %v831_v7, %v320_v63  ;;  %v1058_v14 = vadd.f32 %v959_v8, %v352_v0  ;;  %v1932_v15 = vpop.f32.mrb[22].mxu0  ;;  %v1964_v16 = vpop.f32.mrb[22].mxu1 }
 0x11b   : > { %1247 = vst.msk [vmem:[%s2525_s8 + $0x168] sm:$0xff] %vm235_vm0, %v1183_v60  ;;  %v1188_v12 = vld [vmem:[#allocation2 + $0x190] sm:$0xff]  ;;  %1220 = vst.msk [vmem:[%s2525_s8 + $0x90] sm:$0xff] %vm235_vm0, %v1156_v11  ;;  %v1029_v19 = vadd.f32 %v1932_v15, %v323_v3  ;;  %v1061_v20 = vadd.f32 %v1964_v16, %v355_v4  ;;  %v834_v21 = vpop.f32.mrb[23].mxu0  ;;  %v962_v22 = vpop.f32.mrb[23].mxu1  ;;  %v328_v63 = vld [vmem:[#allocation2 + $0xe0] sm:$0xff] }
 0x11c   : > { %1252 = vst.msk [vmem:[%s2525_s8 + $0x190] sm:$0xff] %vm235_vm0, %v1188_v12  ;;  %v1154_v17 = vld [vmem:[#allocation2 + $0x80] sm:$0xff]  ;;  %1093 = vst.msk [vmem:[#allocation2 + $0xb0] sm:$0xff] %vm235_vm0, %v1028_v5  ;;  %v1027_v25 = vadd.f32 %v834_v21, %v321_v9  ;;  %v1059_v26 = vadd.f32 %v962_v22, %v353_v10  ;;  %v362_v62 = vld [vmem:[#allocation2 + $0x1f0] sm:$0xff] }
 0x11d   : > { %v1186_v18 = vld [vmem:[#allocation2 + $0x180] sm:$0xff]  ;;  %1125 = vst.msk [vmem:[#allocation2 + $0x1b0] sm:$0xff] %vm235_vm0, %v1060_v6  ;;  %1218 = vst.msk [vmem:[%s2525_s8 + $0x80] sm:$0xff] %vm235_vm0, %v1154_v17  ;;  %v331_v3 = vld [vmem:[#allocation2 + $0xf8] sm:$0xff] }
 0x11e   : > { %1250 = vst.msk [vmem:[%s2525_s8 + $0x180] sm:$0xff] %vm235_vm0, %v1186_v18  ;;  %v1157_v23 = vld [vmem:[#allocation2 + $0x98] sm:$0xff]  ;;  %1091 = vst.msk [vmem:[#allocation2 + $0xa0] sm:$0xff] %vm235_vm0, %v1026_v13  ;;  %v360_v0 = vld [vmem:[#allocation2 + $0x1e0] sm:$0xff] }
 0x11f   : > { %v1189_v24 = vld [vmem:[#allocation2 + $0x198] sm:$0xff]  ;;  %1123 = vst.msk [vmem:[#allocation2 + $0x1a0] sm:$0xff] %vm235_vm0, %v1058_v14  ;;  %1221 = vst.msk [vmem:[%s2525_s8 + $0x98] sm:$0xff] %vm235_vm0, %v1157_v23  ;;  %v329_v9 = vld [vmem:[#allocation2 + $0xe8] sm:$0xff] }
 0x120   : > { %1253 = vst.msk [vmem:[%s2525_s8 + $0x198] sm:$0xff] %vm235_vm0, %v1189_v24  ;;  %v1155_v27 = vld [vmem:[#allocation2 + $0x88] sm:$0xff]  ;;  %1094 = vst.msk [vmem:[#allocation2 + $0xb8] sm:$0xff] %vm235_vm0, %v1029_v19  ;;  %v1935_v33 = vpop.f32.mrb[24].mxu0  ;;  %v1967_v34 = vpop.f32.mrb[24].mxu1  ;;  %v363_v4 = vld [vmem:[#allocation2 + $0x1f8] sm:$0xff] }
 0x121   : > { %v1187_v28 = vld [vmem:[#allocation2 + $0x188] sm:$0xff]  ;;  %1126 = vst.msk [vmem:[#allocation2 + $0x1b8] sm:$0xff] %vm235_vm0, %v1061_v20  ;;  %1219 = vst.msk [vmem:[%s2525_s8 + $0x88] sm:$0xff] %vm235_vm0, %v1155_v27  ;;  %v1032_v37 = vadd.f32 %v1935_v33, %v326_v29  ;;  %v1064_v38 = vadd.f32 %v1967_v34, %v358_v30  ;;  %v847_v39 = vpop.f32.mrb[25].mxu0  ;;  %v975_v40 = vpop.f32.mrb[25].mxu1 }
 0x122   : > { %1251 = vst.msk [vmem:[%s2525_s8 + $0x188] sm:$0xff] %vm235_vm0, %v1187_v28  ;;  %1092 = vst.msk [vmem:[#allocation2 + $0xa8] sm:$0xff] %vm235_vm0, %v1027_v25  ;;  %v1030_v45 = vadd.f32 %v847_v39, %v324_v31  ;;  %v1062_v46 = vadd.f32 %v975_v40, %v356_v32  ;;  %v1936_v47 = vpop.f32.mrb[26].mxu0  ;;  %v1968_v48 = vpop.f32.mrb[26].mxu1  ;;  %v361_v10 = vld [vmem:[#allocation2 + $0x1e8] sm:$0xff] }
 0x123   : > { %1124 = vst.msk [vmem:[#allocation2 + $0x1a8] sm:$0xff] %vm235_vm0, %v1059_v26  ;;  %v1160_v43 = vld [vmem:[#allocation2 + $0xb0] sm:$0xff]  ;;  %1097 = vst.msk [vmem:[#allocation2 + $0xd0] sm:$0xff] %vm235_vm0, %v1032_v37  ;;  %v1033_v51 = vadd.f32 %v1936_v47, %v327_v35  ;;  %v1065_v52 = vadd.f32 %v1968_v48, %v359_v36  ;;  %v850_v53 = vpop.f32.mrb[27].mxu0  ;;  %v978_v54 = vpop.f32.mrb[27].mxu1 }
 0x124   : > { %v1192_v44 = vld [vmem:[#allocation2 + $0x1b0] sm:$0xff]  ;;  %1224 = vst.msk [vmem:[%s2525_s8 + $0xb0] sm:$0xff] %vm235_vm0, %v1160_v43  ;;  %1129 = vst.msk [vmem:[#allocation2 + $0x1d0] sm:$0xff] %vm235_vm0, %v1064_v38  ;;  %v1031_v57 = vadd.f32 %v850_v53, %v325_v41  ;;  %v1063_v58 = vadd.f32 %v978_v54, %v357_v42 }
 0x125   : > { %1256 = vst.msk [vmem:[%s2525_s8 + $0x1b0] sm:$0xff] %vm235_vm0, %v1192_v44  ;;  %v1158_v49 = vld [vmem:[#allocation2 + $0xa0] sm:$0xff]  ;;  %1095 = vst.msk [vmem:[#allocation2 + $0xc0] sm:$0xff] %vm235_vm0, %v1030_v45 }
 0x126   : > { %v1190_v50 = vld [vmem:[#allocation2 + $0x1a0] sm:$0xff]  ;;  %1222 = vst.msk [vmem:[%s2525_s8 + $0xa0] sm:$0xff] %vm235_vm0, %v1158_v49  ;;  %1127 = vst.msk [vmem:[#allocation2 + $0x1c0] sm:$0xff] %vm235_vm0, %v1062_v46 }
 0x127   : > { %1254 = vst.msk [vmem:[%s2525_s8 + $0x1a0] sm:$0xff] %vm235_vm0, %v1190_v50  ;;  %v1161_v55 = vld [vmem:[#allocation2 + $0xb8] sm:$0xff]  ;;  %1098 = vst.msk [vmem:[#allocation2 + $0xd8] sm:$0xff] %vm235_vm0, %v1033_v51 }
 0x128   : > { %v1193_v56 = vld [vmem:[#allocation2 + $0x1b8] sm:$0xff]  ;;  %1225 = vst.msk [vmem:[%s2525_s8 + $0xb8] sm:$0xff] %vm235_vm0, %v1161_v55  ;;  %1130 = vst.msk [vmem:[#allocation2 + $0x1d8] sm:$0xff] %vm235_vm0, %v1065_v52  ;;  %v1939_v1 = vpop.f32.mrb[28].mxu0  ;;  %v1971_v2 = vpop.f32.mrb[28].mxu1 }
 0x129   : > { %1257 = vst.msk [vmem:[%s2525_s8 + $0x1b8] sm:$0xff] %vm235_vm0, %v1193_v56  ;;  %v1159_v59 = vld [vmem:[#allocation2 + $0xa8] sm:$0xff]  ;;  %1096 = vst.msk [vmem:[#allocation2 + $0xc8] sm:$0xff] %vm235_vm0, %v1031_v57  ;;  %v1036_v5 = vadd.f32 %v1939_v1, %v330_v61  ;;  %v1068_v6 = vadd.f32 %v1971_v2, %v362_v62  ;;  %v863_v7 = vpop.f32.mrb[29].mxu0  ;;  %v991_v8 = vpop.f32.mrb[29].mxu1 }
 0x12a   : > { %v1191_v60 = vld [vmem:[#allocation2 + $0x1a8] sm:$0xff]  ;;  %1223 = vst.msk [vmem:[%s2525_s8 + $0xa8] sm:$0xff] %vm235_vm0, %v1159_v59  ;;  %1128 = vst.msk [vmem:[#allocation2 + $0x1c8] sm:$0xff] %vm235_vm0, %v1063_v58  ;;  %v1164_v11 = vld [vmem:[#allocation2 + $0xd0] sm:$0xff]  ;;  %v1034_v13 = vadd.f32 %v863_v7, %v328_v63  ;;  %v1066_v14 = vadd.f32 %v991_v8, %v360_v0  ;;  %v1940_v15 = vpop.f32.mrb[30].mxu0  ;;  %v1972_v16 = vpop.f32.mrb[30].mxu1 }
 0x12b   : > { %1255 = vst.msk [vmem:[%s2525_s8 + $0x1a8] sm:$0xff] %vm235_vm0, %v1191_v60  ;;  %v1196_v12 = vld [vmem:[#allocation2 + $0x1d0] sm:$0xff]  ;;  %1228 = vst.msk [vmem:[%s2525_s8 + $0xd0] sm:$0xff] %vm235_vm0, %v1164_v11  ;;  %v1037_v19 = vadd.f32 %v1940_v15, %v331_v3  ;;  %v1069_v20 = vadd.f32 %v1972_v16, %v363_v4  ;;  %v866_v21 = vpop.f32.mrb[31].mxu0  ;;  %v994_v22 = vpop.f32.mrb[31].mxu1 }
 0x12c   : > { %1260 = vst.msk [vmem:[%s2525_s8 + $0x1d0] sm:$0xff] %vm235_vm0, %v1196_v12  ;;  %v1162_v17 = vld [vmem:[#allocation2 + $0xc0] sm:$0xff]  ;;  %1101 = vst.msk [vmem:[#allocation2 + $0xf0] sm:$0xff] %vm235_vm0, %v1036_v5  ;;  %v1035_v25 = vadd.f32 %v866_v21, %v329_v9  ;;  %v1067_v26 = vadd.f32 %v994_v22, %v361_v10 }
 0x12d   : > { %v1194_v18 = vld [vmem:[#allocation2 + $0x1c0] sm:$0xff]  ;;  %1133 = vst.msk [vmem:[#allocation2 + $0x1f0] sm:$0xff] %vm235_vm0, %v1068_v6  ;;  %1226 = vst.msk [vmem:[%s2525_s8 + $0xc0] sm:$0xff] %vm235_vm0, %v1162_v17 }
 0x12e   : > { %1258 = vst.msk [vmem:[%s2525_s8 + $0x1c0] sm:$0xff] %vm235_vm0, %v1194_v18  ;;  %v1165_v23 = vld [vmem:[#allocation2 + $0xd8] sm:$0xff]  ;;  %1099 = vst.msk [vmem:[#allocation2 + $0xe0] sm:$0xff] %vm235_vm0, %v1034_v13 }
 0x12f   : > { %v1197_v24 = vld [vmem:[#allocation2 + $0x1d8] sm:$0xff]  ;;  %1131 = vst.msk [vmem:[#allocation2 + $0x1e0] sm:$0xff] %vm235_vm0, %v1066_v14  ;;  %1229 = vst.msk [vmem:[%s2525_s8 + $0xd8] sm:$0xff] %vm235_vm0, %v1165_v23 }
 0x130   : > { %1261 = vst.msk [vmem:[%s2525_s8 + $0x1d8] sm:$0xff] %vm235_vm0, %v1197_v24  ;;  %v1163_v27 = vld [vmem:[#allocation2 + $0xc8] sm:$0xff]  ;;  %1102 = vst.msk [vmem:[#allocation2 + $0xf8] sm:$0xff] %vm235_vm0, %v1037_v19 }
 0x131   : > { %v1195_v28 = vld [vmem:[#allocation2 + $0x1c8] sm:$0xff]  ;;  %1134 = vst.msk [vmem:[#allocation2 + $0x1f8] sm:$0xff] %vm235_vm0, %v1069_v20  ;;  %1227 = vst.msk [vmem:[%s2525_s8 + $0xc8] sm:$0xff] %vm235_vm0, %v1163_v27 }
 0x132   : > { %1259 = vst.msk [vmem:[%s2525_s8 + $0x1c8] sm:$0xff] %vm235_vm0, %v1195_v28  ;;  %1100 = vst.msk [vmem:[#allocation2 + $0xe8] sm:$0xff] %vm235_vm0, %v1035_v25 }
 0x133   : > { %1132 = vst.msk [vmem:[#allocation2 + $0x1e8] sm:$0xff] %vm235_vm0, %v1067_v26  ;;  %v1168_v29 = vld [vmem:[#allocation2 + $0xf0] sm:$0xff] }
 0x134   : > { %v1200_v30 = vld [vmem:[#allocation2 + $0x1f0] sm:$0xff]  ;;  %1232 = vst.msk [vmem:[%s2525_s8 + $0xf0] sm:$0xff] %vm235_vm0, %v1168_v29 }
 0x135   : > { %1264 = vst.msk [vmem:[%s2525_s8 + $0x1f0] sm:$0xff] %vm235_vm0, %v1200_v30  ;;  %v1166_v31 = vld [vmem:[#allocation2 + $0xe0] sm:$0xff]  ;;  %1272 = sbr.rel (!%p2274_p3) target bundleno = 388 (0x184), region = 40 }
 0x136   : > { %v1198_v32 = vld [vmem:[#allocation2 + $0x1e0] sm:$0xff]  ;;  %1230 = vst.msk [vmem:[%s2525_s8 + $0xe0] sm:$0xff] %vm235_vm0, %v1166_v31 }
 0x137   : > { %1262 = vst.msk [vmem:[%s2525_s8 + $0x1e0] sm:$0xff] %vm235_vm0, %v1198_v32  ;;  %v1169_v33 = vld [vmem:[#allocation2 + $0xf8] sm:$0xff] }
 0x138   : > { %v1201_v34 = vld [vmem:[#allocation2 + $0x1f8] sm:$0xff]  ;;  %1233 = vst.msk [vmem:[%s2525_s8 + $0xf8] sm:$0xff] %vm235_vm0, %v1169_v33 }
 0x139   : > { %1265 = vst.msk [vmem:[%s2525_s8 + $0x1f8] sm:$0xff] %vm235_vm0, %v1201_v34  ;;  %v1167_v35 = vld [vmem:[#allocation2 + $0xe8] sm:$0xff] }
 0x13a   : > { %v1199_v36 = vld [vmem:[#allocation2 + $0x1e8] sm:$0xff]  ;;  %1231 = vst.msk [vmem:[%s2525_s8 + $0xe8] sm:$0xff] %vm235_vm0, %v1167_v35 }
 0x13b   : > { %1263 = vst.msk [vmem:[%s2525_s8 + $0x1e8] sm:$0xff] %vm235_vm0, %v1199_v36 }
 0x13c   : > { %s2938_s9 = smov (!%p1275_p9, %s1274_s9), 64 }
 0x13d   : > { %s1847_s21 = sshll.u32 %s2938_s9, 7 }
 0x13e   : > { %p1850_p10 = scmp.eq.s32.totalorder %s1847_s21, 0 }
 0x13f   : > { %s2724_s23 = sshrl.u32 (!%p1850_p10), %s2938_s9, 6 }
 0x140   : > { %1284 = sbr.rel (%p1850_p10) target bundleno = 388 (0x184), region = 44  ;;  %p1851_p11 = scmp.le.s32.totalorder (!%p1850_p10), %s2724_s23, 0 }
 0x147   : > { %1704 = sbr.rel (%p1851_p11) target bundleno = 367 (0x16f), region = 123  ;;  %s2926_s11 = smov (!%p1851_p11), %s2718_s20 }
 0x148   : > { %s2927_s17 = smov (!%p1851_p11), %s2525_s8  ;;  %s2733_s22 = smov (!%p1851_p11), 0  }
 0x149   : > { %s2735_s24 = smov (!%p1851_p11), 0  }
 0x14e LB: >> { %v1472_v37 = vld [vmem:[%s2200_s17] sm:$0xff]  ;;  %v1474_v38 = vld [vmem:[%s2200_s17 + $0x8] sm:$0xff]  ;;  %v1476_v39 = vld [vmem:[%s2200_s17 + $0x10] sm:$0xff]  ;;  %s1600_s25 = sadd.s32 1, %s2204_s22  ;;  %s1466_s24 = sadd.s32 1, %s2208_s24   ;;  %s2208_s24 = sphi %s2735_s24, %s1466_s24   ;;  %s2204_s22 = sphi %s2733_s22, %s2930_s22   ;;  %s2200_s17 = sphi %s2927_s17, %s2929_s17   ;;  %s2196_s11 = sphi %s2926_s11, %s2928_s11  }
 0x14f   : >> { %1473 = vst [vmem:[%s2196_s11] sm:$0xff] %v1472_v37  ;;  %1475 = vst [vmem:[%s2196_s11 + $0x8] sm:$0xff] %v1474_v38  ;;  %v1478_v40 = vld [vmem:[%s2200_s17 + $0x18] sm:$0xff]  ;;  %v1480_v41 = vld [vmem:[%s2200_s17 + $0x20] sm:$0xff]  ;;  %p1601_p12 = scmp.ge.s32.totalorder %s1600_s25, %s2724_s23  ;;  %p1465_p13 = scmp.ge.s32.totalorder %s1466_s24, %s2724_s23 }
 0x150   : >> { %1477 = vst [vmem:[%s2196_s11 + $0x10] sm:$0xff] %v1476_v39  ;;  %v1482_v42 = vld [vmem:[%s2200_s17 + $0x28] sm:$0xff]  ;;  %1479 = vst [vmem:[%s2196_s11 + $0x18] sm:$0xff] %v1478_v40  ;;  %v1484_v43 = vld [vmem:[%s2200_s17 + $0x30] sm:$0xff] }
 0x151   : >> { %1481 = vst [vmem:[%s2196_s11 + $0x20] sm:$0xff] %v1480_v41  ;;  %1483 = vst [vmem:[%s2196_s11 + $0x28] sm:$0xff] %v1482_v42  ;;  %v1486_v44 = vld [vmem:[%s2200_s17 + $0x38] sm:$0xff]  ;;  %v1488_v45 = vld [vmem:[%s2200_s17 + $0x40] sm:$0xff]  ;;  %s2940_s25 = smov (%p1601_p12, %s1600_s25), 0 }
 0x152   : >> { %1485 = vst [vmem:[%s2196_s11 + $0x30] sm:$0xff] %v1484_v43  ;;  %1487 = vst [vmem:[%s2196_s11 + $0x38] sm:$0xff] %v1486_v44  ;;  %v1490_v46 = vld [vmem:[%s2200_s17 + $0x48] sm:$0xff]  ;;  %v1492_v47 = vld [vmem:[%s2200_s17 + $0x50] sm:$0xff]  ;;  %s1852_s26 = sshll.u32 %s2940_s25, 9  ;;  %s2930_s22 = smov %s2940_s25 }
 0x153   : >> { %1489 = vst [vmem:[%s2196_s11 + $0x40] sm:$0xff] %v1488_v45  ;;  %v1494_v48 = vld [vmem:[%s2200_s17 + $0x58] sm:$0xff]  ;;  %1491 = vst [vmem:[%s2196_s11 + $0x48] sm:$0xff] %v1490_v46  ;;  %v1496_v49 = vld [vmem:[%s2200_s17 + $0x60] sm:$0xff]  ;;  %s2791_s27 = scalar_lea.vmem %s2525_s8, %s1852_s26 [#allocation3]   ;;  %s2794_s28 = scalar_lea.vmem %s2718_s20, %s1852_s26  }
 0x154   : >> { %1493 = vst [vmem:[%s2196_s11 + $0x50] sm:$0xff] %v1492_v47  ;;  %1495 = vst [vmem:[%s2196_s11 + $0x58] sm:$0xff] %v1494_v48  ;;  %v1498_v50 = vld [vmem:[%s2200_s17 + $0x68] sm:$0xff]  ;;  %v1500_v51 = vld [vmem:[%s2200_s17 + $0x70] sm:$0xff] }
 0x155   : >> { %1497 = vst [vmem:[%s2196_s11 + $0x60] sm:$0xff] %v1496_v49  ;;  %1499 = vst [vmem:[%s2196_s11 + $0x68] sm:$0xff] %v1498_v50  ;;  %v1502_v52 = vld [vmem:[%s2200_s17 + $0x78] sm:$0xff]  ;;  %v1504_v53 = vld [vmem:[%s2200_s17 + $0x80] sm:$0xff] }
 0x156   : >> { %1501 = vst [vmem:[%s2196_s11 + $0x70] sm:$0xff] %v1500_v51  ;;  %v1506_v54 = vld [vmem:[%s2200_s17 + $0x88] sm:$0xff]  ;;  %1503 = vst [vmem:[%s2196_s11 + $0x78] sm:$0xff] %v1502_v52  ;;  %v1508_v55 = vld [vmem:[%s2200_s17 + $0x90] sm:$0xff] }
 0x157   : >> { %1505 = vst [vmem:[%s2196_s11 + $0x80] sm:$0xff] %v1504_v53  ;;  %1507 = vst [vmem:[%s2196_s11 + $0x88] sm:$0xff] %v1506_v54  ;;  %v1510_v56 = vld [vmem:[%s2200_s17 + $0x98] sm:$0xff]  ;;  %v1512_v57 = vld [vmem:[%s2200_s17 + $0xa0] sm:$0xff] }
 0x158   : >> { %1509 = vst [vmem:[%s2196_s11 + $0x90] sm:$0xff] %v1508_v55  ;;  %1511 = vst [vmem:[%s2196_s11 + $0x98] sm:$0xff] %v1510_v56  ;;  %v1514_v58 = vld [vmem:[%s2200_s17 + $0xa8] sm:$0xff]  ;;  %v1516_v59 = vld [vmem:[%s2200_s17 + $0xb0] sm:$0xff] }
 0x159   : >> { %1513 = vst [vmem:[%s2196_s11 + $0xa0] sm:$0xff] %v1512_v57  ;;  %v1518_v60 = vld [vmem:[%s2200_s17 + $0xb8] sm:$0xff]  ;;  %1515 = vst [vmem:[%s2196_s11 + $0xa8] sm:$0xff] %v1514_v58  ;;  %v1520_v61 = vld [vmem:[%s2200_s17 + $0xc0] sm:$0xff] }
 0x15a   : >> { %1517 = vst [vmem:[%s2196_s11 + $0xb0] sm:$0xff] %v1516_v59  ;;  %1519 = vst [vmem:[%s2196_s11 + $0xb8] sm:$0xff] %v1518_v60  ;;  %v1522_v62 = vld [vmem:[%s2200_s17 + $0xc8] sm:$0xff]  ;;  %v1524_v63 = vld [vmem:[%s2200_s17 + $0xd0] sm:$0xff] }
 0x15b   : >> { %1521 = vst [vmem:[%s2196_s11 + $0xc0] sm:$0xff] %v1520_v61  ;;  %1523 = vst [vmem:[%s2196_s11 + $0xc8] sm:$0xff] %v1522_v62  ;;  %v1526_v0 = vld [vmem:[%s2200_s17 + $0xd8] sm:$0xff]  ;;  %v1528_v1 = vld [vmem:[%s2200_s17 + $0xe0] sm:$0xff] }
 0x15c   : >> { %1525 = vst [vmem:[%s2196_s11 + $0xd0] sm:$0xff] %v1524_v63  ;;  %v1530_v2 = vld [vmem:[%s2200_s17 + $0xe8] sm:$0xff]  ;;  %1527 = vst [vmem:[%s2196_s11 + $0xd8] sm:$0xff] %v1526_v0  ;;  %v1532_v3 = vld [vmem:[%s2200_s17 + $0xf0] sm:$0xff] }
 0x15d   : >> { %1529 = vst [vmem:[%s2196_s11 + $0xe0] sm:$0xff] %v1528_v1  ;;  %1531 = vst [vmem:[%s2196_s11 + $0xe8] sm:$0xff] %v1530_v2  ;;  %v1534_v4 = vld [vmem:[%s2200_s17 + $0xf8] sm:$0xff]  ;;  %v1536_v5 = vld [vmem:[%s2200_s17 + $0x100] sm:$0xff] }
 0x15e   : >> { %1533 = vst [vmem:[%s2196_s11 + $0xf0] sm:$0xff] %v1532_v3  ;;  %1535 = vst [vmem:[%s2196_s11 + $0xf8] sm:$0xff] %v1534_v4  ;;  %v1538_v6 = vld [vmem:[%s2200_s17 + $0x108] sm:$0xff]  ;;  %v1540_v7 = vld [vmem:[%s2200_s17 + $0x110] sm:$0xff] }
 0x15f   : >> { %1537 = vst [vmem:[%s2196_s11 + $0x100] sm:$0xff] %v1536_v5  ;;  %v1542_v8 = vld [vmem:[%s2200_s17 + $0x118] sm:$0xff]  ;;  %1539 = vst [vmem:[%s2196_s11 + $0x108] sm:$0xff] %v1538_v6  ;;  %v1544_v9 = vld [vmem:[%s2200_s17 + $0x120] sm:$0xff] }
 0x160   : >> { %1541 = vst [vmem:[%s2196_s11 + $0x110] sm:$0xff] %v1540_v7  ;;  %1543 = vst [vmem:[%s2196_s11 + $0x118] sm:$0xff] %v1542_v8  ;;  %v1546_v10 = vld [vmem:[%s2200_s17 + $0x128] sm:$0xff]  ;;  %v1548_v11 = vld [vmem:[%s2200_s17 + $0x130] sm:$0xff] }
 0x161   : >> { %1545 = vst [vmem:[%s2196_s11 + $0x120] sm:$0xff] %v1544_v9  ;;  %1547 = vst [vmem:[%s2196_s11 + $0x128] sm:$0xff] %v1546_v10  ;;  %v1550_v12 = vld [vmem:[%s2200_s17 + $0x138] sm:$0xff]  ;;  %v1552_v13 = vld [vmem:[%s2200_s17 + $0x140] sm:$0xff] }
 0x162   : >> { %1549 = vst [vmem:[%s2196_s11 + $0x130] sm:$0xff] %v1548_v11  ;;  %v1554_v14 = vld [vmem:[%s2200_s17 + $0x148] sm:$0xff]  ;;  %1551 = vst [vmem:[%s2196_s11 + $0x138] sm:$0xff] %v1550_v12  ;;  %v1556_v15 = vld [vmem:[%s2200_s17 + $0x150] sm:$0xff] }
 0x163   : >> { %1553 = vst [vmem:[%s2196_s11 + $0x140] sm:$0xff] %v1552_v13  ;;  %1555 = vst [vmem:[%s2196_s11 + $0x148] sm:$0xff] %v1554_v14  ;;  %v1558_v16 = vld [vmem:[%s2200_s17 + $0x158] sm:$0xff]  ;;  %v1560_v17 = vld [vmem:[%s2200_s17 + $0x160] sm:$0xff] }
 0x164   : >> { %1557 = vst [vmem:[%s2196_s11 + $0x150] sm:$0xff] %v1556_v15  ;;  %1559 = vst [vmem:[%s2196_s11 + $0x158] sm:$0xff] %v1558_v16  ;;  %v1562_v18 = vld [vmem:[%s2200_s17 + $0x168] sm:$0xff]  ;;  %v1564_v19 = vld [vmem:[%s2200_s17 + $0x170] sm:$0xff] }
 0x165   : >> { %1561 = vst [vmem:[%s2196_s11 + $0x160] sm:$0xff] %v1560_v17  ;;  %v1566_v20 = vld [vmem:[%s2200_s17 + $0x178] sm:$0xff]  ;;  %1563 = vst [vmem:[%s2196_s11 + $0x168] sm:$0xff] %v1562_v18  ;;  %v1568_v21 = vld [vmem:[%s2200_s17 + $0x180] sm:$0xff] }
 0x166   : >> { %1565 = vst [vmem:[%s2196_s11 + $0x170] sm:$0xff] %v1564_v19  ;;  %1567 = vst [vmem:[%s2196_s11 + $0x178] sm:$0xff] %v1566_v20  ;;  %v1570_v22 = vld [vmem:[%s2200_s17 + $0x188] sm:$0xff]  ;;  %v1572_v23 = vld [vmem:[%s2200_s17 + $0x190] sm:$0xff] }
 0x167   : >> { %1569 = vst [vmem:[%s2196_s11 + $0x180] sm:$0xff] %v1568_v21  ;;  %1571 = vst [vmem:[%s2196_s11 + $0x188] sm:$0xff] %v1570_v22  ;;  %v1574_v24 = vld [vmem:[%s2200_s17 + $0x198] sm:$0xff]  ;;  %v1576_v25 = vld [vmem:[%s2200_s17 + $0x1a0] sm:$0xff] }
 0x168   : >> { %1573 = vst [vmem:[%s2196_s11 + $0x190] sm:$0xff] %v1572_v23  ;;  %v1578_v26 = vld [vmem:[%s2200_s17 + $0x1a8] sm:$0xff]  ;;  %1575 = vst [vmem:[%s2196_s11 + $0x198] sm:$0xff] %v1574_v24  ;;  %v1580_v27 = vld [vmem:[%s2200_s17 + $0x1b0] sm:$0xff]  ;;  %1468 = sbr.rel (!%p1465_p13) target bundleno = 334 (0x14e), region = 129 }
 0x169   : >> { %1577 = vst [vmem:[%s2196_s11 + $0x1a0] sm:$0xff] %v1576_v25  ;;  %1579 = vst [vmem:[%s2196_s11 + $0x1a8] sm:$0xff] %v1578_v26  ;;  %v1582_v28 = vld [vmem:[%s2200_s17 + $0x1b8] sm:$0xff]  ;;  %v1584_v29 = vld [vmem:[%s2200_s17 + $0x1c0] sm:$0xff] }
 0x16a   : >> { %1581 = vst [vmem:[%s2196_s11 + $0x1b0] sm:$0xff] %v1580_v27  ;;  %1583 = vst [vmem:[%s2196_s11 + $0x1b8] sm:$0xff] %v1582_v28  ;;  %v1586_v30 = vld [vmem:[%s2200_s17 + $0x1c8] sm:$0xff]  ;;  %v1588_v31 = vld [vmem:[%s2200_s17 + $0x1d0] sm:$0xff] }
 0x16b   : >> { %1585 = vst [vmem:[%s2196_s11 + $0x1c0] sm:$0xff] %v1584_v29  ;;  %v1590_v32 = vld [vmem:[%s2200_s17 + $0x1d8] sm:$0xff]  ;;  %1587 = vst [vmem:[%s2196_s11 + $0x1c8] sm:$0xff] %v1586_v30  ;;  %v1592_v33 = vld [vmem:[%s2200_s17 + $0x1e0] sm:$0xff] }
 0x16c   : >> { %1589 = vst [vmem:[%s2196_s11 + $0x1d0] sm:$0xff] %v1588_v31  ;;  %1591 = vst [vmem:[%s2196_s11 + $0x1d8] sm:$0xff] %v1590_v32  ;;  %v1594_v34 = vld [vmem:[%s2200_s17 + $0x1e8] sm:$0xff]  ;;  %v1596_v35 = vld [vmem:[%s2200_s17 + $0x1f0] sm:$0xff] }
 0x16d   : >> { %1593 = vst [vmem:[%s2196_s11 + $0x1e0] sm:$0xff] %v1592_v33  ;;  %1595 = vst [vmem:[%s2196_s11 + $0x1e8] sm:$0xff] %v1594_v34  ;;  %v1598_v36 = vld [vmem:[%s2200_s17 + $0x1f8] sm:$0xff]  ;;  %s2929_s17 = smov %s2791_s27 }
 0x16e   : >> { %1597 = vst [vmem:[%s2196_s11 + $0x1f0] sm:$0xff] %v1596_v35  ;;  %1599 = vst [vmem:[%s2196_s11 + $0x1f8] sm:$0xff] %v1598_v36  ;;  %s2928_s11 = smov %s2794_s28 }
 0x16f PF: > { %s2899_s29 = sand.u32 63, %s2938_s9   ;;  %s1863_s30 = sshll.u32 %s2724_s23, 9 }
 0x170   : > { %s1611_s3 = scalar_lea.vmem %s2525_s8, %s1863_s30 [#allocation3]   ;;  %s1613_s4 = scalar_lea.vmem %s2718_s20, %s1863_s30  }
 0x171   : > { %p1857_p0 = scmp.le.s32.totalorder %s2899_s29, 0 }
 0x172   : > { %s2210_s5 = smov (!%p1857_p0), %s1613_s4   ;;  %s2214_s6 = smov (!%p1857_p0), %s1611_s3  }
 0x173   : > { %1718 = sbr.rel (%p1857_p0) target bundleno = 388 (0x184), region = 134  ;;  %s2218_s7 = smov (!%p1857_p0), 0  }
 0x174   : > { %s2222_s14 = smov (!%p1857_p0), 0  }
 0x17a LB: >> { %v1623_v37 = vld [vmem:[%s2216_s6] sm:$0xff]  ;;  %s1625_s9 = sadd.s32 1, %s2220_s7  ;;  %s1617_s14 = sadd.s32 1, %s2224_s14   ;;  %s2224_s14 = sphi %s2222_s14, %s1617_s14   ;;  %s2220_s7 = sphi %s2218_s7, %s2219_s7   ;;  %s2216_s6 = sphi %s2214_s6, %s1630_s6   ;;  %s2212_s5 = sphi %s2210_s5, %s1631_s5  }
 0x17b   : >> { %1624 = vst [vmem:[%s2212_s5] sm:$0xff] %v1623_v37  ;;  %p1626_p1 = scmp.ge.s32.totalorder %s1625_s9, %s2899_s29  ;;  %p1616_p2 = scmp.ge.s32.totalorder %s1617_s14, %s2899_s29 }
 0x17d   : >> { %s2942_s9 = smov (%p1626_p1, %s1625_s9), 0  ;;  %1619 = sbr.rel (!%p1616_p2) target bundleno = 378 (0x17a), region = 140 }
 0x17e   : >> { %s1858_s8 = sshll.u32 %s2942_s9, 3  ;;  %s2219_s7 = smov %s2942_s9  }
 0x17f   : >> { %s1630_s6 = scalar_lea.vmem %s1611_s3, %s1858_s8 [#allocation3]   ;;  %s1631_s5 = scalar_lea.vmem %s1613_s4, %s1858_s8  }
 0x184 PF: > { %s12_s13 = sadd.s32 1, %s2192_s13   ;;  %s2931_s9 = smov %s2180_s10 }
 0x185   : > { %p9_p3 = scmp.ge.s32.totalorder %s12_s13, 4   ;;  %s2932_s10 = smov %s2283_s19 }
 0x186   : > { %s2933_s11 = smov %s2188_s12  ;;  %s2934_s12 = smov %s2936_s15 }
 0x187   :  { %11 = sbr.rel (!%p9_p3) target bundleno = 3 (0x3), region = 151 }

// kernel: tile.88
= control target key start
LH: loop header
LB: loop body
LE: loop exit
PB: predicated region body
PF: predicated region fallthrough
CT: control target
= control target key end

     0   :  { %s40_s0 = inlined_call_operand.vmem [shape: f32[8], index: 0, kind: input, shape index: {}]   ;;  %s41_s1 = inlined_call_operand.vmem [shape: f32[32,8], index: 1, kind: output, shape index: {}]  }
   0x1   :  { %v4_v0 = vld [vmem:[%s40_s0] ss:$0 sm:$0xff] }
   0x2   :  { %5 = vst [vmem:[%s41_s1] sm:$0xff] %v4_v0  ;;  %12 = vst [vmem:[%s41_s1 + $0x8] sm:$0xff] %v4_v0 }
   0x3   :  { %13 = vst [vmem:[%s41_s1 + $0x10] sm:$0xff] %v4_v0  ;;  %14 = vst [vmem:[%s41_s1 + $0x18] sm:$0xff] %v4_v0 }

// kernel: tile.89
= control target key start
LH: loop header
LB: loop body
LE: loop exit
PB: predicated region body
PF: predicated region fallthrough
CT: control target
= control target key end

     0   :  { %s7_s6 = smov 3  ;;  %s21_s9 = smov 3  ;;  %vm4_vm0 = vcmask 64512   ;;  %vm11_vm1 = vcmask 1048512   ;;  %vm18_vm2 = vcmask 982912   ;;  %vm25_vm3 = vcmask 917312   ;;  %s232_s0 = inlined_call_operand.vmem [shape: f32[32,8], index: 0, kind: input, shape index: {}]   ;;  %s233_s1 = inlined_call_operand.vmem [shape: f32[1,256], index: 1, kind: output, shape index: {}]  }
   0x1   :  { %v122_v0 = vld [vmem:[%s232_s0 + $0xf] ss:$16 sm:%s7_s6]   ;;  %s153_s10 = smov 120   ;;  %v124_v1 = vld [vmem:[%s232_s0 + $0xd] ss:$16 sm:%s21_s9]   ;;  %s14_s13 = smov 3 }
   0x2   :  { %9 = vrot.lane.b32.xlu0 %v122_v0, %s153_s10  ;;  %s154_s14 = smov 104   ;;  %v123_v2 = vld [vmem:[%s232_s0 + $0xe] ss:$16 sm:%s14_s13]   ;;  %s28_s17 = smov 3  ;;  %vm32_vm4 = vcmask 851712   ;;  %vm39_vm5 = vcmask 786112  }
   0x3   :  { %23 = vrot.lane.b32.xlu1 %v124_v1, %s154_s14  ;;  %v125_v3 = vld [vmem:[%s232_s0 + $0xc] ss:$16 sm:%s28_s17]   ;;  %s35_s20 = smov 3  ;;  %s42_s21 = smov 3  ;;  %vm46_vm6 = vcmask 720512   ;;  %vm53_vm7 = vcmask 654912  }
   0x4   :  { %s155_s22 = smov 112   ;;  %s156_s23 = smov 96   ;;  %v126_v4 = vld [vmem:[%s232_s0 + $0xb] ss:$16 sm:%s35_s20]   ;;  %v127_v5 = vld [vmem:[%s232_s0 + $0xa] ss:$16 sm:%s42_s21]  }
   0x5   :  { %s49_s28 = smov 3  ;;  %s56_s29 = smov 3  ;;  %vm60_vm8 = vcmask 589312   ;;  %vm67_vm9 = vcmask 523712   ;;  %vm74_vm10 = vcmask 458112   ;;  %vm81_vm11 = vcmask 392512  }
   0x6   :  { %16 = vrot.lane.b32.xlu0 %v123_v2, %s155_s22  ;;  %s157_s30 = smov 88   ;;  %s158_s2 = smov 80   ;;  %v128_v6 = vld [vmem:[%s232_s0 + $0x9] ss:$16 sm:%s49_s28]   ;;  %vm88_vm12 = vcmask 326912   ;;  %vm95_vm13 = vcmask 261312  }
   0x7   :  { %30 = vrot.lane.b32.xlu1 %v125_v3, %s156_s23  ;;  %v129_v7 = vld [vmem:[%s232_s0 + $0x8] ss:$16 sm:%s56_s29]   ;;  %s63_s7 = smov 3  ;;  %s70_s8 = smov 3  ;;  %vm102_vm14 = vcmask 195712   ;;  %vm109_vm15 = vcmask 130112  }
   0x8   :  { %s159_s9 = smov 72   ;;  %s160_s10 = smov 64   ;;  %v130_v8 = vld [vmem:[%s232_s0 + $0x7] ss:$16 sm:%s63_s7]   ;;  %v131_v9 = vld [vmem:[%s232_s0 + $0x6] ss:$16 sm:%s70_s8]  }
   0x9   :  { %s2_s13 = smov 3  ;;  %s77_s16 = smov 3 }
   0xa   :  { %37 = vrot.lane.b32.xlu0 %v126_v4, %s157_s30  ;;  %v3_v10 = vld [vmem:[%s232_s0] ss:$16 sm:%s2_s13]   ;;  %s84_s19 = smov 3  ;;  %s161_s20 = smov 56  }
   0xb   :  { %44 = vrot.lane.b32.xlu1 %v127_v5, %s158_s2  ;;  %5 = vst.msk [vmem:[#allocation0] ss:$8 sm:$0x3] %vm4_vm0, %v3_v10   ;;  %s162_s21 = smov 48   ;;  %v132_v11 = vld [vmem:[%s232_s0 + $0x5] ss:$16 sm:%s77_s16]  }
   0xc   :  { %v133_v12 = vld [vmem:[%s232_s0 + $0x4] ss:$16 sm:%s84_s19]   ;;  %s91_s26 = smov 3  ;;  %s98_s27 = smov 3 }
   0xd   :  { %s163_s28 = smov 40   ;;  %s164_s29 = smov 32   ;;  %v134_v13 = vld [vmem:[%s232_s0 + $0x3] ss:$16 sm:%s91_s26]   ;;  %v135_v14 = vld [vmem:[%s232_s0 + $0x2] ss:$16 sm:%s98_s27]  }
   0xe   :  { %51 = vrot.lane.b32.xlu0 %v128_v6, %s159_s9  ;;  %s105_s5 = smov 3  ;;  %s165_s6 = smov 24  }
   0xf   :  { %58 = vrot.lane.b32.xlu1 %v129_v7, %s160_s10  ;;  %s166_s7 = smov 16   ;;  %v136_v15 = vld [vmem:[%s232_s0 + $0x1] ss:$16 sm:%s105_s5]   ;;  %s167_s0 = smov 8  }
  0x12   :  { %65 = vrot.lane.b32.xlu0 %v130_v8, %s161_s20 }
  0x13   :  { %72 = vrot.lane.b32.xlu1 %v131_v9, %s162_s21 }
  0x16   :  { %79 = vrot.lane.b32.xlu0 %v132_v11, %s163_s28 }
  0x17   :  { %86 = vrot.lane.b32.xlu1 %v133_v12, %s164_s29 }
  0x1a   :  { %93 = vrot.lane.b32.xlu0 %v134_v13, %s165_s6 }
  0x1b   :  { %100 = vrot.lane.b32.xlu1 %v135_v14, %s166_s7 }
  0x1e   :  { %107 = vrot.lane.b32.xlu0 %v136_v15, %s167_s0 }
  0x74   :  { %v10_v16 = vpop.permute.xlu0 %9  }
  0x75   :  { %12 = vst.msk [vmem:[#allocation0] ss:$8 sm:$0x3] %vm11_vm1, %v10_v16   ;;  %v24_v17 = vpop.permute.xlu1 %23  }
  0x78   :  { %v17_v18 = vpop.permute.xlu0 %16  }
  0x79   :  { %19 = vst.msk [vmem:[#allocation0] ss:$8 sm:$0x3] %vm18_vm2, %v17_v18   ;;  %v31_v19 = vpop.permute.xlu1 %30  }
  0x7a   :  { %26 = vst.msk [vmem:[#allocation0] ss:$8 sm:$0x3] %vm25_vm3, %v24_v17  }
  0x7b   :  { %33 = vst.msk [vmem:[#allocation0] ss:$8 sm:$0x3] %vm32_vm4, %v31_v19  }
  0x7c   :  { %v38_v20 = vpop.permute.xlu0 %37  }
  0x7d   :  { %40 = vst.msk [vmem:[#allocation0] ss:$8 sm:$0x3] %vm39_vm5, %v38_v20   ;;  %v45_v21 = vpop.permute.xlu1 %44  }
  0x7e   :  { %47 = vst.msk [vmem:[#allocation0] ss:$8 sm:$0x3] %vm46_vm6, %v45_v21  }
  0x80   :  { %v52_v22 = vpop.permute.xlu0 %51  }
  0x81   :  { %54 = vst.msk [vmem:[#allocation0] ss:$8 sm:$0x3] %vm53_vm7, %v52_v22   ;;  %v59_v23 = vpop.permute.xlu1 %58  }
  0x82   :  { %61 = vst.msk [vmem:[#allocation0] ss:$8 sm:$0x3] %vm60_vm8, %v59_v23  }
  0x84   :  { %v66_v24 = vpop.permute.xlu0 %65  }
  0x85   :  { %68 = vst.msk [vmem:[#allocation0] ss:$8 sm:$0x3] %vm67_vm9, %v66_v24   ;;  %v73_v25 = vpop.permute.xlu1 %72  }
  0x86   :  { %75 = vst.msk [vmem:[#allocation0] ss:$8 sm:$0x3] %vm74_vm10, %v73_v25  }
  0x88   :  { %v80_v26 = vpop.permute.xlu0 %79  }
  0x89   :  { %82 = vst.msk [vmem:[#allocation0] ss:$8 sm:$0x3] %vm81_vm11, %v80_v26   ;;  %v87_v27 = vpop.permute.xlu1 %86  }
  0x8a   :  { %89 = vst.msk [vmem:[#allocation0] ss:$8 sm:$0x3] %vm88_vm12, %v87_v27  }
  0x8c   :  { %v94_v28 = vpop.permute.xlu0 %93  }
  0x8d   :  { %96 = vst.msk [vmem:[#allocation0] ss:$8 sm:$0x3] %vm95_vm13, %v94_v28   ;;  %v101_v29 = vpop.permute.xlu1 %100  }
  0x8e   :  { %103 = vst.msk [vmem:[#allocation0] ss:$8 sm:$0x3] %vm102_vm14, %v101_v29  }
  0x90   :  { %v108_v30 = vpop.permute.xlu0 %107  }
  0x91   :  { %110 = vst.msk [vmem:[#allocation0] ss:$8 sm:$0x3] %vm109_vm15, %v108_v30  }
  0x98   :  { %v114_v31 = vld [vmem:[#allocation0] sm:$0x1]  ;;  %v118_v32 = vld [vmem:[#allocation0 + $0x8] sm:$0x1] }
  0x99   :  { %116 = vst [vmem:[%s233_s1] sm:$0x1] %v114_v31  ;;  %137 = vst [vmem:[%s233_s1 + $0x1] sm:$0x1] %v118_v32 }

// kernel: decoder_forward.19
= control target key start
LH: loop header
LB: loop body
LE: loop exit
PB: predicated region body
PF: predicated region fallthrough
CT: control target
= control target key end

     0   :  { %v32_v0 = vlaneseq  ;;  %s254_s1 = inlined_call_operand.vmem [shape: f32[1,256], index: 1, kind: input, shape index: {}]   ;;  %s255_s2 = inlined_call_operand.vmem [shape: f32[1,256], index: 2, kind: input, shape index: {}]   ;;  %s256_s0 = inlined_call_operand.vmem [shape: f32[64,256], index: 0, kind: input, shape index: {}]   ;;  %s257_s3 = inlined_call_operand.vmem [shape: f32[64,256], index: 3, kind: output, shape index: {}]  }
   0x1   :  { %v30_v2 = vld [vmem:[%s254_s1] sm:$0x3]  ;;  %v15_v6 = vld [vmem:[%s256_s0 + $0x8] sm:$0xff]  ;;  %v16_v8 = vld [vmem:[%s256_s0 + $0x10] sm:$0xff] }
   0x2   :  { %v33_v1 = vshrl.u32 %v32_v0, 7  ;;  %v58_v3 = vld [vmem:[%s255_s2] sm:$0x3]  ;;  %v17_v9 = vld [vmem:[%s256_s0 + $0x18] sm:$0xff]  ;;  %v19_v15 = vld [vmem:[%s256_s0 + $0x28] sm:$0xff] }
   0x3   :  { %v14_v4 = vld [vmem:[%s256_s0] sm:$0xff]  ;;  %v20_v16 = vld [vmem:[%s256_s0 + $0x30] sm:$0xff]  ;;  %v21_v17 = vld [vmem:[%s256_s0 + $0x38] sm:$0xff] }
   0x4   :  { %v34_v5 = vsub.s32 0, %v33_v1  ;;  %v38_v7 = vsub.s32 1, %v33_v1  ;;  %v18_v10 = vld [vmem:[%s256_s0 + $0x20] sm:$0xff]  ;;  %v23_v31 = vld [vmem:[%s256_s0 + $0x48] sm:$0xff]  ;;  %v24_v32 = vld [vmem:[%s256_s0 + $0x50] sm:$0xff] }
   0x5   :  { %v22_v30 = vld [vmem:[%s256_s0 + $0x40] sm:$0xff]  ;;  %v25_v37 = vld [vmem:[%s256_s0 + $0x58] sm:$0xff]  ;;  %v27_v39 = vld [vmem:[%s256_s0 + $0x68] sm:$0xff] }
   0x6   :  { %v163_v11 = vrot.slane %v30_v2, %v34_v5  ;;  %v63_v12 = vrot.slane %v58_v3, %v34_v5  ;;  %v39_v13 = vrot.slane %v30_v2, %v38_v7  ;;  %v67_v14 = vrot.slane %v58_v3, %v38_v7  ;;  %v26_v38 = vld [vmem:[%s256_s0 + $0x60] sm:$0xff]  ;;  %v28_v44 = vld [vmem:[%s256_s0 + $0x70] sm:$0xff]  ;;  %v29_v45 = vld [vmem:[%s256_s0 + $0x78] sm:$0xff] }
   0x8   :  { %v42_v18 = vsub.f32 %v14_v4, %v163_v11  ;;  %v43_v19 = vsub.f32 %v15_v6, %v39_v13  ;;  %v44_v20 = vsub.f32 %v16_v8, %v163_v11  ;;  %v45_v21 = vsub.f32 %v17_v9, %v39_v13 }
   0x9   :  { %v46_v22 = vsub.f32 %v18_v10, %v163_v11  ;;  %v47_v23 = vsub.f32 %v19_v15, %v39_v13  ;;  %v48_v24 = vsub.f32 %v20_v16, %v163_v11  ;;  %v49_v25 = vsub.f32 %v21_v17, %v39_v13 }
   0xa   :  { %v70_v26 = vmul.f32 %v63_v12, %v42_v18  ;;  %v71_v27 = vmul.f32 %v67_v14, %v43_v19  ;;  %v72_v28 = vmul.f32 %v63_v12, %v44_v20  ;;  %v73_v29 = vmul.f32 %v67_v14, %v45_v21 }
   0xb   :  { %v74_v33 = vmul.f32 %v63_v12, %v46_v22  ;;  %v75_v34 = vmul.f32 %v67_v14, %v47_v23  ;;  %v76_v35 = vmul.f32 %v63_v12, %v48_v24  ;;  %v77_v36 = vmul.f32 %v67_v14, %v49_v25 }
   0xc   :  { %v86_v40 = vmax.f32 %v70_v26, 0.0  ;;  %v87_v41 = vmax.f32 %v71_v27, 0.0  ;;  %v88_v42 = vmax.f32 %v72_v28, 0.0  ;;  %v89_v43 = vmax.f32 %v73_v29, 0.0 }
   0xd   :  { %v90_v46 = vmax.f32 %v74_v33, 0.0  ;;  %v91_v47 = vmax.f32 %v75_v34, 0.0  ;;  %v92_v48 = vmax.f32 %v76_v35, 0.0  ;;  %v93_v49 = vmax.f32 %v77_v36, 0.0 }
   0xe   :  { %102 = vst [vmem:[%s257_s3] sm:$0xff] %v86_v40  ;;  %103 = vst [vmem:[%s257_s3 + $0x8] sm:$0xff] %v87_v41  ;;  %v50_v50 = vsub.f32 %v22_v30, %v163_v11  ;;  %v51_v51 = vsub.f32 %v23_v31, %v39_v13  ;;  %v52_v52 = vsub.f32 %v24_v32, %v163_v11 }
   0xf   :  { %104 = vst [vmem:[%s257_s3 + $0x10] sm:$0xff] %v88_v42  ;;  %105 = vst [vmem:[%s257_s3 + $0x18] sm:$0xff] %v89_v43  ;;  %v53_v53 = vsub.f32 %v25_v37, %v39_v13  ;;  %v54_v54 = vsub.f32 %v26_v38, %v163_v11  ;;  %v55_v55 = vsub.f32 %v27_v39, %v39_v13 }
  0x10   :  { %106 = vst [vmem:[%s257_s3 + $0x20] sm:$0xff] %v90_v46  ;;  %107 = vst [vmem:[%s257_s3 + $0x28] sm:$0xff] %v91_v47  ;;  %v56_v56 = vsub.f32 %v28_v44, %v163_v11  ;;  %v57_v57 = vsub.f32 %v29_v45, %v39_v13  ;;  %v78_v58 = vmul.f32 %v63_v12, %v50_v50 }
  0x11   :  { %108 = vst [vmem:[%s257_s3 + $0x30] sm:$0xff] %v92_v48  ;;  %109 = vst [vmem:[%s257_s3 + $0x38] sm:$0xff] %v93_v49  ;;  %v79_v59 = vmul.f32 %v67_v14, %v51_v51  ;;  %v80_v60 = vmul.f32 %v63_v12, %v52_v52  ;;  %v81_v61 = vmul.f32 %v67_v14, %v53_v53 }
  0x12   :  { %v82_v62 = vmul.f32 %v63_v12, %v54_v54  ;;  %v83_v63 = vmul.f32 %v67_v14, %v55_v55  ;;  %v84_v0 = vmul.f32 %v63_v12, %v56_v56  ;;  %v85_v1 = vmul.f32 %v67_v14, %v57_v57 }
  0x13   :  { %v94_v2 = vmax.f32 %v78_v58, 0.0  ;;  %v95_v3 = vmax.f32 %v79_v59, 0.0  ;;  %v96_v4 = vmax.f32 %v80_v60, 0.0  ;;  %v97_v5 = vmax.f32 %v81_v61, 0.0 }
  0x14   :  { %v98_v6 = vmax.f32 %v82_v62, 0.0  ;;  %v99_v7 = vmax.f32 %v83_v63, 0.0  ;;  %v100_v8 = vmax.f32 %v84_v0, 0.0  ;;  %v101_v9 = vmax.f32 %v85_v1, 0.0 }
  0x15   :  { %110 = vst [vmem:[%s257_s3 + $0x40] sm:$0xff] %v94_v2  ;;  %111 = vst [vmem:[%s257_s3 + $0x48] sm:$0xff] %v95_v3 }
  0x16   :  { %112 = vst [vmem:[%s257_s3 + $0x50] sm:$0xff] %v96_v4  ;;  %113 = vst [vmem:[%s257_s3 + $0x58] sm:$0xff] %v97_v5 }
  0x17   :  { %114 = vst [vmem:[%s257_s3 + $0x60] sm:$0xff] %v98_v6  ;;  %115 = vst [vmem:[%s257_s3 + $0x68] sm:$0xff] %v99_v7 }
  0x18   :  { %116 = vst [vmem:[%s257_s3 + $0x70] sm:$0xff] %v100_v8  ;;  %117 = vst [vmem:[%s257_s3 + $0x78] sm:$0xff] %v101_v9 }

// kernel: decoder_forward.20
= control target key start
LH: loop header
LB: loop body
LE: loop exit
PB: predicated region body
PF: predicated region fallthrough
CT: control target
= control target key end

     0   :  { %s2212_s9 = smov 0   ;;  %s2214_s10 = smov 0   ;;  %s2878_s0 = inlined_call_operand.vmem [shape: bf16[2178,32], index: 0, kind: input, shape index: {}]   ;;  %s2879_s1 = inlined_call_operand.vmem [shape: bf16[32,16], index: 1, kind: input, shape index: {}]   ;;  %s2880_s2 = inlined_call_operand.vmem [shape: f32[2178,16], index: 2, kind: output, shape index: {}]  }
   0x1   :  { %s2216_s11 = smov 0   ;;  %s2218_s12 = smov 0  }
   0x2   :  { %s2220_s13 = smov 0  }
   0x3 LB: > { %s1752_s14 = sadd.s32 4294967295, %s2162_s13   ;;  %s31_s15 = sadd.s32 1, %s2158_s12  ;;  %s2162_s13 = sphi %s2220_s13, %s12_s13   ;;  %s2158_s12 = sphi %s2218_s12, %s2890_s12   ;;  %s2154_s11 = sphi %s2216_s11, %s2889_s11   ;;  %s2150_s10 = sphi %s2214_s10, %s2888_s10   ;;  %s2146_s9 = sphi %s2212_s9, %s2887_s9  }
   0x4   : > { %p33_p0 = scmp.ge.s32.totalorder %s31_s15, 5  ;;  %s96_s16 = sadd.s32 1, %s2150_s10 }
   0x5   : > { %p106_p1 = scmp.ne.s32.totalorder %s2150_s10, %s2146_s9  ;;  %p107_p2 = scmp.eq.s32.totalorder %s1752_s14, 4 }
   0x6   : > { %s2892_s15 = smov (%p33_p0, %s31_s15), 0  ;;  %p1757_p4 = scmp.ge.s32.totalorder %s2162_s13, 1 }
   0x7   : > { %p2244_p3 = por %p107_p2, %p106_p1  ;;  %s91_s18 = ssub.s32 %s2158_s12, %s2892_s15 }
   0x8   : > { %p163_p5 = scmp.lt.s32.totalorder %s2162_s13, 6  ;;  %p94_p6 = scmp.eq.s32.totalorder %s91_s18, 0 }
   0xa   : > { %p164_p7 = pnand %p1757_p4, %p163_p5 }
   0xb   : > { %s2253_s19 = scalar_select %p94_p6, %s2150_s10, %s96_s16  }
   0xc   : > { %167 = sbr.rel (%p164_p7) target bundleno = 383 (0x17f), region = 28  ;;  %v2058_v0 = vld [vmem:[%s2879_s1] sm:$0xff] (!%p164_p7)   ;;  %s2259_s22 = sshll.u32 (!%p164_p7), %s2154_s11, 6  ;;  %v2264_v1 = vld [vmem:[%s2879_s1 + $0x8] sm:$0xff] (!%p164_p7)   ;;  %vm235_vm0 = vcmask (!%p164_p7), 130048   ;;  %v2196_v2 = vmov (!%p164_p7), 0.0  }
   0xd   : > { %p204_p8 = scmp.lt.s32.totalorder (!%p164_p7), %s2259_s22, 272  ;;  %1881 = vmatprep.subr.bf16.mxu0 (!%p164_p7), %v2058_v0  ;;  %1949 = vmatprep.subr.bf16.mxu1 (!%p164_p7), %v2058_v0  ;;  %238 = vst.msk [vmem:[#allocation2 + $0x10] sm:$0xff] (!%p164_p7), %vm235_vm0, %v2196_v2  ;;  %236 = vst.msk [vmem:[#allocation2] sm:$0xff] (!%p164_p7), %vm235_vm0, %v2196_v2  ;;  %vm604_vm1 = vcmask (!%p164_p7), 261120   ;;  %s196_s30 = sand.u32 (!%p164_p7), 1, %s2146_s9  }
   0xe   : > { %1882 = vmatpush3.bf16.msra.mxu0 (!%p164_p7), %v2058_v0  ;;  %1951 = vmatpush3.bf16.msra.mxu1 (!%p164_p7), %v2058_v0  ;;  %237 = vst.msk [vmem:[#allocation2 + $0x8] sm:$0xff] (!%p164_p7), %vm235_vm0, %v2196_v2  ;;  %239 = vst.msk [vmem:[#allocation2 + $0x18] sm:$0xff] (!%p164_p7), %vm235_vm0, %v2196_v2  ;;  %s1758_s3 = sshll.u32 (!%p164_p7), %s196_s30, 9 }
   0xf   : > { %240 = vst.msk [vmem:[#allocation2 + $0x20] sm:$0xff] (!%p164_p7), %vm235_vm0, %v2196_v2  ;;  %241 = vst.msk [vmem:[#allocation2 + $0x28] sm:$0xff] (!%p164_p7), %vm235_vm0, %v2196_v2  ;;  %1883 = vmatprep.subr.bf16.mxu0 (!%p164_p7), %v2264_v1  ;;  %1950 = vmatprep.subr.bf16.mxu1 (!%p164_p7), %v2264_v1  ;;  %s2481_s4 = scalar_lea.vmem (!%p164_p7), [#allocation3], %s1758_s3  }
  0x10   : > { %242 = vst.msk [vmem:[#allocation2 + $0x30] sm:$0xff] (!%p164_p7), %vm235_vm0, %v2196_v2  ;;  %243 = vst.msk [vmem:[#allocation2 + $0x38] sm:$0xff] (!%p164_p7), %vm235_vm0, %v2196_v2 }
  0x11   : > { %244 = vst.msk [vmem:[#allocation2 + $0x40] sm:$0xff] (!%p164_p7), %vm235_vm0, %v2196_v2  ;;  %245 = vst.msk [vmem:[#allocation2 + $0x48] sm:$0xff] (!%p164_p7), %vm235_vm0, %v2196_v2 }
  0x12   : > { %246 = vst.msk [vmem:[#allocation2 + $0x50] sm:$0xff] (!%p164_p7), %vm235_vm0, %v2196_v2  ;;  %247 = vst.msk [vmem:[#allocation2 + $0x58] sm:$0xff] (!%p164_p7), %vm235_vm0, %v2196_v2  ;;  %1884 = vmatpush3.bf16.msra.mxu0 (!%p164_p7), %v2264_v1  ;;  %1952 = vmatpush3.bf16.msra.mxu1 (!%p164_p7), %v2264_v1 }
  0x13   : > { %s2268_s25 = scalar_select %p204_p8, %s2259_s22, 272  ;;  %248 = vst.msk [vmem:[#allocation2 + $0x60] sm:$0xff] %vm235_vm0, %v2196_v2  ;;  %249 = vst.msk [vmem:[#allocation2 + $0x68] sm:$0xff] %vm235_vm0, %v2196_v2 }
  0x14   : > { %250 = vst.msk [vmem:[#allocation2 + $0x70] sm:$0xff] %vm235_vm0, %v2196_v2  ;;  %251 = vst.msk [vmem:[#allocation2 + $0x78] sm:$0xff] %vm235_vm0, %v2196_v2  ;;  %v302_v35 = vld [vmem:[#allocation2 + $0x10] sm:$0xff]  ;;  %v300_v37 = vld [vmem:[#allocation2] sm:$0xff]  ;;  %s1258_s5 = ssub.s32 (%p2244_p3), 273, %s2259_s22  ;;  %s1844_s6 = sshll.u32 (%p2244_p3), %s2154_s11, 9 }
  0x15   : > { %252 = vst.msk [vmem:[#allocation2 + $0x80] sm:$0xff] %vm235_vm0, %v2196_v2  ;;  %253 = vst.msk [vmem:[#allocation2 + $0x88] sm:$0xff] %vm235_vm0, %v2196_v2  ;;  %s1760_s26 = sshll.u32 %s2268_s25, 2  ;;  %v303_v40 = vld [vmem:[#allocation2 + $0x18] sm:$0xff]  ;;  %v301_v45 = vld [vmem:[#allocation2 + $0x8] sm:$0xff]  ;;  %p1259_p9 = scmp.lt.s32.totalorder (%p2244_p3), %s1258_s5, 64 }
  0x16   : > { %254 = vst.msk [vmem:[#allocation2 + $0x90] sm:$0xff] %vm235_vm0, %v2196_v2  ;;  %255 = vst.msk [vmem:[#allocation2 + $0x98] sm:$0xff] %vm235_vm0, %v2196_v2  ;;  %s2404_s29 = scalar_lea.vmem %s2878_s0, %s1760_s26  ;;  %v304_v61 = vld [vmem:[#allocation2 + $0x20] sm:$0xff]  ;;  %s2674_s9 = scalar_lea.vmem (%p2244_p3), %s2880_s2, %s1844_s6  }
  0x17   : > { %256 = vst.msk [vmem:[#allocation2 + $0xa0] sm:$0xff] %vm235_vm0, %v2196_v2  ;;  %257 = vst.msk [vmem:[#allocation2 + $0xa8] sm:$0xff] %vm235_vm0, %v2196_v2  ;;  %v2060_v3 = vld [vmem:[%s2404_s29] sm:$0xff]   ;;  %v2062_v5 = vld [vmem:[%s2404_s29 + $0x8] sm:$0xff]  }
  0x18   : > { %258 = vst.msk [vmem:[#allocation2 + $0xb0] sm:$0xff] %vm235_vm0, %v2196_v2  ;;  %259 = vst.msk [vmem:[#allocation2 + $0xb8] sm:$0xff] %vm235_vm0, %v2196_v2  ;;  %v2061_v4 = vld [vmem:[%s2404_s29 + $0x80] sm:$0xff]   ;;  %1885 = vmatprep.mubr.msk.bf16.mxu0 %vm604_vm1, %v2060_v3  ;;  %v2063_v6 = vld [vmem:[%s2404_s29 + $0x88] sm:$0xff]  }
  0x19   : > { %260 = vst.msk [vmem:[#allocation2 + $0xc0] sm:$0xff] %vm235_vm0, %v2196_v2  ;;  %261 = vst.msk [vmem:[#allocation2 + $0xc8] sm:$0xff] %vm235_vm0, %v2196_v2  ;;  %1917 = vmatprep.mubr.msk.bf16.mxu1 %vm604_vm1, %v2061_v4  ;;  %1886 = vmatmul.mubr.msk.bf16.vlgmr.msra.gmra.mrb[0].mxu0 %vm604_vm1, %v2062_v5  ;;  %v2064_v7 = vld [vmem:[%s2404_s29 + $0x10] sm:$0xff]   ;;  %v2066_v9 = vld [vmem:[%s2404_s29 + $0x18] sm:$0xff]  }
  0x1a   : > { %262 = vst.msk [vmem:[#allocation2 + $0xd0] sm:$0xff] %vm235_vm0, %v2196_v2  ;;  %263 = vst.msk [vmem:[#allocation2 + $0xd8] sm:$0xff] %vm235_vm0, %v2196_v2  ;;  %1918 = vmatmul.mubr.msk.bf16.vlgmr.msra.gmra.mrb[0].mxu1 %vm604_vm1, %v2063_v6  ;;  %v2065_v8 = vld [vmem:[%s2404_s29 + $0x90] sm:$0xff]   ;;  %1889 = vmatprep.mubr.msk.bf16.mxu0 %vm604_vm1, %v2064_v7  ;;  %v2067_v10 = vld [vmem:[%s2404_s29 + $0x98] sm:$0xff]  }
  0x1b   : > { %264 = vst.msk [vmem:[#allocation2 + $0xe0] sm:$0xff] %vm235_vm0, %v2196_v2  ;;  %265 = vst.msk [vmem:[#allocation2 + $0xe8] sm:$0xff] %vm235_vm0, %v2196_v2  ;;  %1921 = vmatprep.mubr.msk.bf16.mxu1 %vm604_vm1, %v2065_v8  ;;  %v2068_v11 = vld [vmem:[%s2404_s29 + $0x20] sm:$0xff]   ;;  %v2070_v13 = vld [vmem:[%s2404_s29 + $0x28] sm:$0xff]  }
  0x1c   : > { %266 = vst.msk [vmem:[#allocation2 + $0xf0] sm:$0xff] %vm235_vm0, %v2196_v2  ;;  %267 = vst.msk [vmem:[#allocation2 + $0xf8] sm:$0xff] %vm235_vm0, %v2196_v2  ;;  %v2069_v12 = vld [vmem:[%s2404_s29 + $0xa0] sm:$0xff]   ;;  %v2071_v14 = vld [vmem:[%s2404_s29 + $0xa8] sm:$0xff]  }
  0x1d   : > { %268 = vst.msk [vmem:[#allocation2 + $0x100] sm:$0xff] %vm235_vm0, %v2196_v2  ;;  %269 = vst.msk [vmem:[#allocation2 + $0x108] sm:$0xff] %vm235_vm0, %v2196_v2  ;;  %v2072_v15 = vld [vmem:[%s2404_s29 + $0x30] sm:$0xff]   ;;  %v2074_v17 = vld [vmem:[%s2404_s29 + $0x38] sm:$0xff]  }
  0x1e   : > { %270 = vst.msk [vmem:[#allocation2 + $0x110] sm:$0xff] %vm235_vm0, %v2196_v2  ;;  %271 = vst.msk [vmem:[#allocation2 + $0x118] sm:$0xff] %vm235_vm0, %v2196_v2  ;;  %v2073_v16 = vld [vmem:[%s2404_s29 + $0xb0] sm:$0xff]   ;;  %v2075_v18 = vld [vmem:[%s2404_s29 + $0xb8] sm:$0xff]  }
  0x1f   : > { %272 = vst.msk [vmem:[#allocation2 + $0x120] sm:$0xff] %vm235_vm0, %v2196_v2  ;;  %273 = vst.msk [vmem:[#allocation2 + $0x128] sm:$0xff] %vm235_vm0, %v2196_v2  ;;  %v2076_v19 = vld [vmem:[%s2404_s29 + $0x40] sm:$0xff]   ;;  %v2078_v21 = vld [vmem:[%s2404_s29 + $0x48] sm:$0xff]  }
  0x20   : > { %274 = vst.msk [vmem:[#allocation2 + $0x130] sm:$0xff] %vm235_vm0, %v2196_v2  ;;  %275 = vst.msk [vmem:[#allocation2 + $0x138] sm:$0xff] %vm235_vm0, %v2196_v2  ;;  %v2077_v20 = vld [vmem:[%s2404_s29 + $0xc0] sm:$0xff]   ;;  %v2079_v22 = vld [vmem:[%s2404_s29 + $0xc8] sm:$0xff]  }
  0x21   : > { %276 = vst.msk [vmem:[#allocation2 + $0x140] sm:$0xff] %vm235_vm0, %v2196_v2  ;;  %277 = vst.msk [vmem:[#allocation2 + $0x148] sm:$0xff] %vm235_vm0, %v2196_v2  ;;  %1890 = vmatmul.mubr.msk.bf16.gmra.mrb[4].mxu0 %vm604_vm1, %v2066_v9  ;;  %v2080_v23 = vld [vmem:[%s2404_s29 + $0x50] sm:$0xff]   ;;  %v2082_v25 = vld [vmem:[%s2404_s29 + $0x58] sm:$0xff]  }
  0x22   : > { %278 = vst.msk [vmem:[#allocation2 + $0x150] sm:$0xff] %vm235_vm0, %v2196_v2  ;;  %279 = vst.msk [vmem:[#allocation2 + $0x158] sm:$0xff] %vm235_vm0, %v2196_v2  ;;  %1922 = vmatmul.mubr.msk.bf16.gmra.mrb[4].mxu1 %vm604_vm1, %v2067_v10  ;;  %1893 = vmatprep.mubr.msk.bf16.mxu0 %vm604_vm1, %v2068_v11  ;;  %v2081_v24 = vld [vmem:[%s2404_s29 + $0xd0] sm:$0xff]   ;;  %v2083_v26 = vld [vmem:[%s2404_s29 + $0xd8] sm:$0xff]  }
  0x23   : > { %280 = vst.msk [vmem:[#allocation2 + $0x160] sm:$0xff] %vm235_vm0, %v2196_v2  ;;  %281 = vst.msk [vmem:[#allocation2 + $0x168] sm:$0xff] %vm235_vm0, %v2196_v2  ;;  %1925 = vmatprep.mubr.msk.bf16.mxu1 %vm604_vm1, %v2069_v12  ;;  %v2084_v27 = vld [vmem:[%s2404_s29 + $0x60] sm:$0xff]   ;;  %v2086_v29 = vld [vmem:[%s2404_s29 + $0x68] sm:$0xff]  }
  0x24   : > { %282 = vst.msk [vmem:[#allocation2 + $0x170] sm:$0xff] %vm235_vm0, %v2196_v2  ;;  %283 = vst.msk [vmem:[#allocation2 + $0x178] sm:$0xff] %vm235_vm0, %v2196_v2  ;;  %v2085_v28 = vld [vmem:[%s2404_s29 + $0xe0] sm:$0xff]   ;;  %v2087_v30 = vld [vmem:[%s2404_s29 + $0xe8] sm:$0xff]  }
  0x25   : > { %284 = vst.msk [vmem:[#allocation2 + $0x180] sm:$0xff] %vm235_vm0, %v2196_v2  ;;  %285 = vst.msk [vmem:[#allocation2 + $0x188] sm:$0xff] %vm235_vm0, %v2196_v2  ;;  %v2088_v31 = vld [vmem:[%s2404_s29 + $0x70] sm:$0xff]   ;;  %v2090_v33 = vld [vmem:[%s2404_s29 + $0x78] sm:$0xff]  }
  0x26   : > { %286 = vst.msk [vmem:[#allocation2 + $0x190] sm:$0xff] %vm235_vm0, %v2196_v2  ;;  %287 = vst.msk [vmem:[#allocation2 + $0x198] sm:$0xff] %vm235_vm0, %v2196_v2  ;;  %v2089_v32 = vld [vmem:[%s2404_s29 + $0xf0] sm:$0xff]   ;;  %v2091_v34 = vld [vmem:[%s2404_s29 + $0xf8] sm:$0xff]  }
  0x27   : > { %288 = vst.msk [vmem:[#allocation2 + $0x1a0] sm:$0xff] %vm235_vm0, %v2196_v2  ;;  %289 = vst.msk [vmem:[#allocation2 + $0x1a8] sm:$0xff] %vm235_vm0, %v2196_v2  ;;  %v334_v36 = vld [vmem:[#allocation2 + $0x110] sm:$0xff]  ;;  %v332_v39 = vld [vmem:[#allocation2 + $0x100] sm:$0xff] }
  0x28   : > { %290 = vst.msk [vmem:[#allocation2 + $0x1b0] sm:$0xff] %vm235_vm0, %v2196_v2  ;;  %291 = vst.msk [vmem:[#allocation2 + $0x1b8] sm:$0xff] %vm235_vm0, %v2196_v2  ;;  %v335_v44 = vld [vmem:[#allocation2 + $0x118] sm:$0xff]  ;;  %v333_v50 = vld [vmem:[#allocation2 + $0x108] sm:$0xff] }
  0x29   : > { %292 = vst.msk [vmem:[#allocation2 + $0x1c0] sm:$0xff] %vm235_vm0, %v2196_v2  ;;  %293 = vst.msk [vmem:[#allocation2 + $0x1c8] sm:$0xff] %vm235_vm0, %v2196_v2  ;;  %1894 = vmatmul.mubr.msk.bf16.gmra.mrb[8].mxu0 %vm604_vm1, %v2070_v13  ;;  %v306_v59 = vld [vmem:[#allocation2 + $0x30] sm:$0xff]  ;;  %v336_v63 = vld [vmem:[#allocation2 + $0x120] sm:$0xff] }
  0x2a   : > { %294 = vst.msk [vmem:[#allocation2 + $0x1d0] sm:$0xff] %vm235_vm0, %v2196_v2  ;;  %295 = vst.msk [vmem:[#allocation2 + $0x1d8] sm:$0xff] %vm235_vm0, %v2196_v2  ;;  %1926 = vmatmul.mubr.msk.bf16.gmra.mrb[8].mxu1 %vm604_vm1, %v2071_v14  ;;  %1897 = vmatprep.mubr.msk.bf16.mxu0 %vm604_vm1, %v2072_v15  ;;  %v338_v60 = vld [vmem:[#allocation2 + $0x130] sm:$0xff]  ;;  %v307_v0 = vld [vmem:[#allocation2 + $0x38] sm:$0xff] }
  0x2b   : > { %296 = vst.msk [vmem:[#allocation2 + $0x1e0] sm:$0xff] %vm235_vm0, %v2196_v2  ;;  %297 = vst.msk [vmem:[#allocation2 + $0x1e8] sm:$0xff] %vm235_vm0, %v2196_v2  ;;  %1929 = vmatprep.mubr.msk.bf16.mxu1 %vm604_vm1, %v2073_v16  ;;  %v339_v4 = vld [vmem:[#allocation2 + $0x138] sm:$0xff]  ;;  %v305_v5 = vld [vmem:[#allocation2 + $0x28] sm:$0xff] }
  0x2c   : > { %298 = vst.msk [vmem:[#allocation2 + $0x1f0] sm:$0xff] %vm235_vm0, %v2196_v2  ;;  %299 = vst.msk [vmem:[#allocation2 + $0x1f8] sm:$0xff] %vm235_vm0, %v2196_v2  ;;  %v337_v11 = vld [vmem:[#allocation2 + $0x128] sm:$0xff] }
  0x31   : > { %1898 = vmatmul.mubr.msk.bf16.gmra.mrb[12].mxu0 %vm604_vm1, %v2074_v17 }
  0x32   : > { %1930 = vmatmul.mubr.msk.bf16.gmra.mrb[12].mxu1 %vm604_vm1, %v2075_v18  ;;  %1901 = vmatprep.mubr.msk.bf16.mxu0 %vm604_vm1, %v2076_v19 }
  0x33   : > { %1933 = vmatprep.mubr.msk.bf16.mxu1 %vm604_vm1, %v2077_v20 }
  0x39   : > { %1902 = vmatmul.mubr.msk.bf16.gmra.mrb[16].mxu0 %vm604_vm1, %v2078_v21 }
  0x3a   : > { %1934 = vmatmul.mubr.msk.bf16.gmra.mrb[16].mxu1 %vm604_vm1, %v2079_v22  ;;  %1905 = vmatprep.mubr.msk.bf16.mxu0 %vm604_vm1, %v2080_v23 }
  0x3b   : > { %1937 = vmatprep.mubr.msk.bf16.mxu1 %vm604_vm1, %v2081_v24 }
  0x41   : > { %1906 = vmatmul.mubr.msk.bf16.gmra.mrb[20].mxu0 %vm604_vm1, %v2082_v25 }
  0x42   : > { %1938 = vmatmul.mubr.msk.bf16.gmra.mrb[20].mxu1 %vm604_vm1, %v2083_v26  ;;  %1909 = vmatprep.mubr.msk.bf16.mxu0 %vm604_vm1, %v2084_v27  ;;  %v310_v27 = vld [vmem:[#allocation2 + $0x50] sm:$0xff] }
  0x43   : > { %1941 = vmatprep.mubr.msk.bf16.mxu1 %vm604_vm1, %v2085_v28  ;;  %v342_v28 = vld [vmem:[#allocation2 + $0x150] sm:$0xff] }
  0x49   : > { %1910 = vmatmul.mubr.msk.bf16.gmra.mrb[24].mxu0 %vm604_vm1, %v2086_v29  ;;  %v308_v29 = vld [vmem:[#allocation2 + $0x40] sm:$0xff] }
  0x4a   : > { %1942 = vmatmul.mubr.msk.bf16.gmra.mrb[24].mxu1 %vm604_vm1, %v2087_v30  ;;  %1913 = vmatprep.mubr.msk.bf16.mxu0 %vm604_vm1, %v2088_v31  ;;  %v340_v31 = vld [vmem:[#allocation2 + $0x140] sm:$0xff] }
  0x4b   : > { %1945 = vmatprep.mubr.msk.bf16.mxu1 %vm604_vm1, %v2089_v32  ;;  %v311_v32 = vld [vmem:[#allocation2 + $0x58] sm:$0xff] }
  0x51   : > { %1914 = vmatmul.mubr.msk.bf16.gmra.mrb[28].mxu0 %vm604_vm1, %v2090_v33 }
  0x52   : > { %1946 = vmatmul.mubr.msk.bf16.gmra.mrb[28].mxu1 %vm604_vm1, %v2091_v34 }
  0xec   : > { %v1887_v38 = vpop.f32.mrb[0].mxu0 }
  0xed   : > { %v992_v41 = vadd.f32 %v1887_v38, %v302_v35  ;;  %v1919_v42 = vpop.f32.mrb[0].mxu1  ;;  %v735_v43 = vpop.f32.mrb[1].mxu0 }
  0xee   : > { %v1024_v46 = vadd.f32 %v1919_v42, %v334_v36  ;;  %v990_v47 = vadd.f32 %v735_v43, %v300_v37  ;;  %v863_v48 = vpop.f32.mrb[1].mxu1  ;;  %v1888_v49 = vpop.f32.mrb[2].mxu0  ;;  %v343_v36 = vld [vmem:[#allocation2 + $0x158] sm:$0xff]  ;;  %v309_v37 = vld [vmem:[#allocation2 + $0x48] sm:$0xff] }
  0xef   : > { %1057 = vst.msk [vmem:[#allocation2 + $0x10] sm:$0xff] %vm235_vm0, %v992_v41  ;;  %v1022_v51 = vadd.f32 %v863_v48, %v332_v39  ;;  %v993_v52 = vadd.f32 %v1888_v49, %v303_v40  ;;  %v1920_v53 = vpop.f32.mrb[2].mxu1  ;;  %v738_v54 = vpop.f32.mrb[3].mxu0  ;;  %v341_v43 = vld [vmem:[#allocation2 + $0x148] sm:$0xff] }
  0xf0   : > { %1089 = vst.msk [vmem:[#allocation2 + $0x110] sm:$0xff] %vm235_vm0, %v1024_v46  ;;  %1055 = vst.msk [vmem:[#allocation2] sm:$0xff] %vm235_vm0, %v990_v47  ;;  %v1025_v55 = vadd.f32 %v1920_v53, %v335_v44  ;;  %v991_v56 = vadd.f32 %v738_v54, %v301_v45  ;;  %v866_v57 = vpop.f32.mrb[3].mxu1 }
  0xf1   : > { %1087 = vst.msk [vmem:[#allocation2 + $0x100] sm:$0xff] %vm235_vm0, %v1022_v51  ;;  %1058 = vst.msk [vmem:[#allocation2 + $0x18] sm:$0xff] %vm235_vm0, %v993_v52  ;;  %v1023_v58 = vadd.f32 %v866_v57, %v333_v50 }
  0xf2   : > { %1090 = vst.msk [vmem:[#allocation2 + $0x118] sm:$0xff] %vm235_vm0, %v1025_v55  ;;  %1056 = vst.msk [vmem:[#allocation2 + $0x8] sm:$0xff] %vm235_vm0, %v991_v56 }
  0xf3   : > { %1088 = vst.msk [vmem:[#allocation2 + $0x108] sm:$0xff] %vm235_vm0, %v1023_v58 }
  0xf4   : > { %v1891_v62 = vpop.f32.mrb[4].mxu0 }
  0xf5   : > { %v996_v1 = vadd.f32 %v1891_v62, %v306_v59  ;;  %v1923_v2 = vpop.f32.mrb[4].mxu1  ;;  %v751_v3 = vpop.f32.mrb[5].mxu0  ;;  %v314_v59 = vld [vmem:[#allocation2 + $0x70] sm:$0xff] }
  0xf6   : > { %v1124_v6 = vld [vmem:[#allocation2 + $0x10] sm:$0xff]  ;;  %v1028_v7 = vadd.f32 %v1923_v2, %v338_v60  ;;  %v994_v8 = vadd.f32 %v751_v3, %v304_v61  ;;  %v879_v9 = vpop.f32.mrb[5].mxu1  ;;  %v1892_v10 = vpop.f32.mrb[6].mxu0  ;;  %v312_v61 = vld [vmem:[#allocation2 + $0x60] sm:$0xff] }
  0xf7   : > { %1188 = vst.msk [vmem:[%s2481_s4 + $0x10] sm:$0xff] %vm235_vm0, %v1124_v6  ;;  %v1156_v12 = vld [vmem:[#allocation2 + $0x110] sm:$0xff]  ;;  %v1122_v13 = vld [vmem:[#allocation2] sm:$0xff]  ;;  %1061 = vst.msk [vmem:[#allocation2 + $0x30] sm:$0xff] %vm235_vm0, %v996_v1  ;;  %v1026_v14 = vadd.f32 %v879_v9, %v336_v63  ;;  %v997_v15 = vadd.f32 %v1892_v10, %v307_v0  ;;  %v1924_v16 = vpop.f32.mrb[6].mxu1  ;;  %v754_v17 = vpop.f32.mrb[7].mxu0 }
  0xf8   : > { %1220 = vst.msk [vmem:[%s2481_s4 + $0x110] sm:$0xff] %vm235_vm0, %v1156_v12  ;;  %1186 = vst.msk [vmem:[%s2481_s4] sm:$0xff] %vm235_vm0, %v1122_v13  ;;  %v1154_v18 = vld [vmem:[#allocation2 + $0x100] sm:$0xff]  ;;  %v1125_v19 = vld [vmem:[#allocation2 + $0x18] sm:$0xff]  ;;  %v1029_v20 = vadd.f32 %v1924_v16, %v339_v4  ;;  %v995_v21 = vadd.f32 %v754_v17, %v305_v5  ;;  %v882_v22 = vpop.f32.mrb[7].mxu1 }
  0xf9   : > { %1093 = vst.msk [vmem:[#allocation2 + $0x130] sm:$0xff] %vm235_vm0, %v1028_v7  ;;  %1059 = vst.msk [vmem:[#allocation2 + $0x20] sm:$0xff] %vm235_vm0, %v994_v8  ;;  %v1157_v23 = vld [vmem:[#allocation2 + $0x118] sm:$0xff]  ;;  %v1123_v24 = vld [vmem:[#allocation2 + $0x8] sm:$0xff]  ;;  %v1027_v25 = vadd.f32 %v882_v22, %v337_v11 }
  0xfa   : > { %1218 = vst.msk [vmem:[%s2481_s4 + $0x100] sm:$0xff] %vm235_vm0, %v1154_v18  ;;  %1189 = vst.msk [vmem:[%s2481_s4 + $0x18] sm:$0xff] %vm235_vm0, %v1125_v19  ;;  %v1155_v26 = vld [vmem:[#allocation2 + $0x108] sm:$0xff]  ;;  %v346_v60 = vld [vmem:[#allocation2 + $0x170] sm:$0xff] }
  0xfb   : > { %1091 = vst.msk [vmem:[#allocation2 + $0x120] sm:$0xff] %vm235_vm0, %v1026_v14  ;;  %1062 = vst.msk [vmem:[#allocation2 + $0x38] sm:$0xff] %vm235_vm0, %v997_v15  ;;  %v344_v63 = vld [vmem:[#allocation2 + $0x160] sm:$0xff]  ;;  %v315_v0 = vld [vmem:[#allocation2 + $0x78] sm:$0xff] }
  0xfc   : > { %1221 = vst.msk [vmem:[%s2481_s4 + $0x118] sm:$0xff] %vm235_vm0, %v1157_v23  ;;  %1187 = vst.msk [vmem:[%s2481_s4 + $0x8] sm:$0xff] %vm235_vm0, %v1123_v24  ;;  %v1895_v30 = vpop.f32.mrb[8].mxu0  ;;  %v347_v4 = vld [vmem:[#allocation2 + $0x178] sm:$0xff]  ;;  %v313_v5 = vld [vmem:[#allocation2 + $0x68] sm:$0xff] }
  0xfd   : > { %1094 = vst.msk [vmem:[#allocation2 + $0x138] sm:$0xff] %vm235_vm0, %v1029_v20  ;;  %1060 = vst.msk [vmem:[#allocation2 + $0x28] sm:$0xff] %vm235_vm0, %v995_v21  ;;  %v1000_v33 = vadd.f32 %v1895_v30, %v310_v27  ;;  %v1927_v34 = vpop.f32.mrb[8].mxu1  ;;  %v767_v35 = vpop.f32.mrb[9].mxu0  ;;  %v345_v11 = vld [vmem:[#allocation2 + $0x168] sm:$0xff]  ;;  %v318_v27 = vld [vmem:[#allocation2 + $0x90] sm:$0xff] }
  0xfe   : > { %1219 = vst.msk [vmem:[%s2481_s4 + $0x108] sm:$0xff] %vm235_vm0, %v1155_v26  ;;  %1092 = vst.msk [vmem:[#allocation2 + $0x128] sm:$0xff] %vm235_vm0, %v1027_v25  ;;  %v1128_v38 = vld [vmem:[#allocation2 + $0x30] sm:$0xff]  ;;  %v1032_v39 = vadd.f32 %v1927_v34, %v342_v28  ;;  %v998_v40 = vadd.f32 %v767_v35, %v308_v29  ;;  %v895_v41 = vpop.f32.mrb[9].mxu1  ;;  %v1896_v42 = vpop.f32.mrb[10].mxu0  ;;  %v316_v29 = vld [vmem:[#allocation2 + $0x80] sm:$0xff] }
  0xff   : > { %1192 = vst.msk [vmem:[%s2481_s4 + $0x30] sm:$0xff] %vm235_vm0, %v1128_v38  ;;  %1065 = vst.msk [vmem:[#allocation2 + $0x50] sm:$0xff] %vm235_vm0, %v1000_v33  ;;  %v1030_v46 = vadd.f32 %v895_v41, %v340_v31  ;;  %v1001_v47 = vadd.f32 %v1896_v42, %v311_v32  ;;  %v1928_v48 = vpop.f32.mrb[10].mxu1  ;;  %v770_v49 = vpop.f32.mrb[11].mxu0  ;;  %v350_v28 = vld [vmem:[#allocation2 + $0x190] sm:$0xff]  ;;  %v348_v31 = vld [vmem:[#allocation2 + $0x180] sm:$0xff] }
 0x100   : > { %v1160_v44 = vld [vmem:[#allocation2 + $0x130] sm:$0xff]  ;;  %v1126_v45 = vld [vmem:[#allocation2 + $0x20] sm:$0xff]  ;;  %1097 = vst.msk [vmem:[#allocation2 + $0x150] sm:$0xff] %vm235_vm0, %v1032_v39  ;;  %1063 = vst.msk [vmem:[#allocation2 + $0x40] sm:$0xff] %vm235_vm0, %v998_v40  ;;  %v1033_v52 = vadd.f32 %v1928_v48, %v343_v36  ;;  %v999_v53 = vadd.f32 %v770_v49, %v309_v37  ;;  %v898_v54 = vpop.f32.mrb[11].mxu1 }
 0x101   : > { %1224 = vst.msk [vmem:[%s2481_s4 + $0x130] sm:$0xff] %vm235_vm0, %v1160_v44  ;;  %1190 = vst.msk [vmem:[%s2481_s4 + $0x20] sm:$0xff] %vm235_vm0, %v1126_v45  ;;  %v1031_v57 = vadd.f32 %v898_v54, %v341_v43  ;;  %v319_v32 = vld [vmem:[#allocation2 + $0x98] sm:$0xff]  ;;  %v317_v37 = vld [vmem:[#allocation2 + $0x88] sm:$0xff] }
 0x102   : > { %v1158_v50 = vld [vmem:[#allocation2 + $0x120] sm:$0xff]  ;;  %v1129_v51 = vld [vmem:[#allocation2 + $0x38] sm:$0xff]  ;;  %1095 = vst.msk [vmem:[#allocation2 + $0x140] sm:$0xff] %vm235_vm0, %v1030_v46  ;;  %1066 = vst.msk [vmem:[#allocation2 + $0x58] sm:$0xff] %vm235_vm0, %v1001_v47 }
 0x103   : > { %1222 = vst.msk [vmem:[%s2481_s4 + $0x120] sm:$0xff] %vm235_vm0, %v1158_v50  ;;  %1193 = vst.msk [vmem:[%s2481_s4 + $0x38] sm:$0xff] %vm235_vm0, %v1129_v51  ;;  %v351_v36 = vld [vmem:[#allocation2 + $0x198] sm:$0xff]  ;;  %v349_v43 = vld [vmem:[#allocation2 + $0x188] sm:$0xff] }
 0x104   : > { %v1161_v55 = vld [vmem:[#allocation2 + $0x138] sm:$0xff]  ;;  %v1127_v56 = vld [vmem:[#allocation2 + $0x28] sm:$0xff]  ;;  %1098 = vst.msk [vmem:[#allocation2 + $0x158] sm:$0xff] %vm235_vm0, %v1033_v52  ;;  %1064 = vst.msk [vmem:[#allocation2 + $0x48] sm:$0xff] %vm235_vm0, %v999_v53  ;;  %v1899_v62 = vpop.f32.mrb[12].mxu0 }
 0x105   : > { %1225 = vst.msk [vmem:[%s2481_s4 + $0x138] sm:$0xff] %vm235_vm0, %v1161_v55  ;;  %1191 = vst.msk [vmem:[%s2481_s4 + $0x28] sm:$0xff] %vm235_vm0, %v1127_v56  ;;  %v1159_v58 = vld [vmem:[#allocation2 + $0x128] sm:$0xff]  ;;  %v1004_v1 = vadd.f32 %v1899_v62, %v314_v59  ;;  %v1931_v2 = vpop.f32.mrb[12].mxu1  ;;  %v783_v3 = vpop.f32.mrb[13].mxu0  ;;  %v322_v59 = vld [vmem:[#allocation2 + $0xb0] sm:$0xff] }
 0x106   : > { %1223 = vst.msk [vmem:[%s2481_s4 + $0x128] sm:$0xff] %vm235_vm0, %v1159_v58  ;;  %1096 = vst.msk [vmem:[#allocation2 + $0x148] sm:$0xff] %vm235_vm0, %v1031_v57  ;;  %v1132_v6 = vld [vmem:[#allocation2 + $0x50] sm:$0xff]  ;;  %v1036_v7 = vadd.f32 %v1931_v2, %v346_v60  ;;  %v1002_v8 = vadd.f32 %v783_v3, %v312_v61  ;;  %v911_v9 = vpop.f32.mrb[13].mxu1  ;;  %v1900_v10 = vpop.f32.mrb[14].mxu0  ;;  %v320_v61 = vld [vmem:[#allocation2 + $0xa0] sm:$0xff] }
 0x107   : > { %1196 = vst.msk [vmem:[%s2481_s4 + $0x50] sm:$0xff] %vm235_vm0, %v1132_v6  ;;  %v1164_v12 = vld [vmem:[#allocation2 + $0x150] sm:$0xff]  ;;  %v1130_v13 = vld [vmem:[#allocation2 + $0x40] sm:$0xff]  ;;  %1069 = vst.msk [vmem:[#allocation2 + $0x70] sm:$0xff] %vm235_vm0, %v1004_v1  ;;  %v1034_v14 = vadd.f32 %v911_v9, %v344_v63  ;;  %v1005_v15 = vadd.f32 %v1900_v10, %v315_v0  ;;  %v1932_v16 = vpop.f32.mrb[14].mxu1  ;;  %v786_v17 = vpop.f32.mrb[15].mxu0 }
 0x108   : > { %1228 = vst.msk [vmem:[%s2481_s4 + $0x150] sm:$0xff] %vm235_vm0, %v1164_v12  ;;  %1194 = vst.msk [vmem:[%s2481_s4 + $0x40] sm:$0xff] %vm235_vm0, %v1130_v13  ;;  %v1037_v20 = vadd.f32 %v1932_v16, %v347_v4  ;;  %v1003_v21 = vadd.f32 %v786_v17, %v313_v5  ;;  %v914_v22 = vpop.f32.mrb[15].mxu1  ;;  %v354_v60 = vld [vmem:[#allocation2 + $0x1b0] sm:$0xff]  ;;  %v352_v63 = vld [vmem:[#allocation2 + $0x1a0] sm:$0xff] }
 0x109   : > { %v1162_v18 = vld [vmem:[#allocation2 + $0x140] sm:$0xff]  ;;  %v1133_v19 = vld [vmem:[#allocation2 + $0x58] sm:$0xff]  ;;  %1101 = vst.msk [vmem:[#allocation2 + $0x170] sm:$0xff] %vm235_vm0, %v1036_v7  ;;  %1067 = vst.msk [vmem:[#allocation2 + $0x60] sm:$0xff] %vm235_vm0, %v1002_v8  ;;  %v1035_v25 = vadd.f32 %v914_v22, %v345_v11 }
 0x10a   : > { %1226 = vst.msk [vmem:[%s2481_s4 + $0x140] sm:$0xff] %vm235_vm0, %v1162_v18  ;;  %1197 = vst.msk [vmem:[%s2481_s4 + $0x58] sm:$0xff] %vm235_vm0, %v1133_v19  ;;  %v323_v0 = vld [vmem:[#allocation2 + $0xb8] sm:$0xff]  ;;  %v321_v5 = vld [vmem:[#allocation2 + $0xa8] sm:$0xff] }
 0x10b   : > { %v1165_v23 = vld [vmem:[#allocation2 + $0x158] sm:$0xff]  ;;  %v1131_v24 = vld [vmem:[#allocation2 + $0x48] sm:$0xff]  ;;  %1099 = vst.msk [vmem:[#allocation2 + $0x160] sm:$0xff] %vm235_vm0, %v1034_v14  ;;  %1070 = vst.msk [vmem:[#allocation2 + $0x78] sm:$0xff] %vm235_vm0, %v1005_v15 }
 0x10c   : > { %1229 = vst.msk [vmem:[%s2481_s4 + $0x158] sm:$0xff] %vm235_vm0, %v1165_v23  ;;  %1195 = vst.msk [vmem:[%s2481_s4 + $0x48] sm:$0xff] %vm235_vm0, %v1131_v24  ;;  %v1903_v30 = vpop.f32.mrb[16].mxu0  ;;  %v355_v4 = vld [vmem:[#allocation2 + $0x1b8] sm:$0xff]  ;;  %v353_v11 = vld [vmem:[#allocation2 + $0x1a8] sm:$0xff] }
 0x10d   : > { %v1163_v26 = vld [vmem:[#allocation2 + $0x148] sm:$0xff]  ;;  %1102 = vst.msk [vmem:[#allocation2 + $0x178] sm:$0xff] %vm235_vm0, %v1037_v20  ;;  %1068 = vst.msk [vmem:[#allocation2 + $0x68] sm:$0xff] %vm235_vm0, %v1003_v21  ;;  %v1008_v33 = vadd.f32 %v1903_v30, %v318_v27  ;;  %v1935_v34 = vpop.f32.mrb[16].mxu1  ;;  %v799_v35 = vpop.f32.mrb[17].mxu0  ;;  %v326_v27 = vld [vmem:[#allocation2 + $0xd0] sm:$0xff] }
 0x10e   : > { %1227 = vst.msk [vmem:[%s2481_s4 + $0x148] sm:$0xff] %vm235_vm0, %v1163_v26  ;;  %1100 = vst.msk [vmem:[#allocation2 + $0x168] sm:$0xff] %vm235_vm0, %v1035_v25  ;;  %v1136_v38 = vld [vmem:[#allocation2 + $0x70] sm:$0xff]  ;;  %v1040_v39 = vadd.f32 %v1935_v34, %v350_v28  ;;  %v1006_v40 = vadd.f32 %v799_v35, %v316_v29  ;;  %v927_v41 = vpop.f32.mrb[17].mxu1  ;;  %v1904_v42 = vpop.f32.mrb[18].mxu0  ;;  %v324_v29 = vld [vmem:[#allocation2 + $0xc0] sm:$0xff] }
 0x10f   : > { %1200 = vst.msk [vmem:[%s2481_s4 + $0x70] sm:$0xff] %vm235_vm0, %v1136_v38  ;;  %1073 = vst.msk [vmem:[#allocation2 + $0x90] sm:$0xff] %vm235_vm0, %v1008_v33  ;;  %v1038_v46 = vadd.f32 %v927_v41, %v348_v31  ;;  %v1009_v47 = vadd.f32 %v1904_v42, %v319_v32  ;;  %v1936_v48 = vpop.f32.mrb[18].mxu1  ;;  %v802_v49 = vpop.f32.mrb[19].mxu0  ;;  %v358_v28 = vld [vmem:[#allocation2 + $0x1d0] sm:$0xff]  ;;  %v356_v31 = vld [vmem:[#allocation2 + $0x1c0] sm:$0xff] }
 0x110   : > { %v1168_v44 = vld [vmem:[#allocation2 + $0x170] sm:$0xff]  ;;  %v1134_v45 = vld [vmem:[#allocation2 + $0x60] sm:$0xff]  ;;  %1105 = vst.msk [vmem:[#allocation2 + $0x190] sm:$0xff] %vm235_vm0, %v1040_v39  ;;  %1071 = vst.msk [vmem:[#allocation2 + $0x80] sm:$0xff] %vm235_vm0, %v1006_v40  ;;  %v1041_v52 = vadd.f32 %v1936_v48, %v351_v36  ;;  %v1007_v53 = vadd.f32 %v802_v49, %v317_v37  ;;  %v930_v54 = vpop.f32.mrb[19].mxu1 }
 0x111   : > { %1232 = vst.msk [vmem:[%s2481_s4 + $0x170] sm:$0xff] %vm235_vm0, %v1168_v44  ;;  %1198 = vst.msk [vmem:[%s2481_s4 + $0x60] sm:$0xff] %vm235_vm0, %v1134_v45  ;;  %v1039_v57 = vadd.f32 %v930_v54, %v349_v43  ;;  %v327_v32 = vld [vmem:[#allocation2 + $0xd8] sm:$0xff]  ;;  %v325_v37 = vld [vmem:[#allocation2 + $0xc8] sm:$0xff] }
 0x112   : > { %v1166_v50 = vld [vmem:[#allocation2 + $0x160] sm:$0xff]  ;;  %v1137_v51 = vld [vmem:[#allocation2 + $0x78] sm:$0xff]  ;;  %1103 = vst.msk [vmem:[#allocation2 + $0x180] sm:$0xff] %vm235_vm0, %v1038_v46  ;;  %1074 = vst.msk [vmem:[#allocation2 + $0x98] sm:$0xff] %vm235_vm0, %v1009_v47 }
 0x113   : > { %1230 = vst.msk [vmem:[%s2481_s4 + $0x160] sm:$0xff] %vm235_vm0, %v1166_v50  ;;  %1201 = vst.msk [vmem:[%s2481_s4 + $0x78] sm:$0xff] %vm235_vm0, %v1137_v51  ;;  %v359_v36 = vld [vmem:[#allocation2 + $0x1d8] sm:$0xff]  ;;  %v357_v43 = vld [vmem:[#allocation2 + $0x1c8] sm:$0xff] }
 0x114   : > { %v1169_v55 = vld [vmem:[#allocation2 + $0x178] sm:$0xff]  ;;  %v1135_v56 = vld [vmem:[#allocation2 + $0x68] sm:$0xff]  ;;  %1106 = vst.msk [vmem:[#allocation2 + $0x198] sm:$0xff] %vm235_vm0, %v1041_v52  ;;  %1072 = vst.msk [vmem:[#allocation2 + $0x88] sm:$0xff] %vm235_vm0, %v1007_v53  ;;  %v1907_v62 = vpop.f32.mrb[20].mxu0 }
 0x115   : > { %1233 = vst.msk [vmem:[%s2481_s4 + $0x178] sm:$0xff] %vm235_vm0, %v1169_v55  ;;  %1199 = vst.msk [vmem:[%s2481_s4 + $0x68] sm:$0xff] %vm235_vm0, %v1135_v56  ;;  %v1167_v58 = vld [vmem:[#allocation2 + $0x168] sm:$0xff]  ;;  %v1012_v1 = vadd.f32 %v1907_v62, %v322_v59  ;;  %v1939_v2 = vpop.f32.mrb[20].mxu1  ;;  %v815_v3 = vpop.f32.mrb[21].mxu0  ;;  %v330_v59 = vld [vmem:[#allocation2 + $0xf0] sm:$0xff] }
 0x116   : > { %1231 = vst.msk [vmem:[%s2481_s4 + $0x168] sm:$0xff] %vm235_vm0, %v1167_v58  ;;  %1104 = vst.msk [vmem:[#allocation2 + $0x188] sm:$0xff] %vm235_vm0, %v1039_v57  ;;  %v1140_v6 = vld [vmem:[#allocation2 + $0x90] sm:$0xff]  ;;  %v1044_v7 = vadd.f32 %v1939_v2, %v354_v60  ;;  %v1010_v8 = vadd.f32 %v815_v3, %v320_v61  ;;  %v943_v9 = vpop.f32.mrb[21].mxu1  ;;  %v1908_v10 = vpop.f32.mrb[22].mxu0  ;;  %v328_v61 = vld [vmem:[#allocation2 + $0xe0] sm:$0xff] }
 0x117   : > { %1204 = vst.msk [vmem:[%s2481_s4 + $0x90] sm:$0xff] %vm235_vm0, %v1140_v6  ;;  %v1172_v12 = vld [vmem:[#allocation2 + $0x190] sm:$0xff]  ;;  %v1138_v13 = vld [vmem:[#allocation2 + $0x80] sm:$0xff]  ;;  %1077 = vst.msk [vmem:[#allocation2 + $0xb0] sm:$0xff] %vm235_vm0, %v1012_v1  ;;  %v1042_v14 = vadd.f32 %v943_v9, %v352_v63  ;;  %v1013_v15 = vadd.f32 %v1908_v10, %v323_v0  ;;  %v1940_v16 = vpop.f32.mrb[22].mxu1  ;;  %v818_v17 = vpop.f32.mrb[23].mxu0 }
 0x118   : > { %1236 = vst.msk [vmem:[%s2481_s4 + $0x190] sm:$0xff] %vm235_vm0, %v1172_v12  ;;  %1202 = vst.msk [vmem:[%s2481_s4 + $0x80] sm:$0xff] %vm235_vm0, %v1138_v13  ;;  %v1045_v20 = vadd.f32 %v1940_v16, %v355_v4  ;;  %v1011_v21 = vadd.f32 %v818_v17, %v321_v5  ;;  %v946_v22 = vpop.f32.mrb[23].mxu1  ;;  %v362_v60 = vld [vmem:[#allocation2 + $0x1f0] sm:$0xff]  ;;  %v360_v63 = vld [vmem:[#allocation2 + $0x1e0] sm:$0xff] }
 0x119   : > { %v1170_v18 = vld [vmem:[#allocation2 + $0x180] sm:$0xff]  ;;  %v1141_v19 = vld [vmem:[#allocation2 + $0x98] sm:$0xff]  ;;  %1109 = vst.msk [vmem:[#allocation2 + $0x1b0] sm:$0xff] %vm235_vm0, %v1044_v7  ;;  %1075 = vst.msk [vmem:[#allocation2 + $0xa0] sm:$0xff] %vm235_vm0, %v1010_v8  ;;  %v1043_v25 = vadd.f32 %v946_v22, %v353_v11 }
 0x11a   : > { %1234 = vst.msk [vmem:[%s2481_s4 + $0x180] sm:$0xff] %vm235_vm0, %v1170_v18  ;;  %1205 = vst.msk [vmem:[%s2481_s4 + $0x98] sm:$0xff] %vm235_vm0, %v1141_v19  ;;  %v331_v0 = vld [vmem:[#allocation2 + $0xf8] sm:$0xff]  ;;  %v329_v5 = vld [vmem:[#allocation2 + $0xe8] sm:$0xff] }
 0x11b   : > { %v1173_v23 = vld [vmem:[#allocation2 + $0x198] sm:$0xff]  ;;  %v1139_v24 = vld [vmem:[#allocation2 + $0x88] sm:$0xff]  ;;  %1107 = vst.msk [vmem:[#allocation2 + $0x1a0] sm:$0xff] %vm235_vm0, %v1042_v14  ;;  %1078 = vst.msk [vmem:[#allocation2 + $0xb8] sm:$0xff] %vm235_vm0, %v1013_v15 }
 0x11c   : > { %1237 = vst.msk [vmem:[%s2481_s4 + $0x198] sm:$0xff] %vm235_vm0, %v1173_v23  ;;  %1203 = vst.msk [vmem:[%s2481_s4 + $0x88] sm:$0xff] %vm235_vm0, %v1139_v24  ;;  %v1911_v30 = vpop.f32.mrb[24].mxu0  ;;  %v363_v4 = vld [vmem:[#allocation2 + $0x1f8] sm:$0xff]  ;;  %v361_v11 = vld [vmem:[#allocation2 + $0x1e8] sm:$0xff] }
 0x11d   : > { %v1171_v26 = vld [vmem:[#allocation2 + $0x188] sm:$0xff]  ;;  %1110 = vst.msk [vmem:[#allocation2 + $0x1b8] sm:$0xff] %vm235_vm0, %v1045_v20  ;;  %1076 = vst.msk [vmem:[#allocation2 + $0xa8] sm:$0xff] %vm235_vm0, %v1011_v21  ;;  %v1016_v33 = vadd.f32 %v1911_v30, %v326_v27  ;;  %v1943_v34 = vpop.f32.mrb[24].mxu1  ;;  %v831_v35 = vpop.f32.mrb[25].mxu0 }
 0x11e   : > { %1235 = vst.msk [vmem:[%s2481_s4 + $0x188] sm:$0xff] %vm235_vm0, %v1171_v26  ;;  %1108 = vst.msk [vmem:[#allocation2 + $0x1a8] sm:$0xff] %vm235_vm0, %v1043_v25  ;;  %v1144_v38 = vld [vmem:[#allocation2 + $0xb0] sm:$0xff]  ;;  %v1048_v39 = vadd.f32 %v1943_v34, %v358_v28  ;;  %v1014_v40 = vadd.f32 %v831_v35, %v324_v29  ;;  %v959_v41 = vpop.f32.mrb[25].mxu1  ;;  %v1912_v42 = vpop.f32.mrb[26].mxu0 }
 0x11f   : > { %1208 = vst.msk [vmem:[%s2481_s4 + $0xb0] sm:$0xff] %vm235_vm0, %v1144_v38  ;;  %1081 = vst.msk [vmem:[#allocation2 + $0xd0] sm:$0xff] %vm235_vm0, %v1016_v33  ;;  %v1046_v46 = vadd.f32 %v959_v41, %v356_v31  ;;  %v1017_v47 = vadd.f32 %v1912_v42, %v327_v32  ;;  %v1944_v48 = vpop.f32.mrb[26].mxu1  ;;  %v834_v49 = vpop.f32.mrb[27].mxu0 }
 0x120   : > { %v1176_v44 = vld [vmem:[#allocation2 + $0x1b0] sm:$0xff]  ;;  %v1142_v45 = vld [vmem:[#allocation2 + $0xa0] sm:$0xff]  ;;  %1113 = vst.msk [vmem:[#allocation2 + $0x1d0] sm:$0xff] %vm235_vm0, %v1048_v39  ;;  %1079 = vst.msk [vmem:[#allocation2 + $0xc0] sm:$0xff] %vm235_vm0, %v1014_v40  ;;  %v1049_v52 = vadd.f32 %v1944_v48, %v359_v36  ;;  %v1015_v53 = vadd.f32 %v834_v49, %v325_v37  ;;  %v962_v54 = vpop.f32.mrb[27].mxu1 }
 0x121   : > { %1240 = vst.msk [vmem:[%s2481_s4 + $0x1b0] sm:$0xff] %vm235_vm0, %v1176_v44  ;;  %1206 = vst.msk [vmem:[%s2481_s4 + $0xa0] sm:$0xff] %vm235_vm0, %v1142_v45  ;;  %v1047_v57 = vadd.f32 %v962_v54, %v357_v43 }
 0x122   : > { %v1174_v50 = vld [vmem:[#allocation2 + $0x1a0] sm:$0xff]  ;;  %v1145_v51 = vld [vmem:[#allocation2 + $0xb8] sm:$0xff]  ;;  %1111 = vst.msk [vmem:[#allocation2 + $0x1c0] sm:$0xff] %vm235_vm0, %v1046_v46  ;;  %1082 = vst.msk [vmem:[#allocation2 + $0xd8] sm:$0xff] %vm235_vm0, %v1017_v47 }
 0x123   : > { %1238 = vst.msk [vmem:[%s2481_s4 + $0x1a0] sm:$0xff] %vm235_vm0, %v1174_v50  ;;  %1209 = vst.msk [vmem:[%s2481_s4 + $0xb8] sm:$0xff] %vm235_vm0, %v1145_v51 }
 0x124   : > { %v1177_v55 = vld [vmem:[#allocation2 + $0x1b8] sm:$0xff]  ;;  %v1143_v56 = vld [vmem:[#allocation2 + $0xa8] sm:$0xff]  ;;  %1114 = vst.msk [vmem:[#allocation2 + $0x1d8] sm:$0xff] %vm235_vm0, %v1049_v52  ;;  %1080 = vst.msk [vmem:[#allocation2 + $0xc8] sm:$0xff] %vm235_vm0, %v1015_v53  ;;  %v1915_v62 = vpop.f32.mrb[28].mxu0 }
 0x125   : > { %1241 = vst.msk [vmem:[%s2481_s4 + $0x1b8] sm:$0xff] %vm235_vm0, %v1177_v55  ;;  %1207 = vst.msk [vmem:[%s2481_s4 + $0xa8] sm:$0xff] %vm235_vm0, %v1143_v56  ;;  %v1175_v58 = vld [vmem:[#allocation2 + $0x1a8] sm:$0xff]  ;;  %v1020_v1 = vadd.f32 %v1915_v62, %v330_v59  ;;  %v1947_v2 = vpop.f32.mrb[28].mxu1  ;;  %v847_v3 = vpop.f32.mrb[29].mxu0 }
 0x126   : > { %1239 = vst.msk [vmem:[%s2481_s4 + $0x1a8] sm:$0xff] %vm235_vm0, %v1175_v58  ;;  %1112 = vst.msk [vmem:[#allocation2 + $0x1c8] sm:$0xff] %vm235_vm0, %v1047_v57  ;;  %v1148_v6 = vld [vmem:[#allocation2 + $0xd0] sm:$0xff]  ;;  %v1052_v7 = vadd.f32 %v1947_v2, %v362_v60  ;;  %v1018_v8 = vadd.f32 %v847_v3, %v328_v61  ;;  %v975_v9 = vpop.f32.mrb[29].mxu1  ;;  %v1916_v10 = vpop.f32.mrb[30].mxu0 }
 0x127   : > { %1212 = vst.msk [vmem:[%s2481_s4 + $0xd0] sm:$0xff] %vm235_vm0, %v1148_v6  ;;  %v1180_v12 = vld [vmem:[#allocation2 + $0x1d0] sm:$0xff]  ;;  %v1146_v13 = vld [vmem:[#allocation2 + $0xc0] sm:$0xff]  ;;  %1085 = vst.msk [vmem:[#allocation2 + $0xf0] sm:$0xff] %vm235_vm0, %v1020_v1  ;;  %v1050_v14 = vadd.f32 %v975_v9, %v360_v63  ;;  %v1021_v15 = vadd.f32 %v1916_v10, %v331_v0  ;;  %v1948_v16 = vpop.f32.mrb[30].mxu1  ;;  %v850_v17 = vpop.f32.mrb[31].mxu0 }
 0x128   : > { %1244 = vst.msk [vmem:[%s2481_s4 + $0x1d0] sm:$0xff] %vm235_vm0, %v1180_v12  ;;  %1210 = vst.msk [vmem:[%s2481_s4 + $0xc0] sm:$0xff] %vm235_vm0, %v1146_v13  ;;  %v1053_v20 = vadd.f32 %v1948_v16, %v363_v4  ;;  %v1019_v21 = vadd.f32 %v850_v17, %v329_v5  ;;  %v978_v22 = vpop.f32.mrb[31].mxu1 }
 0x129   : > { %v1178_v18 = vld [vmem:[#allocation2 + $0x1c0] sm:$0xff]  ;;  %v1149_v19 = vld [vmem:[#allocation2 + $0xd8] sm:$0xff]  ;;  %1117 = vst.msk [vmem:[#allocation2 + $0x1f0] sm:$0xff] %vm235_vm0, %v1052_v7  ;;  %1083 = vst.msk [vmem:[#allocation2 + $0xe0] sm:$0xff] %vm235_vm0, %v1018_v8  ;;  %v1051_v25 = vadd.f32 %v978_v22, %v361_v11 }
 0x12a   : > { %1242 = vst.msk [vmem:[%s2481_s4 + $0x1c0] sm:$0xff] %vm235_vm0, %v1178_v18  ;;  %1213 = vst.msk [vmem:[%s2481_s4 + $0xd8] sm:$0xff] %vm235_vm0, %v1149_v19 }
 0x12b   : > { %v1181_v23 = vld [vmem:[#allocation2 + $0x1d8] sm:$0xff]  ;;  %v1147_v24 = vld [vmem:[#allocation2 + $0xc8] sm:$0xff]  ;;  %1115 = vst.msk [vmem:[#allocation2 + $0x1e0] sm:$0xff] %vm235_vm0, %v1050_v14  ;;  %1086 = vst.msk [vmem:[#allocation2 + $0xf8] sm:$0xff] %vm235_vm0, %v1021_v15 }
 0x12c   : > { %1245 = vst.msk [vmem:[%s2481_s4 + $0x1d8] sm:$0xff] %vm235_vm0, %v1181_v23  ;;  %1211 = vst.msk [vmem:[%s2481_s4 + $0xc8] sm:$0xff] %vm235_vm0, %v1147_v24 }
 0x12d   : > { %v1179_v26 = vld [vmem:[#allocation2 + $0x1c8] sm:$0xff]  ;;  %1118 = vst.msk [vmem:[#allocation2 + $0x1f8] sm:$0xff] %vm235_vm0, %v1053_v20  ;;  %1084 = vst.msk [vmem:[#allocation2 + $0xe8] sm:$0xff] %vm235_vm0, %v1019_v21 }
 0x12e   : > { %1243 = vst.msk [vmem:[%s2481_s4 + $0x1c8] sm:$0xff] %vm235_vm0, %v1179_v26  ;;  %1116 = vst.msk [vmem:[#allocation2 + $0x1e8] sm:$0xff] %vm235_vm0, %v1051_v25  ;;  %v1152_v27 = vld [vmem:[#allocation2 + $0xf0] sm:$0xff] }
 0x12f   : > { %1216 = vst.msk [vmem:[%s2481_s4 + $0xf0] sm:$0xff] %vm235_vm0, %v1152_v27 }
 0x130   : > { %v1184_v28 = vld [vmem:[#allocation2 + $0x1f0] sm:$0xff]  ;;  %v1150_v29 = vld [vmem:[#allocation2 + $0xe0] sm:$0xff]  ;;  %1256 = sbr.rel (!%p2244_p3) target bundleno = 383 (0x17f), region = 40 }
 0x131   : > { %1248 = vst.msk [vmem:[%s2481_s4 + $0x1f0] sm:$0xff] %vm235_vm0, %v1184_v28  ;;  %1214 = vst.msk [vmem:[%s2481_s4 + $0xe0] sm:$0xff] %vm235_vm0, %v1150_v29 }
 0x132   : > { %v1182_v30 = vld [vmem:[#allocation2 + $0x1e0] sm:$0xff]  ;;  %v1153_v31 = vld [vmem:[#allocation2 + $0xf8] sm:$0xff] }
 0x133   : > { %1246 = vst.msk [vmem:[%s2481_s4 + $0x1e0] sm:$0xff] %vm235_vm0, %v1182_v30  ;;  %1217 = vst.msk [vmem:[%s2481_s4 + $0xf8] sm:$0xff] %vm235_vm0, %v1153_v31 }
 0x134   : > { %v1185_v32 = vld [vmem:[#allocation2 + $0x1f8] sm:$0xff]  ;;  %v1151_v33 = vld [vmem:[#allocation2 + $0xe8] sm:$0xff] }
 0x135   : > { %1249 = vst.msk [vmem:[%s2481_s4 + $0x1f8] sm:$0xff] %vm235_vm0, %v1185_v32  ;;  %1215 = vst.msk [vmem:[%s2481_s4 + $0xe8] sm:$0xff] %vm235_vm0, %v1151_v33  ;;  %v1183_v34 = vld [vmem:[#allocation2 + $0x1e8] sm:$0xff] }
 0x136   : > { %1247 = vst.msk [vmem:[%s2481_s4 + $0x1e8] sm:$0xff] %vm235_vm0, %v1183_v34 }
 0x137   : > { %s2894_s5 = smov (!%p1259_p9, %s1258_s5), 64 }
 0x138   : > { %s1829_s14 = sshll.u32 %s2894_s5, 7 }
 0x139   : > { %p1832_p10 = scmp.eq.s32.totalorder %s1829_s14, 0 }
 0x13a   : > { %s2680_s16 = sshrl.u32 (!%p1832_p10), %s2894_s5, 6 }
 0x13b   : > { %1268 = sbr.rel (%p1832_p10) target bundleno = 383 (0x17f), region = 44  ;;  %p1833_p11 = scmp.le.s32.totalorder (!%p1832_p10), %s2680_s16, 0 }
 0x142   : > { %1688 = sbr.rel (%p1833_p11) target bundleno = 362 (0x16a), region = 123  ;;  %s2882_s11 = smov (!%p1833_p11), %s2674_s9 }
 0x143   : > { %s2883_s17 = smov (!%p1833_p11), %s2481_s4  ;;  %s2689_s18 = smov (!%p1833_p11), 0  }
 0x144   : > { %s2691_s20 = smov (!%p1833_p11), 0  }
 0x149 LB: >> { %v1456_v35 = vld [vmem:[%s2170_s17] sm:$0xff]  ;;  %v1458_v36 = vld [vmem:[%s2170_s17 + $0x8] sm:$0xff]  ;;  %v1460_v37 = vld [vmem:[%s2170_s17 + $0x10] sm:$0xff]  ;;  %s1584_s21 = sadd.s32 1, %s2174_s18  ;;  %s1450_s20 = sadd.s32 1, %s2178_s20   ;;  %s2178_s20 = sphi %s2691_s20, %s1450_s20   ;;  %s2174_s18 = sphi %s2689_s18, %s2886_s18   ;;  %s2170_s17 = sphi %s2883_s17, %s2885_s17   ;;  %s2166_s11 = sphi %s2882_s11, %s2884_s11  }
 0x14a   : >> { %1457 = vst [vmem:[%s2166_s11] sm:$0xff] %v1456_v35  ;;  %1459 = vst [vmem:[%s2166_s11 + $0x8] sm:$0xff] %v1458_v36  ;;  %v1462_v38 = vld [vmem:[%s2170_s17 + $0x18] sm:$0xff]  ;;  %v1464_v39 = vld [vmem:[%s2170_s17 + $0x20] sm:$0xff]  ;;  %p1585_p12 = scmp.ge.s32.totalorder %s1584_s21, %s2680_s16  ;;  %p1449_p13 = scmp.ge.s32.totalorder %s1450_s20, %s2680_s16 }
 0x14b   : >> { %1461 = vst [vmem:[%s2166_s11 + $0x10] sm:$0xff] %v1460_v37  ;;  %v1466_v40 = vld [vmem:[%s2170_s17 + $0x28] sm:$0xff]  ;;  %1463 = vst [vmem:[%s2166_s11 + $0x18] sm:$0xff] %v1462_v38  ;;  %v1468_v41 = vld [vmem:[%s2170_s17 + $0x30] sm:$0xff] }
 0x14c   : >> { %1465 = vst [vmem:[%s2166_s11 + $0x20] sm:$0xff] %v1464_v39  ;;  %1467 = vst [vmem:[%s2166_s11 + $0x28] sm:$0xff] %v1466_v40  ;;  %v1470_v42 = vld [vmem:[%s2170_s17 + $0x38] sm:$0xff]  ;;  %v1472_v43 = vld [vmem:[%s2170_s17 + $0x40] sm:$0xff]  ;;  %s2896_s21 = smov (%p1585_p12, %s1584_s21), 0 }
 0x14d   : >> { %1469 = vst [vmem:[%s2166_s11 + $0x30] sm:$0xff] %v1468_v41  ;;  %1471 = vst [vmem:[%s2166_s11 + $0x38] sm:$0xff] %v1470_v42  ;;  %v1474_v44 = vld [vmem:[%s2170_s17 + $0x48] sm:$0xff]  ;;  %v1476_v45 = vld [vmem:[%s2170_s17 + $0x50] sm:$0xff]  ;;  %s1834_s22 = sshll.u32 %s2896_s21, 9  ;;  %s2886_s18 = smov %s2896_s21 }
 0x14e   : >> { %1473 = vst [vmem:[%s2166_s11 + $0x40] sm:$0xff] %v1472_v43  ;;  %v1478_v46 = vld [vmem:[%s2170_s17 + $0x58] sm:$0xff]  ;;  %1475 = vst [vmem:[%s2166_s11 + $0x48] sm:$0xff] %v1474_v44  ;;  %v1480_v47 = vld [vmem:[%s2170_s17 + $0x60] sm:$0xff]  ;;  %s2747_s23 = scalar_lea.vmem %s2481_s4, %s1834_s22 [#allocation3]   ;;  %s2750_s24 = scalar_lea.vmem %s2674_s9, %s1834_s22  }
 0x14f   : >> { %1477 = vst [vmem:[%s2166_s11 + $0x50] sm:$0xff] %v1476_v45  ;;  %1479 = vst [vmem:[%s2166_s11 + $0x58] sm:$0xff] %v1478_v46  ;;  %v1482_v48 = vld [vmem:[%s2170_s17 + $0x68] sm:$0xff]  ;;  %v1484_v49 = vld [vmem:[%s2170_s17 + $0x70] sm:$0xff] }
 0x150   : >> { %1481 = vst [vmem:[%s2166_s11 + $0x60] sm:$0xff] %v1480_v47  ;;  %1483 = vst [vmem:[%s2166_s11 + $0x68] sm:$0xff] %v1482_v48  ;;  %v1486_v50 = vld [vmem:[%s2170_s17 + $0x78] sm:$0xff]  ;;  %v1488_v51 = vld [vmem:[%s2170_s17 + $0x80] sm:$0xff] }
 0x151   : >> { %1485 = vst [vmem:[%s2166_s11 + $0x70] sm:$0xff] %v1484_v49  ;;  %v1490_v52 = vld [vmem:[%s2170_s17 + $0x88] sm:$0xff]  ;;  %1487 = vst [vmem:[%s2166_s11 + $0x78] sm:$0xff] %v1486_v50  ;;  %v1492_v53 = vld [vmem:[%s2170_s17 + $0x90] sm:$0xff] }
 0x152   : >> { %1489 = vst [vmem:[%s2166_s11 + $0x80] sm:$0xff] %v1488_v51  ;;  %1491 = vst [vmem:[%s2166_s11 + $0x88] sm:$0xff] %v1490_v52  ;;  %v1494_v54 = vld [vmem:[%s2170_s17 + $0x98] sm:$0xff]  ;;  %v1496_v55 = vld [vmem:[%s2170_s17 + $0xa0] sm:$0xff] }
 0x153   : >> { %1493 = vst [vmem:[%s2166_s11 + $0x90] sm:$0xff] %v1492_v53  ;;  %1495 = vst [vmem:[%s2166_s11 + $0x98] sm:$0xff] %v1494_v54  ;;  %v1498_v56 = vld [vmem:[%s2170_s17 + $0xa8] sm:$0xff]  ;;  %v1500_v57 = vld [vmem:[%s2170_s17 + $0xb0] sm:$0xff] }
 0x154   : >> { %1497 = vst [vmem:[%s2166_s11 + $0xa0] sm:$0xff] %v1496_v55  ;;  %v1502_v58 = vld [vmem:[%s2170_s17 + $0xb8] sm:$0xff]  ;;  %1499 = vst [vmem:[%s2166_s11 + $0xa8] sm:$0xff] %v1498_v56  ;;  %v1504_v59 = vld [vmem:[%s2170_s17 + $0xc0] sm:$0xff] }
 0x155   : >> { %1501 = vst [vmem:[%s2166_s11 + $0xb0] sm:$0xff] %v1500_v57  ;;  %1503 = vst [vmem:[%s2166_s11 + $0xb8] sm:$0xff] %v1502_v58  ;;  %v1506_v60 = vld [vmem:[%s2170_s17 + $0xc8] sm:$0xff]  ;;  %v1508_v61 = vld [vmem:[%s2170_s17 + $0xd0] sm:$0xff] }
 0x156   : >> { %1505 = vst [vmem:[%s2166_s11 + $0xc0] sm:$0xff] %v1504_v59  ;;  %1507 = vst [vmem:[%s2166_s11 + $0xc8] sm:$0xff] %v1506_v60  ;;  %v1510_v62 = vld [vmem:[%s2170_s17 + $0xd8] sm:$0xff]  ;;  %v1512_v63 = vld [vmem:[%s2170_s17 + $0xe0] sm:$0xff] }
 0x157   : >> { %1509 = vst [vmem:[%s2166_s11 + $0xd0] sm:$0xff] %v1508_v61  ;;  %v1514_v0 = vld [vmem:[%s2170_s17 + $0xe8] sm:$0xff]  ;;  %1511 = vst [vmem:[%s2166_s11 + $0xd8] sm:$0xff] %v1510_v62  ;;  %v1516_v1 = vld [vmem:[%s2170_s17 + $0xf0] sm:$0xff] }
 0x158   : >> { %1513 = vst [vmem:[%s2166_s11 + $0xe0] sm:$0xff] %v1512_v63  ;;  %1515 = vst [vmem:[%s2166_s11 + $0xe8] sm:$0xff] %v1514_v0  ;;  %v1518_v2 = vld [vmem:[%s2170_s17 + $0xf8] sm:$0xff]  ;;  %v1520_v3 = vld [vmem:[%s2170_s17 + $0x100] sm:$0xff] }
 0x159   : >> { %1517 = vst [vmem:[%s2166_s11 + $0xf0] sm:$0xff] %v1516_v1  ;;  %1519 = vst [vmem:[%s2166_s11 + $0xf8] sm:$0xff] %v1518_v2  ;;  %v1522_v4 = vld [vmem:[%s2170_s17 + $0x108] sm:$0xff]  ;;  %v1524_v5 = vld [vmem:[%s2170_s17 + $0x110] sm:$0xff] }
 0x15a   : >> { %1521 = vst [vmem:[%s2166_s11 + $0x100] sm:$0xff] %v1520_v3  ;;  %v1526_v6 = vld [vmem:[%s2170_s17 + $0x118] sm:$0xff]  ;;  %1523 = vst [vmem:[%s2166_s11 + $0x108] sm:$0xff] %v1522_v4  ;;  %v1528_v7 = vld [vmem:[%s2170_s17 + $0x120] sm:$0xff] }
 0x15b   : >> { %1525 = vst [vmem:[%s2166_s11 + $0x110] sm:$0xff] %v1524_v5  ;;  %1527 = vst [vmem:[%s2166_s11 + $0x118] sm:$0xff] %v1526_v6  ;;  %v1530_v8 = vld [vmem:[%s2170_s17 + $0x128] sm:$0xff]  ;;  %v1532_v9 = vld [vmem:[%s2170_s17 + $0x130] sm:$0xff] }
 0x15c   : >> { %1529 = vst [vmem:[%s2166_s11 + $0x120] sm:$0xff] %v1528_v7  ;;  %1531 = vst [vmem:[%s2166_s11 + $0x128] sm:$0xff] %v1530_v8  ;;  %v1534_v10 = vld [vmem:[%s2170_s17 + $0x138] sm:$0xff]  ;;  %v1536_v11 = vld [vmem:[%s2170_s17 + $0x140] sm:$0xff] }
 0x15d   : >> { %1533 = vst [vmem:[%s2166_s11 + $0x130] sm:$0xff] %v1532_v9  ;;  %v1538_v12 = vld [vmem:[%s2170_s17 + $0x148] sm:$0xff]  ;;  %1535 = vst [vmem:[%s2166_s11 + $0x138] sm:$0xff] %v1534_v10  ;;  %v1540_v13 = vld [vmem:[%s2170_s17 + $0x150] sm:$0xff] }
 0x15e   : >> { %1537 = vst [vmem:[%s2166_s11 + $0x140] sm:$0xff] %v1536_v11  ;;  %1539 = vst [vmem:[%s2166_s11 + $0x148] sm:$0xff] %v1538_v12  ;;  %v1542_v14 = vld [vmem:[%s2170_s17 + $0x158] sm:$0xff]  ;;  %v1544_v15 = vld [vmem:[%s2170_s17 + $0x160] sm:$0xff] }
 0x15f   : >> { %1541 = vst [vmem:[%s2166_s11 + $0x150] sm:$0xff] %v1540_v13  ;;  %1543 = vst [vmem:[%s2166_s11 + $0x158] sm:$0xff] %v1542_v14  ;;  %v1546_v16 = vld [vmem:[%s2170_s17 + $0x168] sm:$0xff]  ;;  %v1548_v17 = vld [vmem:[%s2170_s17 + $0x170] sm:$0xff] }
 0x160   : >> { %1545 = vst [vmem:[%s2166_s11 + $0x160] sm:$0xff] %v1544_v15  ;;  %v1550_v18 = vld [vmem:[%s2170_s17 + $0x178] sm:$0xff]  ;;  %1547 = vst [vmem:[%s2166_s11 + $0x168] sm:$0xff] %v1546_v16  ;;  %v1552_v19 = vld [vmem:[%s2170_s17 + $0x180] sm:$0xff] }
 0x161   : >> { %1549 = vst [vmem:[%s2166_s11 + $0x170] sm:$0xff] %v1548_v17  ;;  %1551 = vst [vmem:[%s2166_s11 + $0x178] sm:$0xff] %v1550_v18  ;;  %v1554_v20 = vld [vmem:[%s2170_s17 + $0x188] sm:$0xff]  ;;  %v1556_v21 = vld [vmem:[%s2170_s17 + $0x190] sm:$0xff] }
 0x162   : >> { %1553 = vst [vmem:[%s2166_s11 + $0x180] sm:$0xff] %v1552_v19  ;;  %1555 = vst [vmem:[%s2166_s11 + $0x188] sm:$0xff] %v1554_v20  ;;  %v1558_v22 = vld [vmem:[%s2170_s17 + $0x198] sm:$0xff]  ;;  %v1560_v23 = vld [vmem:[%s2170_s17 + $0x1a0] sm:$0xff] }
 0x163   : >> { %1557 = vst [vmem:[%s2166_s11 + $0x190] sm:$0xff] %v1556_v21  ;;  %v1562_v24 = vld [vmem:[%s2170_s17 + $0x1a8] sm:$0xff]  ;;  %1559 = vst [vmem:[%s2166_s11 + $0x198] sm:$0xff] %v1558_v22  ;;  %v1564_v25 = vld [vmem:[%s2170_s17 + $0x1b0] sm:$0xff]  ;;  %1452 = sbr.rel (!%p1449_p13) target bundleno = 329 (0x149), region = 129 }
 0x164   : >> { %1561 = vst [vmem:[%s2166_s11 + $0x1a0] sm:$0xff] %v1560_v23  ;;  %1563 = vst [vmem:[%s2166_s11 + $0x1a8] sm:$0xff] %v1562_v24  ;;  %v1566_v26 = vld [vmem:[%s2170_s17 + $0x1b8] sm:$0xff]  ;;  %v1568_v27 = vld [vmem:[%s2170_s17 + $0x1c0] sm:$0xff] }
 0x165   : >> { %1565 = vst [vmem:[%s2166_s11 + $0x1b0] sm:$0xff] %v1564_v25  ;;  %1567 = vst [vmem:[%s2166_s11 + $0x1b8] sm:$0xff] %v1566_v26  ;;  %v1570_v28 = vld [vmem:[%s2170_s17 + $0x1c8] sm:$0xff]  ;;  %v1572_v29 = vld [vmem:[%s2170_s17 + $0x1d0] sm:$0xff] }
 0x166   : >> { %1569 = vst [vmem:[%s2166_s11 + $0x1c0] sm:$0xff] %v1568_v27  ;;  %v1574_v30 = vld [vmem:[%s2170_s17 + $0x1d8] sm:$0xff]  ;;  %1571 = vst [vmem:[%s2166_s11 + $0x1c8] sm:$0xff] %v1570_v28  ;;  %v1576_v31 = vld [vmem:[%s2170_s17 + $0x1e0] sm:$0xff] }
 0x167   : >> { %1573 = vst [vmem:[%s2166_s11 + $0x1d0] sm:$0xff] %v1572_v29  ;;  %1575 = vst [vmem:[%s2166_s11 + $0x1d8] sm:$0xff] %v1574_v30  ;;  %v1578_v32 = vld [vmem:[%s2170_s17 + $0x1e8] sm:$0xff]  ;;  %v1580_v33 = vld [vmem:[%s2170_s17 + $0x1f0] sm:$0xff] }
 0x168   : >> { %1577 = vst [vmem:[%s2166_s11 + $0x1e0] sm:$0xff] %v1576_v31  ;;  %1579 = vst [vmem:[%s2166_s11 + $0x1e8] sm:$0xff] %v1578_v32  ;;  %v1582_v34 = vld [vmem:[%s2170_s17 + $0x1f8] sm:$0xff]  ;;  %s2885_s17 = smov %s2747_s23 }
 0x169   : >> { %1581 = vst [vmem:[%s2166_s11 + $0x1f0] sm:$0xff] %v1580_v33  ;;  %1583 = vst [vmem:[%s2166_s11 + $0x1f8] sm:$0xff] %v1582_v34  ;;  %s2884_s11 = smov %s2750_s24 }
 0x16a PF: > { %s2855_s25 = sand.u32 63, %s2894_s5   ;;  %s1845_s26 = sshll.u32 %s2680_s16, 9 }
 0x16b   : > { %s1595_s27 = scalar_lea.vmem %s2481_s4, %s1845_s26 [#allocation3]   ;;  %s1597_s28 = scalar_lea.vmem %s2674_s9, %s1845_s26  }
 0x16c   : > { %p1839_p0 = scmp.le.s32.totalorder %s2855_s25, 0 }
 0x16d   : > { %s2180_s29 = smov (!%p1839_p0), %s1597_s28   ;;  %s2184_s30 = smov (!%p1839_p0), %s1595_s27  }
 0x16e   : > { %1702 = sbr.rel (%p1839_p0) target bundleno = 383 (0x17f), region = 134  ;;  %s2188_s3 = smov (!%p1839_p0), 0  }
 0x16f   : > { %s2192_s6 = smov (!%p1839_p0), 0  }
 0x175 LB: >> { %v1607_v35 = vld [vmem:[%s2186_s30] sm:$0xff]  ;;  %s1609_s5 = sadd.s32 1, %s2190_s3  ;;  %s1601_s6 = sadd.s32 1, %s2194_s6   ;;  %s2194_s6 = sphi %s2192_s6, %s1601_s6   ;;  %s2190_s3 = sphi %s2188_s3, %s2189_s3   ;;  %s2186_s30 = sphi %s2184_s30, %s1614_s30   ;;  %s2182_s29 = sphi %s2180_s29, %s1615_s29  }
 0x176   : >> { %1608 = vst [vmem:[%s2182_s29] sm:$0xff] %v1607_v35  ;;  %p1610_p1 = scmp.ge.s32.totalorder %s1609_s5, %s2855_s25  ;;  %p1600_p2 = scmp.ge.s32.totalorder %s1601_s6, %s2855_s25 }
 0x178   : >> { %s2898_s5 = smov (%p1610_p1, %s1609_s5), 0  ;;  %1603 = sbr.rel (!%p1600_p2) target bundleno = 373 (0x175), region = 140 }
 0x179   : >> { %s1840_s4 = sshll.u32 %s2898_s5, 3  ;;  %s2189_s3 = smov %s2898_s5  }
 0x17a   : >> { %s1614_s30 = scalar_lea.vmem %s1595_s27, %s1840_s4 [#allocation3]   ;;  %s1615_s29 = scalar_lea.vmem %s1597_s28, %s1840_s4  }
 0x17f PF: > { %s12_s13 = sadd.s32 1, %s2162_s13   ;;  %s2887_s9 = smov %s2150_s10 }
 0x180   : > { %p9_p3 = scmp.ge.s32.totalorder %s12_s13, 7   ;;  %s2888_s10 = smov %s2253_s19 }
 0x181   : > { %s2889_s11 = smov %s2158_s12  ;;  %s2890_s12 = smov %s2892_s15 }
 0x182   :  { %11 = sbr.rel (!%p9_p3) target bundleno = 3 (0x3), region = 151 }

// kernel: tile.98
= control target key start
LH: loop header
LB: loop body
LE: loop exit
PB: predicated region body
PF: predicated region fallthrough
CT: control target
= control target key end

     0   :  { %s64_s0 = inlined_call_operand.vmem [shape: f32[4], index: 0, kind: input, shape index: {}]   ;;  %s65_s1 = inlined_call_operand.vmem [shape: f32[64,4], index: 1, kind: output, shape index: {}]  }
   0x1   :  { %v4_v0 = vld [vmem:[%s64_s0] ss:$0 sm:$0xff] }
   0x2   :  { %5 = vst [vmem:[%s65_s1] sm:$0xff] %v4_v0  ;;  %20 = vst [vmem:[%s65_s1 + $0x8] sm:$0xff] %v4_v0 }
   0x3   :  { %21 = vst [vmem:[%s65_s1 + $0x10] sm:$0xff] %v4_v0  ;;  %22 = vst [vmem:[%s65_s1 + $0x18] sm:$0xff] %v4_v0 }
   0x4   :  { %23 = vst [vmem:[%s65_s1 + $0x20] sm:$0xff] %v4_v0  ;;  %24 = vst [vmem:[%s65_s1 + $0x28] sm:$0xff] %v4_v0 }
   0x5   :  { %25 = vst [vmem:[%s65_s1 + $0x30] sm:$0xff] %v4_v0  ;;  %26 = vst [vmem:[%s65_s1 + $0x38] sm:$0xff] %v4_v0 }

// kernel: tile.99
= control target key start
LH: loop header
LB: loop body
LE: loop exit
PB: predicated region body
PF: predicated region fallthrough
CT: control target
= control target key end

     0   :  { %vm5_vm0 = vcmask 1041409   ;;  %s425_s14 = smov 124   ;;  %s426_s21 = smov 116   ;;  %vm7_vm1 = vcmask 31744   ;;  %vm17_vm2 = vcmask 1048544   ;;  %vm27_vm3 = vcmask 1015744   ;;  %s696_s0 = inlined_call_operand.vmem [shape: f32[64,4], index: 0, kind: input, shape index: {}]   ;;  %s697_s1 = inlined_call_operand.vmem [shape: f32[1,256], index: 1, kind: output, shape index: {}]  }
   0x1   :  { %v331_v0 = vld [vmem:[%s696_s0 + $0x1f] sm:$0x1]   ;;  %v335_v3 = vld [vmem:[%s696_s0 + $0x1d] sm:$0x1]   ;;  %v333_v6 = vld [vmem:[%s696_s0 + $0x1e] sm:$0x1]  }
   0x2   :  { %v332_v1 = vld [vmem:[%s696_s0 + $0x3e] sm:$0x2]   ;;  %v336_v4 = vld [vmem:[%s696_s0 + $0x3c] sm:$0x2]   ;;  %v334_v7 = vld [vmem:[%s696_s0 + $0x3d] sm:$0x2]  }
   0x3   :  { %v14_v2 = vsel %vm5_vm0, %v332_v1, %v331_v0  ;;  %v34_v5 = vsel %vm5_vm0, %v336_v4, %v335_v3  ;;  %v337_v8 = vld [vmem:[%s696_s0 + $0x1c] sm:$0x1]   ;;  %v24_v9 = vsel %vm5_vm0, %v334_v7, %v333_v6  ;;  %v339_v12 = vld [vmem:[%s696_s0 + $0x1b] sm:$0x1]   ;;  %v341_v14 = vld [vmem:[%s696_s0 + $0x1a] sm:$0x1]  }
   0x4   :  { %15 = vrot.lane.b32.xlu0 %v14_v2, %s425_s14  ;;  %35 = vrot.lane.b32.xlu1 %v34_v5, %s426_s21  ;;  %v338_v10 = vld [vmem:[%s696_s0 + $0x3b] sm:$0x2]   ;;  %v340_v13 = vld [vmem:[%s696_s0 + $0x3a] sm:$0x2]   ;;  %s427_s3 = smov 120   ;;  %s428_s4 = smov 112  }
   0x5   :  { %v44_v11 = vsel %vm5_vm0, %v338_v10, %v337_v8  ;;  %v342_v15 = vld [vmem:[%s696_s0 + $0x39] sm:$0x2]   ;;  %v54_v16 = vsel %vm5_vm0, %v340_v13, %v339_v12  ;;  %v343_v18 = vld [vmem:[%s696_s0 + $0x19] sm:$0x1]   ;;  %v345_v20 = vld [vmem:[%s696_s0 + $0x18] sm:$0x1]  }
   0x6   :  { %v64_v17 = vsel %vm5_vm0, %v342_v15, %v341_v14  ;;  %v344_v19 = vld [vmem:[%s696_s0 + $0x38] sm:$0x2]   ;;  %v346_v21 = vld [vmem:[%s696_s0 + $0x37] sm:$0x2]   ;;  %s429_s13 = smov 108   ;;  %s430_s14 = smov 104  }
   0x7   :  { %v74_v22 = vsel %vm5_vm0, %v344_v19, %v343_v18  ;;  %v84_v23 = vsel %vm5_vm0, %v346_v21, %v345_v20  ;;  %v347_v24 = vld [vmem:[%s696_s0 + $0x17] sm:$0x1]   ;;  %v349_v26 = vld [vmem:[%s696_s0 + $0x16] sm:$0x1]   ;;  %s431_s23 = smov 100   ;;  %s432_s24 = smov 96  }
   0x8   :  { %25 = vrot.lane.b32.xlu0 %v24_v9, %s427_s3  ;;  %45 = vrot.lane.b32.xlu1 %v44_v11, %s428_s4  ;;  %v348_v25 = vld [vmem:[%s696_s0 + $0x36] sm:$0x2]   ;;  %v350_v27 = vld [vmem:[%s696_s0 + $0x35] sm:$0x2]   ;;  %s433_s4 = smov 92   ;;  %s434_s5 = smov 88  }
   0x9   :  { %v94_v28 = vsel %vm5_vm0, %v348_v25, %v347_v24  ;;  %v104_v29 = vsel %vm5_vm0, %v350_v27, %v349_v26  ;;  %v351_v30 = vld [vmem:[%s696_s0 + $0x15] sm:$0x1]   ;;  %v353_v32 = vld [vmem:[%s696_s0 + $0x14] sm:$0x1]   ;;  %v355_v36 = vld [vmem:[%s696_s0 + $0x13] sm:$0x1]  }
   0xa   :  { %v352_v31 = vld [vmem:[%s696_s0 + $0x34] sm:$0x2]   ;;  %v354_v33 = vld [vmem:[%s696_s0 + $0x33] sm:$0x2]   ;;  %v356_v37 = vld [vmem:[%s696_s0 + $0x32] sm:$0x2]  }
   0xb   :  { %v114_v34 = vsel %vm5_vm0, %v352_v31, %v351_v30  ;;  %v124_v35 = vsel %vm5_vm0, %v354_v33, %v353_v32  ;;  %v357_v38 = vld [vmem:[%s696_s0 + $0x12] sm:$0x1]   ;;  %s436_s15 = smov 80   ;;  %v134_v40 = vsel %vm5_vm0, %v356_v37, %v355_v36  ;;  %v359_v42 = vld [vmem:[%s696_s0 + $0x11] sm:$0x1]   ;;  %s438_s29 = smov 72  }
   0xc   :  { %55 = vrot.lane.b32.xlu0 %v54_v16, %s429_s13  ;;  %65 = vrot.lane.b32.xlu1 %v64_v17, %s430_s14  ;;  %v358_v39 = vld [vmem:[%s696_s0 + $0x31] sm:$0x2]   ;;  %s435_s14 = smov 84   ;;  %v360_v43 = vld [vmem:[%s696_s0 + $0x30] sm:$0x2]   ;;  %s439_s9 = smov 68  }
   0xd   :  { %v144_v41 = vsel %vm5_vm0, %v358_v39, %v357_v38  ;;  %v361_v44 = vld [vmem:[%s696_s0 + $0x10] sm:$0x1]   ;;  %v2_v46 = vld [vmem:[%s696_s0] sm:$0x1]   ;;  %v154_v48 = vsel %vm5_vm0, %v360_v43, %v359_v42  ;;  %v363_v51 = vld [vmem:[%s696_s0 + $0xf] sm:$0x1]  }
   0xe   :  { %v362_v45 = vld [vmem:[%s696_s0 + $0x2f] sm:$0x2]   ;;  %v330_v47 = vld [vmem:[%s696_s0 + $0x1f] sm:$0x2]   ;;  %v364_v52 = vld [vmem:[%s696_s0 + $0x2e] sm:$0x2]  }
   0xf   :  { %v6_v49 = vsel %vm5_vm0, %v330_v47, %v2_v46  ;;  %v164_v50 = vsel %vm5_vm0, %v362_v45, %v361_v44  ;;  %v365_v53 = vld [vmem:[%s696_s0 + $0xe] sm:$0x1]   ;;  %s440_s10 = smov 64   ;;  %v174_v55 = vsel %vm5_vm0, %v364_v52, %v363_v51  ;;  %v367_v57 = vld [vmem:[%s696_s0 + $0xd] sm:$0x1]   ;;  %s441_s19 = smov 60  }
  0x10   :  { %75 = vrot.lane.b32.xlu0 %v74_v22, %s431_s23  ;;  %85 = vrot.lane.b32.xlu1 %v84_v23, %s432_s24  ;;  %s437_s24 = smov 76   ;;  %8 = vst.msk [vmem:[#allocation0] ss:$8 sm:$0x3] %vm7_vm1, %v6_v49   ;;  %v366_v54 = vld [vmem:[%s696_s0 + $0x2d] sm:$0x2]  }
  0x11   :  { %v184_v56 = vsel %vm5_vm0, %v366_v54, %v365_v53  ;;  %v368_v58 = vld [vmem:[%s696_s0 + $0x2c] sm:$0x2]   ;;  %v369_v59 = vld [vmem:[%s696_s0 + $0xc] sm:$0x1]   ;;  %s442_s20 = smov 56   ;;  %s444_s30 = smov 48  }
  0x12   :  { %v370_v60 = vld [vmem:[%s696_s0 + $0x2b] sm:$0x2]   ;;  %v194_v61 = vsel %vm5_vm0, %v368_v58, %v367_v57  ;;  %v371_v63 = vld [vmem:[%s696_s0 + $0xb] sm:$0x1]   ;;  %v373_v1 = vld [vmem:[%s696_s0 + $0xa] sm:$0x1]  }
  0x13   :  { %v204_v62 = vsel %vm5_vm0, %v370_v60, %v369_v59  ;;  %v372_v0 = vld [vmem:[%s696_s0 + $0x2a] sm:$0x2]   ;;  %v374_v2 = vld [vmem:[%s696_s0 + $0x29] sm:$0x2]   ;;  %v375_v5 = vld [vmem:[%s696_s0 + $0x9] sm:$0x1]  }
  0x14   :  { %95 = vrot.lane.b32.xlu0 %v94_v28, %s433_s4  ;;  %105 = vrot.lane.b32.xlu1 %v104_v29, %s434_s5  ;;  %v214_v3 = vsel %vm5_vm0, %v372_v0, %v371_v63  ;;  %v224_v4 = vsel %vm5_vm0, %v374_v2, %v373_v1  ;;  %v376_v6 = vld [vmem:[%s696_s0 + $0x28] sm:$0x2]   ;;  %v377_v7 = vld [vmem:[%s696_s0 + $0x8] sm:$0x1]   ;;  %s446_s11 = smov 40   ;;  %s448_s21 = smov 32  }
  0x15   :  { %v378_v8 = vld [vmem:[%s696_s0 + $0x27] sm:$0x2]   ;;  %v234_v9 = vsel %vm5_vm0, %v376_v6, %v375_v5  ;;  %v379_v11 = vld [vmem:[%s696_s0 + $0x7] sm:$0x1]   ;;  %v381_v13 = vld [vmem:[%s696_s0 + $0x6] sm:$0x1]  }
  0x16   :  { %v244_v10 = vsel %vm5_vm0, %v378_v8, %v377_v7  ;;  %v380_v12 = vld [vmem:[%s696_s0 + $0x26] sm:$0x2]   ;;  %v382_v14 = vld [vmem:[%s696_s0 + $0x25] sm:$0x2]   ;;  %v383_v17 = vld [vmem:[%s696_s0 + $0x5] sm:$0x1]  }
  0x17   :  { %v254_v15 = vsel %vm5_vm0, %v380_v12, %v379_v11  ;;  %v264_v16 = vsel %vm5_vm0, %v382_v14, %v381_v13  ;;  %v384_v18 = vld [vmem:[%s696_s0 + $0x24] sm:$0x2]   ;;  %v385_v19 = vld [vmem:[%s696_s0 + $0x4] sm:$0x1]   ;;  %s450_s2 = smov 24   ;;  %s452_s12 = smov 16  }
  0x18   :  { %115 = vrot.lane.b32.xlu0 %v114_v34, %s435_s14  ;;  %125 = vrot.lane.b32.xlu1 %v124_v35, %s436_s15  ;;  %v386_v20 = vld [vmem:[%s696_s0 + $0x23] sm:$0x2]   ;;  %v274_v21 = vsel %vm5_vm0, %v384_v18, %v383_v17  ;;  %v387_v23 = vld [vmem:[%s696_s0 + $0x3] sm:$0x1]   ;;  %s454_s17 = smov 8   ;;  %s455_s18 = smov 4  }
  0x19   :  { %v284_v22 = vsel %vm5_vm0, %v386_v20, %v385_v19  ;;  %v388_v24 = vld [vmem:[%s696_s0 + $0x22] sm:$0x2]   ;;  %v389_v25 = vld [vmem:[%s696_s0 + $0x2] sm:$0x1]   ;;  %v391_v29 = vld [vmem:[%s696_s0 + $0x1] sm:$0x1]  }
  0x1a   :  { %v390_v26 = vld [vmem:[%s696_s0 + $0x21] sm:$0x2]   ;;  %v294_v27 = vsel %vm5_vm0, %v388_v24, %v387_v23  ;;  %v392_v30 = vld [vmem:[%s696_s0 + $0x20] sm:$0x2]   ;;  %s453_s0 = smov 12   ;;  %vm37_vm4 = vcmask 982944  }
  0x1b   :  { %v304_v28 = vsel %vm5_vm0, %v390_v26, %v389_v25  ;;  %v314_v31 = vsel %vm5_vm0, %v392_v30, %v391_v29  ;;  %vm47_vm5 = vcmask 950144   ;;  %vm57_vm6 = vcmask 917344  }
  0x1c   :  { %135 = vrot.lane.b32.xlu0 %v134_v40, %s437_s24  ;;  %145 = vrot.lane.b32.xlu1 %v144_v41, %s438_s29  ;;  %s443_s29 = smov 52   ;;  %vm67_vm7 = vcmask 884544   ;;  %vm77_vm8 = vcmask 851744   ;;  %vm87_vm9 = vcmask 818944   ;;  %vm97_vm10 = vcmask 786144  }
  0x1d   :  { %vm107_vm11 = vcmask 753344   ;;  %vm117_vm12 = vcmask 720544   ;;  %vm127_vm13 = vcmask 687744   ;;  %vm137_vm14 = vcmask 654944  }
  0x1e   :  { %vm147_vm15 = vcmask 622144   ;;  %vm157_vm0 = vcmask 589344   ;;  %vm167_vm1 = vcmask 556544  }
  0x20   :  { %155 = vrot.lane.b32.xlu0 %v154_v48, %s439_s9  ;;  %165 = vrot.lane.b32.xlu1 %v164_v50, %s440_s10  ;;  %s445_s10 = smov 44  }
  0x24   :  { %175 = vrot.lane.b32.xlu0 %v174_v55, %s441_s19  ;;  %185 = vrot.lane.b32.xlu1 %v184_v56, %s442_s20  ;;  %s447_s20 = smov 36  }
  0x28   :  { %195 = vrot.lane.b32.xlu0 %v194_v61, %s443_s29  ;;  %205 = vrot.lane.b32.xlu1 %v204_v62, %s444_s30  ;;  %s449_s30 = smov 28  }
  0x2c   :  { %215 = vrot.lane.b32.xlu0 %v214_v3, %s445_s10  ;;  %225 = vrot.lane.b32.xlu1 %v224_v4, %s446_s11  ;;  %s451_s11 = smov 20  }
  0x30   :  { %235 = vrot.lane.b32.xlu0 %v234_v9, %s447_s20  ;;  %245 = vrot.lane.b32.xlu1 %v244_v10, %s448_s21 }
  0x34   :  { %255 = vrot.lane.b32.xlu0 %v254_v15, %s449_s30  ;;  %265 = vrot.lane.b32.xlu1 %v264_v16, %s450_s2 }
  0x38   :  { %275 = vrot.lane.b32.xlu0 %v274_v21, %s451_s11  ;;  %285 = vrot.lane.b32.xlu1 %v284_v22, %s452_s12 }
  0x3c   :  { %295 = vrot.lane.b32.xlu0 %v294_v27, %s453_s0  ;;  %305 = vrot.lane.b32.xlu1 %v304_v28, %s454_s17 }
  0x40   :  { %315 = vrot.lane.b32.xlu0 %v314_v31, %s455_s18 }
  0x76   :  { %v16_v32 = vpop.permute.xlu0 %15   ;;  %v36_v33 = vpop.permute.xlu1 %35  }
  0x77   :  { %18 = vst.msk [vmem:[#allocation0] ss:$8 sm:$0x3] %vm17_vm2, %v16_v32   ;;  %vm177_vm2 = vcmask 523744  }
  0x7a   :  { %v26_v34 = vpop.permute.xlu0 %25   ;;  %v46_v35 = vpop.permute.xlu1 %45  }
  0x7b   :  { %28 = vst.msk [vmem:[#allocation0] ss:$8 sm:$0x3] %vm27_vm3, %v26_v34   ;;  %vm187_vm3 = vcmask 490944  }
  0x7c   :  { %38 = vst.msk [vmem:[#allocation0] ss:$8 sm:$0x3] %vm37_vm4, %v36_v33   ;;  %vm197_vm4 = vcmask 458144  }
  0x7d   :  { %48 = vst.msk [vmem:[#allocation0] ss:$8 sm:$0x3] %vm47_vm5, %v46_v35   ;;  %vm207_vm5 = vcmask 425344  }
  0x7e   :  { %v56_v36 = vpop.permute.xlu0 %55   ;;  %v66_v37 = vpop.permute.xlu1 %65  }
  0x7f   :  { %58 = vst.msk [vmem:[#allocation0] ss:$8 sm:$0x3] %vm57_vm6, %v56_v36   ;;  %vm217_vm6 = vcmask 392544  }
  0x80   :  { %68 = vst.msk [vmem:[#allocation0] ss:$8 sm:$0x3] %vm67_vm7, %v66_v37   ;;  %vm227_vm7 = vcmask 359744  }
  0x82   :  { %v76_v38 = vpop.permute.xlu0 %75   ;;  %v86_v39 = vpop.permute.xlu1 %85  }
  0x83   :  { %78 = vst.msk [vmem:[#allocation0] ss:$8 sm:$0x3] %vm77_vm8, %v76_v38   ;;  %vm237_vm8 = vcmask 326944  }
  0x84   :  { %88 = vst.msk [vmem:[#allocation0] ss:$8 sm:$0x3] %vm87_vm9, %v86_v39   ;;  %vm247_vm9 = vcmask 294144  }
  0x86   :  { %v96_v40 = vpop.permute.xlu0 %95   ;;  %v106_v41 = vpop.permute.xlu1 %105  }
  0x87   :  { %98 = vst.msk [vmem:[#allocation0] ss:$8 sm:$0x3] %vm97_vm10, %v96_v40   ;;  %vm257_vm10 = vcmask 261344  }
  0x88   :  { %108 = vst.msk [vmem:[#allocation0] ss:$8 sm:$0x3] %vm107_vm11, %v106_v41   ;;  %vm267_vm11 = vcmask 228544  }
  0x8a   :  { %v116_v42 = vpop.permute.xlu0 %115   ;;  %v126_v43 = vpop.permute.xlu1 %125  }
  0x8b   :  { %118 = vst.msk [vmem:[#allocation0] ss:$8 sm:$0x3] %vm117_vm12, %v116_v42   ;;  %vm277_vm12 = vcmask 195744  }
  0x8c   :  { %128 = vst.msk [vmem:[#allocation0] ss:$8 sm:$0x3] %vm127_vm13, %v126_v43   ;;  %vm287_vm13 = vcmask 162944  }
  0x8e   :  { %v136_v44 = vpop.permute.xlu0 %135   ;;  %v146_v45 = vpop.permute.xlu1 %145  }
  0x8f   :  { %138 = vst.msk [vmem:[#allocation0] ss:$8 sm:$0x3] %vm137_vm14, %v136_v44   ;;  %vm297_vm14 = vcmask 130144  }
  0x90   :  { %148 = vst.msk [vmem:[#allocation0] ss:$8 sm:$0x3] %vm147_vm15, %v146_v45   ;;  %vm307_vm15 = vcmask 97344  }
  0x92   :  { %v156_v46 = vpop.permute.xlu0 %155   ;;  %v166_v47 = vpop.permute.xlu1 %165  }
  0x93   :  { %158 = vst.msk [vmem:[#allocation0] ss:$8 sm:$0x3] %vm157_vm0, %v156_v46   ;;  %vm317_vm0 = vcmask 64544  }
  0x94   :  { %168 = vst.msk [vmem:[#allocation0] ss:$8 sm:$0x3] %vm167_vm1, %v166_v47  }
  0x96   :  { %v176_v48 = vpop.permute.xlu0 %175   ;;  %v186_v49 = vpop.permute.xlu1 %185  }
  0x97   :  { %178 = vst.msk [vmem:[#allocation0] ss:$8 sm:$0x3] %vm177_vm2, %v176_v48  }
  0x98   :  { %188 = vst.msk [vmem:[#allocation0] ss:$8 sm:$0x3] %vm187_vm3, %v186_v49  }
  0x9a   :  { %v196_v50 = vpop.permute.xlu0 %195   ;;  %v206_v51 = vpop.permute.xlu1 %205  }
  0x9b   :  { %198 = vst.msk [vmem:[#allocation0] ss:$8 sm:$0x3] %vm197_vm4, %v196_v50  }
  0x9c   :  { %208 = vst.msk [vmem:[#allocation0] ss:$8 sm:$0x3] %vm207_vm5, %v206_v51  }
  0x9e   :  { %v216_v52 = vpop.permute.xlu0 %215   ;;  %v226_v53 = vpop.permute.xlu1 %225  }
  0x9f   :  { %218 = vst.msk [vmem:[#allocation0] ss:$8 sm:$0x3] %vm217_vm6, %v216_v52  }
  0xa0   :  { %228 = vst.msk [vmem:[#allocation0] ss:$8 sm:$0x3] %vm227_vm7, %v226_v53  }
  0xa2   :  { %v236_v54 = vpop.permute.xlu0 %235   ;;  %v246_v55 = vpop.permute.xlu1 %245  }
  0xa3   :  { %238 = vst.msk [vmem:[#allocation0] ss:$8 sm:$0x3] %vm237_vm8, %v236_v54  }
  0xa4   :  { %248 = vst.msk [vmem:[#allocation0] ss:$8 sm:$0x3] %vm247_vm9, %v246_v55  }
  0xa6   :  { %v256_v56 = vpop.permute.xlu0 %255   ;;  %v266_v57 = vpop.permute.xlu1 %265  }
  0xa7   :  { %258 = vst.msk [vmem:[#allocation0] ss:$8 sm:$0x3] %vm257_vm10, %v256_v56  }
  0xa8   :  { %268 = vst.msk [vmem:[#allocation0] ss:$8 sm:$0x3] %vm267_vm11, %v266_v57  }
  0xaa   :  { %v276_v58 = vpop.permute.xlu0 %275   ;;  %v286_v59 = vpop.permute.xlu1 %285  }
  0xab   :  { %278 = vst.msk [vmem:[#allocation0] ss:$8 sm:$0x3] %vm277_vm12, %v276_v58  }
  0xac   :  { %288 = vst.msk [vmem:[#allocation0] ss:$8 sm:$0x3] %vm287_vm13, %v286_v59  }
  0xae   :  { %v296_v60 = vpop.permute.xlu0 %295   ;;  %v306_v61 = vpop.permute.xlu1 %305  }
  0xaf   :  { %298 = vst.msk [vmem:[#allocation0] ss:$8 sm:$0x3] %vm297_vm14, %v296_v60  }
  0xb0   :  { %308 = vst.msk [vmem:[#allocation0] ss:$8 sm:$0x3] %vm307_vm15, %v306_v61  }
  0xb2   :  { %v316_v62 = vpop.permute.xlu0 %315  }
  0xb3   :  { %318 = vst.msk [vmem:[#allocation0] ss:$8 sm:$0x3] %vm317_vm0, %v316_v62  }
  0xba   :  { %v322_v63 = vld [vmem:[#allocation0] sm:$0x1]  ;;  %v326_v0 = vld [vmem:[#allocation0 + $0x8] sm:$0x1] }
  0xbb   :  { %324 = vst [vmem:[%s697_s1] sm:$0x1] %v322_v63  ;;  %393 = vst [vmem:[%s697_s1 + $0x1] sm:$0x1] %v326_v0 }

// kernel: decoder_forward.21
= control target key start
LH: loop header
LB: loop body
LE: loop exit
PB: predicated region body
PF: predicated region fallthrough
CT: control target
= control target key end

     0   :  { %v48_v0 = vlaneseq  ;;  %s492_s1 = inlined_call_operand.vmem [shape: f32[1,256], index: 1, kind: input, shape index: {}]   ;;  %s493_s2 = inlined_call_operand.vmem [shape: f32[1,256], index: 2, kind: input, shape index: {}]   ;;  %s494_s0 = inlined_call_operand.vmem [shape: f32[128,256], index: 0, kind: input, shape index: {}]   ;;  %s495_s3 = inlined_call_operand.vmem [shape: f32[128,256], index: 3, kind: output, shape index: {}]  }
   0x1   :  { %v46_v2 = vld [vmem:[%s492_s1] sm:$0x3]  ;;  %v15_v6 = vld [vmem:[%s494_s0 + $0x8] sm:$0xff]  ;;  %v16_v8 = vld [vmem:[%s494_s0 + $0x10] sm:$0xff] }
   0x2   :  { %v49_v1 = vshrl.u32 %v48_v0, 7  ;;  %v90_v3 = vld [vmem:[%s493_s2] sm:$0x3]  ;;  %v17_v9 = vld [vmem:[%s494_s0 + $0x18] sm:$0xff]  ;;  %v19_v15 = vld [vmem:[%s494_s0 + $0x28] sm:$0xff] }
   0x3   :  { %v14_v4 = vld [vmem:[%s494_s0] sm:$0xff]  ;;  %v20_v16 = vld [vmem:[%s494_s0 + $0x30] sm:$0xff]  ;;  %v21_v17 = vld [vmem:[%s494_s0 + $0x38] sm:$0xff] }
   0x4   :  { %v50_v5 = vsub.s32 0, %v49_v1  ;;  %v54_v7 = vsub.s32 1, %v49_v1  ;;  %v18_v10 = vld [vmem:[%s494_s0 + $0x20] sm:$0xff]  ;;  %v23_v31 = vld [vmem:[%s494_s0 + $0x48] sm:$0xff]  ;;  %v24_v32 = vld [vmem:[%s494_s0 + $0x50] sm:$0xff] }
   0x5   :  { %v22_v30 = vld [vmem:[%s494_s0 + $0x40] sm:$0xff]  ;;  %v25_v37 = vld [vmem:[%s494_s0 + $0x58] sm:$0xff]  ;;  %v27_v39 = vld [vmem:[%s494_s0 + $0x68] sm:$0xff] }
   0x6   :  { %v243_v11 = vrot.slane %v46_v2, %v50_v5  ;;  %v245_v12 = vrot.slane %v90_v3, %v50_v5  ;;  %v247_v13 = vrot.slane %v46_v2, %v54_v7  ;;  %v249_v14 = vrot.slane %v90_v3, %v54_v7  ;;  %v26_v38 = vld [vmem:[%s494_s0 + $0x60] sm:$0xff]  ;;  %v28_v44 = vld [vmem:[%s494_s0 + $0x70] sm:$0xff]  ;;  %v29_v45 = vld [vmem:[%s494_s0 + $0x78] sm:$0xff] }
   0x7   :  { %v30_v62 = vld [vmem:[%s494_s0 + $0x80] sm:$0xff]  ;;  %v31_v63 = vld [vmem:[%s494_s0 + $0x88] sm:$0xff]  ;;  %v32_v0 = vld [vmem:[%s494_s0 + $0x90] sm:$0xff] }
   0x8   :  { %v58_v18 = vsub.f32 %v14_v4, %v243_v11  ;;  %v59_v19 = vsub.f32 %v15_v6, %v247_v13  ;;  %v60_v20 = vsub.f32 %v16_v8, %v243_v11  ;;  %v61_v21 = vsub.f32 %v17_v9, %v247_v13  ;;  %v33_v5 = vld [vmem:[%s494_s0 + $0x98] sm:$0xff]  ;;  %v34_v6 = vld [vmem:[%s494_s0 + $0xa0] sm:$0xff]  ;;  %v35_v7 = vld [vmem:[%s494_s0 + $0xa8] sm:$0xff] }
   0x9   :  { %v62_v22 = vsub.f32 %v18_v10, %v243_v11  ;;  %v63_v23 = vsub.f32 %v19_v15, %v247_v13  ;;  %v64_v24 = vsub.f32 %v20_v16, %v243_v11  ;;  %v65_v25 = vsub.f32 %v21_v17, %v247_v13  ;;  %v36_v16 = vld [vmem:[%s494_s0 + $0xb0] sm:$0xff]  ;;  %v37_v17 = vld [vmem:[%s494_s0 + $0xb8] sm:$0xff] }
   0xa   :  { %v102_v26 = vmul.f32 %v245_v12, %v58_v18  ;;  %v103_v27 = vmul.f32 %v249_v14, %v59_v19  ;;  %v104_v28 = vmul.f32 %v245_v12, %v60_v20  ;;  %v105_v29 = vmul.f32 %v249_v14, %v61_v21 }
   0xb   :  { %v106_v33 = vmul.f32 %v245_v12, %v62_v22  ;;  %v107_v34 = vmul.f32 %v249_v14, %v63_v23  ;;  %v108_v35 = vmul.f32 %v245_v12, %v64_v24  ;;  %v109_v36 = vmul.f32 %v249_v14, %v65_v25 }
   0xc   :  { %v134_v40 = vmax.f32 %v102_v26, 0.0  ;;  %v135_v41 = vmax.f32 %v103_v27, 0.0  ;;  %v136_v42 = vmax.f32 %v104_v28, 0.0  ;;  %v137_v43 = vmax.f32 %v105_v29, 0.0 }
   0xd   :  { %v138_v46 = vmax.f32 %v106_v33, 0.0  ;;  %v139_v47 = vmax.f32 %v107_v34, 0.0  ;;  %v140_v48 = vmax.f32 %v108_v35, 0.0  ;;  %v141_v49 = vmax.f32 %v109_v36, 0.0  ;;  %v38_v34 = vld [vmem:[%s494_s0 + $0xc0] sm:$0xff]  ;;  %v39_v35 = vld [vmem:[%s494_s0 + $0xc8] sm:$0xff] }
   0xe   :  { %166 = vst [vmem:[%s495_s3] sm:$0xff] %v134_v40  ;;  %167 = vst [vmem:[%s495_s3 + $0x8] sm:$0xff] %v135_v41  ;;  %v66_v50 = vsub.f32 %v22_v30, %v243_v11  ;;  %v67_v51 = vsub.f32 %v23_v31, %v247_v13  ;;  %v68_v52 = vsub.f32 %v24_v32, %v243_v11  ;;  %v40_v36 = vld [vmem:[%s494_s0 + $0xd0] sm:$0xff]  ;;  %v41_v41 = vld [vmem:[%s494_s0 + $0xd8] sm:$0xff] }
   0xf   :  { %168 = vst [vmem:[%s495_s3 + $0x10] sm:$0xff] %v136_v42  ;;  %169 = vst [vmem:[%s495_s3 + $0x18] sm:$0xff] %v137_v43  ;;  %v69_v53 = vsub.f32 %v25_v37, %v247_v13  ;;  %v70_v54 = vsub.f32 %v26_v38, %v243_v11  ;;  %v71_v55 = vsub.f32 %v27_v39, %v247_v13  ;;  %v42_v42 = vld [vmem:[%s494_s0 + $0xe0] sm:$0xff]  ;;  %v43_v43 = vld [vmem:[%s494_s0 + $0xe8] sm:$0xff] }
  0x10   :  { %170 = vst [vmem:[%s495_s3 + $0x20] sm:$0xff] %v138_v46  ;;  %171 = vst [vmem:[%s495_s3 + $0x28] sm:$0xff] %v139_v47  ;;  %v72_v56 = vsub.f32 %v28_v44, %v243_v11  ;;  %v73_v57 = vsub.f32 %v29_v45, %v247_v13  ;;  %v110_v58 = vmul.f32 %v245_v12, %v66_v50 }
  0x11   :  { %172 = vst [vmem:[%s495_s3 + $0x30] sm:$0xff] %v140_v48  ;;  %173 = vst [vmem:[%s495_s3 + $0x38] sm:$0xff] %v141_v49  ;;  %v111_v59 = vmul.f32 %v249_v14, %v67_v51  ;;  %v112_v60 = vmul.f32 %v245_v12, %v68_v52  ;;  %v113_v61 = vmul.f32 %v249_v14, %v69_v53  ;;  %v44_v48 = vld [vmem:[%s494_s0 + $0xf0] sm:$0xff]  ;;  %v45_v49 = vld [vmem:[%s494_s0 + $0xf8] sm:$0xff] }
  0x12   :  { %v114_v1 = vmul.f32 %v245_v12, %v70_v54  ;;  %v115_v2 = vmul.f32 %v249_v14, %v71_v55  ;;  %v116_v3 = vmul.f32 %v245_v12, %v72_v56  ;;  %v117_v4 = vmul.f32 %v249_v14, %v73_v57 }
  0x13   :  { %v142_v8 = vmax.f32 %v110_v58, 0.0  ;;  %v143_v9 = vmax.f32 %v111_v59, 0.0  ;;  %v144_v10 = vmax.f32 %v112_v60, 0.0  ;;  %v145_v15 = vmax.f32 %v113_v61, 0.0 }
  0x14   :  { %v146_v18 = vmax.f32 %v114_v1, 0.0  ;;  %v147_v19 = vmax.f32 %v115_v2, 0.0  ;;  %v148_v20 = vmax.f32 %v116_v3, 0.0  ;;  %v149_v21 = vmax.f32 %v117_v4, 0.0 }
  0x15   :  { %174 = vst [vmem:[%s495_s3 + $0x40] sm:$0xff] %v142_v8  ;;  %175 = vst [vmem:[%s495_s3 + $0x48] sm:$0xff] %v143_v9  ;;  %v74_v22 = vsub.f32 %v30_v62, %v243_v11  ;;  %v75_v23 = vsub.f32 %v31_v63, %v247_v13  ;;  %v76_v24 = vsub.f32 %v32_v0, %v243_v11 }
  0x16   :  { %176 = vst [vmem:[%s495_s3 + $0x50] sm:$0xff] %v144_v10  ;;  %177 = vst [vmem:[%s495_s3 + $0x58] sm:$0xff] %v145_v15  ;;  %v77_v25 = vsub.f32 %v33_v5, %v247_v13  ;;  %v78_v26 = vsub.f32 %v34_v6, %v243_v11  ;;  %v79_v27 = vsub.f32 %v35_v7, %v247_v13 }
  0x17   :  { %178 = vst [vmem:[%s495_s3 + $0x60] sm:$0xff] %v146_v18  ;;  %179 = vst [vmem:[%s495_s3 + $0x68] sm:$0xff] %v147_v19  ;;  %v80_v28 = vsub.f32 %v36_v16, %v243_v11  ;;  %v81_v29 = vsub.f32 %v37_v17, %v247_v13  ;;  %v118_v30 = vmul.f32 %v245_v12, %v74_v22 }
  0x18   :  { %180 = vst [vmem:[%s495_s3 + $0x70] sm:$0xff] %v148_v20  ;;  %181 = vst [vmem:[%s495_s3 + $0x78] sm:$0xff] %v149_v21  ;;  %v119_v31 = vmul.f32 %v249_v14, %v75_v23  ;;  %v120_v32 = vmul.f32 %v245_v12, %v76_v24  ;;  %v121_v33 = vmul.f32 %v249_v14, %v77_v25 }
  0x19   :  { %v122_v37 = vmul.f32 %v245_v12, %v78_v26  ;;  %v123_v38 = vmul.f32 %v249_v14, %v79_v27  ;;  %v124_v39 = vmul.f32 %v245_v12, %v80_v28  ;;  %v125_v40 = vmul.f32 %v249_v14, %v81_v29 }
  0x1a   :  { %v150_v44 = vmax.f32 %v118_v30, 0.0  ;;  %v151_v45 = vmax.f32 %v119_v31, 0.0  ;;  %v152_v46 = vmax.f32 %v120_v32, 0.0  ;;  %v153_v47 = vmax.f32 %v121_v33, 0.0 }
  0x1b   :  { %v154_v50 = vmax.f32 %v122_v37, 0.0  ;;  %v155_v51 = vmax.f32 %v123_v38, 0.0  ;;  %v156_v52 = vmax.f32 %v124_v39, 0.0  ;;  %v157_v53 = vmax.f32 %v125_v40, 0.0 }
  0x1c   :  { %182 = vst [vmem:[%s495_s3 + $0x80] sm:$0xff] %v150_v44  ;;  %183 = vst [vmem:[%s495_s3 + $0x88] sm:$0xff] %v151_v45  ;;  %v82_v54 = vsub.f32 %v38_v34, %v243_v11  ;;  %v83_v55 = vsub.f32 %v39_v35, %v247_v13  ;;  %v84_v56 = vsub.f32 %v40_v36, %v243_v11 }
  0x1d   :  { %184 = vst [vmem:[%s495_s3 + $0x90] sm:$0xff] %v152_v46  ;;  %185 = vst [vmem:[%s495_s3 + $0x98] sm:$0xff] %v153_v47  ;;  %v85_v57 = vsub.f32 %v41_v41, %v247_v13  ;;  %v86_v58 = vsub.f32 %v42_v42, %v243_v11  ;;  %v87_v59 = vsub.f32 %v43_v43, %v247_v13 }
  0x1e   :  { %186 = vst [vmem:[%s495_s3 + $0xa0] sm:$0xff] %v154_v50  ;;  %187 = vst [vmem:[%s495_s3 + $0xa8] sm:$0xff] %v155_v51  ;;  %v88_v60 = vsub.f32 %v44_v48, %v243_v11  ;;  %v89_v61 = vsub.f32 %v45_v49, %v247_v13  ;;  %v126_v62 = vmul.f32 %v245_v12, %v82_v54 }
  0x1f   :  { %188 = vst [vmem:[%s495_s3 + $0xb0] sm:$0xff] %v156_v52  ;;  %189 = vst [vmem:[%s495_s3 + $0xb8] sm:$0xff] %v157_v53  ;;  %v127_v63 = vmul.f32 %v249_v14, %v83_v55  ;;  %v128_v0 = vmul.f32 %v245_v12, %v84_v56  ;;  %v129_v1 = vmul.f32 %v249_v14, %v85_v57 }
  0x20   :  { %v130_v2 = vmul.f32 %v245_v12, %v86_v58  ;;  %v131_v3 = vmul.f32 %v249_v14, %v87_v59  ;;  %v132_v4 = vmul.f32 %v245_v12, %v88_v60  ;;  %v133_v5 = vmul.f32 %v249_v14, %v89_v61 }
  0x21   :  { %v158_v6 = vmax.f32 %v126_v62, 0.0  ;;  %v159_v11 = vmax.f32 %v127_v63, 0.0  ;;  %v160_v7 = vmax.f32 %v128_v0, 0.0  ;;  %v161_v13 = vmax.f32 %v129_v1, 0.0 }
  0x22   :  { %v162_v8 = vmax.f32 %v130_v2, 0.0  ;;  %v163_v9 = vmax.f32 %v131_v3, 0.0  ;;  %v164_v10 = vmax.f32 %v132_v4, 0.0  ;;  %v165_v15 = vmax.f32 %v133_v5, 0.0 }
  0x23   :  { %190 = vst [vmem:[%s495_s3 + $0xc0] sm:$0xff] %v158_v6  ;;  %191 = vst [vmem:[%s495_s3 + $0xc8] sm:$0xff] %v159_v11 }
  0x24   :  { %192 = vst [vmem:[%s495_s3 + $0xd0] sm:$0xff] %v160_v7  ;;  %193 = vst [vmem:[%s495_s3 + $0xd8] sm:$0xff] %v161_v13 }
  0x25   :  { %194 = vst [vmem:[%s495_s3 + $0xe0] sm:$0xff] %v162_v8  ;;  %195 = vst [vmem:[%s495_s3 + $0xe8] sm:$0xff] %v163_v9 }
  0x26   :  { %196 = vst [vmem:[%s495_s3 + $0xf0] sm:$0xff] %v164_v10  ;;  %197 = vst [vmem:[%s495_s3 + $0xf8] sm:$0xff] %v165_v15 }

// kernel: decoder_forward.22
= control target key start
LH: loop header
LB: loop body
LE: loop exit
PB: predicated region body
PF: predicated region fallthrough
CT: control target
= control target key end

     0   :  { %s2197_s9 = smov 0   ;;  %s2199_s10 = smov 0   ;;  %s2859_s0 = inlined_call_operand.vmem [shape: bf16[8450,16], index: 0, kind: input, shape index: {}]   ;;  %s2860_s1 = inlined_call_operand.vmem [shape: bf16[16,12], index: 1, kind: input, shape index: {}]   ;;  %s2861_s2 = inlined_call_operand.vmem [shape: f32[8450,12], index: 2, kind: output, shape index: {}]  }
   0x1   :  { %s2201_s11 = smov 0   ;;  %s2203_s12 = smov 0  }
   0x2   :  { %s2205_s13 = smov 0  }
   0x3 LB: > { %s1744_s14 = sadd.s32 4294967295, %s2147_s13   ;;  %s31_s15 = sadd.s32 1, %s2143_s12  ;;  %s2147_s13 = sphi %s2205_s13, %s12_s13   ;;  %s2143_s12 = sphi %s2203_s12, %s2871_s12   ;;  %s2139_s11 = sphi %s2201_s11, %s2870_s11   ;;  %s2135_s10 = sphi %s2199_s10, %s2869_s10   ;;  %s2131_s9 = sphi %s2197_s9, %s2868_s9  }
   0x4   : > { %p33_p0 = scmp.ge.s32.totalorder %s31_s15, 17  ;;  %s96_s16 = sadd.s32 1, %s2135_s10 }
   0x5   : > { %p106_p1 = scmp.ne.s32.totalorder %s2135_s10, %s2131_s9  ;;  %p107_p2 = scmp.eq.s32.totalorder %s1744_s14, 16 }
   0x6   : > { %s2873_s15 = smov (%p33_p0, %s31_s15), 0  ;;  %p1749_p4 = scmp.ge.s32.totalorder %s2147_s13, 1 }
   0x7   : > { %p2229_p3 = por %p107_p2, %p106_p1  ;;  %s91_s18 = ssub.s32 %s2143_s12, %s2873_s15 }
   0x8   : > { %p163_p5 = scmp.lt.s32.totalorder %s2147_s13, 18  ;;  %p94_p6 = scmp.eq.s32.totalorder %s91_s18, 0 }
   0xa   : > { %p164_p7 = pnand %p1749_p4, %p163_p5 }
   0xb   : > { %s2238_s19 = scalar_select %p94_p6, %s2135_s10, %s96_s16  }
   0xc   : > { %167 = sbr.rel (%p164_p7) target bundleno = 383 (0x17f), region = 28  ;;  %v2243_v0 = vld [vmem:[%s2860_s1] sm:$0xff] (!%p164_p7)   ;;  %s2246_s22 = sshll.u32 (!%p164_p7), %s2139_s11, 6  ;;  %vm235_vm0 = vcmask (!%p164_p7), 97280   ;;  %v2181_v1 = vmov (!%p164_p7), 0.0   ;;  %vm596_vm1 = vcmask (!%p164_p7), 130048  }
   0xd   : > { %p204_p8 = scmp.lt.s32.totalorder (!%p164_p7), %s2246_s22, 1056  ;;  %1871 = vmatprep.subr.bf16.mxu0 (!%p164_p7), %v2243_v0  ;;  %1937 = vmatprep.subr.bf16.mxu1 (!%p164_p7), %v2243_v0  ;;  %238 = vst.msk [vmem:[#allocation2 + $0x10] sm:$0xff] (!%p164_p7), %vm235_vm0, %v2181_v1  ;;  %236 = vst.msk [vmem:[#allocation2] sm:$0xff] (!%p164_p7), %vm235_vm0, %v2181_v1  ;;  %s196_s28 = sand.u32 (!%p164_p7), 1, %s2131_s9  }
   0xe   : > { %237 = vst.msk [vmem:[#allocation2 + $0x8] sm:$0xff] (!%p164_p7), %vm235_vm0, %v2181_v1  ;;  %239 = vst.msk [vmem:[#allocation2 + $0x18] sm:$0xff] (!%p164_p7), %vm235_vm0, %v2181_v1  ;;  %1872 = vmatpush3.bf16.msra.mxu0 (!%p164_p7), %v2243_v0  ;;  %1938 = vmatpush3.bf16.msra.mxu1 (!%p164_p7), %v2243_v0  ;;  %s1750_s29 = sshll.u32 (!%p164_p7), %s196_s28, 9 }
   0xf   : > { %240 = vst.msk [vmem:[#allocation2 + $0x20] sm:$0xff] (!%p164_p7), %vm235_vm0, %v2181_v1  ;;  %241 = vst.msk [vmem:[#allocation2 + $0x28] sm:$0xff] (!%p164_p7), %vm235_vm0, %v2181_v1  ;;  %s2462_s30 = scalar_lea.vmem (!%p164_p7), [#allocation3], %s1750_s29  }
  0x10   : > { %242 = vst.msk [vmem:[#allocation2 + $0x30] sm:$0xff] (!%p164_p7), %vm235_vm0, %v2181_v1  ;;  %243 = vst.msk [vmem:[#allocation2 + $0x38] sm:$0xff] (!%p164_p7), %vm235_vm0, %v2181_v1 }
  0x11   : > { %244 = vst.msk [vmem:[#allocation2 + $0x40] sm:$0xff] (!%p164_p7), %vm235_vm0, %v2181_v1  ;;  %245 = vst.msk [vmem:[#allocation2 + $0x48] sm:$0xff] (!%p164_p7), %vm235_vm0, %v2181_v1 }
  0x12   : > { %246 = vst.msk [vmem:[#allocation2 + $0x50] sm:$0xff] (!%p164_p7), %vm235_vm0, %v2181_v1  ;;  %247 = vst.msk [vmem:[#allocation2 + $0x58] sm:$0xff] (!%p164_p7), %vm235_vm0, %v2181_v1 }
  0x13   : > { %248 = vst.msk [vmem:[#allocation2 + $0x60] sm:$0xff] %vm235_vm0, %v2181_v1  ;;  %249 = vst.msk [vmem:[#allocation2 + $0x68] sm:$0xff] %vm235_vm0, %v2181_v1  ;;  %s205_s23 = scalar_select %p204_p8, %s2246_s22, 1056 }
  0x14   : > { %250 = vst.msk [vmem:[#allocation2 + $0x70] sm:$0xff] %vm235_vm0, %v2181_v1  ;;  %251 = vst.msk [vmem:[#allocation2 + $0x78] sm:$0xff] %vm235_vm0, %v2181_v1  ;;  %v302_v34 = vld [vmem:[#allocation2 + $0x10] sm:$0xff]  ;;  %v300_v36 = vld [vmem:[#allocation2] sm:$0xff]  ;;  %s1250_s3 = ssub.s32 (%p2229_p3), 1057, %s2246_s22  ;;  %s1835_s4 = sshll.u32 (%p2229_p3), %s2139_s11, 9 }
  0x15   : > { %252 = vst.msk [vmem:[#allocation2 + $0x80] sm:$0xff] %vm235_vm0, %v2181_v1  ;;  %253 = vst.msk [vmem:[#allocation2 + $0x88] sm:$0xff] %vm235_vm0, %v2181_v1  ;;  %s1752_s24 = sshll.u32 %s205_s23, 2  ;;  %v303_v39 = vld [vmem:[#allocation2 + $0x18] sm:$0xff]  ;;  %v301_v44 = vld [vmem:[#allocation2 + $0x8] sm:$0xff]  ;;  %p1251_p9 = scmp.lt.s32.totalorder (%p2229_p3), %s1250_s3, 64 }
  0x16   : > { %254 = vst.msk [vmem:[#allocation2 + $0x90] sm:$0xff] %vm235_vm0, %v2181_v1  ;;  %255 = vst.msk [vmem:[#allocation2 + $0x98] sm:$0xff] %vm235_vm0, %v2181_v1  ;;  %s2387_s27 = scalar_lea.vmem %s2859_s0, %s1752_s24  ;;  %v304_v60 = vld [vmem:[#allocation2 + $0x20] sm:$0xff]  ;;  %s2655_s7 = scalar_lea.vmem (%p2229_p3), %s2861_s2, %s1835_s4  }
  0x17   : > { %256 = vst.msk [vmem:[#allocation2 + $0xa0] sm:$0xff] %vm235_vm0, %v2181_v1  ;;  %257 = vst.msk [vmem:[#allocation2 + $0xa8] sm:$0xff] %vm235_vm0, %v2181_v1  ;;  %v2045_v2 = vld [vmem:[%s2387_s27] sm:$0xff]   ;;  %v2047_v4 = vld [vmem:[%s2387_s27 + $0x8] sm:$0xff]  }
  0x18   : > { %258 = vst.msk [vmem:[#allocation2 + $0xb0] sm:$0xff] %vm235_vm0, %v2181_v1  ;;  %259 = vst.msk [vmem:[#allocation2 + $0xb8] sm:$0xff] %vm235_vm0, %v2181_v1  ;;  %v2046_v3 = vld [vmem:[%s2387_s27 + $0x80] sm:$0xff]   ;;  %1873 = vmatprep.mubr.msk.bf16.mxu0 %vm596_vm1, %v2045_v2  ;;  %v2048_v5 = vld [vmem:[%s2387_s27 + $0x88] sm:$0xff]  }
  0x19   : > { %260 = vst.msk [vmem:[#allocation2 + $0xc0] sm:$0xff] %vm235_vm0, %v2181_v1  ;;  %261 = vst.msk [vmem:[#allocation2 + $0xc8] sm:$0xff] %vm235_vm0, %v2181_v1  ;;  %1905 = vmatprep.mubr.msk.bf16.mxu1 %vm596_vm1, %v2046_v3  ;;  %1874 = vmatmul.mubr.msk.bf16.vlgmr.msra.gmra.mrb[0].mxu0 %vm596_vm1, %v2047_v4  ;;  %v2049_v6 = vld [vmem:[%s2387_s27 + $0x10] sm:$0xff]   ;;  %v2051_v8 = vld [vmem:[%s2387_s27 + $0x18] sm:$0xff]  }
  0x1a   : > { %262 = vst.msk [vmem:[#allocation2 + $0xd0] sm:$0xff] %vm235_vm0, %v2181_v1  ;;  %263 = vst.msk [vmem:[#allocation2 + $0xd8] sm:$0xff] %vm235_vm0, %v2181_v1  ;;  %1906 = vmatmul.mubr.msk.bf16.vlgmr.msra.gmra.mrb[0].mxu1 %vm596_vm1, %v2048_v5  ;;  %v2050_v7 = vld [vmem:[%s2387_s27 + $0x90] sm:$0xff]   ;;  %1877 = vmatprep.mubr.msk.bf16.mxu0 %vm596_vm1, %v2049_v6  ;;  %v2052_v9 = vld [vmem:[%s2387_s27 + $0x98] sm:$0xff]  }
  0x1b   : > { %264 = vst.msk [vmem:[#allocation2 + $0xe0] sm:$0xff] %vm235_vm0, %v2181_v1  ;;  %265 = vst.msk [vmem:[#allocation2 + $0xe8] sm:$0xff] %vm235_vm0, %v2181_v1  ;;  %1909 = vmatprep.mubr.msk.bf16.mxu1 %vm596_vm1, %v2050_v7  ;;  %v2053_v10 = vld [vmem:[%s2387_s27 + $0x20] sm:$0xff]   ;;  %v2055_v12 = vld [vmem:[%s2387_s27 + $0x28] sm:$0xff]  }
  0x1c   : > { %266 = vst.msk [vmem:[#allocation2 + $0xf0] sm:$0xff] %vm235_vm0, %v2181_v1  ;;  %267 = vst.msk [vmem:[#allocation2 + $0xf8] sm:$0xff] %vm235_vm0, %v2181_v1  ;;  %v2054_v11 = vld [vmem:[%s2387_s27 + $0xa0] sm:$0xff]   ;;  %v2056_v13 = vld [vmem:[%s2387_s27 + $0xa8] sm:$0xff]  }
  0x1d   : > { %268 = vst.msk [vmem:[#allocation2 + $0x100] sm:$0xff] %vm235_vm0, %v2181_v1  ;;  %269 = vst.msk [vmem:[#allocation2 + $0x108] sm:$0xff] %vm235_vm0, %v2181_v1  ;;  %v2057_v14 = vld [vmem:[%s2387_s27 + $0x30] sm:$0xff]   ;;  %v2059_v16 = vld [vmem:[%s2387_s27 + $0x38] sm:$0xff]  }
  0x1e   : > { %270 = vst.msk [vmem:[#allocation2 + $0x110] sm:$0xff] %vm235_vm0, %v2181_v1  ;;  %271 = vst.msk [vmem:[#allocation2 + $0x118] sm:$0xff] %vm235_vm0, %v2181_v1  ;;  %v2058_v15 = vld [vmem:[%s2387_s27 + $0xb0] sm:$0xff]   ;;  %v2060_v17 = vld [vmem:[%s2387_s27 + $0xb8] sm:$0xff]  }
  0x1f   : > { %272 = vst.msk [vmem:[#allocation2 + $0x120] sm:$0xff] %vm235_vm0, %v2181_v1  ;;  %273 = vst.msk [vmem:[#allocation2 + $0x128] sm:$0xff] %vm235_vm0, %v2181_v1  ;;  %v2061_v18 = vld [vmem:[%s2387_s27 + $0x40] sm:$0xff]   ;;  %v2063_v20 = vld [vmem:[%s2387_s27 + $0x48] sm:$0xff]  }
  0x20   : > { %274 = vst.msk [vmem:[#allocation2 + $0x130] sm:$0xff] %vm235_vm0, %v2181_v1  ;;  %275 = vst.msk [vmem:[#allocation2 + $0x138] sm:$0xff] %vm235_vm0, %v2181_v1  ;;  %v2062_v19 = vld [vmem:[%s2387_s27 + $0xc0] sm:$0xff]   ;;  %v2064_v21 = vld [vmem:[%s2387_s27 + $0xc8] sm:$0xff]  }
  0x21   : > { %276 = vst.msk [vmem:[#allocation2 + $0x140] sm:$0xff] %vm235_vm0, %v2181_v1  ;;  %277 = vst.msk [vmem:[#allocation2 + $0x148] sm:$0xff] %vm235_vm0, %v2181_v1  ;;  %1878 = vmatmul.mubr.msk.bf16.gmra.mrb[4].mxu0 %vm596_vm1, %v2051_v8  ;;  %v2065_v22 = vld [vmem:[%s2387_s27 + $0x50] sm:$0xff]   ;;  %v2067_v24 = vld [vmem:[%s2387_s27 + $0x58] sm:$0xff]  }
  0x22   : > { %278 = vst.msk [vmem:[#allocation2 + $0x150] sm:$0xff] %vm235_vm0, %v2181_v1  ;;  %279 = vst.msk [vmem:[#allocation2 + $0x158] sm:$0xff] %vm235_vm0, %v2181_v1  ;;  %1910 = vmatmul.mubr.msk.bf16.gmra.mrb[4].mxu1 %vm596_vm1, %v2052_v9  ;;  %1881 = vmatprep.mubr.msk.bf16.mxu0 %vm596_vm1, %v2053_v10  ;;  %v2066_v23 = vld [vmem:[%s2387_s27 + $0xd0] sm:$0xff]   ;;  %v2068_v25 = vld [vmem:[%s2387_s27 + $0xd8] sm:$0xff]  }
  0x23   : > { %280 = vst.msk [vmem:[#allocation2 + $0x160] sm:$0xff] %vm235_vm0, %v2181_v1  ;;  %281 = vst.msk [vmem:[#allocation2 + $0x168] sm:$0xff] %vm235_vm0, %v2181_v1  ;;  %1913 = vmatprep.mubr.msk.bf16.mxu1 %vm596_vm1, %v2054_v11  ;;  %v2069_v26 = vld [vmem:[%s2387_s27 + $0x60] sm:$0xff]   ;;  %v2071_v28 = vld [vmem:[%s2387_s27 + $0x68] sm:$0xff]  }
  0x24   : > { %282 = vst.msk [vmem:[#allocation2 + $0x170] sm:$0xff] %vm235_vm0, %v2181_v1  ;;  %283 = vst.msk [vmem:[#allocation2 + $0x178] sm:$0xff] %vm235_vm0, %v2181_v1  ;;  %v2070_v27 = vld [vmem:[%s2387_s27 + $0xe0] sm:$0xff]   ;;  %v2072_v29 = vld [vmem:[%s2387_s27 + $0xe8] sm:$0xff]  }
  0x25   : > { %284 = vst.msk [vmem:[#allocation2 + $0x180] sm:$0xff] %vm235_vm0, %v2181_v1  ;;  %285 = vst.msk [vmem:[#allocation2 + $0x188] sm:$0xff] %vm235_vm0, %v2181_v1  ;;  %v2073_v30 = vld [vmem:[%s2387_s27 + $0x70] sm:$0xff]   ;;  %v2075_v32 = vld [vmem:[%s2387_s27 + $0x78] sm:$0xff]  }
  0x26   : > { %286 = vst.msk [vmem:[#allocation2 + $0x190] sm:$0xff] %vm235_vm0, %v2181_v1  ;;  %287 = vst.msk [vmem:[#allocation2 + $0x198] sm:$0xff] %vm235_vm0, %v2181_v1  ;;  %v2074_v31 = vld [vmem:[%s2387_s27 + $0xf0] sm:$0xff]   ;;  %v2076_v33 = vld [vmem:[%s2387_s27 + $0xf8] sm:$0xff]  }
  0x27   : > { %288 = vst.msk [vmem:[#allocation2 + $0x1a0] sm:$0xff] %vm235_vm0, %v2181_v1  ;;  %289 = vst.msk [vmem:[#allocation2 + $0x1a8] sm:$0xff] %vm235_vm0, %v2181_v1  ;;  %v334_v35 = vld [vmem:[#allocation2 + $0x110] sm:$0xff]  ;;  %v332_v38 = vld [vmem:[#allocation2 + $0x100] sm:$0xff] }
  0x28   : > { %290 = vst.msk [vmem:[#allocation2 + $0x1b0] sm:$0xff] %vm235_vm0, %v2181_v1  ;;  %291 = vst.msk [vmem:[#allocation2 + $0x1b8] sm:$0xff] %vm235_vm0, %v2181_v1  ;;  %v335_v43 = vld [vmem:[#allocation2 + $0x118] sm:$0xff]  ;;  %v333_v49 = vld [vmem:[#allocation2 + $0x108] sm:$0xff] }
  0x29   : > { %292 = vst.msk [vmem:[#allocation2 + $0x1c0] sm:$0xff] %vm235_vm0, %v2181_v1  ;;  %293 = vst.msk [vmem:[#allocation2 + $0x1c8] sm:$0xff] %vm235_vm0, %v2181_v1  ;;  %1882 = vmatmul.mubr.msk.bf16.gmra.mrb[8].mxu0 %vm596_vm1, %v2055_v12  ;;  %v306_v58 = vld [vmem:[#allocation2 + $0x30] sm:$0xff]  ;;  %v336_v62 = vld [vmem:[#allocation2 + $0x120] sm:$0xff] }
  0x2a   : > { %294 = vst.msk [vmem:[#allocation2 + $0x1d0] sm:$0xff] %vm235_vm0, %v2181_v1  ;;  %295 = vst.msk [vmem:[#allocation2 + $0x1d8] sm:$0xff] %vm235_vm0, %v2181_v1  ;;  %1914 = vmatmul.mubr.msk.bf16.gmra.mrb[8].mxu1 %vm596_vm1, %v2056_v13  ;;  %1885 = vmatprep.mubr.msk.bf16.mxu0 %vm596_vm1, %v2057_v14  ;;  %v338_v59 = vld [vmem:[#allocation2 + $0x130] sm:$0xff]  ;;  %v307_v63 = vld [vmem:[#allocation2 + $0x38] sm:$0xff] }
  0x2b   : > { %296 = vst.msk [vmem:[#allocation2 + $0x1e0] sm:$0xff] %vm235_vm0, %v2181_v1  ;;  %297 = vst.msk [vmem:[#allocation2 + $0x1e8] sm:$0xff] %vm235_vm0, %v2181_v1  ;;  %1917 = vmatprep.mubr.msk.bf16.mxu1 %vm596_vm1, %v2058_v15  ;;  %v339_v3 = vld [vmem:[#allocation2 + $0x138] sm:$0xff]  ;;  %v305_v4 = vld [vmem:[#allocation2 + $0x28] sm:$0xff] }
  0x2c   : > { %298 = vst.msk [vmem:[#allocation2 + $0x1f0] sm:$0xff] %vm235_vm0, %v2181_v1  ;;  %299 = vst.msk [vmem:[#allocation2 + $0x1f8] sm:$0xff] %vm235_vm0, %v2181_v1  ;;  %v337_v10 = vld [vmem:[#allocation2 + $0x128] sm:$0xff] }
  0x31   : > { %1886 = vmatmul.mubr.msk.bf16.gmra.mrb[12].mxu0 %vm596_vm1, %v2059_v16 }
  0x32   : > { %1918 = vmatmul.mubr.msk.bf16.gmra.mrb[12].mxu1 %vm596_vm1, %v2060_v17  ;;  %1889 = vmatprep.mubr.msk.bf16.mxu0 %vm596_vm1, %v2061_v18 }
  0x33   : > { %1921 = vmatprep.mubr.msk.bf16.mxu1 %vm596_vm1, %v2062_v19 }
  0x39   : > { %1890 = vmatmul.mubr.msk.bf16.gmra.mrb[16].mxu0 %vm596_vm1, %v2063_v20 }
  0x3a   : > { %1922 = vmatmul.mubr.msk.bf16.gmra.mrb[16].mxu1 %vm596_vm1, %v2064_v21  ;;  %1893 = vmatprep.mubr.msk.bf16.mxu0 %vm596_vm1, %v2065_v22 }
  0x3b   : > { %1925 = vmatprep.mubr.msk.bf16.mxu1 %vm596_vm1, %v2066_v23 }
  0x41   : > { %1894 = vmatmul.mubr.msk.bf16.gmra.mrb[20].mxu0 %vm596_vm1, %v2067_v24 }
  0x42   : > { %1926 = vmatmul.mubr.msk.bf16.gmra.mrb[20].mxu1 %vm596_vm1, %v2068_v25  ;;  %1897 = vmatprep.mubr.msk.bf16.mxu0 %vm596_vm1, %v2069_v26  ;;  %v310_v26 = vld [vmem:[#allocation2 + $0x50] sm:$0xff] }
  0x43   : > { %1929 = vmatprep.mubr.msk.bf16.mxu1 %vm596_vm1, %v2070_v27  ;;  %v342_v27 = vld [vmem:[#allocation2 + $0x150] sm:$0xff] }
  0x49   : > { %1898 = vmatmul.mubr.msk.bf16.gmra.mrb[24].mxu0 %vm596_vm1, %v2071_v28  ;;  %v308_v28 = vld [vmem:[#allocation2 + $0x40] sm:$0xff] }
  0x4a   : > { %1930 = vmatmul.mubr.msk.bf16.gmra.mrb[24].mxu1 %vm596_vm1, %v2072_v29  ;;  %1901 = vmatprep.mubr.msk.bf16.mxu0 %vm596_vm1, %v2073_v30  ;;  %v340_v30 = vld [vmem:[#allocation2 + $0x140] sm:$0xff] }
  0x4b   : > { %1933 = vmatprep.mubr.msk.bf16.mxu1 %vm596_vm1, %v2074_v31  ;;  %v311_v31 = vld [vmem:[#allocation2 + $0x58] sm:$0xff] }
  0x51   : > { %1902 = vmatmul.mubr.msk.bf16.gmra.mrb[28].mxu0 %vm596_vm1, %v2075_v32 }
  0x52   : > { %1934 = vmatmul.mubr.msk.bf16.gmra.mrb[28].mxu1 %vm596_vm1, %v2076_v33 }
  0xec   : > { %v1875_v37 = vpop.f32.mrb[0].mxu0 }
  0xed   : > { %v984_v40 = vadd.f32 %v1875_v37, %v302_v34  ;;  %v1907_v41 = vpop.f32.mrb[0].mxu1  ;;  %v727_v42 = vpop.f32.mrb[1].mxu0 }
  0xee   : > { %v1016_v45 = vadd.f32 %v1907_v41, %v334_v35  ;;  %v982_v46 = vadd.f32 %v727_v42, %v300_v36  ;;  %v855_v47 = vpop.f32.mrb[1].mxu1  ;;  %v1876_v48 = vpop.f32.mrb[2].mxu0  ;;  %v343_v35 = vld [vmem:[#allocation2 + $0x158] sm:$0xff]  ;;  %v309_v36 = vld [vmem:[#allocation2 + $0x48] sm:$0xff] }
  0xef   : > { %1049 = vst.msk [vmem:[#allocation2 + $0x10] sm:$0xff] %vm235_vm0, %v984_v40  ;;  %v1014_v50 = vadd.f32 %v855_v47, %v332_v38  ;;  %v985_v51 = vadd.f32 %v1876_v48, %v303_v39  ;;  %v1908_v52 = vpop.f32.mrb[2].mxu1  ;;  %v730_v53 = vpop.f32.mrb[3].mxu0  ;;  %v341_v42 = vld [vmem:[#allocation2 + $0x148] sm:$0xff] }
  0xf0   : > { %1081 = vst.msk [vmem:[#allocation2 + $0x110] sm:$0xff] %vm235_vm0, %v1016_v45  ;;  %1047 = vst.msk [vmem:[#allocation2] sm:$0xff] %vm235_vm0, %v982_v46  ;;  %v1017_v54 = vadd.f32 %v1908_v52, %v335_v43  ;;  %v983_v55 = vadd.f32 %v730_v53, %v301_v44  ;;  %v858_v56 = vpop.f32.mrb[3].mxu1 }
  0xf1   : > { %1079 = vst.msk [vmem:[#allocation2 + $0x100] sm:$0xff] %vm235_vm0, %v1014_v50  ;;  %1050 = vst.msk [vmem:[#allocation2 + $0x18] sm:$0xff] %vm235_vm0, %v985_v51  ;;  %v1015_v57 = vadd.f32 %v858_v56, %v333_v49 }
  0xf2   : > { %1082 = vst.msk [vmem:[#allocation2 + $0x118] sm:$0xff] %vm235_vm0, %v1017_v54  ;;  %1048 = vst.msk [vmem:[#allocation2 + $0x8] sm:$0xff] %vm235_vm0, %v983_v55 }
  0xf3   : > { %1080 = vst.msk [vmem:[#allocation2 + $0x108] sm:$0xff] %vm235_vm0, %v1015_v57 }
  0xf4   : > { %v1879_v61 = vpop.f32.mrb[4].mxu0 }
  0xf5   : > { %v988_v0 = vadd.f32 %v1879_v61, %v306_v58  ;;  %v1911_v1 = vpop.f32.mrb[4].mxu1  ;;  %v743_v2 = vpop.f32.mrb[5].mxu0  ;;  %v314_v58 = vld [vmem:[#allocation2 + $0x70] sm:$0xff] }
  0xf6   : > { %v1116_v5 = vld [vmem:[#allocation2 + $0x10] sm:$0xff]  ;;  %v1020_v6 = vadd.f32 %v1911_v1, %v338_v59  ;;  %v986_v7 = vadd.f32 %v743_v2, %v304_v60  ;;  %v871_v8 = vpop.f32.mrb[5].mxu1  ;;  %v1880_v9 = vpop.f32.mrb[6].mxu0  ;;  %v312_v60 = vld [vmem:[#allocation2 + $0x60] sm:$0xff] }
  0xf7   : > { %1180 = vst.msk [vmem:[%s2462_s30 + $0x10] sm:$0xff] %vm235_vm0, %v1116_v5  ;;  %v1148_v11 = vld [vmem:[#allocation2 + $0x110] sm:$0xff]  ;;  %v1114_v12 = vld [vmem:[#allocation2] sm:$0xff]  ;;  %1053 = vst.msk [vmem:[#allocation2 + $0x30] sm:$0xff] %vm235_vm0, %v988_v0  ;;  %v1018_v13 = vadd.f32 %v871_v8, %v336_v62  ;;  %v989_v14 = vadd.f32 %v1880_v9, %v307_v63  ;;  %v1912_v15 = vpop.f32.mrb[6].mxu1  ;;  %v746_v16 = vpop.f32.mrb[7].mxu0 }
  0xf8   : > { %1212 = vst.msk [vmem:[%s2462_s30 + $0x110] sm:$0xff] %vm235_vm0, %v1148_v11  ;;  %1178 = vst.msk [vmem:[%s2462_s30] sm:$0xff] %vm235_vm0, %v1114_v12  ;;  %v1146_v17 = vld [vmem:[#allocation2 + $0x100] sm:$0xff]  ;;  %v1117_v18 = vld [vmem:[#allocation2 + $0x18] sm:$0xff]  ;;  %v1021_v19 = vadd.f32 %v1912_v15, %v339_v3  ;;  %v987_v20 = vadd.f32 %v746_v16, %v305_v4  ;;  %v874_v21 = vpop.f32.mrb[7].mxu1 }
  0xf9   : > { %1085 = vst.msk [vmem:[#allocation2 + $0x130] sm:$0xff] %vm235_vm0, %v1020_v6  ;;  %1051 = vst.msk [vmem:[#allocation2 + $0x20] sm:$0xff] %vm235_vm0, %v986_v7  ;;  %v1149_v22 = vld [vmem:[#allocation2 + $0x118] sm:$0xff]  ;;  %v1115_v23 = vld [vmem:[#allocation2 + $0x8] sm:$0xff]  ;;  %v1019_v24 = vadd.f32 %v874_v21, %v337_v10 }
  0xfa   : > { %1210 = vst.msk [vmem:[%s2462_s30 + $0x100] sm:$0xff] %vm235_vm0, %v1146_v17  ;;  %1181 = vst.msk [vmem:[%s2462_s30 + $0x18] sm:$0xff] %vm235_vm0, %v1117_v18  ;;  %v1147_v25 = vld [vmem:[#allocation2 + $0x108] sm:$0xff]  ;;  %v346_v59 = vld [vmem:[#allocation2 + $0x170] sm:$0xff] }
  0xfb   : > { %1083 = vst.msk [vmem:[#allocation2 + $0x120] sm:$0xff] %vm235_vm0, %v1018_v13  ;;  %1054 = vst.msk [vmem:[#allocation2 + $0x38] sm:$0xff] %vm235_vm0, %v989_v14  ;;  %v344_v62 = vld [vmem:[#allocation2 + $0x160] sm:$0xff]  ;;  %v315_v63 = vld [vmem:[#allocation2 + $0x78] sm:$0xff] }
  0xfc   : > { %1213 = vst.msk [vmem:[%s2462_s30 + $0x118] sm:$0xff] %vm235_vm0, %v1149_v22  ;;  %1179 = vst.msk [vmem:[%s2462_s30 + $0x8] sm:$0xff] %vm235_vm0, %v1115_v23  ;;  %v1883_v29 = vpop.f32.mrb[8].mxu0  ;;  %v347_v3 = vld [vmem:[#allocation2 + $0x178] sm:$0xff]  ;;  %v313_v4 = vld [vmem:[#allocation2 + $0x68] sm:$0xff] }
  0xfd   : > { %1086 = vst.msk [vmem:[#allocation2 + $0x138] sm:$0xff] %vm235_vm0, %v1021_v19  ;;  %1052 = vst.msk [vmem:[#allocation2 + $0x28] sm:$0xff] %vm235_vm0, %v987_v20  ;;  %v992_v32 = vadd.f32 %v1883_v29, %v310_v26  ;;  %v1915_v33 = vpop.f32.mrb[8].mxu1  ;;  %v759_v34 = vpop.f32.mrb[9].mxu0  ;;  %v345_v10 = vld [vmem:[#allocation2 + $0x168] sm:$0xff]  ;;  %v318_v26 = vld [vmem:[#allocation2 + $0x90] sm:$0xff] }
  0xfe   : > { %1211 = vst.msk [vmem:[%s2462_s30 + $0x108] sm:$0xff] %vm235_vm0, %v1147_v25  ;;  %1084 = vst.msk [vmem:[#allocation2 + $0x128] sm:$0xff] %vm235_vm0, %v1019_v24  ;;  %v1120_v37 = vld [vmem:[#allocation2 + $0x30] sm:$0xff]  ;;  %v1024_v38 = vadd.f32 %v1915_v33, %v342_v27  ;;  %v990_v39 = vadd.f32 %v759_v34, %v308_v28  ;;  %v887_v40 = vpop.f32.mrb[9].mxu1  ;;  %v1884_v41 = vpop.f32.mrb[10].mxu0  ;;  %v316_v28 = vld [vmem:[#allocation2 + $0x80] sm:$0xff] }
  0xff   : > { %1184 = vst.msk [vmem:[%s2462_s30 + $0x30] sm:$0xff] %vm235_vm0, %v1120_v37  ;;  %1057 = vst.msk [vmem:[#allocation2 + $0x50] sm:$0xff] %vm235_vm0, %v992_v32  ;;  %v1022_v45 = vadd.f32 %v887_v40, %v340_v30  ;;  %v993_v46 = vadd.f32 %v1884_v41, %v311_v31  ;;  %v1916_v47 = vpop.f32.mrb[10].mxu1  ;;  %v762_v48 = vpop.f32.mrb[11].mxu0  ;;  %v350_v27 = vld [vmem:[#allocation2 + $0x190] sm:$0xff]  ;;  %v348_v30 = vld [vmem:[#allocation2 + $0x180] sm:$0xff] }
 0x100   : > { %v1152_v43 = vld [vmem:[#allocation2 + $0x130] sm:$0xff]  ;;  %v1118_v44 = vld [vmem:[#allocation2 + $0x20] sm:$0xff]  ;;  %1089 = vst.msk [vmem:[#allocation2 + $0x150] sm:$0xff] %vm235_vm0, %v1024_v38  ;;  %1055 = vst.msk [vmem:[#allocation2 + $0x40] sm:$0xff] %vm235_vm0, %v990_v39  ;;  %v1025_v51 = vadd.f32 %v1916_v47, %v343_v35  ;;  %v991_v52 = vadd.f32 %v762_v48, %v309_v36  ;;  %v890_v53 = vpop.f32.mrb[11].mxu1 }
 0x101   : > { %1216 = vst.msk [vmem:[%s2462_s30 + $0x130] sm:$0xff] %vm235_vm0, %v1152_v43  ;;  %1182 = vst.msk [vmem:[%s2462_s30 + $0x20] sm:$0xff] %vm235_vm0, %v1118_v44  ;;  %v1023_v56 = vadd.f32 %v890_v53, %v341_v42  ;;  %v319_v31 = vld [vmem:[#allocation2 + $0x98] sm:$0xff]  ;;  %v317_v36 = vld [vmem:[#allocation2 + $0x88] sm:$0xff] }
 0x102   : > { %v1150_v49 = vld [vmem:[#allocation2 + $0x120] sm:$0xff]  ;;  %v1121_v50 = vld [vmem:[#allocation2 + $0x38] sm:$0xff]  ;;  %1087 = vst.msk [vmem:[#allocation2 + $0x140] sm:$0xff] %vm235_vm0, %v1022_v45  ;;  %1058 = vst.msk [vmem:[#allocation2 + $0x58] sm:$0xff] %vm235_vm0, %v993_v46 }
 0x103   : > { %1214 = vst.msk [vmem:[%s2462_s30 + $0x120] sm:$0xff] %vm235_vm0, %v1150_v49  ;;  %1185 = vst.msk [vmem:[%s2462_s30 + $0x38] sm:$0xff] %vm235_vm0, %v1121_v50  ;;  %v351_v35 = vld [vmem:[#allocation2 + $0x198] sm:$0xff]  ;;  %v349_v42 = vld [vmem:[#allocation2 + $0x188] sm:$0xff] }
 0x104   : > { %v1153_v54 = vld [vmem:[#allocation2 + $0x138] sm:$0xff]  ;;  %v1119_v55 = vld [vmem:[#allocation2 + $0x28] sm:$0xff]  ;;  %1090 = vst.msk [vmem:[#allocation2 + $0x158] sm:$0xff] %vm235_vm0, %v1025_v51  ;;  %1056 = vst.msk [vmem:[#allocation2 + $0x48] sm:$0xff] %vm235_vm0, %v991_v52  ;;  %v1887_v61 = vpop.f32.mrb[12].mxu0 }
 0x105   : > { %1217 = vst.msk [vmem:[%s2462_s30 + $0x138] sm:$0xff] %vm235_vm0, %v1153_v54  ;;  %1183 = vst.msk [vmem:[%s2462_s30 + $0x28] sm:$0xff] %vm235_vm0, %v1119_v55  ;;  %v1151_v57 = vld [vmem:[#allocation2 + $0x128] sm:$0xff]  ;;  %v996_v0 = vadd.f32 %v1887_v61, %v314_v58  ;;  %v1919_v1 = vpop.f32.mrb[12].mxu1  ;;  %v775_v2 = vpop.f32.mrb[13].mxu0  ;;  %v322_v58 = vld [vmem:[#allocation2 + $0xb0] sm:$0xff] }
 0x106   : > { %1215 = vst.msk [vmem:[%s2462_s30 + $0x128] sm:$0xff] %vm235_vm0, %v1151_v57  ;;  %1088 = vst.msk [vmem:[#allocation2 + $0x148] sm:$0xff] %vm235_vm0, %v1023_v56  ;;  %v1124_v5 = vld [vmem:[#allocation2 + $0x50] sm:$0xff]  ;;  %v1028_v6 = vadd.f32 %v1919_v1, %v346_v59  ;;  %v994_v7 = vadd.f32 %v775_v2, %v312_v60  ;;  %v903_v8 = vpop.f32.mrb[13].mxu1  ;;  %v1888_v9 = vpop.f32.mrb[14].mxu0  ;;  %v320_v60 = vld [vmem:[#allocation2 + $0xa0] sm:$0xff] }
 0x107   : > { %1188 = vst.msk [vmem:[%s2462_s30 + $0x50] sm:$0xff] %vm235_vm0, %v1124_v5  ;;  %v1156_v11 = vld [vmem:[#allocation2 + $0x150] sm:$0xff]  ;;  %v1122_v12 = vld [vmem:[#allocation2 + $0x40] sm:$0xff]  ;;  %1061 = vst.msk [vmem:[#allocation2 + $0x70] sm:$0xff] %vm235_vm0, %v996_v0  ;;  %v1026_v13 = vadd.f32 %v903_v8, %v344_v62  ;;  %v997_v14 = vadd.f32 %v1888_v9, %v315_v63  ;;  %v1920_v15 = vpop.f32.mrb[14].mxu1  ;;  %v778_v16 = vpop.f32.mrb[15].mxu0 }
 0x108   : > { %1220 = vst.msk [vmem:[%s2462_s30 + $0x150] sm:$0xff] %vm235_vm0, %v1156_v11  ;;  %1186 = vst.msk [vmem:[%s2462_s30 + $0x40] sm:$0xff] %vm235_vm0, %v1122_v12  ;;  %v1029_v19 = vadd.f32 %v1920_v15, %v347_v3  ;;  %v995_v20 = vadd.f32 %v778_v16, %v313_v4  ;;  %v906_v21 = vpop.f32.mrb[15].mxu1  ;;  %v354_v59 = vld [vmem:[#allocation2 + $0x1b0] sm:$0xff]  ;;  %v352_v62 = vld [vmem:[#allocation2 + $0x1a0] sm:$0xff] }
 0x109   : > { %v1154_v17 = vld [vmem:[#allocation2 + $0x140] sm:$0xff]  ;;  %v1125_v18 = vld [vmem:[#allocation2 + $0x58] sm:$0xff]  ;;  %1093 = vst.msk [vmem:[#allocation2 + $0x170] sm:$0xff] %vm235_vm0, %v1028_v6  ;;  %1059 = vst.msk [vmem:[#allocation2 + $0x60] sm:$0xff] %vm235_vm0, %v994_v7  ;;  %v1027_v24 = vadd.f32 %v906_v21, %v345_v10 }
 0x10a   : > { %1218 = vst.msk [vmem:[%s2462_s30 + $0x140] sm:$0xff] %vm235_vm0, %v1154_v17  ;;  %1189 = vst.msk [vmem:[%s2462_s30 + $0x58] sm:$0xff] %vm235_vm0, %v1125_v18  ;;  %v323_v63 = vld [vmem:[#allocation2 + $0xb8] sm:$0xff]  ;;  %v321_v4 = vld [vmem:[#allocation2 + $0xa8] sm:$0xff] }
 0x10b   : > { %v1157_v22 = vld [vmem:[#allocation2 + $0x158] sm:$0xff]  ;;  %v1123_v23 = vld [vmem:[#allocation2 + $0x48] sm:$0xff]  ;;  %1091 = vst.msk [vmem:[#allocation2 + $0x160] sm:$0xff] %vm235_vm0, %v1026_v13  ;;  %1062 = vst.msk [vmem:[#allocation2 + $0x78] sm:$0xff] %vm235_vm0, %v997_v14 }
 0x10c   : > { %1221 = vst.msk [vmem:[%s2462_s30 + $0x158] sm:$0xff] %vm235_vm0, %v1157_v22  ;;  %1187 = vst.msk [vmem:[%s2462_s30 + $0x48] sm:$0xff] %vm235_vm0, %v1123_v23  ;;  %v1891_v29 = vpop.f32.mrb[16].mxu0  ;;  %v355_v3 = vld [vmem:[#allocation2 + $0x1b8] sm:$0xff]  ;;  %v353_v10 = vld [vmem:[#allocation2 + $0x1a8] sm:$0xff] }
 0x10d   : > { %v1155_v25 = vld [vmem:[#allocation2 + $0x148] sm:$0xff]  ;;  %1094 = vst.msk [vmem:[#allocation2 + $0x178] sm:$0xff] %vm235_vm0, %v1029_v19  ;;  %1060 = vst.msk [vmem:[#allocation2 + $0x68] sm:$0xff] %vm235_vm0, %v995_v20  ;;  %v1000_v32 = vadd.f32 %v1891_v29, %v318_v26  ;;  %v1923_v33 = vpop.f32.mrb[16].mxu1  ;;  %v791_v34 = vpop.f32.mrb[17].mxu0  ;;  %v326_v26 = vld [vmem:[#allocation2 + $0xd0] sm:$0xff] }
 0x10e   : > { %1219 = vst.msk [vmem:[%s2462_s30 + $0x148] sm:$0xff] %vm235_vm0, %v1155_v25  ;;  %1092 = vst.msk [vmem:[#allocation2 + $0x168] sm:$0xff] %vm235_vm0, %v1027_v24  ;;  %v1128_v37 = vld [vmem:[#allocation2 + $0x70] sm:$0xff]  ;;  %v1032_v38 = vadd.f32 %v1923_v33, %v350_v27  ;;  %v998_v39 = vadd.f32 %v791_v34, %v316_v28  ;;  %v919_v40 = vpop.f32.mrb[17].mxu1  ;;  %v1892_v41 = vpop.f32.mrb[18].mxu0  ;;  %v324_v28 = vld [vmem:[#allocation2 + $0xc0] sm:$0xff] }
 0x10f   : > { %1192 = vst.msk [vmem:[%s2462_s30 + $0x70] sm:$0xff] %vm235_vm0, %v1128_v37  ;;  %1065 = vst.msk [vmem:[#allocation2 + $0x90] sm:$0xff] %vm235_vm0, %v1000_v32  ;;  %v1030_v45 = vadd.f32 %v919_v40, %v348_v30  ;;  %v1001_v46 = vadd.f32 %v1892_v41, %v319_v31  ;;  %v1924_v47 = vpop.f32.mrb[18].mxu1  ;;  %v794_v48 = vpop.f32.mrb[19].mxu0  ;;  %v358_v27 = vld [vmem:[#allocation2 + $0x1d0] sm:$0xff]  ;;  %v356_v30 = vld [vmem:[#allocation2 + $0x1c0] sm:$0xff] }
 0x110   : > { %v1160_v43 = vld [vmem:[#allocation2 + $0x170] sm:$0xff]  ;;  %v1126_v44 = vld [vmem:[#allocation2 + $0x60] sm:$0xff]  ;;  %1097 = vst.msk [vmem:[#allocation2 + $0x190] sm:$0xff] %vm235_vm0, %v1032_v38  ;;  %1063 = vst.msk [vmem:[#allocation2 + $0x80] sm:$0xff] %vm235_vm0, %v998_v39  ;;  %v1033_v51 = vadd.f32 %v1924_v47, %v351_v35  ;;  %v999_v52 = vadd.f32 %v794_v48, %v317_v36  ;;  %v922_v53 = vpop.f32.mrb[19].mxu1 }
 0x111   : > { %1224 = vst.msk [vmem:[%s2462_s30 + $0x170] sm:$0xff] %vm235_vm0, %v1160_v43  ;;  %1190 = vst.msk [vmem:[%s2462_s30 + $0x60] sm:$0xff] %vm235_vm0, %v1126_v44  ;;  %v1031_v56 = vadd.f32 %v922_v53, %v349_v42  ;;  %v327_v31 = vld [vmem:[#allocation2 + $0xd8] sm:$0xff]  ;;  %v325_v36 = vld [vmem:[#allocation2 + $0xc8] sm:$0xff] }
 0x112   : > { %v1158_v49 = vld [vmem:[#allocation2 + $0x160] sm:$0xff]  ;;  %v1129_v50 = vld [vmem:[#allocation2 + $0x78] sm:$0xff]  ;;  %1095 = vst.msk [vmem:[#allocation2 + $0x180] sm:$0xff] %vm235_vm0, %v1030_v45  ;;  %1066 = vst.msk [vmem:[#allocation2 + $0x98] sm:$0xff] %vm235_vm0, %v1001_v46 }
 0x113   : > { %1222 = vst.msk [vmem:[%s2462_s30 + $0x160] sm:$0xff] %vm235_vm0, %v1158_v49  ;;  %1193 = vst.msk [vmem:[%s2462_s30 + $0x78] sm:$0xff] %vm235_vm0, %v1129_v50  ;;  %v359_v35 = vld [vmem:[#allocation2 + $0x1d8] sm:$0xff]  ;;  %v357_v42 = vld [vmem:[#allocation2 + $0x1c8] sm:$0xff] }
 0x114   : > { %v1161_v54 = vld [vmem:[#allocation2 + $0x178] sm:$0xff]  ;;  %v1127_v55 = vld [vmem:[#allocation2 + $0x68] sm:$0xff]  ;;  %1098 = vst.msk [vmem:[#allocation2 + $0x198] sm:$0xff] %vm235_vm0, %v1033_v51  ;;  %1064 = vst.msk [vmem:[#allocation2 + $0x88] sm:$0xff] %vm235_vm0, %v999_v52  ;;  %v1895_v61 = vpop.f32.mrb[20].mxu0 }
 0x115   : > { %1225 = vst.msk [vmem:[%s2462_s30 + $0x178] sm:$0xff] %vm235_vm0, %v1161_v54  ;;  %1191 = vst.msk [vmem:[%s2462_s30 + $0x68] sm:$0xff] %vm235_vm0, %v1127_v55  ;;  %v1159_v57 = vld [vmem:[#allocation2 + $0x168] sm:$0xff]  ;;  %v1004_v0 = vadd.f32 %v1895_v61, %v322_v58  ;;  %v1927_v1 = vpop.f32.mrb[20].mxu1  ;;  %v807_v2 = vpop.f32.mrb[21].mxu0  ;;  %v330_v58 = vld [vmem:[#allocation2 + $0xf0] sm:$0xff] }
 0x116   : > { %1223 = vst.msk [vmem:[%s2462_s30 + $0x168] sm:$0xff] %vm235_vm0, %v1159_v57  ;;  %1096 = vst.msk [vmem:[#allocation2 + $0x188] sm:$0xff] %vm235_vm0, %v1031_v56  ;;  %v1132_v5 = vld [vmem:[#allocation2 + $0x90] sm:$0xff]  ;;  %v1036_v6 = vadd.f32 %v1927_v1, %v354_v59  ;;  %v1002_v7 = vadd.f32 %v807_v2, %v320_v60  ;;  %v935_v8 = vpop.f32.mrb[21].mxu1  ;;  %v1896_v9 = vpop.f32.mrb[22].mxu0  ;;  %v328_v60 = vld [vmem:[#allocation2 + $0xe0] sm:$0xff] }
 0x117   : > { %1196 = vst.msk [vmem:[%s2462_s30 + $0x90] sm:$0xff] %vm235_vm0, %v1132_v5  ;;  %v1164_v11 = vld [vmem:[#allocation2 + $0x190] sm:$0xff]  ;;  %v1130_v12 = vld [vmem:[#allocation2 + $0x80] sm:$0xff]  ;;  %1069 = vst.msk [vmem:[#allocation2 + $0xb0] sm:$0xff] %vm235_vm0, %v1004_v0  ;;  %v1034_v13 = vadd.f32 %v935_v8, %v352_v62  ;;  %v1005_v14 = vadd.f32 %v1896_v9, %v323_v63  ;;  %v1928_v15 = vpop.f32.mrb[22].mxu1  ;;  %v810_v16 = vpop.f32.mrb[23].mxu0 }
 0x118   : > { %1228 = vst.msk [vmem:[%s2462_s30 + $0x190] sm:$0xff] %vm235_vm0, %v1164_v11  ;;  %1194 = vst.msk [vmem:[%s2462_s30 + $0x80] sm:$0xff] %vm235_vm0, %v1130_v12  ;;  %v1037_v19 = vadd.f32 %v1928_v15, %v355_v3  ;;  %v1003_v20 = vadd.f32 %v810_v16, %v321_v4  ;;  %v938_v21 = vpop.f32.mrb[23].mxu1  ;;  %v362_v59 = vld [vmem:[#allocation2 + $0x1f0] sm:$0xff]  ;;  %v360_v62 = vld [vmem:[#allocation2 + $0x1e0] sm:$0xff] }
 0x119   : > { %v1162_v17 = vld [vmem:[#allocation2 + $0x180] sm:$0xff]  ;;  %v1133_v18 = vld [vmem:[#allocation2 + $0x98] sm:$0xff]  ;;  %1101 = vst.msk [vmem:[#allocation2 + $0x1b0] sm:$0xff] %vm235_vm0, %v1036_v6  ;;  %1067 = vst.msk [vmem:[#allocation2 + $0xa0] sm:$0xff] %vm235_vm0, %v1002_v7  ;;  %v1035_v24 = vadd.f32 %v938_v21, %v353_v10 }
 0x11a   : > { %1226 = vst.msk [vmem:[%s2462_s30 + $0x180] sm:$0xff] %vm235_vm0, %v1162_v17  ;;  %1197 = vst.msk [vmem:[%s2462_s30 + $0x98] sm:$0xff] %vm235_vm0, %v1133_v18  ;;  %v331_v63 = vld [vmem:[#allocation2 + $0xf8] sm:$0xff]  ;;  %v329_v4 = vld [vmem:[#allocation2 + $0xe8] sm:$0xff] }
 0x11b   : > { %v1165_v22 = vld [vmem:[#allocation2 + $0x198] sm:$0xff]  ;;  %v1131_v23 = vld [vmem:[#allocation2 + $0x88] sm:$0xff]  ;;  %1099 = vst.msk [vmem:[#allocation2 + $0x1a0] sm:$0xff] %vm235_vm0, %v1034_v13  ;;  %1070 = vst.msk [vmem:[#allocation2 + $0xb8] sm:$0xff] %vm235_vm0, %v1005_v14 }
 0x11c   : > { %1229 = vst.msk [vmem:[%s2462_s30 + $0x198] sm:$0xff] %vm235_vm0, %v1165_v22  ;;  %1195 = vst.msk [vmem:[%s2462_s30 + $0x88] sm:$0xff] %vm235_vm0, %v1131_v23  ;;  %v1899_v29 = vpop.f32.mrb[24].mxu0  ;;  %v363_v3 = vld [vmem:[#allocation2 + $0x1f8] sm:$0xff]  ;;  %v361_v10 = vld [vmem:[#allocation2 + $0x1e8] sm:$0xff] }
 0x11d   : > { %v1163_v25 = vld [vmem:[#allocation2 + $0x188] sm:$0xff]  ;;  %1102 = vst.msk [vmem:[#allocation2 + $0x1b8] sm:$0xff] %vm235_vm0, %v1037_v19  ;;  %1068 = vst.msk [vmem:[#allocation2 + $0xa8] sm:$0xff] %vm235_vm0, %v1003_v20  ;;  %v1008_v32 = vadd.f32 %v1899_v29, %v326_v26  ;;  %v1931_v33 = vpop.f32.mrb[24].mxu1  ;;  %v823_v34 = vpop.f32.mrb[25].mxu0 }
 0x11e   : > { %1227 = vst.msk [vmem:[%s2462_s30 + $0x188] sm:$0xff] %vm235_vm0, %v1163_v25  ;;  %1100 = vst.msk [vmem:[#allocation2 + $0x1a8] sm:$0xff] %vm235_vm0, %v1035_v24  ;;  %v1136_v37 = vld [vmem:[#allocation2 + $0xb0] sm:$0xff]  ;;  %v1040_v38 = vadd.f32 %v1931_v33, %v358_v27  ;;  %v1006_v39 = vadd.f32 %v823_v34, %v324_v28  ;;  %v951_v40 = vpop.f32.mrb[25].mxu1  ;;  %v1900_v41 = vpop.f32.mrb[26].mxu0 }
 0x11f   : > { %1200 = vst.msk [vmem:[%s2462_s30 + $0xb0] sm:$0xff] %vm235_vm0, %v1136_v37  ;;  %1073 = vst.msk [vmem:[#allocation2 + $0xd0] sm:$0xff] %vm235_vm0, %v1008_v32  ;;  %v1038_v45 = vadd.f32 %v951_v40, %v356_v30  ;;  %v1009_v46 = vadd.f32 %v1900_v41, %v327_v31  ;;  %v1932_v47 = vpop.f32.mrb[26].mxu1  ;;  %v826_v48 = vpop.f32.mrb[27].mxu0 }
 0x120   : > { %v1168_v43 = vld [vmem:[#allocation2 + $0x1b0] sm:$0xff]  ;;  %v1134_v44 = vld [vmem:[#allocation2 + $0xa0] sm:$0xff]  ;;  %1105 = vst.msk [vmem:[#allocation2 + $0x1d0] sm:$0xff] %vm235_vm0, %v1040_v38  ;;  %1071 = vst.msk [vmem:[#allocation2 + $0xc0] sm:$0xff] %vm235_vm0, %v1006_v39  ;;  %v1041_v51 = vadd.f32 %v1932_v47, %v359_v35  ;;  %v1007_v52 = vadd.f32 %v826_v48, %v325_v36  ;;  %v954_v53 = vpop.f32.mrb[27].mxu1 }
 0x121   : > { %1232 = vst.msk [vmem:[%s2462_s30 + $0x1b0] sm:$0xff] %vm235_vm0, %v1168_v43  ;;  %1198 = vst.msk [vmem:[%s2462_s30 + $0xa0] sm:$0xff] %vm235_vm0, %v1134_v44  ;;  %v1039_v56 = vadd.f32 %v954_v53, %v357_v42 }
 0x122   : > { %v1166_v49 = vld [vmem:[#allocation2 + $0x1a0] sm:$0xff]  ;;  %v1137_v50 = vld [vmem:[#allocation2 + $0xb8] sm:$0xff]  ;;  %1103 = vst.msk [vmem:[#allocation2 + $0x1c0] sm:$0xff] %vm235_vm0, %v1038_v45  ;;  %1074 = vst.msk [vmem:[#allocation2 + $0xd8] sm:$0xff] %vm235_vm0, %v1009_v46 }
 0x123   : > { %1230 = vst.msk [vmem:[%s2462_s30 + $0x1a0] sm:$0xff] %vm235_vm0, %v1166_v49  ;;  %1201 = vst.msk [vmem:[%s2462_s30 + $0xb8] sm:$0xff] %vm235_vm0, %v1137_v50 }
 0x124   : > { %v1169_v54 = vld [vmem:[#allocation2 + $0x1b8] sm:$0xff]  ;;  %v1135_v55 = vld [vmem:[#allocation2 + $0xa8] sm:$0xff]  ;;  %1106 = vst.msk [vmem:[#allocation2 + $0x1d8] sm:$0xff] %vm235_vm0, %v1041_v51  ;;  %1072 = vst.msk [vmem:[#allocation2 + $0xc8] sm:$0xff] %vm235_vm0, %v1007_v52  ;;  %v1903_v61 = vpop.f32.mrb[28].mxu0 }
 0x125   : > { %1233 = vst.msk [vmem:[%s2462_s30 + $0x1b8] sm:$0xff] %vm235_vm0, %v1169_v54  ;;  %1199 = vst.msk [vmem:[%s2462_s30 + $0xa8] sm:$0xff] %vm235_vm0, %v1135_v55  ;;  %v1167_v57 = vld [vmem:[#allocation2 + $0x1a8] sm:$0xff]  ;;  %v1012_v0 = vadd.f32 %v1903_v61, %v330_v58  ;;  %v1935_v1 = vpop.f32.mrb[28].mxu1  ;;  %v839_v2 = vpop.f32.mrb[29].mxu0 }
 0x126   : > { %1231 = vst.msk [vmem:[%s2462_s30 + $0x1a8] sm:$0xff] %vm235_vm0, %v1167_v57  ;;  %1104 = vst.msk [vmem:[#allocation2 + $0x1c8] sm:$0xff] %vm235_vm0, %v1039_v56  ;;  %v1140_v5 = vld [vmem:[#allocation2 + $0xd0] sm:$0xff]  ;;  %v1044_v6 = vadd.f32 %v1935_v1, %v362_v59  ;;  %v1010_v7 = vadd.f32 %v839_v2, %v328_v60  ;;  %v967_v8 = vpop.f32.mrb[29].mxu1  ;;  %v1904_v9 = vpop.f32.mrb[30].mxu0 }
 0x127   : > { %1204 = vst.msk [vmem:[%s2462_s30 + $0xd0] sm:$0xff] %vm235_vm0, %v1140_v5  ;;  %v1172_v11 = vld [vmem:[#allocation2 + $0x1d0] sm:$0xff]  ;;  %v1138_v12 = vld [vmem:[#allocation2 + $0xc0] sm:$0xff]  ;;  %1077 = vst.msk [vmem:[#allocation2 + $0xf0] sm:$0xff] %vm235_vm0, %v1012_v0  ;;  %v1042_v13 = vadd.f32 %v967_v8, %v360_v62  ;;  %v1013_v14 = vadd.f32 %v1904_v9, %v331_v63  ;;  %v1936_v15 = vpop.f32.mrb[30].mxu1  ;;  %v842_v16 = vpop.f32.mrb[31].mxu0 }
 0x128   : > { %1236 = vst.msk [vmem:[%s2462_s30 + $0x1d0] sm:$0xff] %vm235_vm0, %v1172_v11  ;;  %1202 = vst.msk [vmem:[%s2462_s30 + $0xc0] sm:$0xff] %vm235_vm0, %v1138_v12  ;;  %v1045_v19 = vadd.f32 %v1936_v15, %v363_v3  ;;  %v1011_v20 = vadd.f32 %v842_v16, %v329_v4  ;;  %v970_v21 = vpop.f32.mrb[31].mxu1 }
 0x129   : > { %v1170_v17 = vld [vmem:[#allocation2 + $0x1c0] sm:$0xff]  ;;  %v1141_v18 = vld [vmem:[#allocation2 + $0xd8] sm:$0xff]  ;;  %1109 = vst.msk [vmem:[#allocation2 + $0x1f0] sm:$0xff] %vm235_vm0, %v1044_v6  ;;  %1075 = vst.msk [vmem:[#allocation2 + $0xe0] sm:$0xff] %vm235_vm0, %v1010_v7  ;;  %v1043_v24 = vadd.f32 %v970_v21, %v361_v10 }
 0x12a   : > { %1234 = vst.msk [vmem:[%s2462_s30 + $0x1c0] sm:$0xff] %vm235_vm0, %v1170_v17  ;;  %1205 = vst.msk [vmem:[%s2462_s30 + $0xd8] sm:$0xff] %vm235_vm0, %v1141_v18 }
 0x12b   : > { %v1173_v22 = vld [vmem:[#allocation2 + $0x1d8] sm:$0xff]  ;;  %v1139_v23 = vld [vmem:[#allocation2 + $0xc8] sm:$0xff]  ;;  %1107 = vst.msk [vmem:[#allocation2 + $0x1e0] sm:$0xff] %vm235_vm0, %v1042_v13  ;;  %1078 = vst.msk [vmem:[#allocation2 + $0xf8] sm:$0xff] %vm235_vm0, %v1013_v14 }
 0x12c   : > { %1237 = vst.msk [vmem:[%s2462_s30 + $0x1d8] sm:$0xff] %vm235_vm0, %v1173_v22  ;;  %1203 = vst.msk [vmem:[%s2462_s30 + $0xc8] sm:$0xff] %vm235_vm0, %v1139_v23 }
 0x12d   : > { %v1171_v25 = vld [vmem:[#allocation2 + $0x1c8] sm:$0xff]  ;;  %1110 = vst.msk [vmem:[#allocation2 + $0x1f8] sm:$0xff] %vm235_vm0, %v1045_v19  ;;  %1076 = vst.msk [vmem:[#allocation2 + $0xe8] sm:$0xff] %vm235_vm0, %v1011_v20 }
 0x12e   : > { %1235 = vst.msk [vmem:[%s2462_s30 + $0x1c8] sm:$0xff] %vm235_vm0, %v1171_v25  ;;  %1108 = vst.msk [vmem:[#allocation2 + $0x1e8] sm:$0xff] %vm235_vm0, %v1043_v24  ;;  %v1144_v26 = vld [vmem:[#allocation2 + $0xf0] sm:$0xff] }
 0x12f   : > { %1208 = vst.msk [vmem:[%s2462_s30 + $0xf0] sm:$0xff] %vm235_vm0, %v1144_v26 }
 0x130   : > { %v1176_v27 = vld [vmem:[#allocation2 + $0x1f0] sm:$0xff]  ;;  %v1142_v28 = vld [vmem:[#allocation2 + $0xe0] sm:$0xff]  ;;  %1248 = sbr.rel (!%p2229_p3) target bundleno = 383 (0x17f), region = 40 }
 0x131   : > { %1240 = vst.msk [vmem:[%s2462_s30 + $0x1f0] sm:$0xff] %vm235_vm0, %v1176_v27  ;;  %1206 = vst.msk [vmem:[%s2462_s30 + $0xe0] sm:$0xff] %vm235_vm0, %v1142_v28 }
 0x132   : > { %v1174_v29 = vld [vmem:[#allocation2 + $0x1e0] sm:$0xff]  ;;  %v1145_v30 = vld [vmem:[#allocation2 + $0xf8] sm:$0xff] }
 0x133   : > { %1238 = vst.msk [vmem:[%s2462_s30 + $0x1e0] sm:$0xff] %vm235_vm0, %v1174_v29  ;;  %1209 = vst.msk [vmem:[%s2462_s30 + $0xf8] sm:$0xff] %vm235_vm0, %v1145_v30 }
 0x134   : > { %v1177_v31 = vld [vmem:[#allocation2 + $0x1f8] sm:$0xff]  ;;  %v1143_v32 = vld [vmem:[#allocation2 + $0xe8] sm:$0xff] }
 0x135   : > { %1241 = vst.msk [vmem:[%s2462_s30 + $0x1f8] sm:$0xff] %vm235_vm0, %v1177_v31  ;;  %1207 = vst.msk [vmem:[%s2462_s30 + $0xe8] sm:$0xff] %vm235_vm0, %v1143_v32  ;;  %v1175_v33 = vld [vmem:[#allocation2 + $0x1e8] sm:$0xff] }
 0x136   : > { %1239 = vst.msk [vmem:[%s2462_s30 + $0x1e8] sm:$0xff] %vm235_vm0, %v1175_v33 }
 0x137   : > { %s2875_s3 = smov (!%p1251_p9, %s1250_s3), 64 }
 0x138   : > { %s1820_s8 = sshll.u32 %s2875_s3, 7 }
 0x139   : > { %p1823_p10 = scmp.eq.s32.totalorder %s1820_s8, 0 }
 0x13a   : > { %s2661_s9 = sshrl.u32 (!%p1823_p10), %s2875_s3, 6 }
 0x13b   : > { %1260 = sbr.rel (%p1823_p10) target bundleno = 383 (0x17f), region = 44  ;;  %p1824_p11 = scmp.le.s32.totalorder (!%p1823_p10), %s2661_s9, 0 }
 0x142   : > { %1680 = sbr.rel (%p1824_p11) target bundleno = 362 (0x16a), region = 123  ;;  %s2863_s11 = smov (!%p1824_p11), %s2655_s7 }
 0x143   : > { %s2864_s14 = smov (!%p1824_p11), %s2462_s30  ;;  %s2670_s16 = smov (!%p1824_p11), 0  }
 0x144   : > { %s2672_s17 = smov (!%p1824_p11), 0  }
 0x149 LB: >> { %v1448_v34 = vld [vmem:[%s2155_s14] sm:$0xff]  ;;  %v1450_v35 = vld [vmem:[%s2155_s14 + $0x8] sm:$0xff]  ;;  %v1452_v36 = vld [vmem:[%s2155_s14 + $0x10] sm:$0xff]  ;;  %s1576_s18 = sadd.s32 1, %s2159_s16  ;;  %s1442_s17 = sadd.s32 1, %s2163_s17   ;;  %s2163_s17 = sphi %s2672_s17, %s1442_s17   ;;  %s2159_s16 = sphi %s2670_s16, %s2867_s16   ;;  %s2155_s14 = sphi %s2864_s14, %s2866_s14   ;;  %s2151_s11 = sphi %s2863_s11, %s2865_s11  }
 0x14a   : >> { %1449 = vst [vmem:[%s2151_s11] sm:$0xff] %v1448_v34  ;;  %1451 = vst [vmem:[%s2151_s11 + $0x8] sm:$0xff] %v1450_v35  ;;  %v1454_v37 = vld [vmem:[%s2155_s14 + $0x18] sm:$0xff]  ;;  %v1456_v38 = vld [vmem:[%s2155_s14 + $0x20] sm:$0xff]  ;;  %p1577_p12 = scmp.ge.s32.totalorder %s1576_s18, %s2661_s9  ;;  %p1441_p13 = scmp.ge.s32.totalorder %s1442_s17, %s2661_s9 }
 0x14b   : >> { %1453 = vst [vmem:[%s2151_s11 + $0x10] sm:$0xff] %v1452_v36  ;;  %v1458_v39 = vld [vmem:[%s2155_s14 + $0x28] sm:$0xff]  ;;  %1455 = vst [vmem:[%s2151_s11 + $0x18] sm:$0xff] %v1454_v37  ;;  %v1460_v40 = vld [vmem:[%s2155_s14 + $0x30] sm:$0xff] }
 0x14c   : >> { %1457 = vst [vmem:[%s2151_s11 + $0x20] sm:$0xff] %v1456_v38  ;;  %1459 = vst [vmem:[%s2151_s11 + $0x28] sm:$0xff] %v1458_v39  ;;  %v1462_v41 = vld [vmem:[%s2155_s14 + $0x38] sm:$0xff]  ;;  %v1464_v42 = vld [vmem:[%s2155_s14 + $0x40] sm:$0xff]  ;;  %s2877_s18 = smov (%p1577_p12, %s1576_s18), 0 }
 0x14d   : >> { %1461 = vst [vmem:[%s2151_s11 + $0x30] sm:$0xff] %v1460_v40  ;;  %1463 = vst [vmem:[%s2151_s11 + $0x38] sm:$0xff] %v1462_v41  ;;  %v1466_v43 = vld [vmem:[%s2155_s14 + $0x48] sm:$0xff]  ;;  %v1468_v44 = vld [vmem:[%s2155_s14 + $0x50] sm:$0xff]  ;;  %s1825_s20 = sshll.u32 %s2877_s18, 9  ;;  %s2867_s16 = smov %s2877_s18 }
 0x14e   : >> { %1465 = vst [vmem:[%s2151_s11 + $0x40] sm:$0xff] %v1464_v42  ;;  %v1470_v45 = vld [vmem:[%s2155_s14 + $0x58] sm:$0xff]  ;;  %1467 = vst [vmem:[%s2151_s11 + $0x48] sm:$0xff] %v1466_v43  ;;  %v1472_v46 = vld [vmem:[%s2155_s14 + $0x60] sm:$0xff]  ;;  %s2728_s21 = scalar_lea.vmem %s2462_s30, %s1825_s20 [#allocation3]   ;;  %s2731_s22 = scalar_lea.vmem %s2655_s7, %s1825_s20  }
 0x14f   : >> { %1469 = vst [vmem:[%s2151_s11 + $0x50] sm:$0xff] %v1468_v44  ;;  %1471 = vst [vmem:[%s2151_s11 + $0x58] sm:$0xff] %v1470_v45  ;;  %v1474_v47 = vld [vmem:[%s2155_s14 + $0x68] sm:$0xff]  ;;  %v1476_v48 = vld [vmem:[%s2155_s14 + $0x70] sm:$0xff] }
 0x150   : >> { %1473 = vst [vmem:[%s2151_s11 + $0x60] sm:$0xff] %v1472_v46  ;;  %1475 = vst [vmem:[%s2151_s11 + $0x68] sm:$0xff] %v1474_v47  ;;  %v1478_v49 = vld [vmem:[%s2155_s14 + $0x78] sm:$0xff]  ;;  %v1480_v50 = vld [vmem:[%s2155_s14 + $0x80] sm:$0xff] }
 0x151   : >> { %1477 = vst [vmem:[%s2151_s11 + $0x70] sm:$0xff] %v1476_v48  ;;  %v1482_v51 = vld [vmem:[%s2155_s14 + $0x88] sm:$0xff]  ;;  %1479 = vst [vmem:[%s2151_s11 + $0x78] sm:$0xff] %v1478_v49  ;;  %v1484_v52 = vld [vmem:[%s2155_s14 + $0x90] sm:$0xff] }
 0x152   : >> { %1481 = vst [vmem:[%s2151_s11 + $0x80] sm:$0xff] %v1480_v50  ;;  %1483 = vst [vmem:[%s2151_s11 + $0x88] sm:$0xff] %v1482_v51  ;;  %v1486_v53 = vld [vmem:[%s2155_s14 + $0x98] sm:$0xff]  ;;  %v1488_v54 = vld [vmem:[%s2155_s14 + $0xa0] sm:$0xff] }
 0x153   : >> { %1485 = vst [vmem:[%s2151_s11 + $0x90] sm:$0xff] %v1484_v52  ;;  %1487 = vst [vmem:[%s2151_s11 + $0x98] sm:$0xff] %v1486_v53  ;;  %v1490_v55 = vld [vmem:[%s2155_s14 + $0xa8] sm:$0xff]  ;;  %v1492_v56 = vld [vmem:[%s2155_s14 + $0xb0] sm:$0xff] }
 0x154   : >> { %1489 = vst [vmem:[%s2151_s11 + $0xa0] sm:$0xff] %v1488_v54  ;;  %v1494_v57 = vld [vmem:[%s2155_s14 + $0xb8] sm:$0xff]  ;;  %1491 = vst [vmem:[%s2151_s11 + $0xa8] sm:$0xff] %v1490_v55  ;;  %v1496_v58 = vld [vmem:[%s2155_s14 + $0xc0] sm:$0xff] }
 0x155   : >> { %1493 = vst [vmem:[%s2151_s11 + $0xb0] sm:$0xff] %v1492_v56  ;;  %1495 = vst [vmem:[%s2151_s11 + $0xb8] sm:$0xff] %v1494_v57  ;;  %v1498_v59 = vld [vmem:[%s2155_s14 + $0xc8] sm:$0xff]  ;;  %v1500_v60 = vld [vmem:[%s2155_s14 + $0xd0] sm:$0xff] }
 0x156   : >> { %1497 = vst [vmem:[%s2151_s11 + $0xc0] sm:$0xff] %v1496_v58  ;;  %1499 = vst [vmem:[%s2151_s11 + $0xc8] sm:$0xff] %v1498_v59  ;;  %v1502_v61 = vld [vmem:[%s2155_s14 + $0xd8] sm:$0xff]  ;;  %v1504_v62 = vld [vmem:[%s2155_s14 + $0xe0] sm:$0xff] }
 0x157   : >> { %1501 = vst [vmem:[%s2151_s11 + $0xd0] sm:$0xff] %v1500_v60  ;;  %v1506_v63 = vld [vmem:[%s2155_s14 + $0xe8] sm:$0xff]  ;;  %1503 = vst [vmem:[%s2151_s11 + $0xd8] sm:$0xff] %v1502_v61  ;;  %v1508_v0 = vld [vmem:[%s2155_s14 + $0xf0] sm:$0xff] }
 0x158   : >> { %1505 = vst [vmem:[%s2151_s11 + $0xe0] sm:$0xff] %v1504_v62  ;;  %1507 = vst [vmem:[%s2151_s11 + $0xe8] sm:$0xff] %v1506_v63  ;;  %v1510_v1 = vld [vmem:[%s2155_s14 + $0xf8] sm:$0xff]  ;;  %v1512_v2 = vld [vmem:[%s2155_s14 + $0x100] sm:$0xff] }
 0x159   : >> { %1509 = vst [vmem:[%s2151_s11 + $0xf0] sm:$0xff] %v1508_v0  ;;  %1511 = vst [vmem:[%s2151_s11 + $0xf8] sm:$0xff] %v1510_v1  ;;  %v1514_v3 = vld [vmem:[%s2155_s14 + $0x108] sm:$0xff]  ;;  %v1516_v4 = vld [vmem:[%s2155_s14 + $0x110] sm:$0xff] }
 0x15a   : >> { %1513 = vst [vmem:[%s2151_s11 + $0x100] sm:$0xff] %v1512_v2  ;;  %v1518_v5 = vld [vmem:[%s2155_s14 + $0x118] sm:$0xff]  ;;  %1515 = vst [vmem:[%s2151_s11 + $0x108] sm:$0xff] %v1514_v3  ;;  %v1520_v6 = vld [vmem:[%s2155_s14 + $0x120] sm:$0xff] }
 0x15b   : >> { %1517 = vst [vmem:[%s2151_s11 + $0x110] sm:$0xff] %v1516_v4  ;;  %1519 = vst [vmem:[%s2151_s11 + $0x118] sm:$0xff] %v1518_v5  ;;  %v1522_v7 = vld [vmem:[%s2155_s14 + $0x128] sm:$0xff]  ;;  %v1524_v8 = vld [vmem:[%s2155_s14 + $0x130] sm:$0xff] }
 0x15c   : >> { %1521 = vst [vmem:[%s2151_s11 + $0x120] sm:$0xff] %v1520_v6  ;;  %1523 = vst [vmem:[%s2151_s11 + $0x128] sm:$0xff] %v1522_v7  ;;  %v1526_v9 = vld [vmem:[%s2155_s14 + $0x138] sm:$0xff]  ;;  %v1528_v10 = vld [vmem:[%s2155_s14 + $0x140] sm:$0xff] }
 0x15d   : >> { %1525 = vst [vmem:[%s2151_s11 + $0x130] sm:$0xff] %v1524_v8  ;;  %v1530_v11 = vld [vmem:[%s2155_s14 + $0x148] sm:$0xff]  ;;  %1527 = vst [vmem:[%s2151_s11 + $0x138] sm:$0xff] %v1526_v9  ;;  %v1532_v12 = vld [vmem:[%s2155_s14 + $0x150] sm:$0xff] }
 0x15e   : >> { %1529 = vst [vmem:[%s2151_s11 + $0x140] sm:$0xff] %v1528_v10  ;;  %1531 = vst [vmem:[%s2151_s11 + $0x148] sm:$0xff] %v1530_v11  ;;  %v1534_v13 = vld [vmem:[%s2155_s14 + $0x158] sm:$0xff]  ;;  %v1536_v14 = vld [vmem:[%s2155_s14 + $0x160] sm:$0xff] }
 0x15f   : >> { %1533 = vst [vmem:[%s2151_s11 + $0x150] sm:$0xff] %v1532_v12  ;;  %1535 = vst [vmem:[%s2151_s11 + $0x158] sm:$0xff] %v1534_v13  ;;  %v1538_v15 = vld [vmem:[%s2155_s14 + $0x168] sm:$0xff]  ;;  %v1540_v16 = vld [vmem:[%s2155_s14 + $0x170] sm:$0xff] }
 0x160   : >> { %1537 = vst [vmem:[%s2151_s11 + $0x160] sm:$0xff] %v1536_v14  ;;  %v1542_v17 = vld [vmem:[%s2155_s14 + $0x178] sm:$0xff]  ;;  %1539 = vst [vmem:[%s2151_s11 + $0x168] sm:$0xff] %v1538_v15  ;;  %v1544_v18 = vld [vmem:[%s2155_s14 + $0x180] sm:$0xff] }
 0x161   : >> { %1541 = vst [vmem:[%s2151_s11 + $0x170] sm:$0xff] %v1540_v16  ;;  %1543 = vst [vmem:[%s2151_s11 + $0x178] sm:$0xff] %v1542_v17  ;;  %v1546_v19 = vld [vmem:[%s2155_s14 + $0x188] sm:$0xff]  ;;  %v1548_v20 = vld [vmem:[%s2155_s14 + $0x190] sm:$0xff] }
 0x162   : >> { %1545 = vst [vmem:[%s2151_s11 + $0x180] sm:$0xff] %v1544_v18  ;;  %1547 = vst [vmem:[%s2151_s11 + $0x188] sm:$0xff] %v1546_v19  ;;  %v1550_v21 = vld [vmem:[%s2155_s14 + $0x198] sm:$0xff]  ;;  %v1552_v22 = vld [vmem:[%s2155_s14 + $0x1a0] sm:$0xff] }
 0x163   : >> { %1549 = vst [vmem:[%s2151_s11 + $0x190] sm:$0xff] %v1548_v20  ;;  %v1554_v23 = vld [vmem:[%s2155_s14 + $0x1a8] sm:$0xff]  ;;  %1551 = vst [vmem:[%s2151_s11 + $0x198] sm:$0xff] %v1550_v21  ;;  %v1556_v24 = vld [vmem:[%s2155_s14 + $0x1b0] sm:$0xff]  ;;  %1444 = sbr.rel (!%p1441_p13) target bundleno = 329 (0x149), region = 129 }
 0x164   : >> { %1553 = vst [vmem:[%s2151_s11 + $0x1a0] sm:$0xff] %v1552_v22  ;;  %1555 = vst [vmem:[%s2151_s11 + $0x1a8] sm:$0xff] %v1554_v23  ;;  %v1558_v25 = vld [vmem:[%s2155_s14 + $0x1b8] sm:$0xff]  ;;  %v1560_v26 = vld [vmem:[%s2155_s14 + $0x1c0] sm:$0xff] }
 0x165   : >> { %1557 = vst [vmem:[%s2151_s11 + $0x1b0] sm:$0xff] %v1556_v24  ;;  %1559 = vst [vmem:[%s2151_s11 + $0x1b8] sm:$0xff] %v1558_v25  ;;  %v1562_v27 = vld [vmem:[%s2155_s14 + $0x1c8] sm:$0xff]  ;;  %v1564_v28 = vld [vmem:[%s2155_s14 + $0x1d0] sm:$0xff] }
 0x166   : >> { %1561 = vst [vmem:[%s2151_s11 + $0x1c0] sm:$0xff] %v1560_v26  ;;  %v1566_v29 = vld [vmem:[%s2155_s14 + $0x1d8] sm:$0xff]  ;;  %1563 = vst [vmem:[%s2151_s11 + $0x1c8] sm:$0xff] %v1562_v27  ;;  %v1568_v30 = vld [vmem:[%s2155_s14 + $0x1e0] sm:$0xff] }
 0x167   : >> { %1565 = vst [vmem:[%s2151_s11 + $0x1d0] sm:$0xff] %v1564_v28  ;;  %1567 = vst [vmem:[%s2151_s11 + $0x1d8] sm:$0xff] %v1566_v29  ;;  %v1570_v31 = vld [vmem:[%s2155_s14 + $0x1e8] sm:$0xff]  ;;  %v1572_v32 = vld [vmem:[%s2155_s14 + $0x1f0] sm:$0xff] }
 0x168   : >> { %1569 = vst [vmem:[%s2151_s11 + $0x1e0] sm:$0xff] %v1568_v30  ;;  %1571 = vst [vmem:[%s2151_s11 + $0x1e8] sm:$0xff] %v1570_v31  ;;  %v1574_v33 = vld [vmem:[%s2155_s14 + $0x1f8] sm:$0xff]  ;;  %s2866_s14 = smov %s2728_s21 }
 0x169   : >> { %1573 = vst [vmem:[%s2151_s11 + $0x1f0] sm:$0xff] %v1572_v32  ;;  %1575 = vst [vmem:[%s2151_s11 + $0x1f8] sm:$0xff] %v1574_v33  ;;  %s2865_s11 = smov %s2731_s22 }
 0x16a PF: > { %s2836_s23 = sand.u32 63, %s2875_s3   ;;  %s1836_s24 = sshll.u32 %s2661_s9, 9 }
 0x16b   : > { %s1587_s25 = scalar_lea.vmem %s2462_s30, %s1836_s24 [#allocation3]   ;;  %s1589_s26 = scalar_lea.vmem %s2655_s7, %s1836_s24  }
 0x16c   : > { %p1830_p0 = scmp.le.s32.totalorder %s2836_s23, 0 }
 0x16d   : > { %s2165_s27 = smov (!%p1830_p0), %s1589_s26   ;;  %s2169_s28 = smov (!%p1830_p0), %s1587_s25  }
 0x16e   : > { %1694 = sbr.rel (%p1830_p0) target bundleno = 383 (0x17f), region = 134  ;;  %s2173_s29 = smov (!%p1830_p0), 0  }
 0x16f   : > { %s2177_s4 = smov (!%p1830_p0), 0  }
 0x175 LB: >> { %v1599_v34 = vld [vmem:[%s2171_s28] sm:$0xff]  ;;  %s1601_s3 = sadd.s32 1, %s2175_s29  ;;  %s1593_s4 = sadd.s32 1, %s2179_s4   ;;  %s2179_s4 = sphi %s2177_s4, %s1593_s4   ;;  %s2175_s29 = sphi %s2173_s29, %s2174_s29   ;;  %s2171_s28 = sphi %s2169_s28, %s1606_s28   ;;  %s2167_s27 = sphi %s2165_s27, %s1607_s27  }
 0x176   : >> { %1600 = vst [vmem:[%s2167_s27] sm:$0xff] %v1599_v34  ;;  %p1602_p1 = scmp.ge.s32.totalorder %s1601_s3, %s2836_s23  ;;  %p1592_p2 = scmp.ge.s32.totalorder %s1593_s4, %s2836_s23 }
 0x178   : >> { %s2879_s3 = smov (%p1602_p1, %s1601_s3), 0  ;;  %1595 = sbr.rel (!%p1592_p2) target bundleno = 373 (0x175), region = 140 }
 0x179   : >> { %s1831_s30 = sshll.u32 %s2879_s3, 3  ;;  %s2174_s29 = smov %s2879_s3  }
 0x17a   : >> { %s1606_s28 = scalar_lea.vmem %s1587_s25, %s1831_s30 [#allocation3]   ;;  %s1607_s27 = scalar_lea.vmem %s1589_s26, %s1831_s30  }
 0x17f PF: > { %s12_s13 = sadd.s32 1, %s2147_s13   ;;  %s2868_s9 = smov %s2135_s10 }
 0x180   : > { %p9_p3 = scmp.ge.s32.totalorder %s12_s13, 19   ;;  %s2869_s10 = smov %s2238_s19 }
 0x181   : > { %s2870_s11 = smov %s2143_s12  ;;  %s2871_s12 = smov %s2873_s15 }
 0x182   :  { %11 = sbr.rel (!%p9_p3) target bundleno = 3 (0x3), region = 151 }

// kernel: decoder_forward.23
= control target key start
LH: loop header
LB: loop body
LE: loop exit
PB: predicated region body
PF: predicated region fallthrough
CT: control target
= control target key end

     0   :  { %s1078_s0 = inlined_call_operand.vmem [shape: f32[256,384], index: 0, kind: input, shape index: {}]   ;;  %s1079_s1 = inlined_call_operand.vmem [shape: f32[256,384], index: 1, kind: output, shape index: {}]  }
   0x1   :  { %v8_v0 = vld [vmem:[%s1078_s0] sm:$0xff]  ;;  %v9_v1 = vld [vmem:[%s1078_s0 + $0x8] sm:$0xff]  ;;  %v10_v2 = vld [vmem:[%s1078_s0 + $0x10] sm:$0xff] }
   0x2   :  { %300 = vtanh.f32 %v8_v0  ;;  %v11_v3 = vld [vmem:[%s1078_s0 + $0x18] sm:$0xff]  ;;  %v12_v4 = vld [vmem:[%s1078_s0 + $0x20] sm:$0xff]  ;;  %v13_v5 = vld [vmem:[%s1078_s0 + $0x28] sm:$0xff] }
   0x3   :  { %302 = vtanh.f32 %v9_v1  ;;  %v14_v6 = vld [vmem:[%s1078_s0 + $0x30] sm:$0xff]  ;;  %v15_v7 = vld [vmem:[%s1078_s0 + $0x38] sm:$0xff]  ;;  %v16_v8 = vld [vmem:[%s1078_s0 + $0x40] sm:$0xff] }
   0x4   :  { %304 = vtanh.f32 %v10_v2  ;;  %v17_v9 = vld [vmem:[%s1078_s0 + $0x48] sm:$0xff]  ;;  %v18_v10 = vld [vmem:[%s1078_s0 + $0x50] sm:$0xff]  ;;  %v19_v11 = vld [vmem:[%s1078_s0 + $0x58] sm:$0xff] }
   0x5   :  { %306 = vtanh.f32 %v11_v3  ;;  %v20_v12 = vld [vmem:[%s1078_s0 + $0x60] sm:$0xff]  ;;  %v21_v14 = vld [vmem:[%s1078_s0 + $0x68] sm:$0xff]  ;;  %v22_v16 = vld [vmem:[%s1078_s0 + $0x70] sm:$0xff] }
   0x6   :  { %308 = vtanh.f32 %v12_v4  ;;  %v23_v18 = vld [vmem:[%s1078_s0 + $0x78] sm:$0xff]  ;;  %v24_v20 = vld [vmem:[%s1078_s0 + $0x80] sm:$0xff]  ;;  %v25_v22 = vld [vmem:[%s1078_s0 + $0x88] sm:$0xff] }
   0x7   :  { %310 = vtanh.f32 %v13_v5  ;;  %v26_v24 = vld [vmem:[%s1078_s0 + $0x90] sm:$0xff]  ;;  %v27_v26 = vld [vmem:[%s1078_s0 + $0x98] sm:$0xff]  ;;  %v28_v28 = vld [vmem:[%s1078_s0 + $0xa0] sm:$0xff] }
   0x8   :  { %312 = vtanh.f32 %v14_v6  ;;  %v29_v30 = vld [vmem:[%s1078_s0 + $0xa8] sm:$0xff]  ;;  %v30_v32 = vld [vmem:[%s1078_s0 + $0xb0] sm:$0xff]  ;;  %v31_v34 = vld [vmem:[%s1078_s0 + $0xb8] sm:$0xff] }
   0x9   :  { %314 = vtanh.f32 %v15_v7  ;;  %v32_v36 = vld [vmem:[%s1078_s0 + $0xc0] sm:$0xff]  ;;  %v33_v38 = vld [vmem:[%s1078_s0 + $0xc8] sm:$0xff]  ;;  %v34_v40 = vld [vmem:[%s1078_s0 + $0xd0] sm:$0xff] }
   0xa   :  { %316 = vtanh.f32 %v16_v8  ;;  %v35_v42 = vld [vmem:[%s1078_s0 + $0xd8] sm:$0xff]  ;;  %v36_v44 = vld [vmem:[%s1078_s0 + $0xe0] sm:$0xff]  ;;  %v37_v46 = vld [vmem:[%s1078_s0 + $0xe8] sm:$0xff] }
   0xb   :  { %318 = vtanh.f32 %v17_v9  ;;  %v38_v48 = vld [vmem:[%s1078_s0 + $0xf0] sm:$0xff]  ;;  %v39_v50 = vld [vmem:[%s1078_s0 + $0xf8] sm:$0xff]  ;;  %v40_v52 = vld [vmem:[%s1078_s0 + $0x100] sm:$0xff] }
   0xc   :  { %v301_v13 = vpop.eup %300  ;;  %320 = vtanh.f32 %v18_v10  ;;  %v41_v54 = vld [vmem:[%s1078_s0 + $0x108] sm:$0xff]  ;;  %v42_v56 = vld [vmem:[%s1078_s0 + $0x110] sm:$0xff]  ;;  %v43_v58 = vld [vmem:[%s1078_s0 + $0x118] sm:$0xff] }
   0xd   :  { %v303_v15 = vpop.eup %302  ;;  %200 = vst [vmem:[%s1079_s1] sm:$0xff] %v301_v13  ;;  %322 = vtanh.f32 %v19_v11  ;;  %v44_v60 = vld [vmem:[%s1078_s0 + $0x120] sm:$0xff]  ;;  %v45_v62 = vld [vmem:[%s1078_s0 + $0x128] sm:$0xff]  ;;  %v46_v0 = vld [vmem:[%s1078_s0 + $0x130] sm:$0xff] }
   0xe   :  { %v305_v17 = vpop.eup %304  ;;  %201 = vst [vmem:[%s1079_s1 + $0x8] sm:$0xff] %v303_v15  ;;  %324 = vtanh.f32 %v20_v12  ;;  %v47_v2 = vld [vmem:[%s1078_s0 + $0x138] sm:$0xff]  ;;  %v48_v4 = vld [vmem:[%s1078_s0 + $0x140] sm:$0xff]  ;;  %v49_v6 = vld [vmem:[%s1078_s0 + $0x148] sm:$0xff] }
   0xf   :  { %v307_v19 = vpop.eup %306  ;;  %202 = vst [vmem:[%s1079_s1 + $0x10] sm:$0xff] %v305_v17  ;;  %326 = vtanh.f32 %v21_v14  ;;  %v50_v8 = vld [vmem:[%s1078_s0 + $0x150] sm:$0xff]  ;;  %v51_v10 = vld [vmem:[%s1078_s0 + $0x158] sm:$0xff]  ;;  %v52_v12 = vld [vmem:[%s1078_s0 + $0x160] sm:$0xff] }
  0x10   :  { %v309_v21 = vpop.eup %308  ;;  %203 = vst [vmem:[%s1079_s1 + $0x18] sm:$0xff] %v307_v19  ;;  %328 = vtanh.f32 %v22_v16  ;;  %v53_v14 = vld [vmem:[%s1078_s0 + $0x168] sm:$0xff]  ;;  %v54_v16 = vld [vmem:[%s1078_s0 + $0x170] sm:$0xff] }
  0x11   :  { %v311_v23 = vpop.eup %310  ;;  %204 = vst [vmem:[%s1079_s1 + $0x20] sm:$0xff] %v309_v21  ;;  %330 = vtanh.f32 %v23_v18  ;;  %v55_v18 = vld [vmem:[%s1078_s0 + $0x178] sm:$0xff] }
  0x12   :  { %v313_v25 = vpop.eup %312  ;;  %205 = vst [vmem:[%s1079_s1 + $0x28] sm:$0xff] %v311_v23  ;;  %332 = vtanh.f32 %v24_v20  ;;  %v56_v20 = vld [vmem:[%s1078_s0 + $0x180] sm:$0xff] }
  0x13   :  { %v315_v27 = vpop.eup %314  ;;  %206 = vst [vmem:[%s1079_s1 + $0x30] sm:$0xff] %v313_v25  ;;  %334 = vtanh.f32 %v25_v22  ;;  %v57_v22 = vld [vmem:[%s1078_s0 + $0x188] sm:$0xff] }
  0x14   :  { %v317_v29 = vpop.eup %316  ;;  %207 = vst [vmem:[%s1079_s1 + $0x38] sm:$0xff] %v315_v27  ;;  %336 = vtanh.f32 %v26_v24  ;;  %v58_v24 = vld [vmem:[%s1078_s0 + $0x190] sm:$0xff] }
  0x15   :  { %v319_v31 = vpop.eup %318  ;;  %208 = vst [vmem:[%s1079_s1 + $0x40] sm:$0xff] %v317_v29  ;;  %338 = vtanh.f32 %v27_v26  ;;  %v59_v26 = vld [vmem:[%s1078_s0 + $0x198] sm:$0xff] }
  0x16   :  { %v321_v33 = vpop.eup %320  ;;  %209 = vst [vmem:[%s1079_s1 + $0x48] sm:$0xff] %v319_v31  ;;  %340 = vtanh.f32 %v28_v28  ;;  %v60_v28 = vld [vmem:[%s1078_s0 + $0x1a0] sm:$0xff] }
  0x17   :  { %v323_v35 = vpop.eup %322  ;;  %210 = vst [vmem:[%s1079_s1 + $0x50] sm:$0xff] %v321_v33  ;;  %342 = vtanh.f32 %v29_v30  ;;  %v61_v30 = vld [vmem:[%s1078_s0 + $0x1a8] sm:$0xff] }
  0x18   :  { %v325_v37 = vpop.eup %324  ;;  %211 = vst [vmem:[%s1079_s1 + $0x58] sm:$0xff] %v323_v35  ;;  %344 = vtanh.f32 %v30_v32  ;;  %v62_v32 = vld [vmem:[%s1078_s0 + $0x1b0] sm:$0xff] }
  0x19   :  { %v327_v39 = vpop.eup %326  ;;  %212 = vst [vmem:[%s1079_s1 + $0x60] sm:$0xff] %v325_v37  ;;  %346 = vtanh.f32 %v31_v34  ;;  %v63_v34 = vld [vmem:[%s1078_s0 + $0x1b8] sm:$0xff] }
  0x1a   :  { %v329_v41 = vpop.eup %328  ;;  %213 = vst [vmem:[%s1079_s1 + $0x68] sm:$0xff] %v327_v39  ;;  %348 = vtanh.f32 %v32_v36  ;;  %v64_v36 = vld [vmem:[%s1078_s0 + $0x1c0] sm:$0xff] }
  0x1b   :  { %v331_v43 = vpop.eup %330  ;;  %214 = vst [vmem:[%s1079_s1 + $0x70] sm:$0xff] %v329_v41  ;;  %350 = vtanh.f32 %v33_v38  ;;  %v65_v38 = vld [vmem:[%s1078_s0 + $0x1c8] sm:$0xff] }
  0x1c   :  { %v333_v45 = vpop.eup %332  ;;  %215 = vst [vmem:[%s1079_s1 + $0x78] sm:$0xff] %v331_v43  ;;  %352 = vtanh.f32 %v34_v40  ;;  %v66_v40 = vld [vmem:[%s1078_s0 + $0x1d0] sm:$0xff] }
  0x1d   :  { %v335_v47 = vpop.eup %334  ;;  %216 = vst [vmem:[%s1079_s1 + $0x80] sm:$0xff] %v333_v45  ;;  %354 = vtanh.f32 %v35_v42  ;;  %v67_v42 = vld [vmem:[%s1078_s0 + $0x1d8] sm:$0xff] }
  0x1e   :  { %v337_v49 = vpop.eup %336  ;;  %217 = vst [vmem:[%s1079_s1 + $0x88] sm:$0xff] %v335_v47  ;;  %356 = vtanh.f32 %v36_v44  ;;  %v68_v44 = vld [vmem:[%s1078_s0 + $0x1e0] sm:$0xff] }
  0x1f   :  { %v339_v51 = vpop.eup %338  ;;  %218 = vst [vmem:[%s1079_s1 + $0x90] sm:$0xff] %v337_v49  ;;  %358 = vtanh.f32 %v37_v46  ;;  %v69_v46 = vld [vmem:[%s1078_s0 + $0x1e8] sm:$0xff] }
  0x20   :  { %v341_v53 = vpop.eup %340  ;;  %219 = vst [vmem:[%s1079_s1 + $0x98] sm:$0xff] %v339_v51  ;;  %360 = vtanh.f32 %v38_v48  ;;  %v70_v48 = vld [vmem:[%s1078_s0 + $0x1f0] sm:$0xff] }
  0x21   :  { %v343_v55 = vpop.eup %342  ;;  %220 = vst [vmem:[%s1079_s1 + $0xa0] sm:$0xff] %v341_v53  ;;  %362 = vtanh.f32 %v39_v50  ;;  %v71_v50 = vld [vmem:[%s1078_s0 + $0x1f8] sm:$0xff] }
  0x22   :  { %v345_v57 = vpop.eup %344  ;;  %221 = vst [vmem:[%s1079_s1 + $0xa8] sm:$0xff] %v343_v55  ;;  %364 = vtanh.f32 %v40_v52  ;;  %v72_v52 = vld [vmem:[%s1078_s0 + $0x200] sm:$0xff] }
  0x23   :  { %v347_v59 = vpop.eup %346  ;;  %222 = vst [vmem:[%s1079_s1 + $0xb0] sm:$0xff] %v345_v57  ;;  %366 = vtanh.f32 %v41_v54  ;;  %v73_v54 = vld [vmem:[%s1078_s0 + $0x208] sm:$0xff] }
  0x24   :  { %v349_v61 = vpop.eup %348  ;;  %223 = vst [vmem:[%s1079_s1 + $0xb8] sm:$0xff] %v347_v59  ;;  %368 = vtanh.f32 %v42_v56  ;;  %v74_v56 = vld [vmem:[%s1078_s0 + $0x210] sm:$0xff] }
  0x25   :  { %v351_v63 = vpop.eup %350  ;;  %224 = vst [vmem:[%s1079_s1 + $0xc0] sm:$0xff] %v349_v61  ;;  %370 = vtanh.f32 %v43_v58  ;;  %v75_v58 = vld [vmem:[%s1078_s0 + $0x218] sm:$0xff] }
  0x26   :  { %v353_v1 = vpop.eup %352  ;;  %225 = vst [vmem:[%s1079_s1 + $0xc8] sm:$0xff] %v351_v63  ;;  %372 = vtanh.f32 %v44_v60  ;;  %v76_v60 = vld [vmem:[%s1078_s0 + $0x220] sm:$0xff] }
  0x27   :  { %v355_v3 = vpop.eup %354  ;;  %226 = vst [vmem:[%s1079_s1 + $0xd0] sm:$0xff] %v353_v1  ;;  %374 = vtanh.f32 %v45_v62  ;;  %v77_v62 = vld [vmem:[%s1078_s0 + $0x228] sm:$0xff] }
  0x28   :  { %v357_v5 = vpop.eup %356  ;;  %227 = vst [vmem:[%s1079_s1 + $0xd8] sm:$0xff] %v355_v3  ;;  %376 = vtanh.f32 %v46_v0  ;;  %v78_v0 = vld [vmem:[%s1078_s0 + $0x230] sm:$0xff] }
  0x29   :  { %v359_v7 = vpop.eup %358  ;;  %228 = vst [vmem:[%s1079_s1 + $0xe0] sm:$0xff] %v357_v5  ;;  %378 = vtanh.f32 %v47_v2  ;;  %v79_v2 = vld [vmem:[%s1078_s0 + $0x238] sm:$0xff] }
  0x2a   :  { %v361_v9 = vpop.eup %360  ;;  %229 = vst [vmem:[%s1079_s1 + $0xe8] sm:$0xff] %v359_v7  ;;  %380 = vtanh.f32 %v48_v4  ;;  %v80_v4 = vld [vmem:[%s1078_s0 + $0x240] sm:$0xff] }
  0x2b   :  { %v363_v11 = vpop.eup %362  ;;  %230 = vst [vmem:[%s1079_s1 + $0xf0] sm:$0xff] %v361_v9  ;;  %382 = vtanh.f32 %v49_v6  ;;  %v81_v6 = vld [vmem:[%s1078_s0 + $0x248] sm:$0xff] }
  0x2c   :  { %v365_v13 = vpop.eup %364  ;;  %231 = vst [vmem:[%s1079_s1 + $0xf8] sm:$0xff] %v363_v11  ;;  %384 = vtanh.f32 %v50_v8  ;;  %v82_v8 = vld [vmem:[%s1078_s0 + $0x250] sm:$0xff] }
  0x2d   :  { %v367_v15 = vpop.eup %366  ;;  %232 = vst [vmem:[%s1079_s1 + $0x100] sm:$0xff] %v365_v13  ;;  %386 = vtanh.f32 %v51_v10  ;;  %v83_v10 = vld [vmem:[%s1078_s0 + $0x258] sm:$0xff] }
  0x2e   :  { %v369_v17 = vpop.eup %368  ;;  %233 = vst [vmem:[%s1079_s1 + $0x108] sm:$0xff] %v367_v15  ;;  %388 = vtanh.f32 %v52_v12  ;;  %v84_v12 = vld [vmem:[%s1078_s0 + $0x260] sm:$0xff] }
  0x2f   :  { %v371_v19 = vpop.eup %370  ;;  %234 = vst [vmem:[%s1079_s1 + $0x110] sm:$0xff] %v369_v17  ;;  %390 = vtanh.f32 %v53_v14  ;;  %v85_v14 = vld [vmem:[%s1078_s0 + $0x268] sm:$0xff] }
  0x30   :  { %v373_v21 = vpop.eup %372  ;;  %235 = vst [vmem:[%s1079_s1 + $0x118] sm:$0xff] %v371_v19  ;;  %392 = vtanh.f32 %v54_v16  ;;  %v86_v16 = vld [vmem:[%s1078_s0 + $0x270] sm:$0xff] }
  0x31   :  { %v375_v23 = vpop.eup %374  ;;  %236 = vst [vmem:[%s1079_s1 + $0x120] sm:$0xff] %v373_v21  ;;  %394 = vtanh.f32 %v55_v18  ;;  %v87_v18 = vld [vmem:[%s1078_s0 + $0x278] sm:$0xff] }
  0x32   :  { %v377_v25 = vpop.eup %376  ;;  %237 = vst [vmem:[%s1079_s1 + $0x128] sm:$0xff] %v375_v23  ;;  %396 = vtanh.f32 %v56_v20  ;;  %v88_v20 = vld [vmem:[%s1078_s0 + $0x280] sm:$0xff] }
  0x33   :  { %v379_v27 = vpop.eup %378  ;;  %238 = vst [vmem:[%s1079_s1 + $0x130] sm:$0xff] %v377_v25  ;;  %398 = vtanh.f32 %v57_v22  ;;  %v89_v22 = vld [vmem:[%s1078_s0 + $0x288] sm:$0xff] }
  0x34   :  { %v381_v29 = vpop.eup %380  ;;  %239 = vst [vmem:[%s1079_s1 + $0x138] sm:$0xff] %v379_v27  ;;  %400 = vtanh.f32 %v58_v24  ;;  %v90_v24 = vld [vmem:[%s1078_s0 + $0x290] sm:$0xff] }
  0x35   :  { %v383_v31 = vpop.eup %382  ;;  %240 = vst [vmem:[%s1079_s1 + $0x140] sm:$0xff] %v381_v29  ;;  %402 = vtanh.f32 %v59_v26  ;;  %v91_v26 = vld [vmem:[%s1078_s0 + $0x298] sm:$0xff] }
  0x36   :  { %v385_v33 = vpop.eup %384  ;;  %241 = vst [vmem:[%s1079_s1 + $0x148] sm:$0xff] %v383_v31  ;;  %404 = vtanh.f32 %v60_v28  ;;  %v92_v28 = vld [vmem:[%s1078_s0 + $0x2a0] sm:$0xff] }
  0x37   :  { %v387_v35 = vpop.eup %386  ;;  %242 = vst [vmem:[%s1079_s1 + $0x150] sm:$0xff] %v385_v33  ;;  %406 = vtanh.f32 %v61_v30  ;;  %v93_v30 = vld [vmem:[%s1078_s0 + $0x2a8] sm:$0xff] }
  0x38   :  { %v389_v37 = vpop.eup %388  ;;  %243 = vst [vmem:[%s1079_s1 + $0x158] sm:$0xff] %v387_v35  ;;  %408 = vtanh.f32 %v62_v32  ;;  %v94_v32 = vld [vmem:[%s1078_s0 + $0x2b0] sm:$0xff] }
  0x39   :  { %v391_v39 = vpop.eup %390  ;;  %244 = vst [vmem:[%s1079_s1 + $0x160] sm:$0xff] %v389_v37  ;;  %410 = vtanh.f32 %v63_v34  ;;  %v95_v34 = vld [vmem:[%s1078_s0 + $0x2b8] sm:$0xff] }
  0x3a   :  { %v393_v41 = vpop.eup %392  ;;  %245 = vst [vmem:[%s1079_s1 + $0x168] sm:$0xff] %v391_v39  ;;  %412 = vtanh.f32 %v64_v36  ;;  %v96_v36 = vld [vmem:[%s1078_s0 + $0x2c0] sm:$0xff] }
  0x3b   :  { %v395_v43 = vpop.eup %394  ;;  %246 = vst [vmem:[%s1079_s1 + $0x170] sm:$0xff] %v393_v41  ;;  %414 = vtanh.f32 %v65_v38  ;;  %v97_v38 = vld [vmem:[%s1078_s0 + $0x2c8] sm:$0xff] }
  0x3c   :  { %v397_v45 = vpop.eup %396  ;;  %247 = vst [vmem:[%s1079_s1 + $0x178] sm:$0xff] %v395_v43  ;;  %416 = vtanh.f32 %v66_v40  ;;  %v98_v40 = vld [vmem:[%s1078_s0 + $0x2d0] sm:$0xff] }
  0x3d   :  { %v399_v47 = vpop.eup %398  ;;  %248 = vst [vmem:[%s1079_s1 + $0x180] sm:$0xff] %v397_v45  ;;  %418 = vtanh.f32 %v67_v42  ;;  %v99_v42 = vld [vmem:[%s1078_s0 + $0x2d8] sm:$0xff] }
  0x3e   :  { %v401_v49 = vpop.eup %400  ;;  %249 = vst [vmem:[%s1079_s1 + $0x188] sm:$0xff] %v399_v47  ;;  %420 = vtanh.f32 %v68_v44  ;;  %v100_v44 = vld [vmem:[%s1078_s0 + $0x2e0] sm:$0xff] }
  0x3f   :  { %v403_v51 = vpop.eup %402  ;;  %250 = vst [vmem:[%s1079_s1 + $0x190] sm:$0xff] %v401_v49  ;;  %422 = vtanh.f32 %v69_v46  ;;  %v101_v46 = vld [vmem:[%s1078_s0 + $0x2e8] sm:$0xff] }
  0x40   :  { %v405_v53 = vpop.eup %404  ;;  %251 = vst [vmem:[%s1079_s1 + $0x198] sm:$0xff] %v403_v51  ;;  %424 = vtanh.f32 %v70_v48  ;;  %v102_v48 = vld [vmem:[%s1078_s0 + $0x2f0] sm:$0xff] }
  0x41   :  { %v407_v55 = vpop.eup %406  ;;  %252 = vst [vmem:[%s1079_s1 + $0x1a0] sm:$0xff] %v405_v53  ;;  %426 = vtanh.f32 %v71_v50  ;;  %v103_v50 = vld [vmem:[%s1078_s0 + $0x2f8] sm:$0xff] }
  0x42   :  { %v409_v57 = vpop.eup %408  ;;  %253 = vst [vmem:[%s1079_s1 + $0x1a8] sm:$0xff] %v407_v55  ;;  %428 = vtanh.f32 %v72_v52 }
  0x43   :  { %v411_v59 = vpop.eup %410  ;;  %254 = vst [vmem:[%s1079_s1 + $0x1b0] sm:$0xff] %v409_v57  ;;  %430 = vtanh.f32 %v73_v54 }
  0x44   :  { %v413_v61 = vpop.eup %412  ;;  %255 = vst [vmem:[%s1079_s1 + $0x1b8] sm:$0xff] %v411_v59  ;;  %432 = vtanh.f32 %v74_v56 }
  0x45   :  { %v415_v63 = vpop.eup %414  ;;  %256 = vst [vmem:[%s1079_s1 + $0x1c0] sm:$0xff] %v413_v61  ;;  %434 = vtanh.f32 %v75_v58 }
  0x46   :  { %v417_v1 = vpop.eup %416  ;;  %257 = vst [vmem:[%s1079_s1 + $0x1c8] sm:$0xff] %v415_v63  ;;  %436 = vtanh.f32 %v76_v60 }
  0x47   :  { %v419_v3 = vpop.eup %418  ;;  %258 = vst [vmem:[%s1079_s1 + $0x1d0] sm:$0xff] %v417_v1  ;;  %438 = vtanh.f32 %v77_v62 }
  0x48   :  { %v421_v5 = vpop.eup %420  ;;  %259 = vst [vmem:[%s1079_s1 + $0x1d8] sm:$0xff] %v419_v3  ;;  %440 = vtanh.f32 %v78_v0 }
  0x49   :  { %v423_v7 = vpop.eup %422  ;;  %260 = vst [vmem:[%s1079_s1 + $0x1e0] sm:$0xff] %v421_v5  ;;  %442 = vtanh.f32 %v79_v2 }
  0x4a   :  { %v425_v9 = vpop.eup %424  ;;  %261 = vst [vmem:[%s1079_s1 + $0x1e8] sm:$0xff] %v423_v7  ;;  %444 = vtanh.f32 %v80_v4 }
  0x4b   :  { %v427_v11 = vpop.eup %426  ;;  %262 = vst [vmem:[%s1079_s1 + $0x1f0] sm:$0xff] %v425_v9  ;;  %446 = vtanh.f32 %v81_v6 }
  0x4c   :  { %v429_v13 = vpop.eup %428  ;;  %263 = vst [vmem:[%s1079_s1 + $0x1f8] sm:$0xff] %v427_v11  ;;  %448 = vtanh.f32 %v82_v8 }
  0x4d   :  { %v431_v15 = vpop.eup %430  ;;  %264 = vst [vmem:[%s1079_s1 + $0x200] sm:$0xff] %v429_v13  ;;  %450 = vtanh.f32 %v83_v10 }
  0x4e   :  { %v433_v17 = vpop.eup %432  ;;  %265 = vst [vmem:[%s1079_s1 + $0x208] sm:$0xff] %v431_v15  ;;  %452 = vtanh.f32 %v84_v12 }
  0x4f   :  { %v435_v19 = vpop.eup %434  ;;  %266 = vst [vmem:[%s1079_s1 + $0x210] sm:$0xff] %v433_v17  ;;  %454 = vtanh.f32 %v85_v14 }
  0x50   :  { %v437_v21 = vpop.eup %436  ;;  %267 = vst [vmem:[%s1079_s1 + $0x218] sm:$0xff] %v435_v19  ;;  %456 = vtanh.f32 %v86_v16 }
  0x51   :  { %v439_v23 = vpop.eup %438  ;;  %268 = vst [vmem:[%s1079_s1 + $0x220] sm:$0xff] %v437_v21  ;;  %458 = vtanh.f32 %v87_v18 }
  0x52   :  { %v441_v25 = vpop.eup %440  ;;  %269 = vst [vmem:[%s1079_s1 + $0x228] sm:$0xff] %v439_v23  ;;  %460 = vtanh.f32 %v88_v20 }
  0x53   :  { %v443_v27 = vpop.eup %442  ;;  %270 = vst [vmem:[%s1079_s1 + $0x230] sm:$0xff] %v441_v25  ;;  %462 = vtanh.f32 %v89_v22 }
  0x54   :  { %v445_v29 = vpop.eup %444  ;;  %271 = vst [vmem:[%s1079_s1 + $0x238] sm:$0xff] %v443_v27  ;;  %464 = vtanh.f32 %v90_v24 }
  0x55   :  { %v447_v31 = vpop.eup %446  ;;  %272 = vst [vmem:[%s1079_s1 + $0x240] sm:$0xff] %v445_v29  ;;  %466 = vtanh.f32 %v91_v26 }
  0x56   :  { %v449_v33 = vpop.eup %448  ;;  %273 = vst [vmem:[%s1079_s1 + $0x248] sm:$0xff] %v447_v31  ;;  %468 = vtanh.f32 %v92_v28 }
  0x57   :  { %v451_v35 = vpop.eup %450  ;;  %274 = vst [vmem:[%s1079_s1 + $0x250] sm:$0xff] %v449_v33  ;;  %470 = vtanh.f32 %v93_v30 }
  0x58   :  { %v453_v37 = vpop.eup %452  ;;  %275 = vst [vmem:[%s1079_s1 + $0x258] sm:$0xff] %v451_v35  ;;  %472 = vtanh.f32 %v94_v32 }
  0x59   :  { %v455_v39 = vpop.eup %454  ;;  %276 = vst [vmem:[%s1079_s1 + $0x260] sm:$0xff] %v453_v37  ;;  %474 = vtanh.f32 %v95_v34 }
  0x5a   :  { %v457_v41 = vpop.eup %456  ;;  %277 = vst [vmem:[%s1079_s1 + $0x268] sm:$0xff] %v455_v39  ;;  %476 = vtanh.f32 %v96_v36 }
  0x5b   :  { %v459_v43 = vpop.eup %458  ;;  %278 = vst [vmem:[%s1079_s1 + $0x270] sm:$0xff] %v457_v41  ;;  %478 = vtanh.f32 %v97_v38 }
  0x5c   :  { %v461_v45 = vpop.eup %460  ;;  %279 = vst [vmem:[%s1079_s1 + $0x278] sm:$0xff] %v459_v43  ;;  %480 = vtanh.f32 %v98_v40 }
  0x5d   :  { %v463_v47 = vpop.eup %462  ;;  %280 = vst [vmem:[%s1079_s1 + $0x280] sm:$0xff] %v461_v45  ;;  %482 = vtanh.f32 %v99_v42 }
  0x5e   :  { %v465_v49 = vpop.eup %464  ;;  %281 = vst [vmem:[%s1079_s1 + $0x288] sm:$0xff] %v463_v47  ;;  %484 = vtanh.f32 %v100_v44 }
  0x5f   :  { %v467_v51 = vpop.eup %466  ;;  %282 = vst [vmem:[%s1079_s1 + $0x290] sm:$0xff] %v465_v49  ;;  %486 = vtanh.f32 %v101_v46 }
  0x60   :  { %v469_v52 = vpop.eup %468  ;;  %283 = vst [vmem:[%s1079_s1 + $0x298] sm:$0xff] %v467_v51  ;;  %488 = vtanh.f32 %v102_v48 }
  0x61   :  { %v471_v53 = vpop.eup %470  ;;  %284 = vst [vmem:[%s1079_s1 + $0x2a0] sm:$0xff] %v469_v52  ;;  %490 = vtanh.f32 %v103_v50 }
  0x62   :  { %v473_v54 = vpop.eup %472  ;;  %285 = vst [vmem:[%s1079_s1 + $0x2a8] sm:$0xff] %v471_v53 }
  0x63   :  { %v475_v55 = vpop.eup %474  ;;  %286 = vst [vmem:[%s1079_s1 + $0x2b0] sm:$0xff] %v473_v54 }
  0x64   :  { %v477_v56 = vpop.eup %476  ;;  %287 = vst [vmem:[%s1079_s1 + $0x2b8] sm:$0xff] %v475_v55 }
  0x65   :  { %v479_v57 = vpop.eup %478  ;;  %288 = vst [vmem:[%s1079_s1 + $0x2c0] sm:$0xff] %v477_v56 }
  0x66   :  { %v481_v58 = vpop.eup %480  ;;  %289 = vst [vmem:[%s1079_s1 + $0x2c8] sm:$0xff] %v479_v57 }
  0x67   :  { %v483_v59 = vpop.eup %482  ;;  %290 = vst [vmem:[%s1079_s1 + $0x2d0] sm:$0xff] %v481_v58 }
  0x68   :  { %v485_v60 = vpop.eup %484  ;;  %291 = vst [vmem:[%s1079_s1 + $0x2d8] sm:$0xff] %v483_v59 }
  0x69   :  { %v487_v61 = vpop.eup %486  ;;  %292 = vst [vmem:[%s1079_s1 + $0x2e0] sm:$0xff] %v485_v60 }
  0x6a   :  { %v489_v62 = vpop.eup %488  ;;  %293 = vst [vmem:[%s1079_s1 + $0x2e8] sm:$0xff] %v487_v61 }
  0x6b   :  { %v491_v63 = vpop.eup %490  ;;  %294 = vst [vmem:[%s1079_s1 + $0x2f0] sm:$0xff] %v489_v62 }
  0x6c   :  { %295 = vst [vmem:[%s1079_s1 + $0x2f8] sm:$0xff] %v491_v63 }

</bundles_post_ra>
